<compile_context>
chip_gen: v6e
topology: v6e:2x2x1
jax: 0.10.0
libtpu: 0.0.40
codegen_flags: <defaults>
</compile_context>

<pallas_src>
import functools
import math

import jax
import jax.numpy as jnp
from jax.experimental import pallas as pl
from jax.experimental.pallas import tpu as pltpu


MXU_DTYPE = jnp.bfloat16   # MXU operand dtype (f32 accumulation kept)


# ---------------------------------------------------------------------------
# Pallas kernel: one-shot matmul + fused bias + optional activation
# ---------------------------------------------------------------------------
def _mm_bias_act_kernel(a_ref, w_ref, b_ref, o_ref, *, act):
    r = jnp.dot(a_ref[...], w_ref[...], preferred_element_type=jnp.float32)
    r = r + b_ref[...]
    if act == "relu":
        r = jnp.maximum(r, 0.0)
    elif act == "sigmoid":
        r = jax.nn.sigmoid(r)
    elif act == "tanh":
        r = jnp.tanh(r)
    o_ref[...] = r.astype(o_ref.dtype)


def _round_up(x, m):
    return (x + m - 1) // m * m


def matmul_bias_act(a, w_p, b_p, n_out, act=None):
    """out = act(a @ w + b)[:, :n_out].

    a:   (M, K)  any float dtype (cast to MXU_DTYPE here)
    w_p: (K, Np) MXU_DTYPE, pre-padded along N to a multiple of 128
    b_p: (1, Np) float32, pre-padded
    """
    M, K = a.shape
    Kw, Np = w_p.shape
    assert K == Kw, (K, Kw)

    if M <= 256:
        Mp = _round_up(M, 8)
        tm = Mp
    else:
        Mp = _round_up(M, 256)
        tm = 256
    tn = 256 if Np % 256 == 0 else 128

    a_p = a.astype(MXU_DTYPE)
    if Mp != M:
        a_p = jnp.pad(a_p, ((0, Mp - M), (0, 0)))

    out = pl.pallas_call(
        functools.partial(_mm_bias_act_kernel, act=act),
        out_shape=jax.ShapeDtypeStruct((Mp, Np), jnp.float32),
        grid_spec=pltpu.PrefetchScalarGridSpec(
            num_scalar_prefetch=0,
            grid=(Mp // tm, Np // tn),
            in_specs=[
                pl.BlockSpec((tm, K), lambda i, j: (i, 0)),   # full-K block
                pl.BlockSpec((K, tn), lambda i, j: (0, j)),
                pl.BlockSpec((1, tn), lambda i, j: (0, j)),
            ],
            out_specs=pl.BlockSpec((tm, tn), lambda i, j: (i, j)),
        ),
        compiler_params=pltpu.CompilerParams(
            dimension_semantics=("parallel", "parallel")),
    )(a_p, w_p, b_p)

    if Mp != M or Np != n_out:
        out = out[:M, :n_out]
    return out


# ---------------------------------------------------------------------------
# Convolution via im2col + the Pallas matmul kernel
# ---------------------------------------------------------------------------
def _im2col(x, kh, kw, stride, pad):
    N, H, W, C = x.shape
    xp = jnp.pad(x, ((0, 0), (pad, pad), (pad, pad), (0, 0)))
    OH = (H + 2 * pad - kh) // stride + 1
    OW = (W + 2 * pad - kw) // stride + 1
    cols = []
    for i in range(kh):
        for j in range(kw):
            cols.append(xp[:, i:i + stride * (OH - 1) + 1:stride,
                           j:j + stride * (OW - 1) + 1:stride, :])
    patches = jnp.concatenate(cols, axis=-1)          # (N, OH, OW, kh*kw*C)
    return patches.reshape(N * OH * OW, kh * kw * C), OH, OW


def conv2d_p(x, p, kh, kw, cout, stride=1, pad=0, act=None):
    """Conv with pre-prepared (matmul-form, padded) weights via Pallas."""
    patches, OH, OW = _im2col(x.astype(MXU_DTYPE), kh, kw, stride, pad)
    out = matmul_bias_act(patches, p["w"], p["b"], cout, act=act)
    return out.reshape(x.shape[0], OH, OW, cout)


def conv2d_jnp(x, p, kh, kw, stride=1, pad=0):
    """Tiny Cout (=1) convs in plain jnp — not worth a padded Pallas launch."""
    patches, OH, OW = _im2col(x, kh, kw, stride, pad)
    w = p["w"].reshape(-1, p["w"].shape[-1])
    out = patches @ w + p["b"]
    return out.reshape(x.shape[0], OH, OW, w.shape[-1])


# ---------------------------------------------------------------------------
# Glue ops (plain JAX): bilinear x2 upsample, pixel shuffle, NCHW<->NHWC
# ---------------------------------------------------------------------------
def upsample2x_bilinear(x):
    """NHWC, scale_factor=2, mode='bilinear', align_corners=False."""
    def up_axis(a, axis):
        n = a.shape[axis]
        idx = jnp.arange(n)
        am1 = jnp.take(a, jnp.clip(idx - 1, 0, n - 1), axis=axis)
        ap1 = jnp.take(a, jnp.clip(idx + 1, 0, n - 1), axis=axis)
        even = 0.25 * am1 + 0.75 * a
        odd = 0.75 * a + 0.25 * ap1
        out = jnp.stack([even, odd], axis=axis + 1)
        new_shape = list(a.shape)
        new_shape[axis] = 2 * n
        return out.reshape(new_shape)

    x = up_axis(x, 1)
    x = up_axis(x, 2)
    return x


def pixel_shuffle2(x):
    """NHWC pixel shuffle, r=2 (matches torch.nn.PixelShuffle semantics)."""
    N, H, W, C = x.shape
    r = 2
    c = C // (r * r)
    x = x.reshape(N, H, W, c, r, r)
    x = jnp.transpose(x, (0, 1, 4, 2, 5, 3))
    return x.reshape(N, H * r, W * r, c)


def to_nchw(a):
    return jnp.transpose(a, (0, 3, 1, 2))


# ---------------------------------------------------------------------------
# Module forward passes
# ---------------------------------------------------------------------------
def ca_fwd(p, x):
    """CALayer: global avg pool -> 1x1 conv (relu) -> 1x1 conv -> sigmoid -> scale.

    Batch=1 micro-matmuls -> plain jnp (no Pallas launch overhead)."""
    y = jnp.mean(x, axis=(1, 2))                               # (N, C)
    y = jax.nn.relu(y @ p["w1"] + p["b1"])
    y = jax.nn.sigmoid(y @ p["w2"] + p["b2"])
    return x * y[:, None, None, :]


def gru_fwd(p, x, h, cout=64):
    """ConvGRU(inp, oup, kernel=3, dilation=1) with fused gate convs."""
    if h is None:
        # sigmoid(conv_xz(x)) , tanh(conv_xn(x))  -- one conv, split channels
        zf = conv2d_p(x, p["zf0"], 3, 3, 2 * cout, pad=1, act=None)
        z = jax.nn.sigmoid(zf[..., :cout])
        f = jnp.tanh(zf[..., cout:])
        h = z * f
    else:
        xh = jnp.concatenate([x, h], axis=-1)
        # z and r: conv_x*(x)+conv_h*(h) == conv([x;h]); z/r fused along Cout.
        zr = conv2d_p(xh, p["zr"], 3, 3, 2 * cout, pad=1, act="sigmoid")
        z = zr[..., :cout]
        r = zr[..., cout:]
        xn = jnp.concatenate([x, r * h], axis=-1)
        n = conv2d_p(xn, p["n"], 3, 3, cout, pad=1, act="tanh")
        h = (1.0 - z) * h + z * n
    h = jax.nn.relu(ca_fwd(p["ca"], h))
    return h, h


def single_block_fwd(layers, x):
    """SingleBlock: chain of SingleLayer (3x3 conv -> CA -> relu -> concat)."""
    for lp in layers:
        out = conv2d_p(x, lp["conv"], 3, 3, 32, pad=1)
        out = jax.nn.relu(ca_fwd(lp["ca"], out))
        x = jnp.concatenate([x, out], axis=-1)
    return x


def _net_forward_impl(prep, x_nchw):
    x = jnp.transpose(x_nchw, (0, 2, 3, 1))                    # NCHW -> NHWC

    Input_x = upsample2x_bilinear(x)
    Input_x = conv2d_p(Input_x, prep["head"], 3, 3, 64, pad=1)

    R1 = R2 = R3 = R4 = None
    HR0_list, HR2_list = [], []
    for _ in range(6):
        Output_1 = conv2d_p(Input_x, prep["down1"], 4, 4, 64, stride=2, pad=1)
        HR_1 = conv2d_jnp(Output_1, prep["tail0"], 3, 3, pad=1)
        HR0_list.append(to_nchw(HR_1))

        out2_1 = single_block_fwd(prep["DB2_1"], Output_1)
        out2_1_B = conv2d_p(out2_1, prep["DB2_1_B"], 1, 1, 64) + Output_1
        out2_1_R, R1 = gru_fwd(prep["GRU2_1"], out2_1_B, R1)

        out2_2 = single_block_fwd(prep["DB2_2"], out2_1_R)
        out2_2_B = conv2d_p(out2_2, prep["DB2_2_B"], 1, 1, 64) + out2_1_R
        out2_2_R, R2 = gru_fwd(prep["GRU2_2"], out2_2_B, R2)

        out2_3 = single_block_fwd(prep["DB2_3"], out2_2_R)
        out2_3_B = conv2d_p(out2_3, prep["DB2_3_B"], 1, 1, 64) + out2_2_R
        out2_3_R, R3 = gru_fwd(prep["GRU2_3"], out2_3_B, R3)

        x2f = jnp.concatenate([out2_1_R, out2_2_R, out2_3_R], axis=-1)
        x2f = conv2d_p(x2f, prep["x2_DB_add"], 1, 1, 64)
        x2f, R4 = gru_fwd(prep["x2_GRU_add"], x2f, R4)

        HR_2_con = pixel_shuffle2(conv2d_p(x2f, prep["HR2"], 3, 3, 256, pad=1))
        HR_4 = jnp.concatenate([HR_2_con, Input_x], axis=-1)
        HR_2 = conv2d_jnp(HR_4, prep["tail2"], 3, 3, pad=1)
        HR2_list.append(to_nchw(HR_2))

        Input_x = conv2d_p(HR_4, prep["NextInput"], 1, 1, 64)

    return HR0_list, HR2_list


# Whole forward in one jit: no per-conv Python dispatch, glue fused by XLA.
net_forward = jax.jit(_net_forward_impl)


# ---------------------------------------------------------------------------
# Parameter preparation: reshape/pad/fuse weights ONCE (outside the jit)
# ---------------------------------------------------------------------------
def _prep_conv(w, b):
    """(KH,KW,Cin,Cout) + (Cout,) -> matmul-form, N padded to lane multiple."""
    KH, KW, Cin, Cout = w.shape
    K = KH * KW * Cin
    Np = _round_up(Cout, 128)
    wm = w.reshape(K, Cout).astype(MXU_DTYPE)
    wm = jnp.pad(wm, ((0, 0), (0, Np - Cout)))
    bm = jnp.pad(b.astype(jnp.float32).reshape(1, Cout), ((0, 0), (0, Np - Cout)))
    return {"w": wm, "b": bm}


def _prep_ca(ca):
    c = ca["du1"]["w"].shape[2]
    cr = ca["du1"]["w"].shape[3]
    return {"w1": ca["du1"]["w"].reshape(c, cr), "b1": ca["du1"]["b"],
            "w2": ca["du2"]["w"].reshape(cr, c), "b2": ca["du2"]["b"]}


def _prep_gru(g):
    # h != None path: z/r gates -> one conv on [x;h] producing 2*Cout channels
    wz = jnp.concatenate([g["xz"]["w"], g["hz"]["w"]], axis=2)   # Cin concat
    wr = jnp.concatenate([g["xr"]["w"], g["hr"]["w"]], axis=2)
    w_zr = jnp.concatenate([wz, wr], axis=3)                     # Cout concat
    b_zr = jnp.concatenate([g["xz"]["b"] + g["hz"]["b"],
                            g["xr"]["b"] + g["hr"]["b"]])
    # n gate: conv on [x; r*h]
    w_n = jnp.concatenate([g["xn"]["w"], g["hn"]["w"]], axis=2)
    b_n = g["xn"]["b"] + g["hn"]["b"]
    # h == None path: sigmoid(conv_xz(x)), tanh(conv_xn(x)) -> one conv, split
    w_zf0 = jnp.concatenate([g["xz"]["w"], g["xn"]["w"]], axis=3)
    b_zf0 = jnp.concatenate([g["xz"]["b"], g["xn"]["b"]])
    return {"zr": _prep_conv(w_zr, b_zr),
            "n": _prep_conv(w_n, b_n),
            "zf0": _prep_conv(w_zf0, b_zf0),
            "ca": _prep_ca(g["ca"])}


def prepare_params(raw):
    def db(layers):
        return [{"conv": _prep_conv(l["conv"]["w"], l["conv"]["b"]),
                 "ca": _prep_ca(l["ca"])} for l in layers]

    def cv(p):
        return _prep_conv(p["w"], p["b"])

    return {
        "head": cv(raw["head"]),
        "down1": cv(raw["down1"]),
        "tail0": {"w": raw["tail0"]["w"], "b": raw["tail0"]["b"]},   # jnp path
        "DB2_1": db(raw["DB2_1"]), "DB2_1_B": cv(raw["DB2_1_B"]),
        "GRU2_1": _prep_gru(raw["GRU2_1"]),
        "DB2_2": db(raw["DB2_2"]), "DB2_2_B": cv(raw["DB2_2_B"]),
        "GRU2_2": _prep_gru(raw["GRU2_2"]),
        "DB2_3": db(raw["DB2_3"]), "DB2_3_B": cv(raw["DB2_3_B"]),
        "GRU2_3": _prep_gru(raw["GRU2_3"]),
        "x2_DB_add": cv(raw["x2_DB_add"]),
        "x2_GRU_add": _prep_gru(raw["x2_GRU_add"]),
        "HR2": cv(raw["HR2"]),
        "tail2": {"w": raw["tail2"]["w"], "b": raw["tail2"]["b"]},   # jnp path
        "NextInput": cv(raw["NextInput"]),
    }


# ---------------------------------------------------------------------------
# Deterministic parameter init (xavier-uniform weights, zero bias)
# ---------------------------------------------------------------------------
def init_params(key):
    keys = iter(jax.random.split(key, 1024))

    def conv(kh, kw, cin, cout):
        fan_in = cin * kh * kw
        fan_out = cout * kh * kw
        limit = math.sqrt(6.0 / (fan_in + fan_out))
        w = jax.random.uniform(next(keys), (kh, kw, cin, cout),
                               jnp.float32, -limit, limit)
        return {"w": w, "b": jnp.zeros((cout,), jnp.float32)}

    def ca(c, red):
        return {"du1": conv(1, 1, c, c // red), "du2": conv(1, 1, c // red, c)}

    def gru(cin, cout):
        return {"xz": conv(3, 3, cin, cout), "xr": conv(3, 3, cin, cout),
                "xn": conv(3, 3, cin, cout),
                "hz": conv(3, 3, cout, cout), "hr": conv(3, 3, cout, cout),
                "hn": conv(3, 3, cout, cout),
                "ca": ca(cout, cout // 4)}

    def single_block(cin, growth, n):
        layers = []
        c = cin
        for _ in range(n):
            layers.append({"conv": conv(3, 3, c, growth),
                           "ca": ca(growth, growth // 4)})
            c += growth
        return layers

    # Only the modules actually used in Net.forward (down2/DB4*/GRU4*/HR4/tail4
    # are defined in __init__ but never used in forward, so they are omitted).
    return {
        "head": conv(3, 3, 1, 64),
        "down1": conv(4, 4, 64, 64),
        "tail0": conv(3, 3, 64, 1),
        "DB2_1": single_block(64, 32, 8), "DB2_1_B": conv(1, 1, 320, 64),
        "GRU2_1": gru(64, 64),
        "DB2_2": single_block(64, 32, 8), "DB2_2_B": conv(1, 1, 320, 64),
        "GRU2_2": gru(64, 64),
        "DB2_3": single_block(64, 32, 8), "DB2_3_B": conv(1, 1, 320, 64),
        "GRU2_3": gru(64, 64),
        "x2_DB_add": conv(1, 1, 192, 64), "x2_GRU_add": gru(64, 64),
        "HR2": conv(3, 3, 64, 256),
        "tail2": conv(3, 3, 128, 1),
        "NextInput": conv(1, 1, 128, 64),
    }


if __name__ == "__main__":
    key = jax.random.PRNGKey(0)
    pkey, xkey = jax.random.split(key)
    raw_params = init_params(pkey)
    prep = prepare_params(raw_params)

    # Small input consistent with the module: NCHW, 1 channel.
    x = jax.random.normal(xkey, (1, 1, 8, 8), jnp.float32)

    HR0_list, HR2_list = net_forward(prep, x)
    jax.block_until_ready(HR0_list + HR2_list)

    assert len(HR0_list) == 6 and len(HR2_list) == 6
    assert HR0_list[0].shape == (1, 1, 8, 8)
    assert HR2_list[0].shape == (1, 1, 16, 16)
    assert all(bool(jnp.all(jnp.isfinite(a))) for a in HR0_list + HR2_list)

    print("KERNEL_OK")
</pallas_src>

<mosaic_0001>
module attributes {stable_mosaic.version = 11 : i64} {
  func.func @_mm_bias_act_kernel(%arg0: i32, %arg1: i32, %arg2: memref<256x9xbf16, #tpu.memory_space<vmem>>, %arg3: memref<9x128xbf16, #tpu.memory_space<vmem>>, %arg4: memref<1x128xf32, #tpu.memory_space<vmem>>, %arg5: memref<256x128xf32, #tpu.memory_space<vmem>>) attributes {dimension_semantics = [#tpu.dimension_semantics<parallel>, #tpu.dimension_semantics<parallel>], iteration_bounds = array<i64: 1, 1>, scalar_prefetch = 0 : i64, scratch_operands = 0 : i64, tpu.core_type = #tpu.core_type<tc>, window_params = [{transform_indices = @transform_0, window_bounds = array<i64: 256, 9>}, {transform_indices = @transform_1, window_bounds = array<i64: 9, 128>}, {transform_indices = @transform_2, window_bounds = array<i64: 1, 128>}, {transform_indices = @transform_3, window_bounds = array<i64: 256, 128>}]} {
    %c0 = arith.constant 0 : index
    %c0_0 = arith.constant 0 : index
    %0 = vector.load %arg2[%c0, %c0_0] : memref<256x9xbf16, #tpu.memory_space<vmem>>, vector<256x9xbf16>
    %c0_1 = arith.constant 0 : index
    %c0_2 = arith.constant 0 : index
    %1 = vector.load %arg3[%c0_1, %c0_2] : memref<9x128xbf16, #tpu.memory_space<vmem>>, vector<9x128xbf16>
    %cst = arith.constant dense<0.000000e+00> : vector<256x128xf32>
    %2 = tpu.matmul %0, %1, %cst {dimension_numbers = #tpu.dot_dimension_numbers<[1], [0], [0], [1], [0, 0, 1, 1], [], []>} : vector<256x9xbf16>, vector<9x128xbf16>, vector<256x128xf32> -> vector<256x128xf32>
    %c0_3 = arith.constant 0 : index
    %c0_4 = arith.constant 0 : index
    %3 = vector.load %arg4[%c0_3, %c0_4] : memref<1x128xf32, #tpu.memory_space<vmem>>, vector<1x128xf32>
    %4 = vector.broadcast %3 : vector<1x128xf32> to vector<256x128xf32>
    %5 = arith.addf %2, %4 : vector<256x128xf32>
    %c0_5 = arith.constant 0 : index
    %c0_6 = arith.constant 0 : index
    %6 = vector.load %arg5[%c0_5, %c0_6] : memref<256x128xf32, #tpu.memory_space<vmem>>, vector<256x128xf32>
    tpu.vector_store %arg5[%c0_5, %c0_6], %5 {strides = array<i32>} : memref<256x128xf32, #tpu.memory_space<vmem>>, vector<256x128xf32>,
    return
  }
  func.func @transform_0(%arg0: i32, %arg1: i32) -> (i32, i32) {
    %c0_i32 = arith.constant 0 : i32
    %c0_i32_0 = arith.constant 0 : i32
    return %arg0, %c0_i32 : i32, i32
  }
  func.func @transform_1(%arg0: i32, %arg1: i32) -> (i32, i32) {
    %c0_i32 = arith.constant 0 : i32
    %c0_i32_0 = arith.constant 0 : i32
    return %c0_i32, %arg1 : i32, i32
  }
  func.func @transform_2(%arg0: i32, %arg1: i32) -> (i32, i32) {
    %c0_i32 = arith.constant 0 : i32
    %c0_i32_0 = arith.constant 0 : i32
    return %c0_i32, %arg1 : i32, i32
  }
  func.func @transform_3(%arg0: i32, %arg1: i32) -> (i32, i32) {
    %c0_i32 = arith.constant 0 : i32
    return %arg0, %arg1 : i32, i32
  }
}

module attributes {stable_mosaic.version = 11 : i64} {
  func.func @_mm_bias_act_kernel(%arg0: i32, %arg1: i32, %arg2: memref<64x1024xbf16, #tpu.memory_space<vmem>>, %arg3: memref<1024x128xbf16, #tpu.memory_space<vmem>>, %arg4: memref<1x128xf32, #tpu.memory_space<vmem>>, %arg5: memref<64x128xf32, #tpu.memory_space<vmem>>) attributes {dimension_semantics = [#tpu.dimension_semantics<parallel>, #tpu.dimension_semantics<parallel>], iteration_bounds = array<i64: 1, 1>, scalar_prefetch = 0 : i64, scratch_operands = 0 : i64, tpu.core_type = #tpu.core_type<tc>, window_params = [{transform_indices = @transform_0, window_bounds = array<i64: 64, 1024>}, {transform_indices = @transform_1, window_bounds = array<i64: 1024, 128>}, {transform_indices = @transform_2, window_bounds = array<i64: 1, 128>}, {transform_indices = @transform_3, window_bounds = array<i64: 64, 128>}]} {
    %c0 = arith.constant 0 : index
    %c0_0 = arith.constant 0 : index
    %0 = vector.load %arg2[%c0, %c0_0] : memref<64x1024xbf16, #tpu.memory_space<vmem>>, vector<64x1024xbf16>
    %c0_1 = arith.constant 0 : index
    %c0_2 = arith.constant 0 : index
    %1 = vector.load %arg3[%c0_1, %c0_2] : memref<1024x128xbf16, #tpu.memory_space<vmem>>, vector<1024x128xbf16>
    %cst = arith.constant dense<0.000000e+00> : vector<64x128xf32>
    %2 = tpu.matmul %0, %1, %cst {dimension_numbers = #tpu.dot_dimension_numbers<[1], [0], [0], [1], [0, 0, 1, 1], [], []>} : vector<64x1024xbf16>, vector<1024x128xbf16>, vector<64x128xf32> -> vector<64x128xf32>
    %c0_3 = arith.constant 0 : index
    %c0_4 = arith.constant 0 : index
    %3 = vector.load %arg4[%c0_3, %c0_4] : memref<1x128xf32, #tpu.memory_space<vmem>>, vector<1x128xf32>
    %4 = vector.broadcast %3 : vector<1x128xf32> to vector<64x128xf32>
    %5 = arith.addf %2, %4 : vector<64x128xf32>
    %c0_5 = arith.constant 0 : index
    %c0_6 = arith.constant 0 : index
    %6 = vector.load %arg5[%c0_5, %c0_6] : memref<64x128xf32, #tpu.memory_space<vmem>>, vector<64x128xf32>
    tpu.vector_store %arg5[%c0_5, %c0_6], %5 {strides = array<i32>} : memref<64x128xf32, #tpu.memory_space<vmem>>, vector<64x128xf32>,
    return
  }
  func.func @transform_0(%arg0: i32, %arg1: i32) -> (i32, i32) {
    %c0_i32 = arith.constant 0 : i32
    %c0_i32_0 = arith.constant 0 : i32
    return %arg0, %c0_i32 : i32, i32
  }
  func.func @transform_1(%arg0: i32, %arg1: i32) -> (i32, i32) {
    %c0_i32 = arith.constant 0 : i32
    %c0_i32_0 = arith.constant 0 : i32
    return %c0_i32, %arg1 : i32, i32
  }
  func.func @transform_2(%arg0: i32, %arg1: i32) -> (i32, i32) {
    %c0_i32 = arith.constant 0 : i32
    %c0_i32_0 = arith.constant 0 : i32
    return %c0_i32, %arg1 : i32, i32
  }
  func.func @transform_3(%arg0: i32, %arg1: i32) -> (i32, i32) {
    %c0_i32 = arith.constant 0 : i32
    return %arg0, %arg1 : i32, i32
  }
}

module attributes {stable_mosaic.version = 11 : i64} {
  func.func @_mm_bias_act_kernel(%arg0: i32, %arg1: i32, %arg2: memref<64x576xbf16, #tpu.memory_space<vmem>>, %arg3: memref<576x128xbf16, #tpu.memory_space<vmem>>, %arg4: memref<1x128xf32, #tpu.memory_space<vmem>>, %arg5: memref<64x128xf32, #tpu.memory_space<vmem>>) attributes {dimension_semantics = [#tpu.dimension_semantics<parallel>, #tpu.dimension_semantics<parallel>], iteration_bounds = array<i64: 1, 1>, scalar_prefetch = 0 : i64, scratch_operands = 0 : i64, tpu.core_type = #tpu.core_type<tc>, window_params = [{transform_indices = @transform_0, window_bounds = array<i64: 64, 576>}, {transform_indices = @transform_1, window_bounds = array<i64: 576, 128>}, {transform_indices = @transform_2, window_bounds = array<i64: 1, 128>}, {transform_indices = @transform_3, window_bounds = array<i64: 64, 128>}]} {
    %c0 = arith.constant 0 : index
    %c0_0 = arith.constant 0 : index
    %0 = vector.load %arg2[%c0, %c0_0] : memref<64x576xbf16, #tpu.memory_space<vmem>>, vector<64x576xbf16>
    %c0_1 = arith.constant 0 : index
    %c0_2 = arith.constant 0 : index
    %1 = vector.load %arg3[%c0_1, %c0_2] : memref<576x128xbf16, #tpu.memory_space<vmem>>, vector<576x128xbf16>
    %cst = arith.constant dense<0.000000e+00> : vector<64x128xf32>
    %2 = tpu.matmul %0, %1, %cst {dimension_numbers = #tpu.dot_dimension_numbers<[1], [0], [0], [1], [0, 0, 1, 1], [], []>} : vector<64x576xbf16>, vector<576x128xbf16>, vector<64x128xf32> -> vector<64x128xf32>
    %c0_3 = arith.constant 0 : index
    %c0_4 = arith.constant 0 : index
    %3 = vector.load %arg4[%c0_3, %c0_4] : memref<1x128xf32, #tpu.memory_space<vmem>>, vector<1x128xf32>
    %4 = vector.broadcast %3 : vector<1x128xf32> to vector<64x128xf32>
    %5 = arith.addf %2, %4 : vector<64x128xf32>
    %c0_5 = arith.constant 0 : index
    %c0_6 = arith.constant 0 : index
    %6 = vector.load %arg5[%c0_5, %c0_6] : memref<64x128xf32, #tpu.memory_space<vmem>>, vector<64x128xf32>
    tpu.vector_store %arg5[%c0_5, %c0_6], %5 {strides = array<i32>} : memref<64x128xf32, #tpu.memory_space<vmem>>, vector<64x128xf32>,
    return
  }
  func.func @transform_0(%arg0: i32, %arg1: i32) -> (i32, i32) {
    %c0_i32 = arith.constant 0 : i32
    %c0_i32_0 = arith.constant 0 : i32
    return %arg0, %c0_i32 : i32, i32
  }
  func.func @transform_1(%arg0: i32, %arg1: i32) -> (i32, i32) {
    %c0_i32 = arith.constant 0 : i32
    %c0_i32_0 = arith.constant 0 : i32
    return %c0_i32, %arg1 : i32, i32
  }
  func.func @transform_2(%arg0: i32, %arg1: i32) -> (i32, i32) {
    %c0_i32 = arith.constant 0 : i32
    %c0_i32_0 = arith.constant 0 : i32
    return %c0_i32, %arg1 : i32, i32
  }
  func.func @transform_3(%arg0: i32, %arg1: i32) -> (i32, i32) {
    %c0_i32 = arith.constant 0 : i32
    return %arg0, %arg1 : i32, i32
  }
}

module attributes {stable_mosaic.version = 11 : i64} {
  func.func @_mm_bias_act_kernel(%arg0: i32, %arg1: i32, %arg2: memref<64x864xbf16, #tpu.memory_space<vmem>>, %arg3: memref<864x128xbf16, #tpu.memory_space<vmem>>, %arg4: memref<1x128xf32, #tpu.memory_space<vmem>>, %arg5: memref<64x128xf32, #tpu.memory_space<vmem>>) attributes {dimension_semantics = [#tpu.dimension_semantics<parallel>, #tpu.dimension_semantics<parallel>], iteration_bounds = array<i64: 1, 1>, scalar_prefetch = 0 : i64, scratch_operands = 0 : i64, tpu.core_type = #tpu.core_type<tc>, window_params = [{transform_indices = @transform_0, window_bounds = array<i64: 64, 864>}, {transform_indices = @transform_1, window_bounds = array<i64: 864, 128>}, {transform_indices = @transform_2, window_bounds = array<i64: 1, 128>}, {transform_indices = @transform_3, window_bounds = array<i64: 64, 128>}]} {
    %c0 = arith.constant 0 : index
    %c0_0 = arith.constant 0 : index
    %0 = vector.load %arg2[%c0, %c0_0] : memref<64x864xbf16, #tpu.memory_space<vmem>>, vector<64x864xbf16>
    %c0_1 = arith.constant 0 : index
    %c0_2 = arith.constant 0 : index
    %1 = vector.load %arg3[%c0_1, %c0_2] : memref<864x128xbf16, #tpu.memory_space<vmem>>, vector<864x128xbf16>
    %cst = arith.constant dense<0.000000e+00> : vector<64x128xf32>
    %2 = tpu.matmul %0, %1, %cst {dimension_numbers = #tpu.dot_dimension_numbers<[1], [0], [0], [1], [0, 0, 1, 1], [], []>} : vector<64x864xbf16>, vector<864x128xbf16>, vector<64x128xf32> -> vector<64x128xf32>
    %c0_3 = arith.constant 0 : index
    %c0_4 = arith.constant 0 : index
    %3 = vector.load %arg4[%c0_3, %c0_4] : memref<1x128xf32, #tpu.memory_space<vmem>>, vector<1x128xf32>
    %4 = vector.broadcast %3 : vector<1x128xf32> to vector<64x128xf32>
    %5 = arith.addf %2, %4 : vector<64x128xf32>
    %c0_5 = arith.constant 0 : index
    %c0_6 = arith.constant 0 : index
    %6 = vector.load %arg5[%c0_5, %c0_6] : memref<64x128xf32, #tpu.memory_space<vmem>>, vector<64x128xf32>
    tpu.vector_store %arg5[%c0_5, %c0_6], %5 {strides = array<i32>} : memref<64x128xf32, #tpu.memory_space<vmem>>, vector<64x128xf32>,
    return
  }
  func.func @transform_0(%arg0: i32, %arg1: i32) -> (i32, i32) {
    %c0_i32 = arith.constant 0 : i32
    %c0_i32_0 = arith.constant 0 : i32
    return %arg0, %c0_i32 : i32, i32
  }
  func.func @transform_1(%arg0: i32, %arg1: i32) -> (i32, i32) {
    %c0_i32 = arith.constant 0 : i32
    %c0_i32_0 = arith.constant 0 : i32
    return %c0_i32, %arg1 : i32, i32
  }
  func.func @transform_2(%arg0: i32, %arg1: i32) -> (i32, i32) {
    %c0_i32 = arith.constant 0 : i32
    %c0_i32_0 = arith.constant 0 : i32
    return %c0_i32, %arg1 : i32, i32
  }
  func.func @transform_3(%arg0: i32, %arg1: i32) -> (i32, i32) {
    %c0_i32 = arith.constant 0 : i32
    return %arg0, %arg1 : i32, i32
  }
}

module attributes {stable_mosaic.version = 11 : i64} {
  func.func @_mm_bias_act_kernel(%arg0: i32, %arg1: i32, %arg2: memref<64x1152xbf16, #tpu.memory_space<vmem>>, %arg3: memref<1152x128xbf16, #tpu.memory_space<vmem>>, %arg4: memref<1x128xf32, #tpu.memory_space<vmem>>, %arg5: memref<64x128xf32, #tpu.memory_space<vmem>>) attributes {dimension_semantics = [#tpu.dimension_semantics<parallel>, #tpu.dimension_semantics<parallel>], iteration_bounds = array<i64: 1, 1>, scalar_prefetch = 0 : i64, scratch_operands = 0 : i64, tpu.core_type = #tpu.core_type<tc>, window_params = [{transform_indices = @transform_0, window_bounds = array<i64: 64, 1152>}, {transform_indices = @transform_1, window_bounds = array<i64: 1152, 128>}, {transform_indices = @transform_2, window_bounds = array<i64: 1, 128>}, {transform_indices = @transform_3, window_bounds = array<i64: 64, 128>}]} {
    %c0 = arith.constant 0 : index
    %c0_0 = arith.constant 0 : index
    %0 = vector.load %arg2[%c0, %c0_0] : memref<64x1152xbf16, #tpu.memory_space<vmem>>, vector<64x1152xbf16>
    %c0_1 = arith.constant 0 : index
    %c0_2 = arith.constant 0 : index
    %1 = vector.load %arg3[%c0_1, %c0_2] : memref<1152x128xbf16, #tpu.memory_space<vmem>>, vector<1152x128xbf16>
    %cst = arith.constant dense<0.000000e+00> : vector<64x128xf32>
    %2 = tpu.matmul %0, %1, %cst {dimension_numbers = #tpu.dot_dimension_numbers<[1], [0], [0], [1], [0, 0, 1, 1], [], []>} : vector<64x1152xbf16>, vector<1152x128xbf16>, vector<64x128xf32> -> vector<64x128xf32>
    %c0_3 = arith.constant 0 : index
    %c0_4 = arith.constant 0 : index
    %3 = vector.load %arg4[%c0_3, %c0_4] : memref<1x128xf32, #tpu.memory_space<vmem>>, vector<1x128xf32>
    %4 = vector.broadcast %3 : vector<1x128xf32> to vector<64x128xf32>
    %5 = arith.addf %2, %4 : vector<64x128xf32>
    %c0_5 = arith.constant 0 : index
    %c0_6 = arith.constant 0 : index
    %6 = vector.load %arg5[%c0_5, %c0_6] : memref<64x128xf32, #tpu.memory_space<vmem>>, vector<64x128xf32>
    tpu.vector_store %arg5[%c0_5, %c0_6], %5 {strides = array<i32>} : memref<64x128xf32, #tpu.memory_space<vmem>>, vector<64x128xf32>,
    return
  }
  func.func @transform_0(%arg0: i32, %arg1: i32) -> (i32, i32) {
    %c0_i32 = arith.constant 0 : i32
    %c0_i32_0 = arith.constant 0 : i32
    return %arg0, %c0_i32 : i32, i32
  }
  func.func @transform_1(%arg0: i32, %arg1: i32) -> (i32, i32) {
    %c0_i32 = arith.constant 0 : i32
    %c0_i32_0 = arith.constant 0 : i32
    return %c0_i32, %arg1 : i32, i32
  }
  func.func @transform_2(%arg0: i32, %arg1: i32) -> (i32, i32) {
    %c0_i32 = arith.constant 0 : i32
    %c0_i32_0 = arith.constant 0 : i32
    return %c0_i32, %arg1 : i32, i32
  }
  func.func @transform_3(%arg0: i32, %arg1: i32) -> (i32, i32) {
    %c0_i32 = arith.constant 0 : i32
    return %arg0, %arg1 : i32, i32
  }
}

module attributes {stable_mosaic.version = 11 : i64} {
  func.func @_mm_bias_act_kernel(%arg0: i32, %arg1: i32, %arg2: memref<64x1440xbf16, #tpu.memory_space<vmem>>, %arg3: memref<1440x128xbf16, #tpu.memory_space<vmem>>, %arg4: memref<1x128xf32, #tpu.memory_space<vmem>>, %arg5: memref<64x128xf32, #tpu.memory_space<vmem>>) attributes {dimension_semantics = [#tpu.dimension_semantics<parallel>, #tpu.dimension_semantics<parallel>], iteration_bounds = array<i64: 1, 1>, scalar_prefetch = 0 : i64, scratch_operands = 0 : i64, tpu.core_type = #tpu.core_type<tc>, window_params = [{transform_indices = @transform_0, window_bounds = array<i64: 64, 1440>}, {transform_indices = @transform_1, window_bounds = array<i64: 1440, 128>}, {transform_indices = @transform_2, window_bounds = array<i64: 1, 128>}, {transform_indices = @transform_3, window_bounds = array<i64: 64, 128>}]} {
    %c0 = arith.constant 0 : index
    %c0_0 = arith.constant 0 : index
    %0 = vector.load %arg2[%c0, %c0_0] : memref<64x1440xbf16, #tpu.memory_space<vmem>>, vector<64x1440xbf16>
    %c0_1 = arith.constant 0 : index
    %c0_2 = arith.constant 0 : index
    %1 = vector.load %arg3[%c0_1, %c0_2] : memref<1440x128xbf16, #tpu.memory_space<vmem>>, vector<1440x128xbf16>
    %cst = arith.constant dense<0.000000e+00> : vector<64x128xf32>
    %2 = tpu.matmul %0, %1, %cst {dimension_numbers = #tpu.dot_dimension_numbers<[1], [0], [0], [1], [0, 0, 1, 1], [], []>} : vector<64x1440xbf16>, vector<1440x128xbf16>, vector<64x128xf32> -> vector<64x128xf32>
    %c0_3 = arith.constant 0 : index
    %c0_4 = arith.constant 0 : index
    %3 = vector.load %arg4[%c0_3, %c0_4] : memref<1x128xf32, #tpu.memory_space<vmem>>, vector<1x128xf32>
    %4 = vector.broadcast %3 : vector<1x128xf32> to vector<64x128xf32>
    %5 = arith.addf %2, %4 : vector<64x128xf32>
    %c0_5 = arith.constant 0 : index
    %c0_6 = arith.constant 0 : index
    %6 = vector.load %arg5[%c0_5, %c0_6] : memref<64x128xf32, #tpu.memory_space<vmem>>, vector<64x128xf32>
    tpu.vector_store %arg5[%c0_5, %c0_6], %5 {strides = array<i32>} : memref<64x128xf32, #tpu.memory_space<vmem>>, vector<64x128xf32>,
    return
  }
  func.func @transform_0(%arg0: i32, %arg1: i32) -> (i32, i32) {
    %c0_i32 = arith.constant 0 : i32
    %c0_i32_0 = arith.constant 0 : i32
    return %arg0, %c0_i32 : i32, i32
  }
  func.func @transform_1(%arg0: i32, %arg1: i32) -> (i32, i32) {
    %c0_i32 = arith.constant 0 : i32
    %c0_i32_0 = arith.constant 0 : i32
    return %c0_i32, %arg1 : i32, i32
  }
  func.func @transform_2(%arg0: i32, %arg1: i32) -> (i32, i32) {
    %c0_i32 = arith.constant 0 : i32
    %c0_i32_0 = arith.constant 0 : i32
    return %c0_i32, %arg1 : i32, i32
  }
  func.func @transform_3(%arg0: i32, %arg1: i32) -> (i32, i32) {
    %c0_i32 = arith.constant 0 : i32
    return %arg0, %arg1 : i32, i32
  }
}

module attributes {stable_mosaic.version = 11 : i64} {
  func.func @_mm_bias_act_kernel(%arg0: i32, %arg1: i32, %arg2: memref<64x1728xbf16, #tpu.memory_space<vmem>>, %arg3: memref<1728x128xbf16, #tpu.memory_space<vmem>>, %arg4: memref<1x128xf32, #tpu.memory_space<vmem>>, %arg5: memref<64x128xf32, #tpu.memory_space<vmem>>) attributes {dimension_semantics = [#tpu.dimension_semantics<parallel>, #tpu.dimension_semantics<parallel>], iteration_bounds = array<i64: 1, 1>, scalar_prefetch = 0 : i64, scratch_operands = 0 : i64, tpu.core_type = #tpu.core_type<tc>, window_params = [{transform_indices = @transform_0, window_bounds = array<i64: 64, 1728>}, {transform_indices = @transform_1, window_bounds = array<i64: 1728, 128>}, {transform_indices = @transform_2, window_bounds = array<i64: 1, 128>}, {transform_indices = @transform_3, window_bounds = array<i64: 64, 128>}]} {
    %c0 = arith.constant 0 : index
    %c0_0 = arith.constant 0 : index
    %0 = vector.load %arg2[%c0, %c0_0] : memref<64x1728xbf16, #tpu.memory_space<vmem>>, vector<64x1728xbf16>
    %c0_1 = arith.constant 0 : index
    %c0_2 = arith.constant 0 : index
    %1 = vector.load %arg3[%c0_1, %c0_2] : memref<1728x128xbf16, #tpu.memory_space<vmem>>, vector<1728x128xbf16>
    %cst = arith.constant dense<0.000000e+00> : vector<64x128xf32>
    %2 = tpu.matmul %0, %1, %cst {dimension_numbers = #tpu.dot_dimension_numbers<[1], [0], [0], [1], [0, 0, 1, 1], [], []>} : vector<64x1728xbf16>, vector<1728x128xbf16>, vector<64x128xf32> -> vector<64x128xf32>
    %c0_3 = arith.constant 0 : index
    %c0_4 = arith.constant 0 : index
    %3 = vector.load %arg4[%c0_3, %c0_4] : memref<1x128xf32, #tpu.memory_space<vmem>>, vector<1x128xf32>
    %4 = vector.broadcast %3 : vector<1x128xf32> to vector<64x128xf32>
    %5 = arith.addf %2, %4 : vector<64x128xf32>
    %c0_5 = arith.constant 0 : index
    %c0_6 = arith.constant 0 : index
    %6 = vector.load %arg5[%c0_5, %c0_6] : memref<64x128xf32, #tpu.memory_space<vmem>>, vector<64x128xf32>
    tpu.vector_store %arg5[%c0_5, %c0_6], %5 {strides = array<i32>} : memref<64x128xf32, #tpu.memory_space<vmem>>, vector<64x128xf32>,
    return
  }
  func.func @transform_0(%arg0: i32, %arg1: i32) -> (i32, i32) {
    %c0_i32 = arith.constant 0 : i32
    %c0_i32_0 = arith.constant 0 : i32
    return %arg0, %c0_i32 : i32, i32
  }
  func.func @transform_1(%arg0: i32, %arg1: i32) -> (i32, i32) {
    %c0_i32 = arith.constant 0 : i32
    %c0_i32_0 = arith.constant 0 : i32
    return %c0_i32, %arg1 : i32, i32
  }
  func.func @transform_2(%arg0: i32, %arg1: i32) -> (i32, i32) {
    %c0_i32 = arith.constant 0 : i32
    %c0_i32_0 = arith.constant 0 : i32
    return %c0_i32, %arg1 : i32, i32
  }
  func.func @transform_3(%arg0: i32, %arg1: i32) -> (i32, i32) {
    %c0_i32 = arith.constant 0 : i32
    return %arg0, %arg1 : i32, i32
  }
}

module attributes {stable_mosaic.version = 11 : i64} {
  func.func @_mm_bias_act_kernel(%arg0: i32, %arg1: i32, %arg2: memref<64x2016xbf16, #tpu.memory_space<vmem>>, %arg3: memref<2016x128xbf16, #tpu.memory_space<vmem>>, %arg4: memref<1x128xf32, #tpu.memory_space<vmem>>, %arg5: memref<64x128xf32, #tpu.memory_space<vmem>>) attributes {dimension_semantics = [#tpu.dimension_semantics<parallel>, #tpu.dimension_semantics<parallel>], iteration_bounds = array<i64: 1, 1>, scalar_prefetch = 0 : i64, scratch_operands = 0 : i64, tpu.core_type = #tpu.core_type<tc>, window_params = [{transform_indices = @transform_0, window_bounds = array<i64: 64, 2016>}, {transform_indices = @transform_1, window_bounds = array<i64: 2016, 128>}, {transform_indices = @transform_2, window_bounds = array<i64: 1, 128>}, {transform_indices = @transform_3, window_bounds = array<i64: 64, 128>}]} {
    %c0 = arith.constant 0 : index
    %c0_0 = arith.constant 0 : index
    %0 = vector.load %arg2[%c0, %c0_0] : memref<64x2016xbf16, #tpu.memory_space<vmem>>, vector<64x2016xbf16>
    %c0_1 = arith.constant 0 : index
    %c0_2 = arith.constant 0 : index
    %1 = vector.load %arg3[%c0_1, %c0_2] : memref<2016x128xbf16, #tpu.memory_space<vmem>>, vector<2016x128xbf16>
    %cst = arith.constant dense<0.000000e+00> : vector<64x128xf32>
    %2 = tpu.matmul %0, %1, %cst {dimension_numbers = #tpu.dot_dimension_numbers<[1], [0], [0], [1], [0, 0, 1, 1], [], []>} : vector<64x2016xbf16>, vector<2016x128xbf16>, vector<64x128xf32> -> vector<64x128xf32>
    %c0_3 = arith.constant 0 : index
    %c0_4 = arith.constant 0 : index
    %3 = vector.load %arg4[%c0_3, %c0_4] : memref<1x128xf32, #tpu.memory_space<vmem>>, vector<1x128xf32>
    %4 = vector.broadcast %3 : vector<1x128xf32> to vector<64x128xf32>
    %5 = arith.addf %2, %4 : vector<64x128xf32>
    %c0_5 = arith.constant 0 : index
    %c0_6 = arith.constant 0 : index
    %6 = vector.load %arg5[%c0_5, %c0_6] : memref<64x128xf32, #tpu.memory_space<vmem>>, vector<64x128xf32>
    tpu.vector_store %arg5[%c0_5, %c0_6], %5 {strides = array<i32>} : memref<64x128xf32, #tpu.memory_space<vmem>>, vector<64x128xf32>,
    return
  }
  func.func @transform_0(%arg0: i32, %arg1: i32) -> (i32, i32) {
    %c0_i32 = arith.constant 0 : i32
    %c0_i32_0 = arith.constant 0 : i32
    return %arg0, %c0_i32 : i32, i32
  }
  func.func @transform_1(%arg0: i32, %arg1: i32) -> (i32, i32) {
    %c0_i32 = arith.constant 0 : i32
    %c0_i32_0 = arith.constant 0 : i32
    return %c0_i32, %arg1 : i32, i32
  }
  func.func @transform_2(%arg0: i32, %arg1: i32) -> (i32, i32) {
    %c0_i32 = arith.constant 0 : i32
    %c0_i32_0 = arith.constant 0 : i32
    return %c0_i32, %arg1 : i32, i32
  }
  func.func @transform_3(%arg0: i32, %arg1: i32) -> (i32, i32) {
    %c0_i32 = arith.constant 0 : i32
    return %arg0, %arg1 : i32, i32
  }
}

module attributes {stable_mosaic.version = 11 : i64} {
  func.func @_mm_bias_act_kernel(%arg0: i32, %arg1: i32, %arg2: memref<64x2304xbf16, #tpu.memory_space<vmem>>, %arg3: memref<2304x128xbf16, #tpu.memory_space<vmem>>, %arg4: memref<1x128xf32, #tpu.memory_space<vmem>>, %arg5: memref<64x128xf32, #tpu.memory_space<vmem>>) attributes {dimension_semantics = [#tpu.dimension_semantics<parallel>, #tpu.dimension_semantics<parallel>], iteration_bounds = array<i64: 1, 1>, scalar_prefetch = 0 : i64, scratch_operands = 0 : i64, tpu.core_type = #tpu.core_type<tc>, window_params = [{transform_indices = @transform_0, window_bounds = array<i64: 64, 2304>}, {transform_indices = @transform_1, window_bounds = array<i64: 2304, 128>}, {transform_indices = @transform_2, window_bounds = array<i64: 1, 128>}, {transform_indices = @transform_3, window_bounds = array<i64: 64, 128>}]} {
    %c0 = arith.constant 0 : index
    %c0_0 = arith.constant 0 : index
    %0 = vector.load %arg2[%c0, %c0_0] : memref<64x2304xbf16, #tpu.memory_space<vmem>>, vector<64x2304xbf16>
    %c0_1 = arith.constant 0 : index
    %c0_2 = arith.constant 0 : index
    %1 = vector.load %arg3[%c0_1, %c0_2] : memref<2304x128xbf16, #tpu.memory_space<vmem>>, vector<2304x128xbf16>
    %cst = arith.constant dense<0.000000e+00> : vector<64x128xf32>
    %2 = tpu.matmul %0, %1, %cst {dimension_numbers = #tpu.dot_dimension_numbers<[1], [0], [0], [1], [0, 0, 1, 1], [], []>} : vector<64x2304xbf16>, vector<2304x128xbf16>, vector<64x128xf32> -> vector<64x128xf32>
    %c0_3 = arith.constant 0 : index
    %c0_4 = arith.constant 0 : index
    %3 = vector.load %arg4[%c0_3, %c0_4] : memref<1x128xf32, #tpu.memory_space<vmem>>, vector<1x128xf32>
    %4 = vector.broadcast %3 : vector<1x128xf32> to vector<64x128xf32>
    %5 = arith.addf %2, %4 : vector<64x128xf32>
    %c0_5 = arith.constant 0 : index
    %c0_6 = arith.constant 0 : index
    %6 = vector.load %arg5[%c0_5, %c0_6] : memref<64x128xf32, #tpu.memory_space<vmem>>, vector<64x128xf32>
    tpu.vector_store %arg5[%c0_5, %c0_6], %5 {strides = array<i32>} : memref<64x128xf32, #tpu.memory_space<vmem>>, vector<64x128xf32>,
    return
  }
  func.func @transform_0(%arg0: i32, %arg1: i32) -> (i32, i32) {
    %c0_i32 = arith.constant 0 : i32
    %c0_i32_0 = arith.constant 0 : i32
    return %arg0, %c0_i32 : i32, i32
  }
  func.func @transform_1(%arg0: i32, %arg1: i32) -> (i32, i32) {
    %c0_i32 = arith.constant 0 : i32
    %c0_i32_0 = arith.constant 0 : i32
    return %c0_i32, %arg1 : i32, i32
  }
  func.func @transform_2(%arg0: i32, %arg1: i32) -> (i32, i32) {
    %c0_i32 = arith.constant 0 : i32
    %c0_i32_0 = arith.constant 0 : i32
    return %c0_i32, %arg1 : i32, i32
  }
  func.func @transform_3(%arg0: i32, %arg1: i32) -> (i32, i32) {
    %c0_i32 = arith.constant 0 : i32
    return %arg0, %arg1 : i32, i32
  }
}

module attributes {stable_mosaic.version = 11 : i64} {
  func.func @_mm_bias_act_kernel(%arg0: i32, %arg1: i32, %arg2: memref<64x2592xbf16, #tpu.memory_space<vmem>>, %arg3: memref<2592x128xbf16, #tpu.memory_space<vmem>>, %arg4: memref<1x128xf32, #tpu.memory_space<vmem>>, %arg5: memref<64x128xf32, #tpu.memory_space<vmem>>) attributes {dimension_semantics = [#tpu.dimension_semantics<parallel>, #tpu.dimension_semantics<parallel>], iteration_bounds = array<i64: 1, 1>, scalar_prefetch = 0 : i64, scratch_operands = 0 : i64, tpu.core_type = #tpu.core_type<tc>, window_params = [{transform_indices = @transform_0, window_bounds = array<i64: 64, 2592>}, {transform_indices = @transform_1, window_bounds = array<i64: 2592, 128>}, {transform_indices = @transform_2, window_bounds = array<i64: 1, 128>}, {transform_indices = @transform_3, window_bounds = array<i64: 64, 128>}]} {
    %c0 = arith.constant 0 : index
    %c0_0 = arith.constant 0 : index
    %0 = vector.load %arg2[%c0, %c0_0] : memref<64x2592xbf16, #tpu.memory_space<vmem>>, vector<64x2592xbf16>
    %c0_1 = arith.constant 0 : index
    %c0_2 = arith.constant 0 : index
    %1 = vector.load %arg3[%c0_1, %c0_2] : memref<2592x128xbf16, #tpu.memory_space<vmem>>, vector<2592x128xbf16>
    %cst = arith.constant dense<0.000000e+00> : vector<64x128xf32>
    %2 = tpu.matmul %0, %1, %cst {dimension_numbers = #tpu.dot_dimension_numbers<[1], [0], [0], [1], [0, 0, 1, 1], [], []>} : vector<64x2592xbf16>, vector<2592x128xbf16>, vector<64x128xf32> -> vector<64x128xf32>
    %c0_3 = arith.constant 0 : index
    %c0_4 = arith.constant 0 : index
    %3 = vector.load %arg4[%c0_3, %c0_4] : memref<1x128xf32, #tpu.memory_space<vmem>>, vector<1x128xf32>
    %4 = vector.broadcast %3 : vector<1x128xf32> to vector<64x128xf32>
    %5 = arith.addf %2, %4 : vector<64x128xf32>
    %c0_5 = arith.constant 0 : index
    %c0_6 = arith.constant 0 : index
    %6 = vector.load %arg5[%c0_5, %c0_6] : memref<64x128xf32, #tpu.memory_space<vmem>>, vector<64x128xf32>
    tpu.vector_store %arg5[%c0_5, %c0_6], %5 {strides = array<i32>} : memref<64x128xf32, #tpu.memory_space<vmem>>, vector<64x128xf32>,
    return
  }
  func.func @transform_0(%arg0: i32, %arg1: i32) -> (i32, i32) {
    %c0_i32 = arith.constant 0 : i32
    %c0_i32_0 = arith.constant 0 : i32
    return %arg0, %c0_i32 : i32, i32
  }
  func.func @transform_1(%arg0: i32, %arg1: i32) -> (i32, i32) {
    %c0_i32 = arith.constant 0 : i32
    %c0_i32_0 = arith.constant 0 : i32
    return %c0_i32, %arg1 : i32, i32
  }
  func.func @transform_2(%arg0: i32, %arg1: i32) -> (i32, i32) {
    %c0_i32 = arith.constant 0 : i32
    %c0_i32_0 = arith.constant 0 : i32
    return %c0_i32, %arg1 : i32, i32
  }
  func.func @transform_3(%arg0: i32, %arg1: i32) -> (i32, i32) {
    %c0_i32 = arith.constant 0 : i32
    return %arg0, %arg1 : i32, i32
  }
}

module attributes {stable_mosaic.version = 11 : i64} {
  func.func @_mm_bias_act_kernel(%arg0: i32, %arg1: i32, %arg2: memref<64x320xbf16, #tpu.memory_space<vmem>>, %arg3: memref<320x128xbf16, #tpu.memory_space<vmem>>, %arg4: memref<1x128xf32, #tpu.memory_space<vmem>>, %arg5: memref<64x128xf32, #tpu.memory_space<vmem>>) attributes {dimension_semantics = [#tpu.dimension_semantics<parallel>, #tpu.dimension_semantics<parallel>], iteration_bounds = array<i64: 1, 1>, scalar_prefetch = 0 : i64, scratch_operands = 0 : i64, tpu.core_type = #tpu.core_type<tc>, window_params = [{transform_indices = @transform_0, window_bounds = array<i64: 64, 320>}, {transform_indices = @transform_1, window_bounds = array<i64: 320, 128>}, {transform_indices = @transform_2, window_bounds = array<i64: 1, 128>}, {transform_indices = @transform_3, window_bounds = array<i64: 64, 128>}]} {
    %c0 = arith.constant 0 : index
    %c0_0 = arith.constant 0 : index
    %0 = vector.load %arg2[%c0, %c0_0] : memref<64x320xbf16, #tpu.memory_space<vmem>>, vector<64x320xbf16>
    %c0_1 = arith.constant 0 : index
    %c0_2 = arith.constant 0 : index
    %1 = vector.load %arg3[%c0_1, %c0_2] : memref<320x128xbf16, #tpu.memory_space<vmem>>, vector<320x128xbf16>
    %cst = arith.constant dense<0.000000e+00> : vector<64x128xf32>
    %2 = tpu.matmul %0, %1, %cst {dimension_numbers = #tpu.dot_dimension_numbers<[1], [0], [0], [1], [0, 0, 1, 1], [], []>} : vector<64x320xbf16>, vector<320x128xbf16>, vector<64x128xf32> -> vector<64x128xf32>
    %c0_3 = arith.constant 0 : index
    %c0_4 = arith.constant 0 : index
    %3 = vector.load %arg4[%c0_3, %c0_4] : memref<1x128xf32, #tpu.memory_space<vmem>>, vector<1x128xf32>
    %4 = vector.broadcast %3 : vector<1x128xf32> to vector<64x128xf32>
    %5 = arith.addf %2, %4 : vector<64x128xf32>
    %c0_5 = arith.constant 0 : index
    %c0_6 = arith.constant 0 : index
    %6 = vector.load %arg5[%c0_5, %c0_6] : memref<64x128xf32, #tpu.memory_space<vmem>>, vector<64x128xf32>
    tpu.vector_store %arg5[%c0_5, %c0_6], %5 {strides = array<i32>} : memref<64x128xf32, #tpu.memory_space<vmem>>, vector<64x128xf32>,
    return
  }
  func.func @transform_0(%arg0: i32, %arg1: i32) -> (i32, i32) {
    %c0_i32 = arith.constant 0 : i32
    %c0_i32_0 = arith.constant 0 : i32
    return %arg0, %c0_i32 : i32, i32
  }
  func.func @transform_1(%arg0: i32, %arg1: i32) -> (i32, i32) {
    %c0_i32 = arith.constant 0 : i32
    %c0_i32_0 = arith.constant 0 : i32
    return %c0_i32, %arg1 : i32, i32
  }
  func.func @transform_2(%arg0: i32, %arg1: i32) -> (i32, i32) {
    %c0_i32 = arith.constant 0 : i32
    %c0_i32_0 = arith.constant 0 : i32
    return %c0_i32, %arg1 : i32, i32
  }
  func.func @transform_3(%arg0: i32, %arg1: i32) -> (i32, i32) {
    %c0_i32 = arith.constant 0 : i32
    return %arg0, %arg1 : i32, i32
  }
}

module attributes {stable_mosaic.version = 11 : i64} {
  func.func @_mm_bias_act_kernel(%arg0: i32, %arg1: i32, %arg2: memref<64x192xbf16, #tpu.memory_space<vmem>>, %arg3: memref<192x128xbf16, #tpu.memory_space<vmem>>, %arg4: memref<1x128xf32, #tpu.memory_space<vmem>>, %arg5: memref<64x128xf32, #tpu.memory_space<vmem>>) attributes {dimension_semantics = [#tpu.dimension_semantics<parallel>, #tpu.dimension_semantics<parallel>], iteration_bounds = array<i64: 1, 1>, scalar_prefetch = 0 : i64, scratch_operands = 0 : i64, tpu.core_type = #tpu.core_type<tc>, window_params = [{transform_indices = @transform_0, window_bounds = array<i64: 64, 192>}, {transform_indices = @transform_1, window_bounds = array<i64: 192, 128>}, {transform_indices = @transform_2, window_bounds = array<i64: 1, 128>}, {transform_indices = @transform_3, window_bounds = array<i64: 64, 128>}]} {
    %c0 = arith.constant 0 : index
    %c0_0 = arith.constant 0 : index
    %0 = vector.load %arg2[%c0, %c0_0] : memref<64x192xbf16, #tpu.memory_space<vmem>>, vector<64x192xbf16>
    %c0_1 = arith.constant 0 : index
    %c0_2 = arith.constant 0 : index
    %1 = vector.load %arg3[%c0_1, %c0_2] : memref<192x128xbf16, #tpu.memory_space<vmem>>, vector<192x128xbf16>
    %cst = arith.constant dense<0.000000e+00> : vector<64x128xf32>
    %2 = tpu.matmul %0, %1, %cst {dimension_numbers = #tpu.dot_dimension_numbers<[1], [0], [0], [1], [0, 0, 1, 1], [], []>} : vector<64x192xbf16>, vector<192x128xbf16>, vector<64x128xf32> -> vector<64x128xf32>
    %c0_3 = arith.constant 0 : index
    %c0_4 = arith.constant 0 : index
    %3 = vector.load %arg4[%c0_3, %c0_4] : memref<1x128xf32, #tpu.memory_space<vmem>>, vector<1x128xf32>
    %4 = vector.broadcast %3 : vector<1x128xf32> to vector<64x128xf32>
    %5 = arith.addf %2, %4 : vector<64x128xf32>
    %c0_5 = arith.constant 0 : index
    %c0_6 = arith.constant 0 : index
    %6 = vector.load %arg5[%c0_5, %c0_6] : memref<64x128xf32, #tpu.memory_space<vmem>>, vector<64x128xf32>
    tpu.vector_store %arg5[%c0_5, %c0_6], %5 {strides = array<i32>} : memref<64x128xf32, #tpu.memory_space<vmem>>, vector<64x128xf32>,
    return
  }
  func.func @transform_0(%arg0: i32, %arg1: i32) -> (i32, i32) {
    %c0_i32 = arith.constant 0 : i32
    %c0_i32_0 = arith.constant 0 : i32
    return %arg0, %c0_i32 : i32, i32
  }
  func.func @transform_1(%arg0: i32, %arg1: i32) -> (i32, i32) {
    %c0_i32 = arith.constant 0 : i32
    %c0_i32_0 = arith.constant 0 : i32
    return %c0_i32, %arg1 : i32, i32
  }
  func.func @transform_2(%arg0: i32, %arg1: i32) -> (i32, i32) {
    %c0_i32 = arith.constant 0 : i32
    %c0_i32_0 = arith.constant 0 : i32
    return %c0_i32, %arg1 : i32, i32
  }
  func.func @transform_3(%arg0: i32, %arg1: i32) -> (i32, i32) {
    %c0_i32 = arith.constant 0 : i32
    return %arg0, %arg1 : i32, i32
  }
}

module attributes {stable_mosaic.version = 11 : i64} {
  func.func @_mm_bias_act_kernel(%arg0: i32, %arg1: i32, %arg2: memref<64x576xbf16, #tpu.memory_space<vmem>>, %arg3: memref<576x256xbf16, #tpu.memory_space<vmem>>, %arg4: memref<1x256xf32, #tpu.memory_space<vmem>>, %arg5: memref<64x256xf32, #tpu.memory_space<vmem>>) attributes {dimension_semantics = [#tpu.dimension_semantics<parallel>, #tpu.dimension_semantics<parallel>], iteration_bounds = array<i64: 1, 1>, scalar_prefetch = 0 : i64, scratch_operands = 0 : i64, tpu.core_type = #tpu.core_type<tc>, window_params = [{transform_indices = @transform_0, window_bounds = array<i64: 64, 576>}, {transform_indices = @transform_1, window_bounds = array<i64: 576, 256>}, {transform_indices = @transform_2, window_bounds = array<i64: 1, 256>}, {transform_indices = @transform_3, window_bounds = array<i64: 64, 256>}]} {
    %c0 = arith.constant 0 : index
    %c0_0 = arith.constant 0 : index
    %0 = vector.load %arg2[%c0, %c0_0] : memref<64x576xbf16, #tpu.memory_space<vmem>>, vector<64x576xbf16>
    %c0_1 = arith.constant 0 : index
    %c0_2 = arith.constant 0 : index
    %1 = vector.load %arg3[%c0_1, %c0_2] : memref<576x256xbf16, #tpu.memory_space<vmem>>, vector<576x256xbf16>
    %cst = arith.constant dense<0.000000e+00> : vector<64x256xf32>
    %2 = tpu.matmul %0, %1, %cst {dimension_numbers = #tpu.dot_dimension_numbers<[1], [0], [0], [1], [0, 0, 1, 1], [], []>} : vector<64x576xbf16>, vector<576x256xbf16>, vector<64x256xf32> -> vector<64x256xf32>
    %c0_3 = arith.constant 0 : index
    %c0_4 = arith.constant 0 : index
    %3 = vector.load %arg4[%c0_3, %c0_4] : memref<1x256xf32, #tpu.memory_space<vmem>>, vector<1x256xf32>
    %4 = vector.broadcast %3 : vector<1x256xf32> to vector<64x256xf32>
    %5 = arith.addf %2, %4 : vector<64x256xf32>
    %c0_5 = arith.constant 0 : index
    %c0_6 = arith.constant 0 : index
    %6 = vector.load %arg5[%c0_5, %c0_6] : memref<64x256xf32, #tpu.memory_space<vmem>>, vector<64x256xf32>
    tpu.vector_store %arg5[%c0_5, %c0_6], %5 {strides = array<i32>} : memref<64x256xf32, #tpu.memory_space<vmem>>, vector<64x256xf32>,
    return
  }
  func.func @transform_0(%arg0: i32, %arg1: i32) -> (i32, i32) {
    %c0_i32 = arith.constant 0 : i32
    %c0_i32_0 = arith.constant 0 : i32
    return %arg0, %c0_i32 : i32, i32
  }
  func.func @transform_1(%arg0: i32, %arg1: i32) -> (i32, i32) {
    %c0_i32 = arith.constant 0 : i32
    %c0_i32_0 = arith.constant 0 : i32
    return %c0_i32, %arg1 : i32, i32
  }
  func.func @transform_2(%arg0: i32, %arg1: i32) -> (i32, i32) {
    %c0_i32 = arith.constant 0 : i32
    %c0_i32_0 = arith.constant 0 : i32
    return %c0_i32, %arg1 : i32, i32
  }
  func.func @transform_3(%arg0: i32, %arg1: i32) -> (i32, i32) {
    %c0_i32 = arith.constant 0 : i32
    return %arg0, %arg1 : i32, i32
  }
}

module attributes {stable_mosaic.version = 11 : i64} {
  func.func @_mm_bias_act_kernel(%arg0: i32, %arg1: i32, %arg2: memref<256x128xbf16, #tpu.memory_space<vmem>>, %arg3: memref<128x128xbf16, #tpu.memory_space<vmem>>, %arg4: memref<1x128xf32, #tpu.memory_space<vmem>>, %arg5: memref<256x128xf32, #tpu.memory_space<vmem>>) attributes {dimension_semantics = [#tpu.dimension_semantics<parallel>, #tpu.dimension_semantics<parallel>], iteration_bounds = array<i64: 1, 1>, scalar_prefetch = 0 : i64, scratch_operands = 0 : i64, tpu.core_type = #tpu.core_type<tc>, window_params = [{transform_indices = @transform_0, window_bounds = array<i64: 256, 128>}, {transform_indices = @transform_1, window_bounds = array<i64: 128, 128>}, {transform_indices = @transform_2, window_bounds = array<i64: 1, 128>}, {transform_indices = @transform_3, window_bounds = array<i64: 256, 128>}]} {
    %c0 = arith.constant 0 : index
    %c0_0 = arith.constant 0 : index
    %0 = vector.load %arg2[%c0, %c0_0] : memref<256x128xbf16, #tpu.memory_space<vmem>>, vector<256x128xbf16>
    %c0_1 = arith.constant 0 : index
    %c0_2 = arith.constant 0 : index
    %1 = vector.load %arg3[%c0_1, %c0_2] : memref<128x128xbf16, #tpu.memory_space<vmem>>, vector<128x128xbf16>
    %cst = arith.constant dense<0.000000e+00> : vector<256x128xf32>
    %2 = tpu.matmul %0, %1, %cst {dimension_numbers = #tpu.dot_dimension_numbers<[1], [0], [0], [1], [0, 0, 1, 1], [], []>} : vector<256x128xbf16>, vector<128x128xbf16>, vector<256x128xf32> -> vector<256x128xf32>
    %c0_3 = arith.constant 0 : index
    %c0_4 = arith.constant 0 : index
    %3 = vector.load %arg4[%c0_3, %c0_4] : memref<1x128xf32, #tpu.memory_space<vmem>>, vector<1x128xf32>
    %4 = vector.broadcast %3 : vector<1x128xf32> to vector<256x128xf32>
    %5 = arith.addf %2, %4 : vector<256x128xf32>
    %c0_5 = arith.constant 0 : index
    %c0_6 = arith.constant 0 : index
    %6 = vector.load %arg5[%c0_5, %c0_6] : memref<256x128xf32, #tpu.memory_space<vmem>>, vector<256x128xf32>
    tpu.vector_store %arg5[%c0_5, %c0_6], %5 {strides = array<i32>} : memref<256x128xf32, #tpu.memory_space<vmem>>, vector<256x128xf32>,
    return
  }
  func.func @transform_0(%arg0: i32, %arg1: i32) -> (i32, i32) {
    %c0_i32 = arith.constant 0 : i32
    %c0_i32_0 = arith.constant 0 : i32
    return %arg0, %c0_i32 : i32, i32
  }
  func.func @transform_1(%arg0: i32, %arg1: i32) -> (i32, i32) {
    %c0_i32 = arith.constant 0 : i32
    %c0_i32_0 = arith.constant 0 : i32
    return %c0_i32, %arg1 : i32, i32
  }
  func.func @transform_2(%arg0: i32, %arg1: i32) -> (i32, i32) {
    %c0_i32 = arith.constant 0 : i32
    %c0_i32_0 = arith.constant 0 : i32
    return %c0_i32, %arg1 : i32, i32
  }
  func.func @transform_3(%arg0: i32, %arg1: i32) -> (i32, i32) {
    %c0_i32 = arith.constant 0 : i32
    return %arg0, %arg1 : i32, i32
  }
}

module attributes {stable_mosaic.version = 11 : i64} {
  func.func @_mm_bias_act_kernel(%arg0: i32, %arg1: i32, %arg2: memref<64x1152xbf16, #tpu.memory_space<vmem>>, %arg3: memref<1152x128xbf16, #tpu.memory_space<vmem>>, %arg4: memref<1x128xf32, #tpu.memory_space<vmem>>, %arg5: memref<64x128xf32, #tpu.memory_space<vmem>>) attributes {dimension_semantics = [#tpu.dimension_semantics<parallel>, #tpu.dimension_semantics<parallel>], iteration_bounds = array<i64: 1, 1>, scalar_prefetch = 0 : i64, scratch_operands = 0 : i64, tpu.core_type = #tpu.core_type<tc>, window_params = [{transform_indices = @transform_0, window_bounds = array<i64: 64, 1152>}, {transform_indices = @transform_1, window_bounds = array<i64: 1152, 128>}, {transform_indices = @transform_2, window_bounds = array<i64: 1, 128>}, {transform_indices = @transform_3, window_bounds = array<i64: 64, 128>}]} {
    %c0 = arith.constant 0 : index
    %c0_0 = arith.constant 0 : index
    %0 = vector.load %arg2[%c0, %c0_0] : memref<64x1152xbf16, #tpu.memory_space<vmem>>, vector<64x1152xbf16>
    %c0_1 = arith.constant 0 : index
    %c0_2 = arith.constant 0 : index
    %1 = vector.load %arg3[%c0_1, %c0_2] : memref<1152x128xbf16, #tpu.memory_space<vmem>>, vector<1152x128xbf16>
    %cst = arith.constant dense<0.000000e+00> : vector<64x128xf32>
    %2 = tpu.matmul %0, %1, %cst {dimension_numbers = #tpu.dot_dimension_numbers<[1], [0], [0], [1], [0, 0, 1, 1], [], []>} : vector<64x1152xbf16>, vector<1152x128xbf16>, vector<64x128xf32> -> vector<64x128xf32>
    %c0_3 = arith.constant 0 : index
    %c0_4 = arith.constant 0 : index
    %3 = vector.load %arg4[%c0_3, %c0_4] : memref<1x128xf32, #tpu.memory_space<vmem>>, vector<1x128xf32>
    %4 = vector.broadcast %3 : vector<1x128xf32> to vector<64x128xf32>
    %5 = arith.addf %2, %4 : vector<64x128xf32>
    %6 = arith.negf %5 : vector<64x128xf32>
    %7 = math.exp %6 : vector<64x128xf32>
    %cst_5 = arith.constant 1.000000e+00 : f32
    %8 = vector.broadcast %cst_5 : f32 to vector<64x128xf32>
    %9 = arith.addf %8, %7 : vector<64x128xf32>
    %10 = arith.divf %8, %9 : vector<64x128xf32>
    %c0_6 = arith.constant 0 : index
    %c0_7 = arith.constant 0 : index
    %11 = vector.load %arg5[%c0_6, %c0_7] : memref<64x128xf32, #tpu.memory_space<vmem>>, vector<64x128xf32>
    tpu.vector_store %arg5[%c0_6, %c0_7], %10 {strides = array<i32>} : memref<64x128xf32, #tpu.memory_space<vmem>>, vector<64x128xf32>,
    return
  }
  func.func @transform_0(%arg0: i32, %arg1: i32) -> (i32, i32) {
    %c0_i32 = arith.constant 0 : i32
    %c0_i32_0 = arith.constant 0 : i32
    return %arg0, %c0_i32 : i32, i32
  }
  func.func @transform_1(%arg0: i32, %arg1: i32) -> (i32, i32) {
    %c0_i32 = arith.constant 0 : i32
    %c0_i32_0 = arith.constant 0 : i32
    return %c0_i32, %arg1 : i32, i32
  }
  func.func @transform_2(%arg0: i32, %arg1: i32) -> (i32, i32) {
    %c0_i32 = arith.constant 0 : i32
    %c0_i32_0 = arith.constant 0 : i32
    return %c0_i32, %arg1 : i32, i32
  }
  func.func @transform_3(%arg0: i32, %arg1: i32) -> (i32, i32) {
    %c0_i32 = arith.constant 0 : i32
    return %arg0, %arg1 : i32, i32
  }
}

module attributes {stable_mosaic.version = 11 : i64} {
  func.func @_mm_bias_act_kernel(%arg0: i32, %arg1: i32, %arg2: memref<64x1152xbf16, #tpu.memory_space<vmem>>, %arg3: memref<1152x128xbf16, #tpu.memory_space<vmem>>, %arg4: memref<1x128xf32, #tpu.memory_space<vmem>>, %arg5: memref<64x128xf32, #tpu.memory_space<vmem>>) attributes {dimension_semantics = [#tpu.dimension_semantics<parallel>, #tpu.dimension_semantics<parallel>], iteration_bounds = array<i64: 1, 1>, scalar_prefetch = 0 : i64, scratch_operands = 0 : i64, tpu.core_type = #tpu.core_type<tc>, window_params = [{transform_indices = @transform_0, window_bounds = array<i64: 64, 1152>}, {transform_indices = @transform_1, window_bounds = array<i64: 1152, 128>}, {transform_indices = @transform_2, window_bounds = array<i64: 1, 128>}, {transform_indices = @transform_3, window_bounds = array<i64: 64, 128>}]} {
    %c0 = arith.constant 0 : index
    %c0_0 = arith.constant 0 : index
    %0 = vector.load %arg2[%c0, %c0_0] : memref<64x1152xbf16, #tpu.memory_space<vmem>>, vector<64x1152xbf16>
    %c0_1 = arith.constant 0 : index
    %c0_2 = arith.constant 0 : index
    %1 = vector.load %arg3[%c0_1, %c0_2] : memref<1152x128xbf16, #tpu.memory_space<vmem>>, vector<1152x128xbf16>
    %cst = arith.constant dense<0.000000e+00> : vector<64x128xf32>
    %2 = tpu.matmul %0, %1, %cst {dimension_numbers = #tpu.dot_dimension_numbers<[1], [0], [0], [1], [0, 0, 1, 1], [], []>} : vector<64x1152xbf16>, vector<1152x128xbf16>, vector<64x128xf32> -> vector<64x128xf32>
    %c0_3 = arith.constant 0 : index
    %c0_4 = arith.constant 0 : index
    %3 = vector.load %arg4[%c0_3, %c0_4] : memref<1x128xf32, #tpu.memory_space<vmem>>, vector<1x128xf32>
    %4 = vector.broadcast %3 : vector<1x128xf32> to vector<64x128xf32>
    %5 = arith.addf %2, %4 : vector<64x128xf32>
    %6 = math.tanh %5 : vector<64x128xf32>
    %c0_5 = arith.constant 0 : index
    %c0_6 = arith.constant 0 : index
    %7 = vector.load %arg5[%c0_5, %c0_6] : memref<64x128xf32, #tpu.memory_space<vmem>>, vector<64x128xf32>
    tpu.vector_store %arg5[%c0_5, %c0_6], %6 {strides = array<i32>} : memref<64x128xf32, #tpu.memory_space<vmem>>, vector<64x128xf32>,
    return
  }
  func.func @transform_0(%arg0: i32, %arg1: i32) -> (i32, i32) {
    %c0_i32 = arith.constant 0 : i32
    %c0_i32_0 = arith.constant 0 : i32
    return %arg0, %c0_i32 : i32, i32
  }
  func.func @transform_1(%arg0: i32, %arg1: i32) -> (i32, i32) {
    %c0_i32 = arith.constant 0 : i32
    %c0_i32_0 = arith.constant 0 : i32
    return %c0_i32, %arg1 : i32, i32
  }
  func.func @transform_2(%arg0: i32, %arg1: i32) -> (i32, i32) {
    %c0_i32 = arith.constant 0 : i32
    %c0_i32_0 = arith.constant 0 : i32
    return %c0_i32, %arg1 : i32, i32
  }
  func.func @transform_3(%arg0: i32, %arg1: i32) -> (i32, i32) {
    %c0_i32 = arith.constant 0 : i32
    return %arg0, %arg1 : i32, i32
  }
}

</mosaic_0001>

<bundles_post_ra>
// kernel: _net_forward_impl.230
= control target key start
LH: loop header
LB: loop body
LE: loop exit
PB: predicated region body
PF: predicated region fallthrough
CT: control target
= control target key end

     0   :  { %8 = vsyncpa [#allocation3], 0  ;;  %s800_s0 = inlined_call_operand.vmem [shape: bf16[256,9], index: 0, kind: input, shape index: {}]   ;;  %s801_s1 = inlined_call_operand.hbm [shape: bf16[9,128], index: 1, kind: input, shape index: {}]   ;;  %s802_s2 = inlined_call_operand.hbm [shape: f32[1,128], index: 2, kind: input, shape index: {}]   ;;  %s803_s3 = inlined_call_operand.vmem [shape: f32[256,128], index: 3, kind: output, shape index: {}]  }
   0x1   :  { %9 = vsyncpa [#allocation5], 0  ;;  %s575_s12 = smov [#allocation2]  }
   0x2   :  { %s17_s13 = sshll.u32 %s575_s12, 4  ;;  %s18_s13 = int_to_ptr.vmem [resolvable:$true] %s17_s13 }
   0x3   :  { %s539_s14 = scalar_lea.vmem %s18_s13, 128  ;;  %p544_p1 = scmp.lt.s32.totalorder %s18_s13, %s18_s13 }
   0x4   :  { %p540_p0 = scmp.ne.s32.totalorder %s18_s13, %s539_s14  ;;  %p545_p2 = scmp.lt.s32.totalorder %s539_s14, %s539_s14 }
   0x6   :  { %p546_p3 = por %p545_p2, %p544_p1 }
   0x8   :  { %p547_p4 = pnand %p546_p3, %p540_p0 }
   0xa   :  { %550 = shalt.err (!%p547_p4)
}
   0xb   :  { %s576_s15 = smov 64   ;;  %s577_s16 = smov 4  }
   0xc   :  { %23 = dma.hbm_to_vmem [thread:$0]  %s801_s1, 128, %s18_s13, [#allocation3], %s576_s15, %s576_s15, %s577_s16  }
   0xd   :  { %s578_s19 = smov [#allocation4]  }
   0xe   :  { %s30_s20 = sshll.u32 %s578_s19, 4  ;;  %s31_s20 = int_to_ptr.vmem [resolvable:$true] %s30_s20 }
   0xf   :  { %s559_s21 = scalar_lea.vmem %s31_s20, 16  ;;  %s563_s22 = scalar_lea.vmem %s31_s20, 32 }
  0x10   :  { %p560_p5 = scmp.ne.s32.totalorder %s31_s20, %s559_s21  ;;  %p564_p6 = scmp.lt.s32.totalorder %s31_s20, %s31_s20 }
  0x11   :  { %p565_p7 = scmp.lt.s32.totalorder %s563_s22, %s559_s21 }
  0x13   :  { %p566_p8 = por %p565_p7, %p564_p6 }
  0x15   :  { %p567_p9 = pnand %p566_p8, %p560_p5 }
  0x17   :  { %570 = shalt.err (!%p567_p9)
}
  0x18   :  { %33 = dma.hbm_to_vmem [thread:$0]  %s802_s2, 16, %s31_s20, [#allocation5]  }
  0x19   :  { %571 = dma.done.wait [#allocation3], 128  }
  0x1a   :  { %572 = vsyncadd [#allocation3], 4294967168 }
  0x1b   :  { %573 = dma.done.wait [#allocation5], 16  }
  0x1c   :  { %574 = vsyncadd [#allocation5], 4294967280  ;;  %vm216_vm0 = vcmask 1043456   ;;  %vm217_vm1 = vcmask 1044480   ;;  %v579_v0 = vmov 65535   ;;  %vm167_vm2 = vcmask 72704  }
  0x1d   :  { %v218_v1 = vsel %vm216_vm0, 4294967295, %v579_v0  ;;  %v514_v3 = vld [vmem:[#allocation2] sm:$0x1f]   ;;  %v517_v7 = vld [vmem:[%s800_s0 + $0x8] sm:$0xff]   ;;  %v519_v9 = vld [vmem:[%s800_s0 + $0x10] sm:$0xff]  }
  0x1e   :  { %v219_v2 = vsel %vm217_vm1, %v218_v1, 0  ;;  %v515_v4 = vld [vmem:[%s800_s0] sm:$0xff]   ;;  %v518_v8 = vld [vmem:[%s800_s0 + $0x48] sm:$0xff]   ;;  %v520_v10 = vld [vmem:[%s800_s0 + $0x50] sm:$0xff]  }
  0x1f   :  { %v221_v5 = vand.u32 %v514_v3, %v219_v2  ;;  %v516_v6 = vld [vmem:[%s800_s0 + $0x40] sm:$0xff]   ;;  %475 = vmatprep.mubr.msk.bf16.mxu0 %vm167_vm2, %v515_v4  ;;  %v521_v11 = vld [vmem:[%s800_s0 + $0x18] sm:$0xff]   ;;  %v525_v15 = vld [vmem:[%s800_s0 + $0x28] sm:$0xff]  }
  0x20   :  { %491 = vmatprep.mubr.msk.bf16.mxu1 %vm167_vm2, %v516_v6  ;;  %v522_v12 = vld [vmem:[%s800_s0 + $0x58] sm:$0xff]   ;;  %v523_v13 = vld [vmem:[%s800_s0 + $0x20] sm:$0xff]   ;;  %v526_v16 = vld [vmem:[%s800_s0 + $0x68] sm:$0xff]  }
  0x21   :  { %473 = vmatprep.subr.bf16.mxu0 %v221_v5  ;;  %507 = vmatprep.subr.bf16.mxu1 %v221_v5  ;;  %v524_v14 = vld [vmem:[%s800_s0 + $0x60] sm:$0xff]   ;;  %v527_v17 = vld [vmem:[%s800_s0 + $0x30] sm:$0xff]   ;;  %v529_v19 = vld [vmem:[%s800_s0 + $0x38] sm:$0xff]  }
  0x22   :  { %474 = vmatpush3.bf16.msra.mxu0 %v221_v5  ;;  %508 = vmatpush3.bf16.msra.mxu1 %v221_v5  ;;  %v528_v18 = vld [vmem:[%s800_s0 + $0x70] sm:$0xff]   ;;  %v530_v20 = vld [vmem:[%s800_s0 + $0x78] sm:$0xff]   ;;  %v670_v21 = vld [vmem:[#allocation4] ss:$0 sm:$0xff] }
  0x25   :  { %476 = vmatmul.mubr.msk.bf16.vlgmr.msra.gmra.mxu0 %vm167_vm2, %v517_v7  ;;  %492 = vmatmul.mubr.msk.bf16.vlgmr.msra.gmra.mxu1 %vm167_vm2, %v518_v8 }
  0x26   :  { %479 = vmatprep.mubr.msk.bf16.mxu0 %vm167_vm2, %v519_v9  ;;  %495 = vmatprep.mubr.msk.bf16.mxu1 %vm167_vm2, %v520_v10 }
  0x2d   :  { %480 = vmatmul.mubr.msk.bf16.gmra.mxu0 %vm167_vm2, %v521_v11  ;;  %496 = vmatmul.mubr.msk.bf16.gmra.mxu1 %vm167_vm2, %v522_v12 }
  0x2e   :  { %483 = vmatprep.mubr.msk.bf16.mxu0 %vm167_vm2, %v523_v13  ;;  %499 = vmatprep.mubr.msk.bf16.mxu1 %vm167_vm2, %v524_v14 }
  0x35   :  { %484 = vmatmul.mubr.msk.bf16.gmra.mxu0 %vm167_vm2, %v525_v15  ;;  %500 = vmatmul.mubr.msk.bf16.gmra.mxu1 %vm167_vm2, %v526_v16 }
  0x36   :  { %487 = vmatprep.mubr.msk.bf16.mxu0 %vm167_vm2, %v527_v17  ;;  %503 = vmatprep.mubr.msk.bf16.mxu1 %vm167_vm2, %v528_v18 }
  0x3d   :  { %488 = vmatmul.mubr.msk.bf16.gmra.mxu0 %vm167_vm2, %v529_v19  ;;  %504 = vmatmul.mubr.msk.bf16.gmra.mxu1 %vm167_vm2, %v530_v20 }
  0xe5   :  { %v477_v22 = vpop.f32.mrf.mxu0  ;;  %v493_v23 = vpop.f32.mrf.mxu1 }
  0xe6   :  { %v266_v24 = vadd.f32 %v477_v22, %v670_v21  ;;  %v330_v25 = vadd.f32 %v493_v23, %v670_v21 }
  0xe7   :  { %v257_v26 = vpop.f32.mrf.mxu0  ;;  %v321_v27 = vpop.f32.mrf.mxu1 }
  0xe8   :  { %386 = vst [vmem:[%s803_s3 + $0x10] sm:$0xff] %v266_v24  ;;  %402 = vst [vmem:[%s803_s3 + $0x90] sm:$0xff] %v330_v25  ;;  %v258_v28 = vadd.f32 %v670_v21, %v257_v26  ;;  %v322_v29 = vadd.f32 %v670_v21, %v321_v27 }
  0xe9   :  { %v478_v30 = vpop.f32.mrf.mxu0  ;;  %v494_v31 = vpop.f32.mrf.mxu1 }
  0xea   :  { %384 = vst [vmem:[%s803_s3] sm:$0xff] %v258_v28  ;;  %400 = vst [vmem:[%s803_s3 + $0x80] sm:$0xff] %v322_v29  ;;  %v269_v32 = vadd.f32 %v478_v30, %v670_v21  ;;  %v333_v33 = vadd.f32 %v494_v31, %v670_v21 }
  0xeb   :  { %v260_v34 = vpop.f32.mrf.mxu0  ;;  %v324_v35 = vpop.f32.mrf.mxu1 }
  0xec   :  { %387 = vst [vmem:[%s803_s3 + $0x18] sm:$0xff] %v269_v32  ;;  %403 = vst [vmem:[%s803_s3 + $0x98] sm:$0xff] %v333_v33  ;;  %v261_v36 = vadd.f32 %v670_v21, %v260_v34  ;;  %v325_v37 = vadd.f32 %v670_v21, %v324_v35 }
  0xed   :  { %v481_v38 = vpop.f32.mrf.mxu0  ;;  %v497_v39 = vpop.f32.mrf.mxu1 }
  0xee   :  { %385 = vst [vmem:[%s803_s3 + $0x8] sm:$0xff] %v261_v36  ;;  %401 = vst [vmem:[%s803_s3 + $0x88] sm:$0xff] %v325_v37  ;;  %v282_v40 = vadd.f32 %v481_v38, %v670_v21  ;;  %v346_v41 = vadd.f32 %v497_v39, %v670_v21 }
  0xef   :  { %v273_v42 = vpop.f32.mrf.mxu0  ;;  %v337_v43 = vpop.f32.mrf.mxu1 }
  0xf0   :  { %390 = vst [vmem:[%s803_s3 + $0x30] sm:$0xff] %v282_v40  ;;  %406 = vst [vmem:[%s803_s3 + $0xb0] sm:$0xff] %v346_v41  ;;  %v274_v44 = vadd.f32 %v670_v21, %v273_v42  ;;  %v338_v45 = vadd.f32 %v670_v21, %v337_v43 }
  0xf1   :  { %v482_v46 = vpop.f32.mrf.mxu0  ;;  %v498_v47 = vpop.f32.mrf.mxu1 }
  0xf2   :  { %388 = vst [vmem:[%s803_s3 + $0x20] sm:$0xff] %v274_v44  ;;  %404 = vst [vmem:[%s803_s3 + $0xa0] sm:$0xff] %v338_v45  ;;  %v285_v48 = vadd.f32 %v482_v46, %v670_v21  ;;  %v349_v49 = vadd.f32 %v498_v47, %v670_v21 }
  0xf3   :  { %v276_v50 = vpop.f32.mrf.mxu0  ;;  %v340_v51 = vpop.f32.mrf.mxu1 }
  0xf4   :  { %391 = vst [vmem:[%s803_s3 + $0x38] sm:$0xff] %v285_v48  ;;  %407 = vst [vmem:[%s803_s3 + $0xb8] sm:$0xff] %v349_v49  ;;  %v277_v52 = vadd.f32 %v670_v21, %v276_v50  ;;  %v341_v53 = vadd.f32 %v670_v21, %v340_v51 }
  0xf5   :  { %v485_v54 = vpop.f32.mrf.mxu0  ;;  %v501_v55 = vpop.f32.mrf.mxu1 }
  0xf6   :  { %389 = vst [vmem:[%s803_s3 + $0x28] sm:$0xff] %v277_v52  ;;  %405 = vst [vmem:[%s803_s3 + $0xa8] sm:$0xff] %v341_v53  ;;  %v298_v56 = vadd.f32 %v485_v54, %v670_v21  ;;  %v362_v57 = vadd.f32 %v501_v55, %v670_v21 }
  0xf7   :  { %v289_v58 = vpop.f32.mrf.mxu0  ;;  %v353_v59 = vpop.f32.mrf.mxu1 }
  0xf8   :  { %394 = vst [vmem:[%s803_s3 + $0x50] sm:$0xff] %v298_v56  ;;  %410 = vst [vmem:[%s803_s3 + $0xd0] sm:$0xff] %v362_v57  ;;  %v290_v60 = vadd.f32 %v670_v21, %v289_v58  ;;  %v354_v61 = vadd.f32 %v670_v21, %v353_v59 }
  0xf9   :  { %v486_v62 = vpop.f32.mrf.mxu0  ;;  %v502_v63 = vpop.f32.mrf.mxu1 }
  0xfa   :  { %392 = vst [vmem:[%s803_s3 + $0x40] sm:$0xff] %v290_v60  ;;  %408 = vst [vmem:[%s803_s3 + $0xc0] sm:$0xff] %v354_v61  ;;  %v301_v0 = vadd.f32 %v486_v62, %v670_v21  ;;  %v365_v1 = vadd.f32 %v502_v63, %v670_v21 }
  0xfb   :  { %v292_v2 = vpop.f32.mrf.mxu0  ;;  %v356_v3 = vpop.f32.mrf.mxu1 }
  0xfc   :  { %395 = vst [vmem:[%s803_s3 + $0x58] sm:$0xff] %v301_v0  ;;  %411 = vst [vmem:[%s803_s3 + $0xd8] sm:$0xff] %v365_v1  ;;  %v293_v4 = vadd.f32 %v670_v21, %v292_v2  ;;  %v357_v5 = vadd.f32 %v670_v21, %v356_v3 }
  0xfd   :  { %v489_v6 = vpop.f32.mrf.mxu0  ;;  %v505_v7 = vpop.f32.mrf.mxu1 }
  0xfe   :  { %393 = vst [vmem:[%s803_s3 + $0x48] sm:$0xff] %v293_v4  ;;  %409 = vst [vmem:[%s803_s3 + $0xc8] sm:$0xff] %v357_v5  ;;  %v314_v8 = vadd.f32 %v489_v6, %v670_v21  ;;  %v378_v9 = vadd.f32 %v505_v7, %v670_v21 }
  0xff   :  { %v305_v10 = vpop.f32.mrf.mxu0  ;;  %v369_v11 = vpop.f32.mrf.mxu1 }
 0x100   :  { %398 = vst [vmem:[%s803_s3 + $0x70] sm:$0xff] %v314_v8  ;;  %414 = vst [vmem:[%s803_s3 + $0xf0] sm:$0xff] %v378_v9  ;;  %v306_v12 = vadd.f32 %v670_v21, %v305_v10  ;;  %v370_v13 = vadd.f32 %v670_v21, %v369_v11 }
 0x101   :  { %v490_v14 = vpop.f32.mrf.mxu0  ;;  %v506_v15 = vpop.f32.mrf.mxu1 }
 0x102   :  { %396 = vst [vmem:[%s803_s3 + $0x60] sm:$0xff] %v306_v12  ;;  %412 = vst [vmem:[%s803_s3 + $0xe0] sm:$0xff] %v370_v13  ;;  %v317_v16 = vadd.f32 %v490_v14, %v670_v21  ;;  %v381_v17 = vadd.f32 %v506_v15, %v670_v21 }
 0x103   :  { %v308_v18 = vpop.f32.mrf.mxu0  ;;  %v372_v19 = vpop.f32.mrf.mxu1 }
 0x104   :  { %399 = vst [vmem:[%s803_s3 + $0x78] sm:$0xff] %v317_v16  ;;  %415 = vst [vmem:[%s803_s3 + $0xf8] sm:$0xff] %v381_v17  ;;  %v309_v20 = vadd.f32 %v670_v21, %v308_v18  ;;  %v373_v22 = vadd.f32 %v670_v21, %v372_v19 }
 0x106   :  { %397 = vst [vmem:[%s803_s3 + $0x68] sm:$0xff] %v309_v20  ;;  %413 = vst [vmem:[%s803_s3 + $0xe8] sm:$0xff] %v373_v22 }
 0x107   :  { %420 = vsyncpa [#allocation3], 1 }
 0x108   :  { %421 = vsyncpa [#allocation5], 1 }

// kernel: _net_forward_impl.232
= control target key start
LH: loop header
LB: loop body
LE: loop exit
PB: predicated region body
PF: predicated region fallthrough
CT: control target
= control target key end

     0   :  { %vm434_vm0 = vcmask 523264   ;;  %s1106_s1 = inlined_call_operand.vmem [shape: bf16[576,128], index: 1, kind: input, shape index: {}]   ;;  %s1107_s0 = inlined_call_operand.vmem [shape: bf16[64,576], index: 0, kind: input, shape index: {}]   ;;  %s1108_s2 = inlined_call_operand.vmem [shape: f32[1,128], index: 2, kind: input, shape index: {}]   ;;  %s1109_s3 = inlined_call_operand.vmem [shape: f32[64,128], index: 3, kind: output, shape index: {}]  }
   0x1   :  { %v827_v0 = vld [vmem:[%s1106_s1 + $0x78] sm:$0xff]   ;;  %v831_v4 = vld [vmem:[%s1106_s1 + $0x70] sm:$0xff]   ;;  %v835_v8 = vld [vmem:[%s1106_s1 + $0x68] sm:$0xff]  }
   0x2   :  { %v828_v1 = vld [vmem:[%s1106_s1 + $0xf8] sm:$0xff]   ;;  %715 = vmatprep.subr.bf16.mxu0 %v827_v0  ;;  %v832_v5 = vld [vmem:[%s1106_s1 + $0xf0] sm:$0xff]   ;;  %v836_v9 = vld [vmem:[%s1106_s1 + $0xe8] sm:$0xff]  }
   0x3   :  { %v829_v2 = vld [vmem:[%s1106_s1 + $0x38] sm:$0xff]   ;;  %755 = vmatprep.subr.bf16.mxu1 %v828_v1  ;;  %v833_v6 = vld [vmem:[%s1106_s1 + $0x30] sm:$0xff]   ;;  %v837_v10 = vld [vmem:[%s1106_s1 + $0x28] sm:$0xff]  }
   0x4   :  { %v830_v3 = vld [vmem:[%s1106_s1 + $0xb8] sm:$0xff]   ;;  %716 = vmatpush3.bf16.msra.mxu0 %v829_v2  ;;  %v834_v7 = vld [vmem:[%s1106_s1 + $0xb0] sm:$0xff]   ;;  %v838_v11 = vld [vmem:[%s1106_s1 + $0xa8] sm:$0xff]  }
   0x5   :  { %756 = vmatpush3.bf16.msra.mxu1 %v830_v3  ;;  %717 = vmatprep.subr.bf16.mxu0 %v831_v4  ;;  %v839_v12 = vld [vmem:[%s1106_s1 + $0x60] sm:$0xff]   ;;  %v843_v16 = vld [vmem:[%s1106_s1 + $0x58] sm:$0xff]   ;;  %v847_v20 = vld [vmem:[%s1106_s1 + $0x50] sm:$0xff]  }
   0x6   :  { %757 = vmatprep.subr.bf16.mxu1 %v832_v5  ;;  %v840_v13 = vld [vmem:[%s1106_s1 + $0xe0] sm:$0xff]   ;;  %v844_v17 = vld [vmem:[%s1106_s1 + $0xd8] sm:$0xff]   ;;  %v848_v21 = vld [vmem:[%s1106_s1 + $0xd0] sm:$0xff]  }
   0x7   :  { %v841_v14 = vld [vmem:[%s1106_s1 + $0x20] sm:$0xff]   ;;  %v845_v18 = vld [vmem:[%s1106_s1 + $0x18] sm:$0xff]   ;;  %v849_v22 = vld [vmem:[%s1106_s1 + $0x10] sm:$0xff]  }
   0x8   :  { %718 = vmatpush3.bf16.msra.mxu0 %v833_v6  ;;  %v842_v15 = vld [vmem:[%s1106_s1 + $0xa0] sm:$0xff]   ;;  %v846_v19 = vld [vmem:[%s1106_s1 + $0x98] sm:$0xff]   ;;  %v850_v23 = vld [vmem:[%s1106_s1 + $0x90] sm:$0xff]  }
   0x9   :  { %758 = vmatpush3.bf16.msra.mxu1 %v834_v7  ;;  %719 = vmatprep.subr.bf16.mxu0 %v835_v8  ;;  %v851_v24 = vld [vmem:[%s1106_s1 + $0x48] sm:$0xff]   ;;  %v855_v28 = vld [vmem:[%s1106_s1 + $0x40] sm:$0xff]   ;;  %v865_v36 = vld [vmem:[%s1106_s1 + $0x118] sm:$0xff]  }
   0xa   :  { %759 = vmatprep.subr.bf16.mxu1 %v836_v9  ;;  %v852_v25 = vld [vmem:[%s1106_s1 + $0xc8] sm:$0xff]   ;;  %v856_v29 = vld [vmem:[%s1106_s1 + $0xc0] sm:$0xff]   ;;  %v872_v39 = vld [vmem:[%s1106_s1 + $0x110] sm:$0xff]  }
   0xb   :  { %v853_v26 = vld [vmem:[%s1106_s1 + $0x8] sm:$0xff]   ;;  %v857_v30 = vld [vmem:[%s1106_s1] sm:$0xff]   ;;  %v875_v43 = vld [vmem:[%s1107_s0 + $0x5c] ss:$20 sps:$4 sm:$0xff]  }
   0xc   :  { %720 = vmatpush3.bf16.msra.mxu0 %v837_v10  ;;  %v854_v27 = vld [vmem:[%s1106_s1 + $0x88] sm:$0xff]   ;;  %v858_v31 = vld [vmem:[%s1106_s1 + $0x80] sm:$0xff]   ;;  %v880_v48 = vld [vmem:[%s1107_s0 + $0x7c] ss:$20 sps:$4 sm:$0xff]  }
   0xd   :  { %760 = vmatpush3.bf16.msra.mxu1 %v838_v11  ;;  %721 = vmatprep.subr.bf16.mxu0 %v839_v12  ;;  %v859_v32 = vld [vmem:[%s1107_s0] ss:$20 sps:$4 sm:$0xff]   ;;  %v861_v33 = vld [vmem:[%s1107_s0 + $0x4] ss:$20 sps:$4 sm:$0xff]   ;;  %v862_v34 = vld [vmem:[%s1107_s0 + $0x8] ss:$20 sps:$4 sm:$0xff]  }
   0xe   :  { %761 = vmatprep.subr.bf16.mxu1 %v840_v13  ;;  %v864_v35 = vld [vmem:[%s1107_s0 + $0xc] ss:$20 sps:$4 sm:$0xff]   ;;  %479 = vmatprep.mubr.bf16.mxu0 %v861_v33  ;;  %v868_v38 = vld [vmem:[%s1107_s0 + $0x34] ss:$20 sps:$4 sm:$0xff]   ;;  %v871_v41 = vld [vmem:[%s1107_s0 + $0x30] ss:$20 sps:$4 sm:$0xff]  }
   0xf   :  { %544 = vmatprep.mubr.bf16.mxu1 %v864_v35  ;;  %v866_v37 = vld [vmem:[%s1107_s0 + $0x2c] ss:$20 sps:$4 sm:$0xff]   ;;  %v870_v40 = vld [vmem:[%s1107_s0 + $0x28] ss:$20 sps:$4 sm:$0xff]   ;;  %v877_v46 = vld [vmem:[%s1107_s0 + $0x50] ss:$20 sps:$4 sm:$0xff]  }
  0x10   :  { %722 = vmatpush3.bf16.msra.mxu0 %v841_v14  ;;  %v873_v42 = vld [vmem:[%s1107_s0 + $0x54] ss:$20 sps:$4 sm:$0xff]   ;;  %v886_v45 = vld [vmem:[%s1106_s1 + $0x100] sm:$0xff]   ;;  %v878_v47 = vld [vmem:[%s1107_s0 + $0x58] ss:$20 sps:$4 sm:$0xff]  }
  0x11   :  { %762 = vmatpush3.bf16.msra.mxu1 %v842_v15  ;;  %723 = vmatprep.subr.bf16.mxu0 %v843_v16  ;;  %v879_v44 = vld [vmem:[%s1106_s1 + $0x108] sm:$0xff]   ;;  %v882_v49 = vld [vmem:[%s1107_s0 + $0x84] ss:$20 sps:$4 sm:$0xff]   ;;  %v885_v51 = vld [vmem:[%s1107_s0 + $0x80] ss:$20 sps:$4 sm:$0xff]  }
  0x12   :  { %763 = vmatprep.subr.bf16.mxu1 %v844_v17  ;;  %v884_v50 = vld [vmem:[%s1107_s0 + $0x78] ss:$20 sps:$4 sm:$0xff]   ;;  %v887_v52 = vld [vmem:[%s1107_s0 + $0x10] ss:$20 sps:$4 sm:$0xff]   ;;  %v888_v53 = vld [vmem:[%s1107_s0 + $0x60] ss:$20 sps:$4 sm:$0xff]  }
  0x13   :  { %v889_v54 = vld [vmem:[%s1107_s0 + $0x38] ss:$20 sps:$4 sm:$0xff]   ;;  %v890_v55 = vld [vmem:[%s1107_s0 + $0x88] ss:$20 sps:$4 sm:$0xff]  }
  0x14   :  { %724 = vmatpush3.bf16.msra.mxu0 %v845_v18 }
  0x15   :  { %764 = vmatpush3.bf16.msra.mxu1 %v846_v19  ;;  %725 = vmatprep.subr.bf16.mxu0 %v847_v20  ;;  %v654_v19 = vld [vmem:[%s1108_s2] ss:$0 sm:$0xff] }
  0x16   :  { %765 = vmatprep.subr.bf16.mxu1 %v848_v21 }
  0x18   :  { %726 = vmatpush3.bf16.msra.mxu0 %v849_v22 }
  0x19   :  { %766 = vmatpush3.bf16.msra.mxu1 %v850_v23  ;;  %727 = vmatprep.subr.bf16.mxu0 %v851_v24 }
  0x1a   :  { %767 = vmatprep.subr.bf16.mxu1 %v852_v25 }
  0x1c   :  { %728 = vmatpush3.bf16.msra.mxu0 %v853_v26 }
  0x1d   :  { %768 = vmatpush3.bf16.msra.mxu1 %v854_v27  ;;  %729 = vmatprep.subr.bf16.mxu0 %v855_v28 }
  0x1e   :  { %769 = vmatprep.subr.bf16.mxu1 %v856_v29 }
  0x20   :  { %730 = vmatpush3.bf16.msra.mxu0 %v857_v30 }
  0x21   :  { %770 = vmatpush3.bf16.msra.mxu1 %v858_v31  ;;  %803 = vmatprep.subr.bf16.mxu0 %v865_v36 }
  0x22   :  { %819 = vmatprep.subr.bf16.mxu1 %v865_v36 }
  0x23   :  { %480 = vmatmul.mubr.bf16.vlgmr.msra.gmra.mxu0 %v859_v32 }
  0x24   :  { %545 = vmatmul.mubr.bf16.vlgmr.msra.gmra.mxu1 %v862_v34  ;;  %804 = vmatpush3.bf16.msra.mxu0 %v865_v36 }
  0x25   :  { %823 = vmatpush3.bf16.msra.mxu1 %v865_v36  ;;  %487 = vmatprep.mubr.bf16.mxu0 %v866_v37 }
  0x26   :  { %552 = vmatprep.mubr.bf16.mxu1 %v868_v38  ;;  %805 = vmatprep.subr.bf16.mxu0 %v872_v39 }
  0x27   :  { %820 = vmatprep.subr.bf16.mxu1 %v872_v39 }
  0x28   :  { %806 = vmatpush3.bf16.msra.mxu0 %v872_v39 }
  0x29   :  { %824 = vmatpush3.bf16.msra.mxu1 %v872_v39  ;;  %807 = vmatprep.subr.bf16.mxu0 %v879_v44 }
  0x2a   :  { %821 = vmatprep.subr.bf16.mxu1 %v879_v44 }
  0x2b   :  { %488 = vmatmul.mubr.bf16.gmra.mxu0 %v870_v40 }
  0x2c   :  { %553 = vmatmul.mubr.bf16.gmra.mxu1 %v871_v41  ;;  %495 = vmatprep.mubr.bf16.mxu0 %v873_v42 }
  0x2d   :  { %560 = vmatprep.mubr.bf16.mxu1 %v875_v43  ;;  %808 = vmatpush3.bf16.msra.mxu0 %v879_v44 }
  0x2e   :  { %825 = vmatpush3.bf16.msra.mxu1 %v879_v44  ;;  %809 = vmatprep.subr.bf16.mxu0 %v886_v45 }
  0x2f   :  { %822 = vmatprep.subr.bf16.mxu1 %v886_v45 }
  0x31   :  { %810 = vmatpush3.bf16.msra.mxu0 %v886_v45 }
  0x32   :  { %826 = vmatpush3.bf16.msra.mxu1 %v886_v45 }
  0x33   :  { %496 = vmatmul.mubr.bf16.gmra.mxu0 %v877_v46 }
  0x34   :  { %561 = vmatmul.mubr.bf16.gmra.mxu1 %v878_v47  ;;  %503 = vmatprep.mubr.bf16.mxu0 %v880_v48 }
  0x35   :  { %568 = vmatprep.mubr.bf16.mxu1 %v882_v49 }
  0x3b   :  { %504 = vmatmul.mubr.bf16.gmra.mxu0 %v884_v50 }
  0x3c   :  { %569 = vmatmul.mubr.bf16.gmra.mxu1 %v885_v51  ;;  %811 = vmatprep.mubr.msk.bf16.mxu0 %vm434_vm0, %v887_v52 }
  0x3d   :  { %815 = vmatprep.mubr.msk.bf16.mxu1 %vm434_vm0, %v888_v53 }
  0x43   :  { %812 = vmatmul.mubr.msk.bf16.vlgmr.msra.gmra.mxu0 %vm434_vm0, %v889_v54 }
  0x44   :  { %816 = vmatmul.mubr.msk.bf16.vlgmr.msra.gmra.mxu1 %vm434_vm0, %v890_v55 }
  0xe3   :  { %v731_v56 = vpop.f32.mrf.mxu0 }
  0xe4   :  { %v771_v57 = vpop.f32.mrf.mxu1 }
  0xe5   :  { %v732_v58 = vpop.f32.mrf.mxu0 }
  0xe6   :  { %v772_v59 = vpop.f32.mrf.mxu1  ;;  %v733_v17 = vadd.f32 %v732_v58, %v731_v56 }
  0xe7   :  { %v734_v60 = vpop.f32.mrf.mxu0  ;;  %v773_v34 = vadd.f32 %v772_v59, %v771_v57 }
  0xe8   :  { %v774_v61 = vpop.f32.mrf.mxu1  ;;  %v482_v27 = vadd.f32 %v733_v17, %v654_v19 }
  0xe9   :  { %v735_v62 = vpop.f32.mrf.mxu0 }
  0xea   :  { %v775_v63 = vpop.f32.mrf.mxu1  ;;  %v736_v28 = vadd.f32 %v735_v62, %v734_v60  ;;  %v547_v46 = vadd.f32 %v773_v34, %v482_v27 }
  0xeb   :  { %v737_v0 = vpop.f32.mrf.mxu0  ;;  %v776_v56 = vadd.f32 %v775_v63, %v774_v61 }
  0xec   :  { %v777_v1 = vpop.f32.mrf.mxu1  ;;  %v485_v43 = vadd.f32 %v736_v28, %v654_v19 }
  0xed   :  { %v738_v2 = vpop.f32.mrf.mxu0 }
  0xee   :  { %v778_v3 = vpop.f32.mrf.mxu1  ;;  %v739_v15 = vadd.f32 %v738_v2, %v737_v0  ;;  %v550_v2 = vadd.f32 %v776_v56, %v485_v43 }
  0xef   :  { %v740_v4 = vpop.f32.mrf.mxu0  ;;  %v779_v30 = vadd.f32 %v778_v3, %v777_v1 }
  0xf0   :  { %v780_v5 = vpop.f32.mrf.mxu1  ;;  %v490_v23 = vadd.f32 %v739_v15, %v654_v19 }
  0xf1   :  { %v741_v6 = vpop.f32.mrf.mxu0 }
  0xf2   :  { %v781_v7 = vpop.f32.mrf.mxu1  ;;  %v742_v24 = vadd.f32 %v741_v6, %v740_v4  ;;  %v555_v41 = vadd.f32 %v779_v30, %v490_v23 }
  0xf3   :  { %v743_v8 = vpop.f32.mrf.mxu0  ;;  %v782_v47 = vadd.f32 %v781_v7, %v780_v5 }
  0xf4   :  { %v783_v9 = vpop.f32.mrf.mxu1  ;;  %v493_v38 = vadd.f32 %v742_v24, %v654_v19 }
  0xf5   :  { %v744_v10 = vpop.f32.mrf.mxu0 }
  0xf6   :  { %v784_v11 = vpop.f32.mrf.mxu1  ;;  %v745_v21 = vadd.f32 %v744_v10, %v743_v8  ;;  %v558_v59 = vadd.f32 %v782_v47, %v493_v38 }
  0xf7   :  { %v746_v12 = vpop.f32.mrf.mxu0  ;;  %v785_v44 = vadd.f32 %v784_v11, %v783_v9 }
  0xf8   :  { %v786_v13 = vpop.f32.mrf.mxu1  ;;  %v498_v35 = vadd.f32 %v745_v21, %v654_v19 }
  0xf9   :  { %v747_v14 = vpop.f32.mrf.mxu0 }
  0xfa   :  { %v787_v16 = vpop.f32.mrf.mxu1  ;;  %v748_v36 = vadd.f32 %v747_v14, %v746_v12  ;;  %v563_v55 = vadd.f32 %v785_v44, %v498_v35 }
  0xfb   :  { %v749_v18 = vpop.f32.mrf.mxu0  ;;  %v788_v62 = vadd.f32 %v787_v16, %v786_v13 }
  0xfc   :  { %v789_v20 = vpop.f32.mrf.mxu1  ;;  %v501_v52 = vadd.f32 %v748_v36, %v654_v19 }
  0xfd   :  { %v750_v22 = vpop.f32.mrf.mxu0 }
  0xfe   :  { %v751_v25 = vadd.f32 %v750_v22, %v749_v18  ;;  %v790_v26 = vpop.f32.mrf.mxu1  ;;  %v566_v5 = vadd.f32 %v788_v62, %v501_v52 }
  0xff   :  { %v752_v29 = vpop.f32.mrf.mxu0  ;;  %v791_v32 = vadd.f32 %v790_v26, %v789_v20 }
 0x100   :  { %v506_v31 = vadd.f32 %v751_v25, %v654_v19  ;;  %v792_v33 = vpop.f32.mrf.mxu1 }
 0x101   :  { %v753_v37 = vpop.f32.mrf.mxu0 }
 0x102   :  { %v754_v39 = vadd.f32 %v753_v37, %v752_v29  ;;  %v793_v40 = vpop.f32.mrf.mxu1  ;;  %v571_v42 = vadd.f32 %v791_v32, %v506_v31 }
 0x103   :  { %v813_v45 = vpop.f32.mrf.mxu0  ;;  %v794_v49 = vadd.f32 %v793_v40, %v792_v33 }
 0x104   :  { %v509_v48 = vadd.f32 %v754_v39, %v654_v19  ;;  %v620_v50 = vadd.f32 %v813_v45, %v555_v41  ;;  %v817_v51 = vpop.f32.mrf.mxu1 }
 0x105   :  { %v636_v53 = vadd.f32 %v817_v51, %v571_v42  ;;  %v611_v54 = vpop.f32.mrf.mxu0 }
 0x106   :  { %644 = vst [vmem:[%s1109_s3 + $0x10] sm:$0xff] %v620_v50  ;;  %v612_v57 = vadd.f32 %v611_v54, %v547_v46  ;;  %v627_v58 = vpop.f32.mrf.mxu1  ;;  %v574_v60 = vadd.f32 %v794_v49, %v509_v48 }
 0x107   :  { %648 = vst [vmem:[%s1109_s3 + $0x30] sm:$0xff] %v636_v53  ;;  %v628_v0 = vadd.f32 %v627_v58, %v563_v55  ;;  %v814_v1 = vpop.f32.mrf.mxu0 }
 0x108   :  { %642 = vst [vmem:[%s1109_s3] sm:$0xff] %v612_v57  ;;  %v623_v61 = vadd.f32 %v814_v1, %v558_v59  ;;  %v818_v63 = vpop.f32.mrf.mxu1 }
 0x109   :  { %646 = vst [vmem:[%s1109_s3 + $0x20] sm:$0xff] %v628_v0  ;;  %v639_v3 = vadd.f32 %v818_v63, %v574_v60  ;;  %v614_v4 = vpop.f32.mrf.mxu0 }
 0x10a   :  { %645 = vst [vmem:[%s1109_s3 + $0x18] sm:$0xff] %v623_v61  ;;  %v615_v6 = vadd.f32 %v614_v4, %v550_v2  ;;  %v630_v7 = vpop.f32.mrf.mxu1 }
 0x10b   :  { %649 = vst [vmem:[%s1109_s3 + $0x38] sm:$0xff] %v639_v3  ;;  %v631_v8 = vadd.f32 %v630_v7, %v566_v5 }
 0x10c   :  { %643 = vst [vmem:[%s1109_s3 + $0x8] sm:$0xff] %v615_v6 }
 0x10d   :  { %647 = vst [vmem:[%s1109_s3 + $0x28] sm:$0xff] %v631_v8 }

// kernel: _net_forward_impl.231
= control target key start
LH: loop header
LB: loop body
LE: loop exit
PB: predicated region body
PF: predicated region fallthrough
CT: control target
= control target key end

     0   :  { %s1700_s1 = inlined_call_operand.vmem [shape: bf16[1024,128], index: 1, kind: input, shape index: {}]   ;;  %s1701_s0 = inlined_call_operand.vmem [shape: bf16[64,1024], index: 0, kind: input, shape index: {}]   ;;  %s1702_s2 = inlined_call_operand.vmem [shape: f32[1,128], index: 2, kind: input, shape index: {}]   ;;  %s1703_s3 = inlined_call_operand.vmem [shape: f32[64,128], index: 3, kind: output, shape index: {}]  }
   0x1   :  { %v1255_v0 = vld [vmem:[%s1700_s1 + $0x78] sm:$0xff]   ;;  %v1259_v4 = vld [vmem:[%s1700_s1 + $0x70] sm:$0xff]   ;;  %v1263_v8 = vld [vmem:[%s1700_s1 + $0x68] sm:$0xff]  }
   0x2   :  { %v1256_v1 = vld [vmem:[%s1700_s1 + $0xf8] sm:$0xff]   ;;  %1095 = vmatprep.subr.bf16.mxu0 %v1255_v0  ;;  %v1260_v5 = vld [vmem:[%s1700_s1 + $0xf0] sm:$0xff]   ;;  %v1264_v9 = vld [vmem:[%s1700_s1 + $0xe8] sm:$0xff]  }
   0x3   :  { %v1257_v2 = vld [vmem:[%s1700_s1 + $0x38] sm:$0xff]   ;;  %1135 = vmatprep.subr.bf16.mxu1 %v1256_v1  ;;  %v1261_v6 = vld [vmem:[%s1700_s1 + $0x30] sm:$0xff]   ;;  %v1265_v10 = vld [vmem:[%s1700_s1 + $0x28] sm:$0xff]  }
   0x4   :  { %v1258_v3 = vld [vmem:[%s1700_s1 + $0xb8] sm:$0xff]   ;;  %1096 = vmatpush3.bf16.msra.mxu0 %v1257_v2  ;;  %v1262_v7 = vld [vmem:[%s1700_s1 + $0xb0] sm:$0xff]   ;;  %v1266_v11 = vld [vmem:[%s1700_s1 + $0xa8] sm:$0xff]  }
   0x5   :  { %1136 = vmatpush3.bf16.msra.mxu1 %v1258_v3  ;;  %1097 = vmatprep.subr.bf16.mxu0 %v1259_v4  ;;  %v1267_v12 = vld [vmem:[%s1700_s1 + $0x60] sm:$0xff]   ;;  %v1271_v16 = vld [vmem:[%s1700_s1 + $0x58] sm:$0xff]   ;;  %v1275_v20 = vld [vmem:[%s1700_s1 + $0x50] sm:$0xff]  }
   0x6   :  { %1137 = vmatprep.subr.bf16.mxu1 %v1260_v5  ;;  %v1268_v13 = vld [vmem:[%s1700_s1 + $0xe0] sm:$0xff]   ;;  %v1272_v17 = vld [vmem:[%s1700_s1 + $0xd8] sm:$0xff]   ;;  %v1276_v21 = vld [vmem:[%s1700_s1 + $0xd0] sm:$0xff]  }
   0x7   :  { %v1269_v14 = vld [vmem:[%s1700_s1 + $0x20] sm:$0xff]   ;;  %v1273_v18 = vld [vmem:[%s1700_s1 + $0x18] sm:$0xff]   ;;  %v1277_v22 = vld [vmem:[%s1700_s1 + $0x10] sm:$0xff]  }
   0x8   :  { %1098 = vmatpush3.bf16.msra.mxu0 %v1261_v6  ;;  %v1270_v15 = vld [vmem:[%s1700_s1 + $0xa0] sm:$0xff]   ;;  %v1274_v19 = vld [vmem:[%s1700_s1 + $0x98] sm:$0xff]   ;;  %v1278_v23 = vld [vmem:[%s1700_s1 + $0x90] sm:$0xff]  }
   0x9   :  { %1138 = vmatpush3.bf16.msra.mxu1 %v1262_v7  ;;  %1099 = vmatprep.subr.bf16.mxu0 %v1263_v8  ;;  %v1279_v24 = vld [vmem:[%s1700_s1 + $0x48] sm:$0xff]   ;;  %v1283_v28 = vld [vmem:[%s1700_s1 + $0x40] sm:$0xff]   ;;  %v1287_v40 = vld [vmem:[%s1700_s1 + $0x178] sm:$0xff]  }
   0xa   :  { %1139 = vmatprep.subr.bf16.mxu1 %v1264_v9  ;;  %v1280_v25 = vld [vmem:[%s1700_s1 + $0xc8] sm:$0xff]   ;;  %v1284_v29 = vld [vmem:[%s1700_s1 + $0xc0] sm:$0xff]   ;;  %v1288_v41 = vld [vmem:[%s1700_s1 + $0x1f8] sm:$0xff]  }
   0xb   :  { %v1281_v26 = vld [vmem:[%s1700_s1 + $0x8] sm:$0xff]   ;;  %v1285_v30 = vld [vmem:[%s1700_s1] sm:$0xff]   ;;  %v1289_v42 = vld [vmem:[%s1700_s1 + $0x138] sm:$0xff]  }
   0xc   :  { %1100 = vmatpush3.bf16.msra.mxu0 %v1265_v10  ;;  %v1282_v27 = vld [vmem:[%s1700_s1 + $0x88] sm:$0xff]   ;;  %v1286_v31 = vld [vmem:[%s1700_s1 + $0x80] sm:$0xff]   ;;  %v1290_v43 = vld [vmem:[%s1700_s1 + $0x1b8] sm:$0xff]  }
   0xd   :  { %1140 = vmatpush3.bf16.msra.mxu1 %v1266_v11  ;;  %1101 = vmatprep.subr.bf16.mxu0 %v1267_v12  ;;  %v15_v32 = vld [vmem:[%s1701_s0] sm:$0xff]  ;;  %v16_v34 = vld [vmem:[%s1701_s0 + $0x8] sm:$0xff]  ;;  %v1291_v44 = vld [vmem:[%s1700_s1 + $0x170] sm:$0xff]  }
   0xe   :  { %1141 = vmatprep.subr.bf16.mxu1 %v1268_v13  ;;  %v19_v33 = vld [vmem:[%s1701_s0 + $0x20] sm:$0xff]  ;;  %v20_v37 = vld [vmem:[%s1701_s0 + $0x28] sm:$0xff]  ;;  %v1292_v45 = vld [vmem:[%s1700_s1 + $0x1f0] sm:$0xff]  }
   0xf   :  { %v999_v35 = vcombine.low %v15_v32, %v19_v33  ;;  %v1000_v36 = vcombine.high %v15_v32, %v19_v33  ;;  %v1001_v38 = vcombine.low %v16_v34, %v20_v37  ;;  %v1002_v39 = vcombine.high %v16_v34, %v20_v37  ;;  %v1293_v46 = vld [vmem:[%s1700_s1 + $0x130] sm:$0xff]   ;;  %v23_v48 = vld [vmem:[%s1701_s0 + $0x40] sm:$0xff]  ;;  %v24_v51 = vld [vmem:[%s1701_s0 + $0x48] sm:$0xff] }
  0x10   :  { %1102 = vmatpush3.bf16.msra.mxu0 %v1269_v14  ;;  %v1294_v47 = vld [vmem:[%s1700_s1 + $0x1b0] sm:$0xff]   ;;  %v27_v49 = vld [vmem:[%s1701_s0 + $0x60] sm:$0xff]  ;;  %v28_v52 = vld [vmem:[%s1701_s0 + $0x68] sm:$0xff] }
  0x11   :  { %1142 = vmatpush3.bf16.msra.mxu1 %v1270_v15  ;;  %1103 = vmatprep.subr.bf16.mxu0 %v1271_v16  ;;  %v1008_v50 = vcombine.high %v23_v48, %v27_v49  ;;  %v1007_v53 = vcombine.low %v23_v48, %v27_v49  ;;  %v1010_v54 = vcombine.high %v24_v51, %v28_v52  ;;  %v1295_v56 = vld [vmem:[%s1700_s1 + $0x168] sm:$0xff]   ;;  %v1299_v60 = vld [vmem:[%s1700_s1 + $0x160] sm:$0xff]   ;;  %v1303_v8 = vld [vmem:[%s1700_s1 + $0x158] sm:$0xff]  }
  0x12   :  { %1143 = vmatprep.subr.bf16.mxu1 %v1272_v17  ;;  %758 = vmatprep.mubr.bf16.mxu0 %v1000_v36  ;;  %v1009_v55 = vcombine.low %v24_v51, %v28_v52  ;;  %v1296_v57 = vld [vmem:[%s1700_s1 + $0x1e8] sm:$0xff]   ;;  %v1300_v61 = vld [vmem:[%s1700_s1 + $0x1e0] sm:$0xff]   ;;  %v1304_v9 = vld [vmem:[%s1700_s1 + $0x1d8] sm:$0xff]  }
  0x13   :  { %823 = vmatprep.mubr.bf16.mxu1 %v1002_v39  ;;  %v1297_v58 = vld [vmem:[%s1700_s1 + $0x128] sm:$0xff]   ;;  %v1301_v62 = vld [vmem:[%s1700_s1 + $0x120] sm:$0xff]   ;;  %v1305_v10 = vld [vmem:[%s1700_s1 + $0x118] sm:$0xff]  }
  0x14   :  { %1104 = vmatpush3.bf16.msra.mxu0 %v1273_v18  ;;  %v1298_v59 = vld [vmem:[%s1700_s1 + $0x1a8] sm:$0xff]   ;;  %v1302_v63 = vld [vmem:[%s1700_s1 + $0x1a0] sm:$0xff]   ;;  %v1306_v11 = vld [vmem:[%s1700_s1 + $0x198] sm:$0xff]  }
  0x15   :  { %1144 = vmatpush3.bf16.msra.mxu1 %v1274_v19  ;;  %1105 = vmatprep.subr.bf16.mxu0 %v1275_v20  ;;  %v31_v0 = vld [vmem:[%s1701_s0 + $0x80] sm:$0xff]  ;;  %v32_v2 = vld [vmem:[%s1701_s0 + $0x88] sm:$0xff]  ;;  %v1307_v12 = vld [vmem:[%s1700_s1 + $0x150] sm:$0xff]  }
  0x16   :  { %1145 = vmatprep.subr.bf16.mxu1 %v1276_v21  ;;  %v35_v1 = vld [vmem:[%s1701_s0 + $0xa0] sm:$0xff]  ;;  %v36_v3 = vld [vmem:[%s1701_s0 + $0xa8] sm:$0xff]  ;;  %v1308_v13 = vld [vmem:[%s1700_s1 + $0x1d0] sm:$0xff]  }
  0x17   :  { %v1016_v4 = vcombine.high %v31_v0, %v35_v1  ;;  %v1018_v5 = vcombine.high %v32_v2, %v36_v3  ;;  %v1015_v6 = vcombine.low %v31_v0, %v35_v1  ;;  %v1017_v7 = vcombine.low %v32_v2, %v36_v3  ;;  %v1309_v14 = vld [vmem:[%s1700_s1 + $0x110] sm:$0xff]   ;;  %v39_v16 = vld [vmem:[%s1701_s0 + $0xc0] sm:$0xff]  ;;  %v40_v18 = vld [vmem:[%s1701_s0 + $0xc8] sm:$0xff] }
  0x18   :  { %1106 = vmatpush3.bf16.msra.mxu0 %v1277_v22  ;;  %v1310_v15 = vld [vmem:[%s1700_s1 + $0x190] sm:$0xff]   ;;  %v43_v17 = vld [vmem:[%s1701_s0 + $0xe0] sm:$0xff]  ;;  %v44_v20 = vld [vmem:[%s1701_s0 + $0xe8] sm:$0xff] }
  0x19   :  { %1146 = vmatpush3.bf16.msra.mxu1 %v1278_v23  ;;  %1107 = vmatprep.subr.bf16.mxu0 %v1279_v24  ;;  %v1024_v19 = vcombine.high %v39_v16, %v43_v17  ;;  %v1023_v21 = vcombine.low %v39_v16, %v43_v17  ;;  %v1026_v22 = vcombine.high %v40_v18, %v44_v20  ;;  %v1311_v24 = vld [vmem:[%s1700_s1 + $0x148] sm:$0xff]   ;;  %v17_v32 = vld [vmem:[%s1701_s0 + $0x10] sm:$0xff]  ;;  %v18_v36 = vld [vmem:[%s1701_s0 + $0x18] sm:$0xff] }
  0x1a   :  { %1147 = vmatprep.subr.bf16.mxu1 %v1280_v25  ;;  %v1025_v23 = vcombine.low %v40_v18, %v44_v20  ;;  %v1312_v25 = vld [vmem:[%s1700_s1 + $0x1c8] sm:$0xff]   ;;  %v21_v33 = vld [vmem:[%s1701_s0 + $0x30] sm:$0xff]  ;;  %v22_v37 = vld [vmem:[%s1701_s0 + $0x38] sm:$0xff] }
  0x1b   :  { %v1003_v34 = vcombine.low %v17_v32, %v21_v33  ;;  %v1005_v39 = vcombine.low %v18_v36, %v22_v37  ;;  %v34_v48 = vld [vmem:[%s1701_s0 + $0x98] sm:$0xff] }
  0x1c   :  { %1108 = vmatpush3.bf16.msra.mxu0 %v1281_v26  ;;  %v1313_v26 = vld [vmem:[%s1700_s1 + $0x108] sm:$0xff]   ;;  %v38_v49 = vld [vmem:[%s1701_s0 + $0xb8] sm:$0xff] }
  0x1d   :  { %1148 = vmatpush3.bf16.msra.mxu1 %v1282_v27  ;;  %1109 = vmatprep.subr.bf16.mxu0 %v1283_v28  ;;  %v1314_v27 = vld [vmem:[%s1700_s1 + $0x188] sm:$0xff]   ;;  %v1315_v28 = vld [vmem:[%s1700_s1 + $0x140] sm:$0xff]  }
  0x1e   :  { %1149 = vmatprep.subr.bf16.mxu1 %v1284_v29  ;;  %v1316_v29 = vld [vmem:[%s1700_s1 + $0x1c0] sm:$0xff]  }
  0x20   :  { %1110 = vmatpush3.bf16.msra.mxu0 %v1285_v30  ;;  %v1317_v30 = vld [vmem:[%s1700_s1 + $0x100] sm:$0xff]  }
  0x21   :  { %1150 = vmatpush3.bf16.msra.mxu1 %v1286_v31  ;;  %1175 = vmatprep.subr.bf16.mxu0 %v1287_v40  ;;  %v1318_v31 = vld [vmem:[%s1700_s1 + $0x180] sm:$0xff]   ;;  %v1006_v40 = vcombine.high %v18_v36, %v22_v37 }
  0x22   :  { %1215 = vmatprep.subr.bf16.mxu1 %v1288_v41  ;;  %v29_v41 = vld [vmem:[%s1701_s0 + $0x70] sm:$0xff] }
  0x23   :  { %759 = vmatmul.mubr.bf16.vlgmr.msra.gmra.mxu0 %v999_v35  ;;  %v1004_v35 = vcombine.high %v17_v32, %v21_v33 }
  0x24   :  { %824 = vmatmul.mubr.bf16.vlgmr.msra.gmra.mxu1 %v1001_v38  ;;  %1176 = vmatpush3.bf16.msra.mxu0 %v1289_v42  ;;  %v25_v38 = vld [vmem:[%s1701_s0 + $0x50] sm:$0xff]  ;;  %v26_v42 = vld [vmem:[%s1701_s0 + $0x58] sm:$0xff] }
  0x25   :  { %1216 = vmatpush3.bf16.msra.mxu1 %v1290_v43  ;;  %1177 = vmatprep.subr.bf16.mxu0 %v1291_v44  ;;  %v30_v43 = vld [vmem:[%s1701_s0 + $0x78] sm:$0xff]  ;;  %v1012_v44 = vcombine.high %v25_v38, %v29_v41 }
  0x26   :  { %1217 = vmatprep.subr.bf16.mxu1 %v1292_v45  ;;  %766 = vmatprep.mubr.bf16.mxu0 %v1008_v50  ;;  %v1014_v45 = vcombine.high %v26_v42, %v30_v43  ;;  %v1011_v50 = vcombine.low %v25_v38, %v29_v41  ;;  %v1013_v51 = vcombine.low %v26_v42, %v30_v43 }
  0x27   :  { %831 = vmatprep.mubr.bf16.mxu1 %v1010_v54  ;;  %v41_v54 = vld [vmem:[%s1701_s0 + $0xd0] sm:$0xff] }
  0x28   :  { %1178 = vmatpush3.bf16.msra.mxu0 %v1293_v46  ;;  %v33_v46 = vld [vmem:[%s1701_s0 + $0x90] sm:$0xff] }
  0x29   :  { %1218 = vmatpush3.bf16.msra.mxu1 %v1294_v47  ;;  %1179 = vmatprep.subr.bf16.mxu0 %v1295_v56  ;;  %v37_v47 = vld [vmem:[%s1701_s0 + $0xb0] sm:$0xff]  ;;  %v42_v56 = vld [vmem:[%s1701_s0 + $0xd8] sm:$0xff] }
  0x2a   :  { %1219 = vmatprep.subr.bf16.mxu1 %v1296_v57  ;;  %v1020_v52 = vcombine.high %v33_v46, %v37_v47  ;;  %v46_v57 = vld [vmem:[%s1701_s0 + $0xf8] sm:$0xff] }
  0x2b   :  { %767 = vmatmul.mubr.bf16.gmra.mxu0 %v1007_v53  ;;  %v1022_v53 = vcombine.high %v34_v48, %v38_v49 }
  0x2c   :  { %832 = vmatmul.mubr.bf16.gmra.mxu1 %v1009_v55  ;;  %1180 = vmatpush3.bf16.msra.mxu0 %v1297_v58  ;;  %v45_v55 = vld [vmem:[%s1701_s0 + $0xf0] sm:$0xff]  ;;  %v1019_v58 = vcombine.low %v33_v46, %v37_v47 }
  0x2d   :  { %1220 = vmatpush3.bf16.msra.mxu1 %v1298_v59  ;;  %1181 = vmatprep.subr.bf16.mxu0 %v1299_v60  ;;  %v1021_v59 = vcombine.low %v34_v48, %v38_v49  ;;  %v1028_v60 = vcombine.high %v41_v54, %v45_v55 }
  0x2e   :  { %1221 = vmatprep.subr.bf16.mxu1 %v1300_v61  ;;  %774 = vmatprep.mubr.bf16.mxu0 %v1016_v4  ;;  %v1030_v61 = vcombine.high %v42_v56, %v46_v57 }
  0x2f   :  { %839 = vmatprep.mubr.bf16.mxu1 %v1018_v5 }
  0x30   :  { %1182 = vmatpush3.bf16.msra.mxu0 %v1301_v62  ;;  %v1027_v62 = vcombine.low %v41_v54, %v45_v55 }
  0x31   :  { %1222 = vmatpush3.bf16.msra.mxu1 %v1302_v63  ;;  %1183 = vmatprep.subr.bf16.mxu0 %v1303_v8  ;;  %v1029_v63 = vcombine.low %v42_v56, %v46_v57 }
  0x32   :  { %1223 = vmatprep.subr.bf16.mxu1 %v1304_v9 }
  0x33   :  { %775 = vmatmul.mubr.bf16.gmra.mxu0 %v1015_v6 }
  0x34   :  { %840 = vmatmul.mubr.bf16.gmra.mxu1 %v1017_v7  ;;  %1184 = vmatpush3.bf16.msra.mxu0 %v1305_v10 }
  0x35   :  { %1224 = vmatpush3.bf16.msra.mxu1 %v1306_v11  ;;  %1185 = vmatprep.subr.bf16.mxu0 %v1307_v12 }
  0x36   :  { %1225 = vmatprep.subr.bf16.mxu1 %v1308_v13  ;;  %782 = vmatprep.mubr.bf16.mxu0 %v1024_v19 }
  0x37   :  { %847 = vmatprep.mubr.bf16.mxu1 %v1026_v22 }
  0x38   :  { %1186 = vmatpush3.bf16.msra.mxu0 %v1309_v14 }
  0x39   :  { %1226 = vmatpush3.bf16.msra.mxu1 %v1310_v15  ;;  %1187 = vmatprep.subr.bf16.mxu0 %v1311_v24 }
  0x3a   :  { %1227 = vmatprep.subr.bf16.mxu1 %v1312_v25 }
  0x3b   :  { %783 = vmatmul.mubr.bf16.gmra.mxu0 %v1023_v21 }
  0x3c   :  { %848 = vmatmul.mubr.bf16.gmra.mxu1 %v1025_v23  ;;  %1188 = vmatpush3.bf16.msra.mxu0 %v1313_v26 }
  0x3d   :  { %1228 = vmatpush3.bf16.msra.mxu1 %v1314_v27  ;;  %1189 = vmatprep.subr.bf16.mxu0 %v1315_v28 }
  0x3e   :  { %1229 = vmatprep.subr.bf16.mxu1 %v1316_v29  ;;  %888 = vmatprep.mubr.bf16.mxu0 %v1004_v35 }
  0x3f   :  { %953 = vmatprep.mubr.bf16.mxu1 %v1006_v40 }
  0x40   :  { %1190 = vmatpush3.bf16.msra.mxu0 %v1317_v30  ;;  %v1648_v30 = vld [vmem:[%s1702_s2] ss:$0 sm:$0xff] }
  0x41   :  { %1230 = vmatpush3.bf16.msra.mxu1 %v1318_v31 }
  0x43   :  { %889 = vmatmul.mubr.bf16.vlgmr.msra.gmra.mxu0 %v1003_v34 }
  0x44   :  { %954 = vmatmul.mubr.bf16.vlgmr.msra.gmra.mxu1 %v1005_v39  ;;  %896 = vmatprep.mubr.bf16.mxu0 %v1012_v44 }
  0x45   :  { %961 = vmatprep.mubr.bf16.mxu1 %v1014_v45 }
  0x4b   :  { %897 = vmatmul.mubr.bf16.gmra.mxu0 %v1011_v50 }
  0x4c   :  { %962 = vmatmul.mubr.bf16.gmra.mxu1 %v1013_v51  ;;  %904 = vmatprep.mubr.bf16.mxu0 %v1020_v52 }
  0x4d   :  { %969 = vmatprep.mubr.bf16.mxu1 %v1022_v53 }
  0x53   :  { %905 = vmatmul.mubr.bf16.gmra.mxu0 %v1019_v58 }
  0x54   :  { %970 = vmatmul.mubr.bf16.gmra.mxu1 %v1021_v59  ;;  %912 = vmatprep.mubr.bf16.mxu0 %v1028_v60 }
  0x55   :  { %977 = vmatprep.mubr.bf16.mxu1 %v1030_v61 }
  0x5b   :  { %913 = vmatmul.mubr.bf16.gmra.mxu0 %v1027_v62 }
  0x5c   :  { %978 = vmatmul.mubr.bf16.gmra.mxu1 %v1029_v63 }
  0xe3   :  { %v1111_v0 = vpop.f32.mrf.mxu0 }
  0xe4   :  { %v1151_v1 = vpop.f32.mrf.mxu1 }
  0xe5   :  { %v1112_v2 = vpop.f32.mrf.mxu0 }
  0xe6   :  { %v1152_v3 = vpop.f32.mrf.mxu1  ;;  %v1113_v28 = vadd.f32 %v1112_v2, %v1111_v0 }
  0xe7   :  { %v1114_v4 = vpop.f32.mrf.mxu0  ;;  %v1153_v37 = vadd.f32 %v1152_v3, %v1151_v1 }
  0xe8   :  { %v1154_v5 = vpop.f32.mrf.mxu1  ;;  %v761_v34 = vadd.f32 %v1113_v28, %v1648_v30 }
  0xe9   :  { %v1115_v6 = vpop.f32.mrf.mxu0 }
  0xea   :  { %v1155_v7 = vpop.f32.mrf.mxu1  ;;  %v1116_v35 = vadd.f32 %v1115_v6, %v1114_v4  ;;  %v826_v41 = vadd.f32 %v1153_v37, %v761_v34 }
  0xeb   :  { %v1117_v8 = vpop.f32.mrf.mxu0  ;;  %v1156_v46 = vadd.f32 %v1155_v7, %v1154_v5 }
  0xec   :  { %v1157_v9 = vpop.f32.mrf.mxu1  ;;  %v764_v42 = vadd.f32 %v1116_v35, %v1648_v30 }
  0xed   :  { %v1118_v10 = vpop.f32.mrf.mxu0 }
  0xee   :  { %v1158_v11 = vpop.f32.mrf.mxu1  ;;  %v1119_v39 = vadd.f32 %v1118_v10, %v1117_v8  ;;  %v829_v52 = vadd.f32 %v1156_v46, %v764_v42 }
  0xef   :  { %v1120_v12 = vpop.f32.mrf.mxu0  ;;  %v1159_v57 = vadd.f32 %v1158_v11, %v1157_v9 }
  0xf0   :  { %v1160_v13 = vpop.f32.mrf.mxu1  ;;  %v769_v50 = vadd.f32 %v1119_v39, %v1648_v30 }
  0xf1   :  { %v1121_v14 = vpop.f32.mrf.mxu0 }
  0xf2   :  { %v1161_v15 = vpop.f32.mrf.mxu1  ;;  %v1122_v53 = vadd.f32 %v1121_v14, %v1120_v12  ;;  %v834_v62 = vadd.f32 %v1159_v57, %v769_v50 }
  0xf3   :  { %v1123_v16 = vpop.f32.mrf.mxu0  ;;  %v1162_v6 = vadd.f32 %v1161_v15, %v1160_v13 }
  0xf4   :  { %v1627_v17 = vpop.f32.mrf.mxu1  ;;  %v772_v0 = vadd.f32 %v1122_v53, %v1648_v30 }
  0xf5   :  { %v1124_v18 = vpop.f32.mrf.mxu0 }
  0xf6   :  { %v1629_v19 = vpop.f32.mrf.mxu1  ;;  %v1125_v1 = vadd.f32 %v1124_v18, %v1123_v16  ;;  %v837_v12 = vadd.f32 %v1162_v6, %v772_v0 }
  0xf7   :  { %v1126_v20 = vpop.f32.mrf.mxu0  ;;  %v1165_v35 = vadd.f32 %v1629_v19, %v1627_v17 }
  0xf8   :  { %v1631_v21 = vpop.f32.mrf.mxu1  ;;  %v777_v14 = vadd.f32 %v1125_v1, %v1648_v30 }
  0xf9   :  { %v1127_v22 = vpop.f32.mrf.mxu0 }
  0xfa   :  { %v1633_v23 = vpop.f32.mrf.mxu1  ;;  %v1128_v10 = vadd.f32 %v1127_v22, %v1126_v20  ;;  %v842_v37 = vadd.f32 %v1165_v35, %v777_v14 }
  0xfb   :  { %v1635_v24 = vpop.f32.mrf.mxu0  ;;  %v1168_v17 = vadd.f32 %v1633_v23, %v1631_v21 }
  0xfc   :  { %v1637_v25 = vpop.f32.mrf.mxu1  ;;  %v780_v20 = vadd.f32 %v1128_v10, %v1648_v30 }
  0xfd   :  { %v1639_v26 = vpop.f32.mrf.mxu0 }
  0xfe   :  { %v1641_v27 = vpop.f32.mrf.mxu1 }
  0xff   :  { %v1643_v29 = vpop.f32.mrf.mxu0  ;;  %v1171_v21 = vadd.f32 %v1641_v27, %v1637_v25 }
 0x100   :  { %v1650_v31 = vpop.f32.mrf.mxu1 }
 0x101   :  { %v1652_v32 = vpop.f32.mrf.mxu0 }
 0x102   :  { %v1654_v33 = vpop.f32.mrf.mxu1 }
 0x103   :  { %v1191_v36 = vpop.f32.mrf.mxu0 }
 0x104   :  { %v1231_v38 = vpop.f32.mrf.mxu1 }
 0x105   :  { %v1192_v40 = vpop.f32.mrf.mxu0 }
 0x106   :  { %v1193_v43 = vadd.f32 %v1192_v40, %v1191_v36  ;;  %v1232_v44 = vpop.f32.mrf.mxu1 }
 0x107   :  { %v1194_v45 = vpop.f32.mrf.mxu0  ;;  %v1233_v48 = vadd.f32 %v1232_v44, %v1231_v38  ;;  %v1131_v38 = vadd.f32 %v1639_v26, %v1635_v24  ;;  %v1134_v24 = vadd.f32 %v1652_v32, %v1643_v29 }
 0x108   :  { %v891_v47 = vadd.f32 %v1193_v43, %v826_v41  ;;  %v1234_v49 = vpop.f32.mrf.mxu1 }
 0x109   :  { %v1195_v51 = vpop.f32.mrf.mxu0 }
 0x10a   :  { %v956_v54 = vadd.f32 %v1233_v48, %v891_v47  ;;  %v1196_v55 = vadd.f32 %v1195_v51, %v1194_v45  ;;  %v1235_v56 = vpop.f32.mrf.mxu1  ;;  %v845_v45 = vadd.f32 %v1168_v17, %v780_v20  ;;  %v785_v47 = vadd.f32 %v1131_v38, %v1648_v30 }
 0x10b   :  { %v1197_v58 = vpop.f32.mrf.mxu0  ;;  %v1236_v60 = vadd.f32 %v1235_v56, %v1234_v49 }
 0x10c   :  { %986 = vst [vmem:[%s1703_s3] sm:$0xff] %v956_v54  ;;  %v894_v59 = vadd.f32 %v1196_v55, %v829_v52  ;;  %v1237_v61 = vpop.f32.mrf.mxu1  ;;  %v850_v54 = vadd.f32 %v1171_v21, %v785_v47  ;;  %v788_v55 = vadd.f32 %v1134_v24, %v1648_v30 }
 0x10d   :  { %v1198_v63 = vpop.f32.mrf.mxu0 }
 0x10e   :  { %v959_v2 = vadd.f32 %v1236_v60, %v894_v59  ;;  %v1199_v3 = vadd.f32 %v1198_v63, %v1197_v58  ;;  %v1238_v4 = vpop.f32.mrf.mxu1  ;;  %v1174_v58 = vadd.f32 %v1654_v33, %v1650_v31 }
 0x10f   :  { %v1200_v5 = vpop.f32.mrf.mxu0  ;;  %v1239_v8 = vadd.f32 %v1238_v4, %v1237_v61 }
 0x110   :  { %987 = vst [vmem:[%s1703_s3 + $0x8] sm:$0xff] %v959_v2  ;;  %v899_v7 = vadd.f32 %v1199_v3, %v834_v62  ;;  %v1240_v9 = vpop.f32.mrf.mxu1  ;;  %v853_v61 = vadd.f32 %v1174_v58, %v788_v55 }
 0x111   :  { %v1201_v11 = vpop.f32.mrf.mxu0 }
 0x112   :  { %v964_v28 = vadd.f32 %v1239_v8, %v899_v7  ;;  %v1202_v34 = vadd.f32 %v1201_v11, %v1200_v5  ;;  %v1241_v16 = vpop.f32.mrf.mxu1 }
 0x113   :  { %v1203_v18 = vpop.f32.mrf.mxu0  ;;  %v1242_v15 = vadd.f32 %v1241_v16, %v1240_v9 }
 0x114   :  { %988 = vst [vmem:[%s1703_s3 + $0x10] sm:$0xff] %v964_v28  ;;  %v902_v13 = vadd.f32 %v1202_v34, %v837_v12  ;;  %v1243_v36 = vpop.f32.mrf.mxu1 }
 0x115   :  { %v1204_v22 = vpop.f32.mrf.mxu0 }
 0x116   :  { %v967_v39 = vadd.f32 %v1242_v15, %v902_v13  ;;  %v1205_v40 = vadd.f32 %v1204_v22, %v1203_v18  ;;  %v1244_v41 = vpop.f32.mrf.mxu1 }
 0x117   :  { %v1206_v19 = vpop.f32.mrf.mxu0  ;;  %v1245_v43 = vadd.f32 %v1244_v41, %v1243_v36 }
 0x118   :  { %989 = vst [vmem:[%s1703_s3 + $0x18] sm:$0xff] %v967_v39  ;;  %v907_v42 = vadd.f32 %v1205_v40, %v842_v37  ;;  %v1246_v44 = vpop.f32.mrf.mxu1 }
 0x119   :  { %v1207_v46 = vpop.f32.mrf.mxu0 }
 0x11a   :  { %v972_v26 = vadd.f32 %v1245_v43, %v907_v42  ;;  %v1208_v48 = vadd.f32 %v1207_v46, %v1206_v19  ;;  %v1247_v49 = vpop.f32.mrf.mxu1 }
 0x11b   :  { %v1209_v50 = vpop.f32.mrf.mxu0  ;;  %v1248_v51 = vadd.f32 %v1247_v49, %v1246_v44 }
 0x11c   :  { %990 = vst [vmem:[%s1703_s3 + $0x20] sm:$0xff] %v972_v26  ;;  %v910_v23 = vadd.f32 %v1208_v48, %v845_v45  ;;  %v1249_v52 = vpop.f32.mrf.mxu1 }
 0x11d   :  { %v1210_v53 = vpop.f32.mrf.mxu0 }
 0x11e   :  { %v975_v56 = vadd.f32 %v1248_v51, %v910_v23  ;;  %v1211_v29 = vadd.f32 %v1210_v53, %v1209_v50  ;;  %v1250_v32 = vpop.f32.mrf.mxu1 }
 0x11f   :  { %v1212_v57 = vpop.f32.mrf.mxu0  ;;  %v1251_v27 = vadd.f32 %v1250_v32, %v1249_v52 }
 0x120   :  { %991 = vst [vmem:[%s1703_s3 + $0x28] sm:$0xff] %v975_v56  ;;  %v915_v25 = vadd.f32 %v1211_v29, %v850_v54  ;;  %v1252_v59 = vpop.f32.mrf.mxu1 }
 0x121   :  { %v1213_v60 = vpop.f32.mrf.mxu0 }
 0x122   :  { %v980_v62 = vadd.f32 %v1251_v27, %v915_v25  ;;  %v1214_v63 = vadd.f32 %v1213_v60, %v1212_v57  ;;  %v1253_v0 = vpop.f32.mrf.mxu1 }
 0x123   :  { %v1254_v1 = vadd.f32 %v1253_v0, %v1252_v59 }
 0x124   :  { %992 = vst [vmem:[%s1703_s3 + $0x30] sm:$0xff] %v980_v62  ;;  %v918_v30 = vadd.f32 %v1214_v63, %v853_v61 }
 0x126   :  { %v983_v2 = vadd.f32 %v1254_v1, %v918_v30 }
 0x128   :  { %993 = vst [vmem:[%s1703_s3 + $0x38] sm:$0xff] %v983_v2 }

// kernel: _net_forward_impl.233
= control target key start
LH: loop header
LB: loop body
LE: loop exit
PB: predicated region body
PF: predicated region fallthrough
CT: control target
= control target key end

     0   :  { %vm626_vm0 = vcmask 785408   ;;  %s1573_s1 = inlined_call_operand.vmem [shape: bf16[864,128], index: 1, kind: input, shape index: {}]   ;;  %s1574_s0 = inlined_call_operand.vmem [shape: bf16[64,864], index: 0, kind: input, shape index: {}]   ;;  %s1575_s2 = inlined_call_operand.vmem [shape: f32[1,128], index: 2, kind: input, shape index: {}]   ;;  %s1576_s3 = inlined_call_operand.vmem [shape: f32[64,128], index: 3, kind: output, shape index: {}]  }
   0x1   :  { %v1148_v0 = vld [vmem:[%s1573_s1 + $0x78] sm:$0xff]   ;;  %v1152_v4 = vld [vmem:[%s1573_s1 + $0x70] sm:$0xff]   ;;  %v1156_v8 = vld [vmem:[%s1573_s1 + $0x68] sm:$0xff]  }
   0x2   :  { %v1149_v1 = vld [vmem:[%s1573_s1 + $0x38] sm:$0xff]   ;;  %998 = vmatprep.subr.bf16.mxu0 %v1148_v0  ;;  %v1153_v5 = vld [vmem:[%s1573_s1 + $0x30] sm:$0xff]   ;;  %v1157_v9 = vld [vmem:[%s1573_s1 + $0x28] sm:$0xff]  }
   0x3   :  { %v1150_v2 = vld [vmem:[%s1573_s1 + $0xf8] sm:$0xff]   ;;  %999 = vmatpush3.bf16.msra.mxu0 %v1149_v1  ;;  %v1154_v6 = vld [vmem:[%s1573_s1 + $0xf0] sm:$0xff]   ;;  %v1158_v10 = vld [vmem:[%s1573_s1 + $0xe8] sm:$0xff]  }
   0x4   :  { %v1151_v3 = vld [vmem:[%s1573_s1 + $0xb8] sm:$0xff]   ;;  %1038 = vmatprep.subr.bf16.mxu1 %v1150_v2  ;;  %1000 = vmatprep.subr.bf16.mxu0 %v1152_v4  ;;  %v1155_v7 = vld [vmem:[%s1573_s1 + $0xb0] sm:$0xff]   ;;  %v1159_v11 = vld [vmem:[%s1573_s1 + $0xa8] sm:$0xff]  }
   0x5   :  { %1039 = vmatpush3.bf16.msra.mxu1 %v1151_v3  ;;  %v1160_v12 = vld [vmem:[%s1573_s1 + $0x60] sm:$0xff]   ;;  %v1164_v16 = vld [vmem:[%s1573_s1 + $0x58] sm:$0xff]   ;;  %v1168_v20 = vld [vmem:[%s1573_s1 + $0x50] sm:$0xff]  }
   0x6   :  { %1040 = vmatprep.subr.bf16.mxu1 %v1154_v6  ;;  %v1161_v13 = vld [vmem:[%s1573_s1 + $0x20] sm:$0xff]   ;;  %v1165_v17 = vld [vmem:[%s1573_s1 + $0x18] sm:$0xff]   ;;  %v1169_v21 = vld [vmem:[%s1573_s1 + $0x10] sm:$0xff]  }
   0x7   :  { %1001 = vmatpush3.bf16.msra.mxu0 %v1153_v5  ;;  %v1162_v14 = vld [vmem:[%s1573_s1 + $0xe0] sm:$0xff]   ;;  %v1166_v18 = vld [vmem:[%s1573_s1 + $0xd8] sm:$0xff]   ;;  %v1170_v22 = vld [vmem:[%s1573_s1 + $0xd0] sm:$0xff]  }
   0x8   :  { %1002 = vmatprep.subr.bf16.mxu0 %v1156_v8  ;;  %v1163_v15 = vld [vmem:[%s1573_s1 + $0xa0] sm:$0xff]   ;;  %v1167_v19 = vld [vmem:[%s1573_s1 + $0x98] sm:$0xff]   ;;  %v1171_v23 = vld [vmem:[%s1573_s1 + $0x90] sm:$0xff]  }
   0x9   :  { %1041 = vmatpush3.bf16.msra.mxu1 %v1155_v7  ;;  %v1172_v24 = vld [vmem:[%s1573_s1 + $0x48] sm:$0xff]   ;;  %v1176_v28 = vld [vmem:[%s1573_s1 + $0x40] sm:$0xff]   ;;  %v1183_v34 = vld [vmem:[%s1573_s1 + $0x178] sm:$0xff]  }
   0xa   :  { %1042 = vmatprep.subr.bf16.mxu1 %v1158_v10  ;;  %v1173_v25 = vld [vmem:[%s1573_s1 + $0x8] sm:$0xff]   ;;  %v1177_v29 = vld [vmem:[%s1573_s1] sm:$0xff]   ;;  %v1187_v37 = vld [vmem:[%s1573_s1 + $0x138] sm:$0xff]  }
   0xb   :  { %1003 = vmatpush3.bf16.msra.mxu0 %v1157_v9  ;;  %v1174_v26 = vld [vmem:[%s1573_s1 + $0xc8] sm:$0xff]   ;;  %v1178_v30 = vld [vmem:[%s1573_s1 + $0xc0] sm:$0xff]   ;;  %v1188_v38 = vld [vmem:[%s1573_s1 + $0x170] sm:$0xff]  }
   0xc   :  { %1004 = vmatprep.subr.bf16.mxu0 %v1160_v12  ;;  %v1175_v27 = vld [vmem:[%s1573_s1 + $0x88] sm:$0xff]   ;;  %v1179_v31 = vld [vmem:[%s1574_s0] ss:$28 sps:$4 sm:$0xff]   ;;  %v1189_v39 = vld [vmem:[%s1573_s1 + $0x130] sm:$0xff]  }
   0xd   :  { %1043 = vmatpush3.bf16.msra.mxu1 %v1159_v11  ;;  %v1181_v32 = vld [vmem:[%s1574_s0 + $0x4] ss:$28 sps:$4 sm:$0xff]   ;;  %v1186_v36 = vld [vmem:[%s1574_s0 + $0xc] ss:$28 sps:$4 sm:$0xff]   ;;  %v1190_v40 = vld [vmem:[%s1574_s0 + $0x3c] ss:$28 sps:$4 sm:$0xff]  }
   0xe   :  { %1044 = vmatprep.subr.bf16.mxu1 %v1162_v14  ;;  %v1182_v33 = vld [vmem:[%s1573_s1 + $0x80] sm:$0xff]   ;;  %671 = vmatprep.mubr.bf16.mxu0 %v1181_v32  ;;  %v1192_v41 = vld [vmem:[%s1574_s0 + $0x38] ss:$28 sps:$4 sm:$0xff]   ;;  %v1193_v42 = vld [vmem:[%s1573_s1 + $0x168] sm:$0xff]  }
   0xf   :  { %1005 = vmatpush3.bf16.msra.mxu0 %v1161_v13  ;;  %v1184_v35 = vld [vmem:[%s1574_s0 + $0x8] ss:$28 sps:$4 sm:$0xff]   ;;  %736 = vmatprep.mubr.bf16.mxu1 %v1186_v36  ;;  %v1197_v45 = vld [vmem:[%s1574_s0 + $0x40] ss:$28 sps:$4 sm:$0xff]   ;;  %v1201_v49 = vld [vmem:[%s1574_s0 + $0x74] ss:$28 sps:$4 sm:$0xff]  }
  0x10   :  { %1006 = vmatprep.subr.bf16.mxu0 %v1164_v16  ;;  %v1194_v43 = vld [vmem:[%s1574_s0 + $0x44] ss:$28 sps:$4 sm:$0xff]   ;;  %v1196_v44 = vld [vmem:[%s1573_s1 + $0x128] sm:$0xff]   ;;  %v1204_v51 = vld [vmem:[%s1573_s1 + $0x158] sm:$0xff]  }
  0x11   :  { %1045 = vmatpush3.bf16.msra.mxu1 %v1163_v15  ;;  %v1198_v46 = vld [vmem:[%s1573_s1 + $0x160] sm:$0xff]   ;;  %v1199_v47 = vld [vmem:[%s1573_s1 + $0x1a8] sm:$0xff]   ;;  %v1206_v53 = vld [vmem:[%s1574_s0 + $0x7c] ss:$28 sps:$4 sm:$0xff]  }
  0x12   :  { %1046 = vmatprep.subr.bf16.mxu1 %v1166_v18  ;;  %v1200_v48 = vld [vmem:[%s1573_s1 + $0x120] sm:$0xff]   ;;  %v1203_v50 = vld [vmem:[%s1574_s0 + $0x70] ss:$28 sps:$4 sm:$0xff]   ;;  %v1208_v54 = vld [vmem:[%s1573_s1 + $0x118] sm:$0xff]  }
  0x13   :  { %1007 = vmatpush3.bf16.msra.mxu0 %v1165_v17  ;;  %v1205_v52 = vld [vmem:[%s1573_s1 + $0x1a0] sm:$0xff]   ;;  %v1209_v55 = vld [vmem:[%s1574_s0 + $0x78] ss:$28 sps:$4 sm:$0xff]   ;;  %v1213_v59 = vld [vmem:[%s1574_s0 + $0xac] ss:$28 sps:$4 sm:$0xff]  }
  0x14   :  { %1008 = vmatprep.subr.bf16.mxu0 %v1168_v20  ;;  %v1210_v56 = vld [vmem:[%s1573_s1 + $0x150] sm:$0xff]   ;;  %v1211_v57 = vld [vmem:[%s1573_s1 + $0x198] sm:$0xff]   ;;  %v1215_v60 = vld [vmem:[%s1574_s0 + $0xa8] ss:$28 sps:$4 sm:$0xff]  }
  0x15   :  { %1047 = vmatpush3.bf16.msra.mxu1 %v1167_v19  ;;  %v1212_v58 = vld [vmem:[%s1573_s1 + $0x110] sm:$0xff]   ;;  %v1216_v61 = vld [vmem:[%s1573_s1 + $0x148] sm:$0xff]   ;;  %v1222_v2 = vld [vmem:[%s1573_s1 + $0x140] sm:$0xff]  }
  0x16   :  { %1048 = vmatprep.subr.bf16.mxu1 %v1170_v22  ;;  %v1217_v62 = vld [vmem:[%s1573_s1 + $0x190] sm:$0xff]   ;;  %v1220_v0 = vld [vmem:[%s1573_s1 + $0x108] sm:$0xff]   ;;  %v1224_v4 = vld [vmem:[%s1573_s1 + $0x100] sm:$0xff]  }
  0x17   :  { %1009 = vmatpush3.bf16.msra.mxu0 %v1169_v21  ;;  %v1218_v63 = vld [vmem:[%s1574_s0 + $0xb4] ss:$28 sps:$4 sm:$0xff]   ;;  %v1223_v3 = vld [vmem:[%s1573_s1 + $0x188] sm:$0xff]   ;;  %v1228_v7 = vld [vmem:[%s1573_s1 + $0x180] sm:$0xff]  }
  0x18   :  { %1010 = vmatprep.subr.bf16.mxu0 %v1172_v24  ;;  %v1221_v1 = vld [vmem:[%s1574_s0 + $0xb0] ss:$28 sps:$4 sm:$0xff]   ;;  %v1229_v8 = vld [vmem:[%s1574_s0 + $0x18] ss:$28 sps:$4 sm:$0xff]   ;;  %v1237_v11 = vld [vmem:[%s1574_s0 + $0x88] ss:$28 sps:$4 sm:$0xff]  }
  0x19   :  { %1049 = vmatpush3.bf16.msra.mxu1 %v1171_v23  ;;  %v1225_v5 = vld [vmem:[%s1574_s0 + $0x10] ss:$28 sps:$4 sm:$0xff]   ;;  %v1233_v12 = vld [vmem:[%s1574_s0 + $0x48] ss:$28 sps:$4 sm:$0xff]   ;;  %v1238_v14 = vld [vmem:[%s1574_s0 + $0xc0] ss:$28 sps:$4 sm:$0xff]  }
  0x1a   :  { %1050 = vmatprep.subr.bf16.mxu1 %v1174_v26  ;;  %v1227_v6 = vld [vmem:[%s1574_s0 + $0x14] ss:$28 sps:$4 sm:$0xff]   ;;  %v1231_v10 = vld [vmem:[%s1574_s0 + $0x4c] ss:$28 sps:$4 sm:$0xff]   ;;  %v1234_v13 = vld [vmem:[%s1574_s0 + $0x84] ss:$28 sps:$4 sm:$0xff]  }
  0x1b   :  { %1011 = vmatpush3.bf16.msra.mxu0 %v1173_v25  ;;  %v1230_v9 = vld [vmem:[%s1574_s0 + $0x50] ss:$28 sps:$4 sm:$0xff]   ;;  %v1236_v15 = vld [vmem:[%s1574_s0 + $0x80] ss:$28 sps:$4 sm:$0xff]   ;;  %v1241_v17 = vld [vmem:[%s1574_s0 + $0xb8] ss:$28 sps:$4 sm:$0xff]  }
  0x1c   :  { %1012 = vmatprep.subr.bf16.mxu0 %v1176_v28  ;;  %v1239_v16 = vld [vmem:[%s1574_s0 + $0xbc] ss:$28 sps:$4 sm:$0xff]  }
  0x1d   :  { %1051 = vmatpush3.bf16.msra.mxu1 %v1175_v27 }
  0x1e   :  { %1052 = vmatprep.subr.bf16.mxu1 %v1178_v30 }
  0x1f   :  { %1013 = vmatpush3.bf16.msra.mxu0 %v1177_v29 }
  0x20   :  { %1078 = vmatprep.subr.bf16.mxu0 %v1183_v34 }
  0x21   :  { %1053 = vmatpush3.bf16.msra.mxu1 %v1182_v33 }
  0x22   :  { %672 = vmatmul.mubr.bf16.vlgmr.msra.gmra.mxu0 %v1179_v31  ;;  %1128 = vmatprep.subr.bf16.mxu1 %v1199_v47 }
  0x23   :  { %1079 = vmatpush3.bf16.msra.mxu0 %v1187_v37  ;;  %679 = vmatprep.mubr.bf16.mxu0 %v1190_v40 }
  0x24   :  { %737 = vmatmul.mubr.bf16.vlgmr.msra.gmra.mxu1 %v1184_v35  ;;  %1080 = vmatprep.subr.bf16.mxu0 %v1188_v38 }
  0x25   :  { %744 = vmatprep.mubr.bf16.mxu1 %v1194_v43  ;;  %1129 = vmatpush3.bf16.msra.mxu1 %v1199_v47 }
  0x26   :  { %1130 = vmatprep.subr.bf16.mxu1 %v1205_v52 }
  0x27   :  { %1081 = vmatpush3.bf16.msra.mxu0 %v1189_v39 }
  0x28   :  { %1082 = vmatprep.subr.bf16.mxu0 %v1193_v42 }
  0x29   :  { %1131 = vmatpush3.bf16.msra.mxu1 %v1205_v52 }
  0x2a   :  { %680 = vmatmul.mubr.bf16.gmra.mxu0 %v1192_v41  ;;  %1132 = vmatprep.subr.bf16.mxu1 %v1211_v57 }
  0x2b   :  { %1083 = vmatpush3.bf16.msra.mxu0 %v1196_v44  ;;  %687 = vmatprep.mubr.bf16.mxu0 %v1201_v49 }
  0x2c   :  { %745 = vmatmul.mubr.bf16.gmra.mxu1 %v1197_v45  ;;  %1084 = vmatprep.subr.bf16.mxu0 %v1198_v46 }
  0x2d   :  { %752 = vmatprep.mubr.bf16.mxu1 %v1206_v53  ;;  %1133 = vmatpush3.bf16.msra.mxu1 %v1211_v57 }
  0x2e   :  { %1134 = vmatprep.subr.bf16.mxu1 %v1217_v62 }
  0x2f   :  { %1085 = vmatpush3.bf16.msra.mxu0 %v1200_v48  ;;  %v1525_v48 = vld [vmem:[%s1575_s2] ss:$0 sm:$0xff] }
  0x30   :  { %1086 = vmatprep.subr.bf16.mxu0 %v1204_v51 }
  0x31   :  { %1135 = vmatpush3.bf16.msra.mxu1 %v1217_v62 }
  0x32   :  { %688 = vmatmul.mubr.bf16.gmra.mxu0 %v1203_v50  ;;  %1136 = vmatprep.subr.bf16.mxu1 %v1223_v3 }
  0x33   :  { %1087 = vmatpush3.bf16.msra.mxu0 %v1208_v54  ;;  %695 = vmatprep.mubr.bf16.mxu0 %v1213_v59 }
  0x34   :  { %753 = vmatmul.mubr.bf16.gmra.mxu1 %v1209_v55  ;;  %1088 = vmatprep.subr.bf16.mxu0 %v1210_v56 }
  0x35   :  { %760 = vmatprep.mubr.bf16.mxu1 %v1218_v63  ;;  %1137 = vmatpush3.bf16.msra.mxu1 %v1223_v3 }
  0x36   :  { %1138 = vmatprep.subr.bf16.mxu1 %v1228_v7 }
  0x37   :  { %1089 = vmatpush3.bf16.msra.mxu0 %v1212_v58 }
  0x38   :  { %1090 = vmatprep.subr.bf16.mxu0 %v1216_v61 }
  0x39   :  { %1139 = vmatpush3.bf16.msra.mxu1 %v1228_v7 }
  0x3a   :  { %696 = vmatmul.mubr.bf16.gmra.mxu0 %v1215_v60 }
  0x3b   :  { %1091 = vmatpush3.bf16.msra.mxu0 %v1220_v0  ;;  %801 = vmatprep.mubr.bf16.mxu0 %v1227_v6 }
  0x3c   :  { %761 = vmatmul.mubr.bf16.gmra.mxu1 %v1221_v1  ;;  %1092 = vmatprep.subr.bf16.mxu0 %v1222_v2 }
  0x3d   :  { %1140 = vmatprep.mubr.msk.bf16.mxu1 %vm626_vm0, %v1229_v8 }
  0x3f   :  { %1093 = vmatpush3.bf16.msra.mxu0 %v1224_v4 }
  0x42   :  { %802 = vmatmul.mubr.bf16.vlgmr.msra.gmra.mxu0 %v1225_v5 }
  0x43   :  { %809 = vmatprep.mubr.bf16.mxu0 %v1231_v10 }
  0x44   :  { %1141 = vmatmul.mubr.msk.bf16.vlgmr.msra.gmra.mxu1 %vm626_vm0, %v1230_v9 }
  0x45   :  { %1144 = vmatprep.mubr.msk.bf16.mxu1 %vm626_vm0, %v1237_v11 }
  0x4a   :  { %810 = vmatmul.mubr.bf16.gmra.mxu0 %v1233_v12 }
  0x4b   :  { %817 = vmatprep.mubr.bf16.mxu0 %v1234_v13 }
  0x4c   :  { %1145 = vmatmul.mubr.msk.bf16.gmra.mxu1 %vm626_vm0, %v1238_v14 }
  0x52   :  { %818 = vmatmul.mubr.bf16.gmra.mxu0 %v1236_v15 }
  0x53   :  { %825 = vmatprep.mubr.bf16.mxu0 %v1239_v16 }
  0x5a   :  { %826 = vmatmul.mubr.bf16.gmra.mxu0 %v1241_v17 }
  0xe2   :  { %v1014_v18 = vpop.f32.mrf.mxu0 }
  0xe4   :  { %v1015_v19 = vpop.f32.mrf.mxu0  ;;  %v1054_v20 = vpop.f32.mrf.mxu1 }
  0xe5   :  { %v1016_v46 = vadd.f32 %v1015_v19, %v1014_v18 }
  0xe6   :  { %v1017_v21 = vpop.f32.mrf.mxu0  ;;  %v1055_v22 = vpop.f32.mrf.mxu1 }
  0xe7   :  { %v674_v51 = vadd.f32 %v1016_v46, %v1525_v48  ;;  %v1056_v52 = vadd.f32 %v1055_v22, %v1054_v20 }
  0xe8   :  { %v1018_v23 = vpop.f32.mrf.mxu0  ;;  %v1057_v24 = vpop.f32.mrf.mxu1 }
  0xe9   :  { %v1019_v53 = vadd.f32 %v1018_v23, %v1017_v21  ;;  %v739_v58 = vadd.f32 %v1056_v52, %v674_v51 }
  0xea   :  { %v1020_v25 = vpop.f32.mrf.mxu0  ;;  %v1058_v26 = vpop.f32.mrf.mxu1 }
  0xeb   :  { %v677_v59 = vadd.f32 %v1019_v53, %v1525_v48  ;;  %v1059_v60 = vadd.f32 %v1058_v26, %v1057_v24 }
  0xec   :  { %v1021_v27 = vpop.f32.mrf.mxu0  ;;  %v1060_v28 = vpop.f32.mrf.mxu1 }
  0xed   :  { %v1022_v56 = vadd.f32 %v1021_v27, %v1020_v25  ;;  %v742_v5 = vadd.f32 %v1059_v60, %v677_v59 }
  0xee   :  { %v1023_v29 = vpop.f32.mrf.mxu0  ;;  %v1061_v30 = vpop.f32.mrf.mxu1 }
  0xef   :  { %v682_v2 = vadd.f32 %v1022_v56, %v1525_v48  ;;  %v1062_v3 = vadd.f32 %v1061_v30, %v1060_v28 }
  0xf0   :  { %v1024_v31 = vpop.f32.mrf.mxu0  ;;  %v1063_v32 = vpop.f32.mrf.mxu1 }
  0xf1   :  { %v1025_v6 = vadd.f32 %v1024_v31, %v1023_v29  ;;  %v747_v13 = vadd.f32 %v1062_v3, %v682_v2 }
  0xf2   :  { %v1026_v33 = vpop.f32.mrf.mxu0  ;;  %v1064_v34 = vpop.f32.mrf.mxu1 }
  0xf3   :  { %v685_v16 = vadd.f32 %v1025_v6, %v1525_v48  ;;  %v1065_v17 = vadd.f32 %v1064_v34, %v1063_v32 }
  0xf4   :  { %v1027_v35 = vpop.f32.mrf.mxu0  ;;  %v1066_v36 = vpop.f32.mrf.mxu1 }
  0xf5   :  { %v1028_v14 = vadd.f32 %v1027_v35, %v1026_v33  ;;  %v750_v26 = vadd.f32 %v1065_v17, %v685_v16 }
  0xf6   :  { %v1029_v37 = vpop.f32.mrf.mxu0  ;;  %v1067_v38 = vpop.f32.mrf.mxu1 }
  0xf7   :  { %v690_v23 = vadd.f32 %v1028_v14, %v1525_v48  ;;  %v1068_v24 = vadd.f32 %v1067_v38, %v1066_v36 }
  0xf8   :  { %v1030_v39 = vpop.f32.mrf.mxu0  ;;  %v1512_v40 = vpop.f32.mrf.mxu1 }
  0xf9   :  { %v1031_v27 = vadd.f32 %v1030_v39, %v1029_v37  ;;  %v755_v33 = vadd.f32 %v1068_v24, %v690_v23 }
  0xfa   :  { %v1032_v41 = vpop.f32.mrf.mxu0  ;;  %v1514_v42 = vpop.f32.mrf.mxu1 }
  0xfb   :  { %v693_v46 = vadd.f32 %v1031_v27, %v1525_v48  ;;  %v1071_v36 = vadd.f32 %v1514_v42, %v1512_v40 }
  0xfc   :  { %v1033_v43 = vpop.f32.mrf.mxu0  ;;  %v1516_v44 = vpop.f32.mrf.mxu1 }
  0xfd   :  { %v1034_v34 = vadd.f32 %v1033_v43, %v1032_v41 }
  0xfe   :  { %v1518_v45 = vpop.f32.mrf.mxu0  ;;  %v1520_v47 = vpop.f32.mrf.mxu1 }
  0xff   :  { %v698_v53 = vadd.f32 %v1034_v34, %v1525_v48  ;;  %v1074_v41 = vadd.f32 %v1520_v47, %v1516_v44 }
 0x100   :  { %v1527_v49 = vpop.f32.mrf.mxu0  ;;  %v1529_v50 = vpop.f32.mrf.mxu1 }
 0x101   :  { %v1037_v56 = vadd.f32 %v1527_v49, %v1518_v45  ;;  %v763_v60 = vadd.f32 %v1074_v41, %v698_v53 }
 0x102   :  { %v1094_v54 = vpop.f32.mrf.mxu0  ;;  %v1532_v55 = vpop.f32.mrf.mxu1 }
 0x103   :  { %v1077_v44 = vadd.f32 %v1532_v55, %v1529_v50 }
 0x104   :  { %v1095_v57 = vpop.f32.mrf.mxu0  ;;  %v1142_v62 = vpop.f32.mrf.mxu1 }
 0x105   :  { %v1096_v61 = vadd.f32 %v1095_v57, %v1094_v54  ;;  %v758_v54 = vadd.f32 %v1071_v36, %v693_v46 }
 0x106   :  { %v1097_v63 = vpop.f32.mrf.mxu0  ;;  %v868_v1 = vpop.f32.mrf.mxu1 }
 0x107   :  { %v804_v0 = vadd.f32 %v1096_v61, %v739_v58 }
 0x108   :  { %v1098_v4 = vpop.f32.mrf.mxu0  ;;  %v1143_v9 = vpop.f32.mrf.mxu1 }
 0x109   :  { %v1099_v7 = vadd.f32 %v1098_v4, %v1097_v63  ;;  %v869_v8 = vadd.f32 %v868_v1, %v804_v0 }
 0x10a   :  { %v1100_v10 = vpop.f32.mrf.mxu0  ;;  %v871_v12 = vpop.f32.mrf.mxu1 }
 0x10b   :  { %899 = vst [vmem:[%s1576_s3] sm:$0xff] %v869_v8  ;;  %v807_v11 = vadd.f32 %v1099_v7, %v742_v5 }
 0x10c   :  { %v1101_v15 = vpop.f32.mrf.mxu0  ;;  %v1146_v21 = vpop.f32.mrf.mxu1 }
 0x10d   :  { %v1102_v18 = vadd.f32 %v1101_v15, %v1100_v10  ;;  %v872_v19 = vadd.f32 %v871_v12, %v807_v11 }
 0x10e   :  { %v1103_v20 = vpop.f32.mrf.mxu0  ;;  %v884_v31 = vpop.f32.mrf.mxu1 }
 0x10f   :  { %v812_v22 = vadd.f32 %v1102_v18, %v747_v13  ;;  %900 = vst [vmem:[%s1576_s3 + $0x8] sm:$0xff] %v872_v19 }
 0x110   :  { %v1104_v25 = vpop.f32.mrf.mxu0  ;;  %v1147_v39 = vpop.f32.mrf.mxu1 }
 0x111   :  { %v877_v28 = vadd.f32 %v1142_v62, %v812_v22  ;;  %v1105_v29 = vadd.f32 %v1104_v25, %v1103_v20  ;;  %v701_v62 = vadd.f32 %v1037_v56, %v1525_v48 }
 0x112   :  { %v1106_v30 = vpop.f32.mrf.mxu0  ;;  %v887_v58 = vpop.f32.mrf.mxu1 }
 0x113   :  { %901 = vst [vmem:[%s1576_s3 + $0x10] sm:$0xff] %v877_v28  ;;  %v815_v32 = vadd.f32 %v1105_v29, %v750_v26  ;;  %v766_v1 = vadd.f32 %v1077_v44, %v701_v62 }
 0x114   :  { %v1107_v35 = vpop.f32.mrf.mxu0 }
 0x115   :  { %v880_v38 = vadd.f32 %v1143_v9, %v815_v32  ;;  %v1108_v51 = vadd.f32 %v1107_v35, %v1106_v30 }
 0x116   :  { %v1109_v37 = vpop.f32.mrf.mxu0 }
 0x117   :  { %902 = vst [vmem:[%s1576_s3 + $0x18] sm:$0xff] %v880_v38  ;;  %v820_v52 = vadd.f32 %v1108_v51, %v755_v33 }
 0x118   :  { %v1110_v43 = vpop.f32.mrf.mxu0 }
 0x119   :  { %v1111_v40 = vadd.f32 %v1110_v43, %v1109_v37  ;;  %v885_v42 = vadd.f32 %v884_v31, %v820_v52 }
 0x11a   :  { %v1112_v57 = vpop.f32.mrf.mxu0 }
 0x11b   :  { %903 = vst [vmem:[%s1576_s3 + $0x20] sm:$0xff] %v885_v42  ;;  %v823_v59 = vadd.f32 %v1111_v40, %v758_v54 }
 0x11c   :  { %v1113_v61 = vpop.f32.mrf.mxu0 }
 0x11d   :  { %v1114_v47 = vadd.f32 %v1113_v61, %v1112_v57  ;;  %v888_v63 = vadd.f32 %v887_v58, %v823_v59 }
 0x11e   :  { %v1115_v0 = vpop.f32.mrf.mxu0 }
 0x11f   :  { %v828_v45 = vadd.f32 %v1114_v47, %v763_v60  ;;  %904 = vst [vmem:[%s1576_s3 + $0x28] sm:$0xff] %v888_v63 }
 0x120   :  { %v1116_v49 = vpop.f32.mrf.mxu0 }
 0x121   :  { %v893_v2 = vadd.f32 %v1146_v21, %v828_v45  ;;  %v1117_v3 = vadd.f32 %v1116_v49, %v1115_v0 }
 0x123   :  { %905 = vst [vmem:[%s1576_s3 + $0x30] sm:$0xff] %v893_v2  ;;  %v831_v48 = vadd.f32 %v1117_v3, %v766_v1 }
 0x125   :  { %v896_v4 = vadd.f32 %v1147_v39, %v831_v48 }
 0x127   :  { %906 = vst [vmem:[%s1576_s3 + $0x38] sm:$0xff] %v896_v4 }

// kernel: _net_forward_impl.234
= control target key start
LH: loop header
LB: loop body
LE: loop exit
PB: predicated region body
PF: predicated region fallthrough
CT: control target
= control target key end

     0   :  { %s2035_s1 = inlined_call_operand.vmem [shape: bf16[1152,128], index: 1, kind: input, shape index: {}]   ;;  %s2036_s0 = inlined_call_operand.vmem [shape: bf16[64,1152], index: 0, kind: input, shape index: {}]   ;;  %s2037_s2 = inlined_call_operand.vmem [shape: f32[1,128], index: 2, kind: input, shape index: {}]   ;;  %s2038_s3 = inlined_call_operand.vmem [shape: f32[64,128], index: 3, kind: output, shape index: {}]  }
   0x1   :  { %v1480_v0 = vld [vmem:[%s2035_s1 + $0x78] sm:$0xff]   ;;  %v1484_v4 = vld [vmem:[%s2035_s1 + $0x70] sm:$0xff]   ;;  %v1488_v8 = vld [vmem:[%s2035_s1 + $0x68] sm:$0xff]  }
   0x2   :  { %v1481_v1 = vld [vmem:[%s2035_s1 + $0xf8] sm:$0xff]   ;;  %1268 = vmatprep.subr.bf16.mxu0 %v1480_v0  ;;  %v1485_v5 = vld [vmem:[%s2035_s1 + $0xf0] sm:$0xff]   ;;  %v1489_v9 = vld [vmem:[%s2035_s1 + $0xe8] sm:$0xff]  }
   0x3   :  { %v1482_v2 = vld [vmem:[%s2035_s1 + $0x38] sm:$0xff]   ;;  %1308 = vmatprep.subr.bf16.mxu1 %v1481_v1  ;;  %v1486_v6 = vld [vmem:[%s2035_s1 + $0x30] sm:$0xff]   ;;  %v1490_v10 = vld [vmem:[%s2035_s1 + $0x28] sm:$0xff]  }
   0x4   :  { %v1483_v3 = vld [vmem:[%s2035_s1 + $0xb8] sm:$0xff]   ;;  %1269 = vmatpush3.bf16.msra.mxu0 %v1482_v2  ;;  %v1487_v7 = vld [vmem:[%s2035_s1 + $0xb0] sm:$0xff]   ;;  %v1491_v11 = vld [vmem:[%s2035_s1 + $0xa8] sm:$0xff]  }
   0x5   :  { %1309 = vmatpush3.bf16.msra.mxu1 %v1483_v3  ;;  %1270 = vmatprep.subr.bf16.mxu0 %v1484_v4  ;;  %v1492_v12 = vld [vmem:[%s2035_s1 + $0x60] sm:$0xff]   ;;  %v1496_v16 = vld [vmem:[%s2035_s1 + $0x58] sm:$0xff]   ;;  %v1500_v20 = vld [vmem:[%s2035_s1 + $0x50] sm:$0xff]  }
   0x6   :  { %1310 = vmatprep.subr.bf16.mxu1 %v1485_v5  ;;  %v1493_v13 = vld [vmem:[%s2035_s1 + $0xe0] sm:$0xff]   ;;  %v1497_v17 = vld [vmem:[%s2035_s1 + $0xd8] sm:$0xff]   ;;  %v1501_v21 = vld [vmem:[%s2035_s1 + $0xd0] sm:$0xff]  }
   0x7   :  { %v1494_v14 = vld [vmem:[%s2035_s1 + $0x20] sm:$0xff]   ;;  %v1498_v18 = vld [vmem:[%s2035_s1 + $0x18] sm:$0xff]   ;;  %v1502_v22 = vld [vmem:[%s2035_s1 + $0x10] sm:$0xff]  }
   0x8   :  { %1271 = vmatpush3.bf16.msra.mxu0 %v1486_v6  ;;  %v1495_v15 = vld [vmem:[%s2035_s1 + $0xa0] sm:$0xff]   ;;  %v1499_v19 = vld [vmem:[%s2035_s1 + $0x98] sm:$0xff]   ;;  %v1503_v23 = vld [vmem:[%s2035_s1 + $0x90] sm:$0xff]  }
   0x9   :  { %1311 = vmatpush3.bf16.msra.mxu1 %v1487_v7  ;;  %1272 = vmatprep.subr.bf16.mxu0 %v1488_v8  ;;  %v1504_v24 = vld [vmem:[%s2035_s1 + $0x48] sm:$0xff]   ;;  %v1508_v28 = vld [vmem:[%s2035_s1 + $0x40] sm:$0xff]   ;;  %v1518_v36 = vld [vmem:[%s2035_s1 + $0x178] sm:$0xff]  }
   0xa   :  { %1312 = vmatprep.subr.bf16.mxu1 %v1489_v9  ;;  %v1505_v25 = vld [vmem:[%s2035_s1 + $0xc8] sm:$0xff]   ;;  %v1509_v29 = vld [vmem:[%s2035_s1 + $0xc0] sm:$0xff]   ;;  %v1519_v37 = vld [vmem:[%s2035_s1 + $0x1f8] sm:$0xff]  }
   0xb   :  { %v1506_v26 = vld [vmem:[%s2035_s1 + $0x8] sm:$0xff]   ;;  %v1510_v30 = vld [vmem:[%s2035_s1] sm:$0xff]   ;;  %v1520_v38 = vld [vmem:[%s2035_s1 + $0x138] sm:$0xff]  }
   0xc   :  { %1273 = vmatpush3.bf16.msra.mxu0 %v1490_v10  ;;  %v1507_v27 = vld [vmem:[%s2035_s1 + $0x88] sm:$0xff]   ;;  %v1511_v31 = vld [vmem:[%s2035_s1 + $0x80] sm:$0xff]   ;;  %v1521_v39 = vld [vmem:[%s2035_s1 + $0x1b8] sm:$0xff]  }
   0xd   :  { %1313 = vmatpush3.bf16.msra.mxu1 %v1491_v11  ;;  %1274 = vmatprep.subr.bf16.mxu0 %v1492_v12  ;;  %v1512_v32 = vld [vmem:[%s2036_s0] ss:$36 sps:$4 sm:$0xff]   ;;  %v1515_v34 = vld [vmem:[%s2036_s0 + $0x8] ss:$36 sps:$4 sm:$0xff]   ;;  %v1522_v40 = vld [vmem:[%s2035_s1 + $0x170] sm:$0xff]  }
   0xe   :  { %1314 = vmatprep.subr.bf16.mxu1 %v1493_v13  ;;  %v1514_v33 = vld [vmem:[%s2036_s0 + $0x4] ss:$36 sps:$4 sm:$0xff]   ;;  %v1517_v35 = vld [vmem:[%s2036_s0 + $0xc] ss:$36 sps:$4 sm:$0xff]   ;;  %v1528_v45 = vld [vmem:[%s2036_s0 + $0x54] ss:$36 sps:$4 sm:$0xff]  }
   0xf   :  { %854 = vmatprep.mubr.bf16.mxu0 %v1514_v33  ;;  %919 = vmatprep.mubr.bf16.mxu1 %v1517_v35  ;;  %v1523_v41 = vld [vmem:[%s2035_s1 + $0x1f0] sm:$0xff]   ;;  %v1530_v46 = vld [vmem:[%s2036_s0 + $0x48] ss:$36 sps:$4 sm:$0xff]   ;;  %v1536_v52 = vld [vmem:[%s2035_s1 + $0x160] sm:$0xff]  }
  0x10   :  { %1275 = vmatpush3.bf16.msra.mxu0 %v1494_v14  ;;  %v1524_v42 = vld [vmem:[%s2035_s1 + $0x130] sm:$0xff]   ;;  %v1532_v48 = vld [vmem:[%s2035_s1 + $0x168] sm:$0xff]   ;;  %v1537_v53 = vld [vmem:[%s2035_s1 + $0x1e0] sm:$0xff]  }
  0x11   :  { %1315 = vmatpush3.bf16.msra.mxu1 %v1495_v15  ;;  %1276 = vmatprep.subr.bf16.mxu0 %v1496_v16  ;;  %v1525_v43 = vld [vmem:[%s2035_s1 + $0x1b0] sm:$0xff]   ;;  %v1533_v49 = vld [vmem:[%s2035_s1 + $0x1e8] sm:$0xff]   ;;  %v1538_v54 = vld [vmem:[%s2035_s1 + $0x120] sm:$0xff]  }
  0x12   :  { %1316 = vmatprep.subr.bf16.mxu1 %v1497_v17  ;;  %v1526_v44 = vld [vmem:[%s2036_s0 + $0x4c] ss:$36 sps:$4 sm:$0xff]   ;;  %v1539_v55 = vld [vmem:[%s2035_s1 + $0x1a0] sm:$0xff]   ;;  %v1540_v56 = vld [vmem:[%s2036_s0 + $0x94] ss:$36 sps:$4 sm:$0xff]  }
  0x13   :  { %v1531_v47 = vld [vmem:[%s2036_s0 + $0x50] ss:$36 sps:$4 sm:$0xff]   ;;  %v1534_v50 = vld [vmem:[%s2035_s1 + $0x128] sm:$0xff]   ;;  %v1542_v57 = vld [vmem:[%s2036_s0 + $0x9c] ss:$36 sps:$4 sm:$0xff]  }
  0x14   :  { %1277 = vmatpush3.bf16.msra.mxu0 %v1498_v18  ;;  %v1535_v51 = vld [vmem:[%s2035_s1 + $0x1a8] sm:$0xff]   ;;  %v1544_v58 = vld [vmem:[%s2036_s0 + $0x90] ss:$36 sps:$4 sm:$0xff]   ;;  %v1545_v59 = vld [vmem:[%s2036_s0 + $0x98] ss:$36 sps:$4 sm:$0xff]  }
  0x15   :  { %1317 = vmatpush3.bf16.msra.mxu1 %v1499_v19  ;;  %1278 = vmatprep.subr.bf16.mxu0 %v1500_v20  ;;  %v1546_v60 = vld [vmem:[%s2035_s1 + $0x158] sm:$0xff]   ;;  %v1550_v0 = vld [vmem:[%s2035_s1 + $0x150] sm:$0xff]   ;;  %v1556_v5 = vld [vmem:[%s2036_s0 + $0xe4] ss:$36 sps:$4 sm:$0xff]  }
  0x16   :  { %1318 = vmatprep.subr.bf16.mxu1 %v1501_v21  ;;  %v1547_v61 = vld [vmem:[%s2035_s1 + $0x1d8] sm:$0xff]   ;;  %v1551_v1 = vld [vmem:[%s2035_s1 + $0x1d0] sm:$0xff]   ;;  %v1559_v7 = vld [vmem:[%s2036_s0 + $0xe0] ss:$36 sps:$4 sm:$0xff]  }
  0x17   :  { %v1548_v62 = vld [vmem:[%s2035_s1 + $0x118] sm:$0xff]   ;;  %v1552_v2 = vld [vmem:[%s2035_s1 + $0x110] sm:$0xff]   ;;  %v1560_v8 = vld [vmem:[%s2035_s1 + $0x148] sm:$0xff]  }
  0x18   :  { %1279 = vmatpush3.bf16.msra.mxu0 %v1502_v22  ;;  %v1549_v63 = vld [vmem:[%s2035_s1 + $0x198] sm:$0xff]   ;;  %v1553_v3 = vld [vmem:[%s2035_s1 + $0x190] sm:$0xff]   ;;  %v1561_v9 = vld [vmem:[%s2035_s1 + $0x1c8] sm:$0xff]  }
  0x19   :  { %1319 = vmatpush3.bf16.msra.mxu1 %v1503_v23  ;;  %1280 = vmatprep.subr.bf16.mxu0 %v1504_v24  ;;  %v1554_v4 = vld [vmem:[%s2036_s0 + $0xdc] ss:$36 sps:$4 sm:$0xff]   ;;  %v1562_v10 = vld [vmem:[%s2035_s1 + $0x108] sm:$0xff]   ;;  %v1568_v16 = vld [vmem:[%s2036_s0 + $0x10] ss:$36 sps:$4 sm:$0xff]  }
  0x1a   :  { %1320 = vmatprep.subr.bf16.mxu1 %v1505_v25  ;;  %v1558_v6 = vld [vmem:[%s2036_s0 + $0xd8] ss:$36 sps:$4 sm:$0xff]   ;;  %v1563_v11 = vld [vmem:[%s2035_s1 + $0x188] sm:$0xff]   ;;  %v1564_v12 = vld [vmem:[%s2035_s1 + $0x140] sm:$0xff]  }
  0x1b   :  { %v1565_v13 = vld [vmem:[%s2035_s1 + $0x1c0] sm:$0xff]   ;;  %v1570_v17 = vld [vmem:[%s2036_s0 + $0x14] ss:$36 sps:$4 sm:$0xff]   ;;  %v1592_v33 = vld [vmem:[%s2036_s0 + $0xec] ss:$36 sps:$4 sm:$0xff]  }
  0x1c   :  { %1281 = vmatpush3.bf16.msra.mxu0 %v1506_v26  ;;  %v1566_v14 = vld [vmem:[%s2035_s1 + $0x100] sm:$0xff]   ;;  %v1571_v18 = vld [vmem:[%s2036_s0 + $0x18] ss:$36 sps:$4 sm:$0xff]   ;;  %v1575_v21 = vld [vmem:[%s2035_s1 + $0x230] sm:$0xff]  }
  0x1d   :  { %1321 = vmatpush3.bf16.msra.mxu1 %v1507_v27  ;;  %1282 = vmatprep.subr.bf16.mxu0 %v1508_v28  ;;  %v1567_v15 = vld [vmem:[%s2035_s1 + $0x180] sm:$0xff]   ;;  %v1574_v20 = vld [vmem:[%s2035_s1 + $0x238] sm:$0xff]   ;;  %v1582_v26 = vld [vmem:[%s2035_s1 + $0x228] sm:$0xff]  }
  0x1e   :  { %1322 = vmatprep.subr.bf16.mxu1 %v1509_v29  ;;  %v1573_v19 = vld [vmem:[%s2036_s0 + $0x1c] ss:$36 sps:$4 sm:$0xff]   ;;  %v1578_v23 = vld [vmem:[%s2036_s0 + $0x64] ss:$36 sps:$4 sm:$0xff]   ;;  %v1586_v28 = vld [vmem:[%s2036_s0 + $0xac] ss:$36 sps:$4 sm:$0xff]  }
  0x1f   :  { %v1576_v22 = vld [vmem:[%s2036_s0 + $0x5c] ss:$36 sps:$4 sm:$0xff]   ;;  %v1584_v27 = vld [vmem:[%s2036_s0 + $0xa4] ss:$36 sps:$4 sm:$0xff]   ;;  %v1591_v35 = vld [vmem:[%s2035_s1 + $0x210] sm:$0xff]  }
  0x20   :  { %1283 = vmatpush3.bf16.msra.mxu0 %v1510_v30  ;;  %v1580_v24 = vld [vmem:[%s2036_s0 + $0x58] ss:$36 sps:$4 sm:$0xff]   ;;  %v1581_v25 = vld [vmem:[%s2036_s0 + $0x60] ss:$36 sps:$4 sm:$0xff]  }
  0x21   :  { %1323 = vmatpush3.bf16.msra.mxu1 %v1511_v31  ;;  %1348 = vmatprep.subr.bf16.mxu0 %v1518_v36  ;;  %v1583_v29 = vld [vmem:[%s2035_s1 + $0x220] sm:$0xff]   ;;  %v1589_v31 = vld [vmem:[%s2036_s0 + $0xa8] ss:$36 sps:$4 sm:$0xff]  }
  0x22   :  { %1388 = vmatprep.subr.bf16.mxu1 %v1519_v37  ;;  %v1588_v30 = vld [vmem:[%s2036_s0 + $0xa0] ss:$36 sps:$4 sm:$0xff]   ;;  %v1596_v36 = vld [vmem:[%s2036_s0 + $0xe8] ss:$36 sps:$4 sm:$0xff]  }
  0x23   :  { %855 = vmatmul.mubr.bf16.vlgmr.msra.gmra.mxu0 %v1512_v32  ;;  %v1590_v32 = vld [vmem:[%s2035_s1 + $0x218] sm:$0xff]   ;;  %v1598_v37 = vld [vmem:[%s2035_s1 + $0x208] sm:$0xff]  }
  0x24   :  { %920 = vmatmul.mubr.bf16.vlgmr.msra.gmra.mxu1 %v1515_v34  ;;  %1349 = vmatpush3.bf16.msra.mxu0 %v1520_v38  ;;  %v1594_v34 = vld [vmem:[%s2036_s0 + $0xf4] ss:$36 sps:$4 sm:$0xff]  }
  0x25   :  { %1389 = vmatpush3.bf16.msra.mxu1 %v1521_v39  ;;  %1350 = vmatprep.subr.bf16.mxu0 %v1522_v40  ;;  %v1597_v38 = vld [vmem:[%s2036_s0 + $0xf0] ss:$36 sps:$4 sm:$0xff]   ;;  %v1600_v39 = vld [vmem:[%s2036_s0 + $0x20] ss:$36 sps:$4 sm:$0xff]  }
  0x26   :  { %1390 = vmatprep.subr.bf16.mxu1 %v1523_v41  ;;  %862 = vmatprep.mubr.bf16.mxu0 %v1526_v44  ;;  %v1601_v40 = vld [vmem:[%s2036_s0 + $0xb0] ss:$36 sps:$4 sm:$0xff]   ;;  %v1599_v41 = vld [vmem:[%s2035_s1 + $0x200] sm:$0xff]  }
  0x27   :  { %927 = vmatprep.mubr.bf16.mxu1 %v1528_v45 }
  0x28   :  { %1351 = vmatpush3.bf16.msra.mxu0 %v1524_v42  ;;  %v1602_v42 = vld [vmem:[%s2036_s0 + $0x68] ss:$36 sps:$4 sm:$0xff]  }
  0x29   :  { %1391 = vmatpush3.bf16.msra.mxu1 %v1525_v43  ;;  %1352 = vmatprep.subr.bf16.mxu0 %v1532_v48  ;;  %v1603_v43 = vld [vmem:[%s2036_s0 + $0xf8] ss:$36 sps:$4 sm:$0xff]  }
  0x2a   :  { %1392 = vmatprep.subr.bf16.mxu1 %v1533_v49 }
  0x2b   :  { %863 = vmatmul.mubr.bf16.gmra.mxu0 %v1530_v46 }
  0x2c   :  { %928 = vmatmul.mubr.bf16.gmra.mxu1 %v1531_v47  ;;  %1353 = vmatpush3.bf16.msra.mxu0 %v1534_v50 }
  0x2d   :  { %1393 = vmatpush3.bf16.msra.mxu1 %v1535_v51  ;;  %1354 = vmatprep.subr.bf16.mxu0 %v1536_v52 }
  0x2e   :  { %1394 = vmatprep.subr.bf16.mxu1 %v1537_v53  ;;  %870 = vmatprep.mubr.bf16.mxu0 %v1540_v56 }
  0x2f   :  { %935 = vmatprep.mubr.bf16.mxu1 %v1542_v57 }
  0x30   :  { %1355 = vmatpush3.bf16.msra.mxu0 %v1538_v54 }
  0x31   :  { %1395 = vmatpush3.bf16.msra.mxu1 %v1539_v55  ;;  %1356 = vmatprep.subr.bf16.mxu0 %v1546_v60 }
  0x32   :  { %1396 = vmatprep.subr.bf16.mxu1 %v1547_v61 }
  0x33   :  { %871 = vmatmul.mubr.bf16.gmra.mxu0 %v1544_v58 }
  0x34   :  { %936 = vmatmul.mubr.bf16.gmra.mxu1 %v1545_v59  ;;  %1357 = vmatpush3.bf16.msra.mxu0 %v1548_v62 }
  0x35   :  { %1397 = vmatpush3.bf16.msra.mxu1 %v1549_v63  ;;  %1358 = vmatprep.subr.bf16.mxu0 %v1550_v0 }
  0x36   :  { %1398 = vmatprep.subr.bf16.mxu1 %v1551_v1  ;;  %878 = vmatprep.mubr.bf16.mxu0 %v1554_v4 }
  0x37   :  { %943 = vmatprep.mubr.bf16.mxu1 %v1556_v5 }
  0x38   :  { %1359 = vmatpush3.bf16.msra.mxu0 %v1552_v2 }
  0x39   :  { %1399 = vmatpush3.bf16.msra.mxu1 %v1553_v3  ;;  %1360 = vmatprep.subr.bf16.mxu0 %v1560_v8 }
  0x3a   :  { %1400 = vmatprep.subr.bf16.mxu1 %v1561_v9 }
  0x3b   :  { %879 = vmatmul.mubr.bf16.gmra.mxu0 %v1558_v6 }
  0x3c   :  { %944 = vmatmul.mubr.bf16.gmra.mxu1 %v1559_v7  ;;  %1361 = vmatpush3.bf16.msra.mxu0 %v1562_v10 }
  0x3d   :  { %1401 = vmatpush3.bf16.msra.mxu1 %v1563_v11  ;;  %1362 = vmatprep.subr.bf16.mxu0 %v1564_v12 }
  0x3e   :  { %1402 = vmatprep.subr.bf16.mxu1 %v1565_v13  ;;  %984 = vmatprep.mubr.bf16.mxu0 %v1570_v17 }
  0x3f   :  { %1049 = vmatprep.mubr.bf16.mxu1 %v1573_v19 }
  0x40   :  { %1363 = vmatpush3.bf16.msra.mxu0 %v1566_v14 }
  0x41   :  { %1403 = vmatpush3.bf16.msra.mxu1 %v1567_v15  ;;  %1440 = vmatprep.subr.bf16.mxu0 %v1574_v20 }
  0x42   :  { %1464 = vmatprep.subr.bf16.mxu1 %v1574_v20 }
  0x43   :  { %985 = vmatmul.mubr.bf16.vlgmr.msra.gmra.mxu0 %v1568_v16 }
  0x44   :  { %1050 = vmatmul.mubr.bf16.vlgmr.msra.gmra.mxu1 %v1571_v18  ;;  %1441 = vmatpush3.bf16.msra.mxu0 %v1574_v20 }
  0x45   :  { %1472 = vmatpush3.bf16.msra.mxu1 %v1574_v20  ;;  %1442 = vmatprep.subr.bf16.mxu0 %v1575_v21 }
  0x46   :  { %1465 = vmatprep.subr.bf16.mxu1 %v1575_v21  ;;  %992 = vmatprep.mubr.bf16.mxu0 %v1576_v22 }
  0x47   :  { %1057 = vmatprep.mubr.bf16.mxu1 %v1578_v23 }
  0x48   :  { %1443 = vmatpush3.bf16.msra.mxu0 %v1575_v21 }
  0x49   :  { %1473 = vmatpush3.bf16.msra.mxu1 %v1575_v21  ;;  %1444 = vmatprep.subr.bf16.mxu0 %v1582_v26 }
  0x4a   :  { %1466 = vmatprep.subr.bf16.mxu1 %v1582_v26 }
  0x4b   :  { %993 = vmatmul.mubr.bf16.gmra.mxu0 %v1580_v24 }
  0x4c   :  { %1058 = vmatmul.mubr.bf16.gmra.mxu1 %v1581_v25  ;;  %1000 = vmatprep.mubr.bf16.mxu0 %v1584_v27 }
  0x4d   :  { %1445 = vmatpush3.bf16.msra.mxu0 %v1582_v26  ;;  %1065 = vmatprep.mubr.bf16.mxu1 %v1586_v28 }
  0x4e   :  { %1474 = vmatpush3.bf16.msra.mxu1 %v1582_v26  ;;  %1446 = vmatprep.subr.bf16.mxu0 %v1583_v29 }
  0x4f   :  { %1467 = vmatprep.subr.bf16.mxu1 %v1583_v29 }
  0x51   :  { %1447 = vmatpush3.bf16.msra.mxu0 %v1583_v29 }
  0x52   :  { %1475 = vmatpush3.bf16.msra.mxu1 %v1583_v29  ;;  %1448 = vmatprep.subr.bf16.mxu0 %v1590_v32 }
  0x53   :  { %1001 = vmatmul.mubr.bf16.gmra.mxu0 %v1588_v30  ;;  %1468 = vmatprep.subr.bf16.mxu1 %v1590_v32  ;;  %v1159_v30 = vld [vmem:[%s2037_s2] ss:$0 sm:$0xff] }
  0x54   :  { %1066 = vmatmul.mubr.bf16.gmra.mxu1 %v1589_v31  ;;  %1008 = vmatprep.mubr.bf16.mxu0 %v1592_v33 }
  0x55   :  { %1449 = vmatpush3.bf16.msra.mxu0 %v1590_v32  ;;  %1073 = vmatprep.mubr.bf16.mxu1 %v1594_v34 }
  0x56   :  { %1476 = vmatpush3.bf16.msra.mxu1 %v1590_v32  ;;  %1450 = vmatprep.subr.bf16.mxu0 %v1591_v35 }
  0x57   :  { %1469 = vmatprep.subr.bf16.mxu1 %v1591_v35 }
  0x59   :  { %1451 = vmatpush3.bf16.msra.mxu0 %v1591_v35 }
  0x5a   :  { %1477 = vmatpush3.bf16.msra.mxu1 %v1591_v35  ;;  %1452 = vmatprep.subr.bf16.mxu0 %v1598_v37 }
  0x5b   :  { %1009 = vmatmul.mubr.bf16.gmra.mxu0 %v1596_v36  ;;  %1470 = vmatprep.subr.bf16.mxu1 %v1598_v37 }
  0x5c   :  { %1074 = vmatmul.mubr.bf16.gmra.mxu1 %v1597_v38  ;;  %1456 = vmatprep.mubr.bf16.mxu0 %v1600_v39 }
  0x5d   :  { %1453 = vmatpush3.bf16.msra.mxu0 %v1598_v37  ;;  %1460 = vmatprep.mubr.bf16.mxu1 %v1601_v40 }
  0x5e   :  { %1478 = vmatpush3.bf16.msra.mxu1 %v1598_v37  ;;  %1454 = vmatprep.subr.bf16.mxu0 %v1599_v41 }
  0x5f   :  { %1471 = vmatprep.subr.bf16.mxu1 %v1599_v41 }
  0x61   :  { %1455 = vmatpush3.bf16.msra.mxu0 %v1599_v41 }
  0x62   :  { %1479 = vmatpush3.bf16.msra.mxu1 %v1599_v41 }
  0x64   :  { %1457 = vmatmul.mubr.bf16.vlgmr.msra.gmra.mxu0 %v1602_v42 }
  0x65   :  { %1461 = vmatmul.mubr.bf16.vlgmr.msra.gmra.mxu1 %v1603_v43 }
  0xe3   :  { %v1284_v44 = vpop.f32.mrf.mxu0 }
  0xe4   :  { %v1324_v45 = vpop.f32.mrf.mxu1 }
  0xe5   :  { %v1285_v46 = vpop.f32.mrf.mxu0 }
  0xe6   :  { %v1325_v47 = vpop.f32.mrf.mxu1  ;;  %v1286_v27 = vadd.f32 %v1285_v46, %v1284_v44 }
  0xe7   :  { %v1287_v48 = vpop.f32.mrf.mxu0  ;;  %v1326_v40 = vadd.f32 %v1325_v47, %v1324_v45 }
  0xe8   :  { %v1948_v49 = vpop.f32.mrf.mxu1  ;;  %v857_v35 = vadd.f32 %v1286_v27, %v1159_v30 }
  0xe9   :  { %v1288_v50 = vpop.f32.mrf.mxu0 }
  0xea   :  { %v1950_v51 = vpop.f32.mrf.mxu1  ;;  %v1289_v36 = vadd.f32 %v1288_v50, %v1287_v48 }
  0xeb   :  { %v1290_v52 = vpop.f32.mrf.mxu0  ;;  %v1329_v48 = vadd.f32 %v1950_v51, %v1948_v49 }
  0xec   :  { %v1330_v53 = vpop.f32.mrf.mxu1 }
  0xed   :  { %v1291_v54 = vpop.f32.mrf.mxu0 }
  0xee   :  { %v1331_v55 = vpop.f32.mrf.mxu1  ;;  %v1292_v31 = vadd.f32 %v1291_v54, %v1290_v52 }
  0xef   :  { %v1293_v56 = vpop.f32.mrf.mxu0  ;;  %v1332_v52 = vadd.f32 %v1331_v55, %v1330_v53 }
  0xf0   :  { %v1952_v57 = vpop.f32.mrf.mxu1  ;;  %v865_v41 = vadd.f32 %v1292_v31, %v1159_v30 }
  0xf1   :  { %v1294_v58 = vpop.f32.mrf.mxu0 }
  0xf2   :  { %v1954_v59 = vpop.f32.mrf.mxu1  ;;  %v1295_v39 = vadd.f32 %v1294_v58, %v1293_v56  ;;  %v930_v45 = vadd.f32 %v1332_v52, %v865_v41 }
  0xf3   :  { %v1296_v60 = vpop.f32.mrf.mxu0 }
  0xf4   :  { %v1956_v61 = vpop.f32.mrf.mxu1  ;;  %v868_v50 = vadd.f32 %v1295_v39, %v1159_v30 }
  0xf5   :  { %v1297_v62 = vpop.f32.mrf.mxu0 }
  0xf6   :  { %v1958_v63 = vpop.f32.mrf.mxu1  ;;  %v1298_v42 = vadd.f32 %v1297_v62, %v1296_v60 }
  0xf7   :  { %v1299_v0 = vpop.f32.mrf.mxu0  ;;  %v1338_v31 = vadd.f32 %v1958_v63, %v1956_v61 }
  0xf8   :  { %v1960_v1 = vpop.f32.mrf.mxu1  ;;  %v873_v47 = vadd.f32 %v1298_v42, %v1159_v30 }
  0xf9   :  { %v1300_v2 = vpop.f32.mrf.mxu0 }
  0xfa   :  { %v1962_v3 = vpop.f32.mrf.mxu1  ;;  %v1301_v58 = vadd.f32 %v1300_v2, %v1299_v0 }
  0xfb   :  { %v1302_v4 = vpop.f32.mrf.mxu0 }
  0xfc   :  { %v1342_v5 = vpop.f32.mrf.mxu1 }
  0xfd   :  { %v1303_v6 = vpop.f32.mrf.mxu0 }
  0xfe   :  { %v1343_v7 = vpop.f32.mrf.mxu1  ;;  %v1304_v34 = vadd.f32 %v1303_v6, %v1302_v4 }
  0xff   :  { %v1305_v8 = vpop.f32.mrf.mxu0  ;;  %v1344_v4 = vadd.f32 %v1343_v7, %v1342_v5 }
 0x100   :  { %v1345_v9 = vpop.f32.mrf.mxu1 }
 0x101   :  { %v1306_v10 = vpop.f32.mrf.mxu0 }
 0x102   :  { %v1346_v11 = vpop.f32.mrf.mxu1  ;;  %v1307_v43 = vadd.f32 %v1306_v10, %v1305_v8  ;;  %v1335_v8 = vadd.f32 %v1954_v59, %v1952_v57 }
 0x103   :  { %v1364_v12 = vpop.f32.mrf.mxu0  ;;  %v1347_v49 = vadd.f32 %v1346_v11, %v1345_v9  ;;  %v1341_v9 = vadd.f32 %v1962_v3, %v1960_v1 }
 0x104   :  { %v1964_v13 = vpop.f32.mrf.mxu1  ;;  %v884_v60 = vadd.f32 %v1307_v43, %v1159_v30 }
 0x105   :  { %v1365_v14 = vpop.f32.mrf.mxu0 }
 0x106   :  { %v1966_v15 = vpop.f32.mrf.mxu1  ;;  %v1366_v53 = vadd.f32 %v1365_v14, %v1364_v12 }
 0x107   :  { %v1968_v16 = vpop.f32.mrf.mxu0 }
 0x108   :  { %v1970_v17 = vpop.f32.mrf.mxu1 }
 0x109   :  { %2039 = vst [vmem:[#allocation2_spill] sm:$0xff] %v1970_v17  ;;  %v1972_v18 = vpop.f32.mrf.mxu0  ;;  %v922_v17 = vadd.f32 %v1326_v40, %v857_v35  ;;  %v876_v35 = vadd.f32 %v1301_v58, %v1159_v30 }
 0x10a   :  { %v1974_v19 = vpop.f32.mrf.mxu1  ;;  %v1369_v14 = vadd.f32 %v1972_v18, %v1968_v16 }
 0x10b   :  { %2040 = vst [vmem:[#allocation3_spill] sm:$0xff] %v1974_v19  ;;  %v1370_v20 = vpop.f32.mrf.mxu0  ;;  %v881_v19 = vadd.f32 %v1304_v34, %v1159_v30  ;;  %v938_v34 = vadd.f32 %v1338_v31, %v873_v47  ;;  %v987_v12 = vadd.f32 %v1366_v53, %v922_v17  ;;  %v941_v17 = vadd.f32 %v1341_v9, %v876_v35 }
 0x10c   :  { %v1976_v21 = vpop.f32.mrf.mxu1 }
 0x10d   :  { %v1371_v22 = vpop.f32.mrf.mxu0  ;;  %v946_v10 = vadd.f32 %v1344_v4, %v881_v19 }
 0x10e   :  { %v1411_v23 = vpop.f32.mrf.mxu1  ;;  %v1372_v56 = vadd.f32 %v1371_v22, %v1370_v20  ;;  %v933_v20 = vadd.f32 %v1335_v8, %v868_v50 }
 0x10f   :  { %v1373_v24 = vpop.f32.mrf.mxu0  ;;  %v1412_v61 = vadd.f32 %v1411_v23, %v1976_v21 }
 0x110   :  { %v1978_v25 = vpop.f32.mrf.mxu1  ;;  %v995_v22 = vadd.f32 %v1372_v56, %v930_v45 }
 0x111   :  { %2041 = vst [vmem:[#allocation4_spill] sm:$0xff] %v1978_v25  ;;  %v1374_v26 = vpop.f32.mrf.mxu0 }
 0x112   :  { %v1980_v28 = vpop.f32.mrf.mxu1  ;;  %v1375_v0 = vadd.f32 %v1374_v26, %v1373_v24  ;;  %v1406_v26 = vadd.f32 %v1966_v15, %v1964_v13  ;;  %v2045_v15 = vld [vmem:[#allocation2_spill] sm:$0xff] }
 0x113   :  { %2042 = vst [vmem:[#allocation5_spill] sm:$0xff] %v1980_v28  ;;  %v1376_v29 = vpop.f32.mrf.mxu0  ;;  %v860_v28 = vadd.f32 %v1289_v36, %v1159_v30  ;;  %v949_v36 = vadd.f32 %v1347_v49, %v884_v60  ;;  %v1060_v30 = vadd.f32 %v1412_v61, %v995_v22 }
 0x114   :  { %v1985_v32 = vpop.f32.mrf.mxu1 }
 0x115   :  { %v1377_v33 = vpop.f32.mrf.mxu0  ;;  %v925_v27 = vadd.f32 %v1329_v48, %v860_v28  ;;  %v998_v28 = vadd.f32 %v1375_v0, %v933_v20  ;;  %v2046_v48 = vld [vmem:[#allocation3_spill] sm:$0xff] }
 0x116   :  { %v1417_v37 = vpop.f32.mrf.mxu1  ;;  %v1378_v51 = vadd.f32 %v1377_v33, %v1376_v29  ;;  %v1409_v50 = vadd.f32 %v2046_v48, %v2045_v15 }
 0x117   :  { %v1379_v38 = vpop.f32.mrf.mxu0  ;;  %v1418_v33 = vadd.f32 %v1417_v37, %v1985_v32  ;;  %v990_v21 = vadd.f32 %v1369_v14, %v925_v27 }
 0x118   :  { %v1987_v44 = vpop.f32.mrf.mxu1  ;;  %v1003_v11 = vadd.f32 %v1378_v51, %v938_v34  ;;  %v2043_v23 = vld [vmem:[#allocation4_spill] sm:$0xff] }
 0x119   :  { %v1380_v46 = vpop.f32.mrf.mxu0 }
 0x11a   :  { %v1989_v54 = vpop.f32.mrf.mxu1  ;;  %v1381_v19 = vadd.f32 %v1380_v46, %v1379_v38  ;;  %v2044_v40 = vld [vmem:[#allocation5_spill] sm:$0xff]  ;;  %v1052_v38 = vadd.f32 %v1406_v26, %v987_v12  ;;  %v1068_v52 = vadd.f32 %v1418_v33, %v1003_v11 }
 0x11b   :  { %v1382_v25 = vpop.f32.mrf.mxu0  ;;  %v1415_v41 = vadd.f32 %v2044_v40, %v2043_v23  ;;  %v1421_v56 = vadd.f32 %v1989_v54, %v1987_v44 }
 0x11c   :  { %v1422_v62 = vpop.f32.mrf.mxu1  ;;  %v1006_v42 = vadd.f32 %v1381_v19, %v941_v17 }
 0x11d   :  { %v1383_v6 = vpop.f32.mrf.mxu0  ;;  %v1063_v4 = vadd.f32 %v1415_v41, %v998_v28 }
 0x11e   :  { %v1384_v55 = vadd.f32 %v1383_v6, %v1382_v25  ;;  %v1423_v5 = vpop.f32.mrf.mxu1  ;;  %v1071_v44 = vadd.f32 %v1421_v56, %v1006_v42 }
 0x11f   :  { %v1385_v7 = vpop.f32.mrf.mxu0  ;;  %v1424_v39 = vadd.f32 %v1423_v5, %v1422_v62  ;;  %v1055_v62 = vadd.f32 %v1409_v50, %v990_v21 }
 0x120   :  { %v1011_v2 = vadd.f32 %v1384_v55, %v946_v10  ;;  %v1425_v57 = vpop.f32.mrf.mxu1 }
 0x121   :  { %v1386_v59 = vpop.f32.mrf.mxu0 }
 0x122   :  { %v1387_v63 = vadd.f32 %v1386_v59, %v1385_v7  ;;  %v1426_v24 = vpop.f32.mrf.mxu1  ;;  %v1076_v25 = vadd.f32 %v1424_v39, %v1011_v2 }
 0x123   :  { %v1427_v16 = vadd.f32 %v1426_v24, %v1425_v57 }
 0x124   :  { %v1014_v29 = vadd.f32 %v1387_v63, %v949_v36  ;;  %v1458_v18 = vpop.f32.mrf.mxu0 }
 0x125   :  { %v1125_v1 = vadd.f32 %v1458_v18, %v1060_v30  ;;  %v1462_v3 = vpop.f32.mrf.mxu1 }
 0x126   :  { %v1141_v43 = vadd.f32 %v1462_v3, %v1076_v25  ;;  %v1116_v46 = vpop.f32.mrf.mxu0  ;;  %v1079_v13 = vadd.f32 %v1427_v16, %v1014_v29 }
 0x127   :  { %1149 = vst [vmem:[%s2038_s3 + $0x10] sm:$0xff] %v1125_v1  ;;  %v1117_v32 = vadd.f32 %v1116_v46, %v1052_v38  ;;  %v1132_v37 = vpop.f32.mrf.mxu1 }
 0x128   :  { %1153 = vst [vmem:[%s2038_s3 + $0x30] sm:$0xff] %v1141_v43  ;;  %v1133_v45 = vadd.f32 %v1132_v37, %v1068_v52  ;;  %v1459_v47 = vpop.f32.mrf.mxu0 }
 0x129   :  { %1147 = vst [vmem:[%s2038_s3] sm:$0xff] %v1117_v32  ;;  %v1128_v58 = vadd.f32 %v1459_v47, %v1063_v4  ;;  %v1463_v60 = vpop.f32.mrf.mxu1 }
 0x12a   :  { %1151 = vst [vmem:[%s2038_s3 + $0x20] sm:$0xff] %v1133_v45  ;;  %v1144_v6 = vadd.f32 %v1463_v60, %v1079_v13  ;;  %v1119_v8 = vpop.f32.mrf.mxu0 }
 0x12b   :  { %1150 = vst [vmem:[%s2038_s3 + $0x18] sm:$0xff] %v1128_v58  ;;  %v1120_v54 = vadd.f32 %v1119_v8, %v1055_v62  ;;  %v1135_v10 = vpop.f32.mrf.mxu1 }
 0x12c   :  { %1154 = vst [vmem:[%s2038_s3 + $0x38] sm:$0xff] %v1144_v6  ;;  %v1136_v53 = vadd.f32 %v1135_v10, %v1071_v44 }
 0x12d   :  { %1148 = vst [vmem:[%s2038_s3 + $0x8] sm:$0xff] %v1120_v54 }
 0x12e   :  { %1152 = vst [vmem:[%s2038_s3 + $0x28] sm:$0xff] %v1136_v53 }

// kernel: _net_forward_impl.235
= control target key start
LH: loop header
LB: loop body
LE: loop exit
PB: predicated region body
PF: predicated region fallthrough
CT: control target
= control target key end

     0   :  { %vm1026_vm0 = vcmask 261120   ;;  %s2565_s1 = inlined_call_operand.vmem [shape: bf16[1440,128], index: 1, kind: input, shape index: {}]   ;;  %s2566_s0 = inlined_call_operand.vmem [shape: bf16[64,1440], index: 0, kind: input, shape index: {}]   ;;  %s2567_s2 = inlined_call_operand.vmem [shape: f32[1,128], index: 2, kind: input, shape index: {}]   ;;  %s2568_s3 = inlined_call_operand.vmem [shape: f32[64,128], index: 3, kind: output, shape index: {}]  }
   0x1   :  { %v1785_v0 = vld [vmem:[%s2565_s1 + $0x78] sm:$0xff]   ;;  %v1789_v4 = vld [vmem:[%s2565_s1 + $0x70] sm:$0xff]   ;;  %v1793_v8 = vld [vmem:[%s2565_s1 + $0x68] sm:$0xff]  }
   0x2   :  { %v1786_v1 = vld [vmem:[%s2565_s1 + $0xf8] sm:$0xff]   ;;  %1584 = vmatprep.subr.bf16.mxu0 %v1785_v0  ;;  %v1790_v5 = vld [vmem:[%s2565_s1 + $0xf0] sm:$0xff]   ;;  %v1794_v9 = vld [vmem:[%s2565_s1 + $0xe8] sm:$0xff]  }
   0x3   :  { %v1787_v2 = vld [vmem:[%s2565_s1 + $0x38] sm:$0xff]   ;;  %1624 = vmatprep.subr.bf16.mxu1 %v1786_v1  ;;  %v1791_v6 = vld [vmem:[%s2565_s1 + $0x30] sm:$0xff]   ;;  %v1795_v10 = vld [vmem:[%s2565_s1 + $0x28] sm:$0xff]  }
   0x4   :  { %v1788_v3 = vld [vmem:[%s2565_s1 + $0xb8] sm:$0xff]   ;;  %1585 = vmatpush3.bf16.msra.mxu0 %v1787_v2  ;;  %v1792_v7 = vld [vmem:[%s2565_s1 + $0xb0] sm:$0xff]   ;;  %v1796_v11 = vld [vmem:[%s2565_s1 + $0xa8] sm:$0xff]  }
   0x5   :  { %1625 = vmatpush3.bf16.msra.mxu1 %v1788_v3  ;;  %1586 = vmatprep.subr.bf16.mxu0 %v1789_v4  ;;  %v1797_v12 = vld [vmem:[%s2565_s1 + $0x60] sm:$0xff]   ;;  %v1801_v16 = vld [vmem:[%s2565_s1 + $0x58] sm:$0xff]   ;;  %v1805_v20 = vld [vmem:[%s2565_s1 + $0x50] sm:$0xff]  }
   0x6   :  { %1626 = vmatprep.subr.bf16.mxu1 %v1790_v5  ;;  %v1798_v13 = vld [vmem:[%s2565_s1 + $0xe0] sm:$0xff]   ;;  %v1802_v17 = vld [vmem:[%s2565_s1 + $0xd8] sm:$0xff]   ;;  %v1806_v21 = vld [vmem:[%s2565_s1 + $0xd0] sm:$0xff]  }
   0x7   :  { %v1799_v14 = vld [vmem:[%s2565_s1 + $0x20] sm:$0xff]   ;;  %v1803_v18 = vld [vmem:[%s2565_s1 + $0x18] sm:$0xff]   ;;  %v1807_v22 = vld [vmem:[%s2565_s1 + $0x10] sm:$0xff]  }
   0x8   :  { %1587 = vmatpush3.bf16.msra.mxu0 %v1791_v6  ;;  %v1800_v15 = vld [vmem:[%s2565_s1 + $0xa0] sm:$0xff]   ;;  %v1804_v19 = vld [vmem:[%s2565_s1 + $0x98] sm:$0xff]   ;;  %v1808_v23 = vld [vmem:[%s2565_s1 + $0x90] sm:$0xff]  }
   0x9   :  { %1627 = vmatpush3.bf16.msra.mxu1 %v1792_v7  ;;  %1588 = vmatprep.subr.bf16.mxu0 %v1793_v8  ;;  %v1809_v24 = vld [vmem:[%s2565_s1 + $0x48] sm:$0xff]   ;;  %v1813_v28 = vld [vmem:[%s2565_s1 + $0x40] sm:$0xff]   ;;  %v1823_v36 = vld [vmem:[%s2565_s1 + $0x178] sm:$0xff]  }
   0xa   :  { %1628 = vmatprep.subr.bf16.mxu1 %v1794_v9  ;;  %v1810_v25 = vld [vmem:[%s2565_s1 + $0xc8] sm:$0xff]   ;;  %v1814_v29 = vld [vmem:[%s2565_s1 + $0xc0] sm:$0xff]   ;;  %v1824_v37 = vld [vmem:[%s2565_s1 + $0x1f8] sm:$0xff]  }
   0xb   :  { %v1811_v26 = vld [vmem:[%s2565_s1 + $0x8] sm:$0xff]   ;;  %v1815_v30 = vld [vmem:[%s2565_s1] sm:$0xff]   ;;  %v1825_v38 = vld [vmem:[%s2565_s1 + $0x138] sm:$0xff]  }
   0xc   :  { %1589 = vmatpush3.bf16.msra.mxu0 %v1795_v10  ;;  %v1812_v27 = vld [vmem:[%s2565_s1 + $0x88] sm:$0xff]   ;;  %v1816_v31 = vld [vmem:[%s2565_s1 + $0x80] sm:$0xff]   ;;  %v1826_v39 = vld [vmem:[%s2565_s1 + $0x1b8] sm:$0xff]  }
   0xd   :  { %1629 = vmatpush3.bf16.msra.mxu1 %v1796_v11  ;;  %1590 = vmatprep.subr.bf16.mxu0 %v1797_v12  ;;  %v1817_v32 = vld [vmem:[%s2566_s0] ss:$48 sps:$4 sm:$0xff]   ;;  %v1819_v33 = vld [vmem:[%s2566_s0 + $0x4] ss:$48 sps:$4 sm:$0xff]   ;;  %v1820_v34 = vld [vmem:[%s2566_s0 + $0x8] ss:$48 sps:$4 sm:$0xff]  }
   0xe   :  { %1630 = vmatprep.subr.bf16.mxu1 %v1798_v13  ;;  %v1822_v35 = vld [vmem:[%s2566_s0 + $0xc] ss:$48 sps:$4 sm:$0xff]   ;;  %1071 = vmatprep.mubr.bf16.mxu0 %v1819_v33  ;;  %v1827_v40 = vld [vmem:[%s2565_s1 + $0x170] sm:$0xff]   ;;  %v1836_v47 = vld [vmem:[%s2566_s0 + $0x68] ss:$48 sps:$4 sm:$0xff]  }
   0xf   :  { %1136 = vmatprep.mubr.bf16.mxu1 %v1822_v35  ;;  %v1828_v41 = vld [vmem:[%s2565_s1 + $0x1f0] sm:$0xff]   ;;  %v1833_v45 = vld [vmem:[%s2566_s0 + $0x6c] ss:$48 sps:$4 sm:$0xff]   ;;  %v1841_v52 = vld [vmem:[%s2565_s1 + $0x160] sm:$0xff]  }
  0x10   :  { %1591 = vmatpush3.bf16.msra.mxu0 %v1799_v14  ;;  %v1829_v42 = vld [vmem:[%s2565_s1 + $0x130] sm:$0xff]   ;;  %v1837_v48 = vld [vmem:[%s2565_s1 + $0x168] sm:$0xff]   ;;  %v1842_v53 = vld [vmem:[%s2565_s1 + $0x1e0] sm:$0xff]  }
  0x11   :  { %1631 = vmatpush3.bf16.msra.mxu1 %v1800_v15  ;;  %1592 = vmatprep.subr.bf16.mxu0 %v1801_v16  ;;  %v1830_v43 = vld [vmem:[%s2565_s1 + $0x1b0] sm:$0xff]   ;;  %v1838_v49 = vld [vmem:[%s2565_s1 + $0x1e8] sm:$0xff]   ;;  %v1843_v54 = vld [vmem:[%s2565_s1 + $0x120] sm:$0xff]  }
  0x12   :  { %1632 = vmatprep.subr.bf16.mxu1 %v1802_v17  ;;  %v1831_v44 = vld [vmem:[%s2566_s0 + $0x64] ss:$48 sps:$4 sm:$0xff]   ;;  %v1835_v46 = vld [vmem:[%s2566_s0 + $0x60] ss:$48 sps:$4 sm:$0xff]   ;;  %v1839_v50 = vld [vmem:[%s2565_s1 + $0x128] sm:$0xff]  }
  0x13   :  { %v1840_v51 = vld [vmem:[%s2565_s1 + $0x1a8] sm:$0xff]   ;;  %v1844_v55 = vld [vmem:[%s2565_s1 + $0x1a0] sm:$0xff]   ;;  %v1851_v60 = vld [vmem:[%s2565_s1 + $0x158] sm:$0xff]  }
  0x14   :  { %1593 = vmatpush3.bf16.msra.mxu0 %v1803_v18  ;;  %v1845_v56 = vld [vmem:[%s2566_s0 + $0xc4] ss:$48 sps:$4 sm:$0xff]   ;;  %v1847_v57 = vld [vmem:[%s2566_s0 + $0xcc] ss:$48 sps:$4 sm:$0xff]   ;;  %v1849_v58 = vld [vmem:[%s2566_s0 + $0xc0] ss:$48 sps:$4 sm:$0xff]  }
  0x15   :  { %1633 = vmatpush3.bf16.msra.mxu1 %v1804_v19  ;;  %1594 = vmatprep.subr.bf16.mxu0 %v1805_v20  ;;  %v1850_v59 = vld [vmem:[%s2566_s0 + $0xc8] ss:$48 sps:$4 sm:$0xff]   ;;  %v1855_v0 = vld [vmem:[%s2565_s1 + $0x150] sm:$0xff]   ;;  %v1861_v5 = vld [vmem:[%s2566_s0 + $0x12c] ss:$48 sps:$4 sm:$0xff]   ;;  %v1947_v20 = vmov 0  }
  0x16   :  { %1634 = vmatprep.subr.bf16.mxu1 %v1806_v21  ;;  %v1852_v61 = vld [vmem:[%s2565_s1 + $0x1d8] sm:$0xff]   ;;  %v1856_v1 = vld [vmem:[%s2565_s1 + $0x1d0] sm:$0xff]   ;;  %v1865_v8 = vld [vmem:[%s2565_s1 + $0x148] sm:$0xff]  }
  0x17   :  { %v1853_v62 = vld [vmem:[%s2565_s1 + $0x118] sm:$0xff]   ;;  %v1857_v2 = vld [vmem:[%s2565_s1 + $0x110] sm:$0xff]   ;;  %v1866_v9 = vld [vmem:[%s2565_s1 + $0x1c8] sm:$0xff]  }
  0x18   :  { %1595 = vmatpush3.bf16.msra.mxu0 %v1807_v22  ;;  %v1854_v63 = vld [vmem:[%s2565_s1 + $0x198] sm:$0xff]   ;;  %v1858_v3 = vld [vmem:[%s2565_s1 + $0x190] sm:$0xff]   ;;  %v1867_v10 = vld [vmem:[%s2565_s1 + $0x108] sm:$0xff]  }
  0x19   :  { %1635 = vmatpush3.bf16.msra.mxu1 %v1808_v23  ;;  %1596 = vmatprep.subr.bf16.mxu0 %v1809_v24  ;;  %v1859_v4 = vld [vmem:[%s2566_s0 + $0x124] ss:$48 sps:$4 sm:$0xff]   ;;  %v1863_v6 = vld [vmem:[%s2566_s0 + $0x120] ss:$48 sps:$4 sm:$0xff]   ;;  %v1864_v7 = vld [vmem:[%s2566_s0 + $0x128] ss:$48 sps:$4 sm:$0xff]  }
  0x1a   :  { %1636 = vmatprep.subr.bf16.mxu1 %v1810_v25  ;;  %v1868_v11 = vld [vmem:[%s2565_s1 + $0x188] sm:$0xff]   ;;  %v1869_v12 = vld [vmem:[%s2565_s1 + $0x140] sm:$0xff]   ;;  %v1879_v21 = vld [vmem:[%s2565_s1 + $0x278] sm:$0xff]  }
  0x1b   :  { %v1870_v13 = vld [vmem:[%s2565_s1 + $0x1c0] sm:$0xff]   ;;  %v1876_v18 = vld [vmem:[%s2566_s0 + $0x18] ss:$48 sps:$4 sm:$0xff]   ;;  %v1878_v19 = vld [vmem:[%s2566_s0 + $0x1c] ss:$48 sps:$4 sm:$0xff]  }
  0x1c   :  { %1597 = vmatpush3.bf16.msra.mxu0 %v1811_v26  ;;  %v1871_v14 = vld [vmem:[%s2565_s1 + $0x100] sm:$0xff]   ;;  %v1880_v22 = vld [vmem:[%s2565_s1 + $0x238] sm:$0xff]   ;;  %v1882_v24 = vld [vmem:[%s2565_s1 + $0x270] sm:$0xff]  }
  0x1d   :  { %1637 = vmatpush3.bf16.msra.mxu1 %v1812_v27  ;;  %1598 = vmatprep.subr.bf16.mxu0 %v1813_v28  ;;  %v1872_v15 = vld [vmem:[%s2565_s1 + $0x180] sm:$0xff]   ;;  %v1881_v23 = vld [vmem:[%s2565_s1 + $0x2b8] sm:$0xff]   ;;  %v1883_v25 = vld [vmem:[%s2565_s1 + $0x230] sm:$0xff]  }
  0x1e   :  { %1638 = vmatprep.subr.bf16.mxu1 %v1814_v29  ;;  %v1873_v16 = vld [vmem:[%s2566_s0 + $0x10] ss:$48 sps:$4 sm:$0xff]   ;;  %v1875_v17 = vld [vmem:[%s2566_s0 + $0x14] ss:$48 sps:$4 sm:$0xff]   ;;  %v1888_v29 = vld [vmem:[%s2565_s1 + $0x268] sm:$0xff]  }
  0x1f   :  { %v1884_v26 = vld [vmem:[%s2565_s1 + $0x2b0] sm:$0xff]   ;;  %v1893_v33 = vld [vmem:[%s2566_s0 + $0x78] ss:$48 sps:$4 sm:$0xff]   ;;  %v1895_v35 = vld [vmem:[%s2565_s1 + $0x220] sm:$0xff]  }
  0x20   :  { %1599 = vmatpush3.bf16.msra.mxu0 %v1815_v30  ;;  %v1885_v27 = vld [vmem:[%s2566_s0 + $0x74] ss:$48 sps:$4 sm:$0xff]   ;;  %v1887_v28 = vld [vmem:[%s2566_s0 + $0x70] ss:$48 sps:$4 sm:$0xff]   ;;  %v1889_v30 = vld [vmem:[%s2566_s0 + $0x7c] ss:$48 sps:$4 sm:$0xff]  }
  0x21   :  { %1639 = vmatpush3.bf16.msra.mxu1 %v1816_v31  ;;  %1664 = vmatprep.subr.bf16.mxu0 %v1823_v36  ;;  %v1891_v31 = vld [vmem:[%s2565_s1 + $0x228] sm:$0xff]   ;;  %v1896_v36 = vld [vmem:[%s2565_s1 + $0x2a0] sm:$0xff]  }
  0x22   :  { %1704 = vmatprep.subr.bf16.mxu1 %v1824_v37  ;;  %v1897_v37 = vld [vmem:[%s2566_s0 + $0xd4] ss:$48 sps:$4 sm:$0xff]  }
  0x23   :  { %1072 = vmatmul.mubr.bf16.vlgmr.msra.gmra.mxu0 %v1817_v32  ;;  %v1892_v32 = vld [vmem:[%s2565_s1 + $0x2a8] sm:$0xff]  }
  0x24   :  { %1137 = vmatmul.mubr.bf16.vlgmr.msra.gmra.mxu1 %v1820_v34  ;;  %1665 = vmatpush3.bf16.msra.mxu0 %v1825_v38  ;;  %v1894_v34 = vld [vmem:[%s2565_s1 + $0x260] sm:$0xff]  }
  0x25   :  { %1705 = vmatpush3.bf16.msra.mxu1 %v1826_v39  ;;  %1666 = vmatprep.subr.bf16.mxu0 %v1827_v40  ;;  %v1899_v38 = vld [vmem:[%s2566_s0 + $0xd0] ss:$48 sps:$4 sm:$0xff]   ;;  %v1900_v39 = vld [vmem:[%s2565_s1 + $0x258] sm:$0xff]  }
  0x26   :  { %1706 = vmatprep.subr.bf16.mxu1 %v1828_v41  ;;  %1079 = vmatprep.mubr.bf16.mxu0 %v1831_v44  ;;  %v1901_v40 = vld [vmem:[%s2566_s0 + $0xdc] ss:$48 sps:$4 sm:$0xff]   ;;  %v1906_v44 = vld [vmem:[%s2565_s1 + $0x250] sm:$0xff]  }
  0x27   :  { %1144 = vmatprep.mubr.bf16.mxu1 %v1833_v45  ;;  %v1903_v41 = vld [vmem:[%s2565_s1 + $0x218] sm:$0xff]   ;;  %v1907_v45 = vld [vmem:[%s2565_s1 + $0x210] sm:$0xff]  }
  0x28   :  { %1667 = vmatpush3.bf16.msra.mxu0 %v1829_v42  ;;  %v1904_v42 = vld [vmem:[%s2565_s1 + $0x298] sm:$0xff]  }
  0x29   :  { %1707 = vmatpush3.bf16.msra.mxu1 %v1830_v43  ;;  %1668 = vmatprep.subr.bf16.mxu0 %v1837_v48  ;;  %v1905_v43 = vld [vmem:[%s2566_s0 + $0xd8] ss:$48 sps:$4 sm:$0xff]   ;;  %v1911_v48 = vld [vmem:[%s2566_s0 + $0x130] ss:$48 sps:$4 sm:$0xff]  }
  0x2a   :  { %1708 = vmatprep.subr.bf16.mxu1 %v1838_v49  ;;  %v1912_v49 = vld [vmem:[%s2565_s1 + $0x248] sm:$0xff]  }
  0x2b   :  { %1080 = vmatmul.mubr.bf16.gmra.mxu0 %v1835_v46  ;;  %v1908_v46 = vld [vmem:[%s2565_s1 + $0x290] sm:$0xff]  }
  0x2c   :  { %1145 = vmatmul.mubr.bf16.gmra.mxu1 %v1836_v47  ;;  %1669 = vmatpush3.bf16.msra.mxu0 %v1839_v50  ;;  %v1909_v47 = vld [vmem:[%s2566_s0 + $0x134] ss:$48 sps:$4 sm:$0xff]   ;;  %v1913_v50 = vld [vmem:[%s2566_s0 + $0x13c] ss:$48 sps:$4 sm:$0xff]  }
  0x2d   :  { %1709 = vmatpush3.bf16.msra.mxu1 %v1840_v51  ;;  %1670 = vmatprep.subr.bf16.mxu0 %v1841_v52  ;;  %v1915_v51 = vld [vmem:[%s2565_s1 + $0x208] sm:$0xff]  }
  0x2e   :  { %1710 = vmatprep.subr.bf16.mxu1 %v1842_v53  ;;  %1087 = vmatprep.mubr.bf16.mxu0 %v1845_v56  ;;  %v1916_v52 = vld [vmem:[%s2565_s1 + $0x288] sm:$0xff]   ;;  %v1920_v56 = vld [vmem:[%s2565_s1 + $0x280] sm:$0xff]  }
  0x2f   :  { %1152 = vmatprep.mubr.bf16.mxu1 %v1847_v57  ;;  %v1917_v53 = vld [vmem:[%s2566_s0 + $0x138] ss:$48 sps:$4 sm:$0xff]   ;;  %v1921_v57 = vld [vmem:[%s2566_s0 + $0x20] ss:$48 sps:$4 sm:$0xff]  }
  0x30   :  { %1671 = vmatpush3.bf16.msra.mxu0 %v1843_v54  ;;  %v1918_v54 = vld [vmem:[%s2565_s1 + $0x240] sm:$0xff]  }
  0x31   :  { %1711 = vmatpush3.bf16.msra.mxu1 %v1844_v55  ;;  %1672 = vmatprep.subr.bf16.mxu0 %v1851_v60  ;;  %v1919_v55 = vld [vmem:[%s2565_s1 + $0x200] sm:$0xff]  }
  0x32   :  { %1712 = vmatprep.subr.bf16.mxu1 %v1852_v61  ;;  %v1926_v60 = vld [vmem:[%s2566_s0 + $0x84] ss:$48 sps:$4 sm:$0xff]   ;;  %v1930_v61 = vld [vmem:[%s2566_s0 + $0x2c] ss:$48 sps:$4 sm:$0xff]  }
  0x33   :  { %1088 = vmatmul.mubr.bf16.gmra.mxu0 %v1849_v58  ;;  %v1923_v58 = vld [vmem:[%s2566_s0 + $0x24] ss:$48 sps:$4 sm:$0xff]  }
  0x34   :  { %1153 = vmatmul.mubr.bf16.gmra.mxu1 %v1850_v59  ;;  %1673 = vmatpush3.bf16.msra.mxu0 %v1853_v62  ;;  %v1924_v59 = vld [vmem:[%s2565_s1 + $0x2c8] sm:$0xff]   ;;  %v1925_v62 = vld [vmem:[%s2565_s1 + $0x2c0] sm:$0xff]  }
  0x35   :  { %1713 = vmatpush3.bf16.msra.mxu1 %v1854_v63  ;;  %1674 = vmatprep.subr.bf16.mxu0 %v1855_v0  ;;  %v1928_v63 = vld [vmem:[%s2566_s0 + $0x28] ss:$48 sps:$4 sm:$0xff]   ;;  %v1931_v0 = vld [vmem:[%s2566_s0 + $0x80] ss:$48 sps:$4 sm:$0xff]  }
  0x36   :  { %1714 = vmatprep.subr.bf16.mxu1 %v1856_v1  ;;  %1095 = vmatprep.mubr.bf16.mxu0 %v1859_v4  ;;  %v1932_v1 = vld [vmem:[%s2566_s0 + $0xe4] ss:$48 sps:$4 sm:$0xff]   ;;  %v1937_v4 = vld [vmem:[%s2566_s0 + $0x88] ss:$48 sps:$4 sm:$0xff]  }
  0x37   :  { %1160 = vmatprep.mubr.bf16.mxu1 %v1861_v5  ;;  %v1938_v5 = vld [vmem:[%s2566_s0 + $0x144] ss:$48 sps:$4 sm:$0xff]  }
  0x38   :  { %1675 = vmatpush3.bf16.msra.mxu0 %v1857_v2  ;;  %v1934_v2 = vld [vmem:[%s2566_s0 + $0x8c] ss:$48 sps:$4 sm:$0xff]  }
  0x39   :  { %1715 = vmatpush3.bf16.msra.mxu1 %v1858_v3  ;;  %1676 = vmatprep.subr.bf16.mxu0 %v1865_v8  ;;  %v1936_v3 = vld [vmem:[%s2566_s0 + $0xe0] ss:$48 sps:$4 sm:$0xff]   ;;  %v1943_v8 = vld [vmem:[%s2566_s0 + $0xe8] ss:$48 sps:$4 sm:$0xff]  }
  0x3a   :  { %1716 = vmatprep.subr.bf16.mxu1 %v1866_v9  ;;  %v1944_v9 = vld [vmem:[%s2566_s0 + $0x14c] ss:$48 sps:$4 sm:$0xff]  }
  0x3b   :  { %1096 = vmatmul.mubr.bf16.gmra.mxu0 %v1863_v6  ;;  %v1940_v6 = vld [vmem:[%s2566_s0 + $0xec] ss:$48 sps:$4 sm:$0xff]  }
  0x3c   :  { %1161 = vmatmul.mubr.bf16.gmra.mxu1 %v1864_v7  ;;  %1677 = vmatpush3.bf16.msra.mxu0 %v1867_v10  ;;  %v1942_v7 = vld [vmem:[%s2566_s0 + $0x140] ss:$48 sps:$4 sm:$0xff]   ;;  %v1946_v10 = vld [vmem:[%s2566_s0 + $0x148] ss:$48 sps:$4 sm:$0xff]  }
  0x3d   :  { %1717 = vmatpush3.bf16.msra.mxu1 %v1868_v11  ;;  %1678 = vmatprep.subr.bf16.mxu0 %v1869_v12 }
  0x3e   :  { %1718 = vmatprep.subr.bf16.mxu1 %v1870_v13  ;;  %1201 = vmatprep.mubr.bf16.mxu0 %v1875_v17 }
  0x3f   :  { %1266 = vmatprep.mubr.bf16.mxu1 %v1878_v19 }
  0x40   :  { %1679 = vmatpush3.bf16.msra.mxu0 %v1871_v14 }
  0x41   :  { %1719 = vmatpush3.bf16.msra.mxu1 %v1872_v15  ;;  %1744 = vmatprep.subr.bf16.mxu0 %v1879_v21 }
  0x42   :  { %1364 = vmatprep.subr.bf16.mxu1 %v1947_v20 }
  0x43   :  { %1202 = vmatmul.mubr.bf16.vlgmr.msra.gmra.mxu0 %v1873_v16 }
  0x44   :  { %1267 = vmatmul.mubr.bf16.vlgmr.msra.gmra.mxu1 %v1876_v18  ;;  %1745 = vmatpush3.bf16.msra.mxu0 %v1880_v22 }
  0x45   :  { %1365 = vmatpush1.bf16.msra.mxu1 %v1881_v23  ;;  %1746 = vmatprep.subr.bf16.mxu0 %v1882_v24 }
  0x46   :  { %1366 = vmatprep.subr.bf16.mxu1 %v1947_v20  ;;  %1209 = vmatprep.mubr.bf16.mxu0 %v1885_v27 }
  0x47   :  { %1274 = vmatprep.mubr.bf16.mxu1 %v1889_v30 }
  0x48   :  { %1747 = vmatpush3.bf16.msra.mxu0 %v1883_v25 }
  0x49   :  { %1367 = vmatpush1.bf16.msra.mxu1 %v1884_v26  ;;  %1748 = vmatprep.subr.bf16.mxu0 %v1888_v29 }
  0x4a   :  { %1368 = vmatprep.subr.bf16.mxu1 %v1947_v20 }
  0x4b   :  { %1210 = vmatmul.mubr.bf16.gmra.mxu0 %v1887_v28 }
  0x4c   :  { %1749 = vmatpush3.bf16.msra.mxu0 %v1891_v31  ;;  %1275 = vmatmul.mubr.bf16.gmra.mxu1 %v1893_v33 }
  0x4d   :  { %1369 = vmatpush1.bf16.msra.mxu1 %v1892_v32  ;;  %1750 = vmatprep.subr.bf16.mxu0 %v1894_v34 }
  0x4e   :  { %1370 = vmatprep.subr.bf16.mxu1 %v1947_v20  ;;  %1217 = vmatprep.mubr.bf16.mxu0 %v1897_v37 }
  0x4f   :  { %1282 = vmatprep.mubr.bf16.mxu1 %v1901_v40 }
  0x50   :  { %1751 = vmatpush3.bf16.msra.mxu0 %v1895_v35 }
  0x51   :  { %1371 = vmatpush1.bf16.msra.mxu1 %v1896_v36  ;;  %1752 = vmatprep.subr.bf16.mxu0 %v1900_v39 }
  0x52   :  { %1372 = vmatprep.subr.bf16.mxu1 %v1947_v20 }
  0x53   :  { %1218 = vmatmul.mubr.bf16.gmra.mxu0 %v1899_v38 }
  0x54   :  { %1753 = vmatpush3.bf16.msra.mxu0 %v1903_v41  ;;  %1283 = vmatmul.mubr.bf16.gmra.mxu1 %v1905_v43 }
  0x55   :  { %1373 = vmatpush1.bf16.msra.mxu1 %v1904_v42  ;;  %1754 = vmatprep.subr.bf16.mxu0 %v1906_v44 }
  0x56   :  { %1374 = vmatprep.subr.bf16.mxu1 %v1947_v20  ;;  %1225 = vmatprep.mubr.bf16.mxu0 %v1909_v47 }
  0x57   :  { %1290 = vmatprep.mubr.bf16.mxu1 %v1913_v50 }
  0x58   :  { %1755 = vmatpush3.bf16.msra.mxu0 %v1907_v45 }
  0x59   :  { %1375 = vmatpush1.bf16.msra.mxu1 %v1908_v46  ;;  %1756 = vmatprep.subr.bf16.mxu0 %v1912_v49 }
  0x5a   :  { %1376 = vmatprep.subr.bf16.mxu1 %v1947_v20 }
  0x5b   :  { %1226 = vmatmul.mubr.bf16.gmra.mxu0 %v1911_v48 }
  0x5c   :  { %1757 = vmatpush3.bf16.msra.mxu0 %v1915_v51  ;;  %1291 = vmatmul.mubr.bf16.gmra.mxu1 %v1917_v53 }
  0x5d   :  { %1377 = vmatpush1.bf16.msra.mxu1 %v1916_v52  ;;  %1758 = vmatprep.subr.bf16.mxu0 %v1918_v54 }
  0x5e   :  { %1378 = vmatprep.subr.bf16.mxu1 %v1947_v20  ;;  %1331 = vmatprep.mubr.bf16.mxu0 %v1923_v58 }
  0x5f   :  { %1580 = vmatprep.mubr.msk.bf16.mxu1 %vm1026_vm0, %v1930_v61 }
  0x60   :  { %1759 = vmatpush3.bf16.msra.mxu0 %v1919_v55 }
  0x61   :  { %1379 = vmatpush1.bf16.msra.mxu1 %v1920_v56 }
  0x62   :  { %1392 = vmatprep.subr.bf16.mxu1 %v1947_v20 }
  0x63   :  { %1332 = vmatmul.mubr.bf16.vlgmr.msra.gmra.mxu0 %v1921_v57 }
  0x64   :  { %1339 = vmatprep.mubr.bf16.mxu0 %v1926_v60 }
  0x65   :  { %1393 = vmatpush2.bf16.msra.mxu1 %v1924_v59 }
  0x66   :  { %1394 = vmatprep.subr.bf16.mxu1 %v1947_v20 }
  0x69   :  { %1395 = vmatpush2.bf16.msra.mxu1 %v1925_v62 }
  0x6b   :  { %1340 = vmatmul.mubr.bf16.gmra.mxu0 %v1931_v0 }
  0x6c   :  { %1397 = vmatmul.mubr.bf16.vlgmr.msra.gmra.mxu1 %v1928_v63  ;;  %1347 = vmatprep.mubr.bf16.mxu0 %v1932_v1 }
  0x6d   :  { %1581 = vmatprep.mubr.msk.bf16.mxu1 %vm1026_vm0, %v1934_v2 }
  0x73   :  { %1348 = vmatmul.mubr.bf16.gmra.mxu0 %v1936_v3 }
  0x74   :  { %1405 = vmatmul.mubr.bf16.gmra.mxu1 %v1937_v4  ;;  %1355 = vmatprep.mubr.bf16.mxu0 %v1938_v5  ;;  %v2471_v4 = vld [vmem:[%s2567_s2] ss:$0 sm:$0xff] }
  0x75   :  { %1582 = vmatprep.mubr.msk.bf16.mxu1 %vm1026_vm0, %v1940_v6 }
  0x7b   :  { %1356 = vmatmul.mubr.bf16.gmra.mxu0 %v1942_v7 }
  0x7c   :  { %1413 = vmatmul.mubr.bf16.gmra.mxu1 %v1943_v8 }
  0x7d   :  { %1583 = vmatprep.mubr.msk.bf16.mxu1 %vm1026_vm0, %v1944_v9 }
  0x84   :  { %1421 = vmatmul.mubr.bf16.gmra.mxu1 %v1946_v10 }
  0xe3   :  { %v1600_v11 = vpop.f32.mrf.mxu0 }
  0xe4   :  { %v2396_v12 = vpop.f32.mrf.mxu1 }
  0xe5   :  { %v1601_v13 = vpop.f32.mrf.mxu0 }
  0xe6   :  { %v2398_v14 = vpop.f32.mrf.mxu1  ;;  %v1602_v3 = vadd.f32 %v1601_v13, %v1600_v11 }
  0xe7   :  { %v1603_v15 = vpop.f32.mrf.mxu0  ;;  %v1642_v11 = vadd.f32 %v2398_v14, %v2396_v12 }
  0xe8   :  { %v2400_v16 = vpop.f32.mrf.mxu1  ;;  %v1074_v9 = vadd.f32 %v1602_v3, %v2471_v4 }
  0xe9   :  { %v1604_v17 = vpop.f32.mrf.mxu0 }
  0xea   :  { %v2402_v18 = vpop.f32.mrf.mxu1  ;;  %v1605_v10 = vadd.f32 %v1604_v17, %v1603_v15 }
  0xeb   :  { %v1606_v19 = vpop.f32.mrf.mxu0 }
  0xec   :  { %v2404_v20 = vpop.f32.mrf.mxu1 }
  0xed   :  { %v1607_v21 = vpop.f32.mrf.mxu0 }
  0xee   :  { %v2406_v22 = vpop.f32.mrf.mxu1 }
  0xef   :  { %v2408_v23 = vpop.f32.mrf.mxu0 }
  0xf0   :  { %v2410_v24 = vpop.f32.mrf.mxu1 }
  0xf1   :  { %v2412_v25 = vpop.f32.mrf.mxu0 }
  0xf2   :  { %v2414_v26 = vpop.f32.mrf.mxu1  ;;  %v1611_v17 = vadd.f32 %v2412_v25, %v2408_v23 }
  0xf3   :  { %v2416_v27 = vpop.f32.mrf.mxu0 }
  0xf4   :  { %v2418_v28 = vpop.f32.mrf.mxu1 }
  0xf5   :  { %v2420_v29 = vpop.f32.mrf.mxu0 }
  0xf6   :  { %v2422_v30 = vpop.f32.mrf.mxu1  ;;  %v1614_v23 = vadd.f32 %v2420_v29, %v2416_v27 }
  0xf7   :  { %v2424_v31 = vpop.f32.mrf.mxu0 }
  0xf8   :  { %v2426_v32 = vpop.f32.mrf.mxu1  ;;  %v1090_v27 = vadd.f32 %v1614_v23, %v2471_v4 }
  0xf9   :  { %v2428_v33 = vpop.f32.mrf.mxu0 }
  0xfa   :  { %v2430_v34 = vpop.f32.mrf.mxu1 }
  0xfb   :  { %v2432_v35 = vpop.f32.mrf.mxu0 }
  0xfc   :  { %v2434_v36 = vpop.f32.mrf.mxu1 }
  0xfd   :  { %2569 = vst [vmem:[#allocation2_spill] sm:$0xff] %v2434_v36  ;;  %v2436_v37 = vpop.f32.mrf.mxu0  ;;  %v1077_v36 = vadd.f32 %v1605_v10, %v2471_v4 }
  0xfe   :  { %v2438_v38 = vpop.f32.mrf.mxu1 }
  0xff   :  { %2570 = vst [vmem:[#allocation3_spill] sm:$0xff] %v2438_v38  ;;  %v2440_v39 = vpop.f32.mrf.mxu0  ;;  %v1139_v38 = vadd.f32 %v1642_v11, %v1074_v9 }
 0x100   :  { %v2442_v40 = vpop.f32.mrf.mxu1 }
 0x101   :  { %2571 = vst [vmem:[#allocation4_spill] sm:$0xff] %v2442_v40  ;;  %v2444_v41 = vpop.f32.mrf.mxu0  ;;  %v1608_v40 = vadd.f32 %v1607_v21, %v1606_v19 }
 0x102   :  { %v2446_v42 = vpop.f32.mrf.mxu1 }
 0x103   :  { %2572 = vst [vmem:[#allocation5_spill] sm:$0xff] %v2446_v42  ;;  %v1680_v43 = vpop.f32.mrf.mxu0  ;;  %v1082_v15 = vadd.f32 %v1608_v40, %v2471_v4 }
 0x104   :  { %v1720_v44 = vpop.f32.mrf.mxu1 }
 0x105   :  { %v1681_v45 = vpop.f32.mrf.mxu0 }
 0x106   :  { %v1721_v46 = vpop.f32.mrf.mxu1  ;;  %v1682_v13 = vadd.f32 %v1681_v45, %v1680_v43  ;;  %v1648_v45 = vadd.f32 %v2406_v22, %v2404_v20  ;;  %v1651_v20 = vadd.f32 %v2414_v26, %v2410_v24  ;;  %v1654_v24 = vadd.f32 %v2422_v30, %v2418_v28 }
 0x107   :  { %v1683_v47 = vpop.f32.mrf.mxu0  ;;  %v1722_v19 = vadd.f32 %v1721_v46, %v1720_v44 }
 0x108   :  { %v1723_v49 = vpop.f32.mrf.mxu1 }
 0x109   :  { %v1684_v48 = vpop.f32.mrf.mxu0 }
 0x10a   :  { %v1724_v51 = vpop.f32.mrf.mxu1 }
 0x10b   :  { %v1686_v50 = vpop.f32.mrf.mxu0  ;;  %v1725_v25 = vadd.f32 %v1724_v51, %v1723_v49 }
 0x10c   :  { %v1726_v53 = vpop.f32.mrf.mxu1 }
 0x10d   :  { %v1687_v52 = vpop.f32.mrf.mxu0 }
 0x10e   :  { %v1727_v55 = vpop.f32.mrf.mxu1  ;;  %v1688_v9 = vadd.f32 %v1687_v52, %v1686_v50 }
 0x10f   :  { %v1689_v54 = vpop.f32.mrf.mxu0 }
 0x110   :  { %v2448_v57 = vpop.f32.mrf.mxu1 }
 0x111   :  { %v1690_v56 = vpop.f32.mrf.mxu0 }
 0x112   :  { %v2452_v59 = vpop.f32.mrf.mxu1  ;;  %v1691_v50 = vadd.f32 %v1690_v56, %v1689_v54 }
 0x113   :  { %v2450_v58 = vpop.f32.mrf.mxu0 }
 0x114   :  { %v2458_v62 = vpop.f32.mrf.mxu1 }
 0x115   :  { %v2454_v60 = vpop.f32.mrf.mxu0 }
 0x116   :  { %v2462_v0 = vpop.f32.mrf.mxu1 }
 0x117   :  { %v2456_v61 = vpop.f32.mrf.mxu0 }
 0x118   :  { %v2464_v1 = vpop.f32.mrf.mxu1 }
 0x119   :  { %v2460_v63 = vpop.f32.mrf.mxu0 }
 0x11a   :  { %v2473_v5 = vpop.f32.mrf.mxu1 }
 0x11b   :  { %v2466_v2 = vpop.f32.mrf.mxu0  ;;  %2574 = vst [vmem:[#allocation7_spill] sm:$0xff] %v2473_v5  ;;  %v1685_v5 = vadd.f32 %v1684_v48, %v1683_v47  ;;  %v1085_v47 = vadd.f32 %v1611_v17, %v2471_v4  ;;  %v1155_v17 = vadd.f32 %v1654_v24, %v1090_v27 }
 0x11c   :  { %2573 = vst [vmem:[#allocation6_spill] sm:$0xff] %v2466_v2  ;;  %v2477_v7 = vpop.f32.mrf.mxu1 }
 0x11d   :  { %v2475_v6 = vpop.f32.mrf.mxu0  ;;  %2576 = vst [vmem:[#allocation9_spill] sm:$0xff] %v2477_v7  ;;  %v1645_v7 = vadd.f32 %v2402_v18, %v2400_v16 }
 0x11e   :  { %2575 = vst [vmem:[#allocation8_spill] sm:$0xff] %v2475_v6  ;;  %v2486_v2 = vpop.f32.mrf.mxu1 }
 0x11f   :  { %v2479_v8 = vpop.f32.mrf.mxu0  ;;  %v1142_v14 = vadd.f32 %v1645_v7, %v1077_v36 }
 0x120   :  { %2577 = vst [vmem:[#allocation10_spill] sm:$0xff] %v2479_v8  ;;  %v1204_v8 = vadd.f32 %v1682_v13, %v1139_v38  ;;  %v2494_v12 = vpop.f32.mrf.mxu1  ;;  %v1147_v38 = vadd.f32 %v1648_v45, %v1082_v15  ;;  %v1150_v13 = vadd.f32 %v1651_v20, %v1085_v47  ;;  %v2580_v47 = vld [vmem:[#allocation3_spill] sm:$0xff] }
 0x121   :  { %v2482_v42 = vpop.f32.mrf.mxu0  ;;  %v1207_v16 = vadd.f32 %v1685_v5, %v1142_v14  ;;  %v1620_v14 = vadd.f32 %v2436_v37, %v2432_v35 }
 0x122   :  { %v1269_v10 = vadd.f32 %v1722_v19, %v1204_v8  ;;  %v2499_v40 = vpop.f32.mrf.mxu1  ;;  %v1212_v48 = vadd.f32 %v1688_v9, %v1147_v38  ;;  %v1617_v8 = vadd.f32 %v2428_v33, %v2424_v31  ;;  %v1215_v54 = vadd.f32 %v1691_v50, %v1150_v13  ;;  %v2579_v38 = vld [vmem:[#allocation2_spill] sm:$0xff]  ;;  %v2583_v50 = vld [vmem:[#allocation4_spill] sm:$0xff] }
 0x123   :  { %v1760_v6 = vpop.f32.mrf.mxu0  ;;  %v1272_v22 = vadd.f32 %v1725_v25, %v1207_v16  ;;  %v1731_v31 = vadd.f32 %v2452_v59, %v2448_v57  ;;  %v1694_v33 = vadd.f32 %v2454_v60, %v2450_v58  ;;  %v1657_v57 = vadd.f32 %v2430_v34, %v2426_v32 }
 0x124   :  { %v1697_v58 = vadd.f32 %v2460_v63, %v2456_v61  ;;  %v1623_v16 = vadd.f32 %v2444_v41, %v2440_v39  ;;  %v1660_v23 = vadd.f32 %v2580_v47, %v2579_v38  ;;  %v2585_v27 = vld [vmem:[#allocation9_spill] sm:$0xff] }
 0x125   :  { %v1761_v3 = vpop.f32.mrf.mxu0  ;;  %v1280_v60 = vadd.f32 %v1731_v31, %v1215_v54 }
 0x126   :  { %v1762_v21 = vadd.f32 %v1761_v3, %v1760_v6  ;;  %v1728_v6 = vadd.f32 %v1727_v55, %v1726_v53  ;;  %v1093_v3 = vadd.f32 %v1617_v8, %v2471_v4 }
 0x127   :  { %v1763_v43 = vpop.f32.mrf.mxu0 }
 0x128   :  { %v1334_v46 = vadd.f32 %v1762_v21, %v1269_v10  ;;  %v1277_v26 = vadd.f32 %v1728_v6, %v1212_v48  ;;  %v1220_v21 = vadd.f32 %v1694_v33, %v1155_v17  ;;  %v1158_v45 = vadd.f32 %v1657_v57, %v1093_v3 }
 0x129   :  { %v1764_v18 = vpop.f32.mrf.mxu0  ;;  %v1098_v10 = vadd.f32 %v1620_v14, %v2471_v4 }
 0x12a   :  { %v1765_v36 = vadd.f32 %v1764_v18, %v1763_v43  ;;  %v1734_v43 = vadd.f32 %v2462_v0, %v2458_v62  ;;  %v1223_v63 = vadd.f32 %v1697_v58, %v1158_v45  ;;  %v2578_v18 = vld [vmem:[#allocation7_spill] sm:$0xff] }
 0x12b   :  { %v1766_v44 = vpop.f32.mrf.mxu0  ;;  %v1737_v62 = vadd.f32 %v2578_v18, %v2464_v1  ;;  %v1163_v6 = vadd.f32 %v1660_v23, %v1098_v10 }
 0x12c   :  { %v1398_v7 = vpop.f32.mrf.mxu1  ;;  %v1337_v51 = vadd.f32 %v1765_v36, %v1272_v22  ;;  %v1285_v25 = vadd.f32 %v1734_v43, %v1220_v21  ;;  %v2581_v36 = vld [vmem:[#allocation6_spill] sm:$0xff] }
 0x12d   :  { %v1399_v52 = vadd.f32 %v1398_v7, %v1334_v46  ;;  %v1767_v5 = vpop.f32.mrf.mxu0  ;;  %v1101_v7 = vadd.f32 %v1623_v16, %v2471_v4  ;;  %v1288_v8 = vadd.f32 %v1737_v62, %v1223_v63 }
 0x12e   :  { %v1400_v11 = vpop.f32.mrf.mxu1  ;;  %v1768_v29 = vadd.f32 %v1767_v5, %v1766_v44  ;;  %v2582_v44 = vld [vmem:[#allocation8_spill] sm:$0xff] }
 0x12f   :  { %1429 = vst [vmem:[%s2568_s3] sm:$0xff] %v1399_v52  ;;  %v1769_v49 = vpop.f32.mrf.mxu0  ;;  %v1700_v46 = vadd.f32 %v2582_v44, %v2581_v36  ;;  %v2584_v52 = vld [vmem:[#allocation5_spill] sm:$0xff] }
 0x130   :  { %v1401_v53 = vpop.f32.mrf.mxu1  ;;  %v1342_v19 = vadd.f32 %v1768_v29, %v1277_v26  ;;  %v1663_v5 = vadd.f32 %v2584_v52, %v2583_v50  ;;  %v1740_v29 = vadd.f32 %v2486_v2, %v2585_v27  ;;  %v1743_v2 = vadd.f32 %v2499_v40, %v2494_v12 }
 0x131   :  { %v1402_v55 = vadd.f32 %v1401_v53, %v1337_v51  ;;  %v1770_v56 = vpop.f32.mrf.mxu0  ;;  %v1228_v13 = vadd.f32 %v1700_v46, %v1163_v6 }
 0x132   :  { %v1403_v15 = vpop.f32.mrf.mxu1  ;;  %v1771_v28 = vadd.f32 %v1770_v56, %v1769_v49  ;;  %v2586_v49 = vld [vmem:[#allocation10_spill] sm:$0xff]  ;;  %v1166_v53 = vadd.f32 %v1663_v5, %v1101_v7 }
 0x133   :  { %1430 = vst [vmem:[%s2568_s3 + $0x8] sm:$0xff] %v1402_v55  ;;  %v1772_v30 = vpop.f32.mrf.mxu0  ;;  %v1703_v51 = vadd.f32 %v2482_v42, %v2586_v49  ;;  %v1293_v56 = vadd.f32 %v1740_v29, %v1228_v13 }
 0x134   :  { %v1406_v59 = vpop.f32.mrf.mxu1  ;;  %v1345_v61 = vadd.f32 %v1771_v28, %v1280_v60 }
 0x135   :  { %v1407_v35 = vadd.f32 %v1406_v59, %v1342_v19  ;;  %v1773_v37 = vpop.f32.mrf.mxu0  ;;  %v1231_v3 = vadd.f32 %v1703_v51, %v1166_v53 }
 0x136   :  { %v1408_v9 = vpop.f32.mrf.mxu1  ;;  %v1774_v32 = vadd.f32 %v1773_v37, %v1772_v30 }
 0x137   :  { %1431 = vst [vmem:[%s2568_s3 + $0x10] sm:$0xff] %v1407_v35  ;;  %v1775_v34 = vpop.f32.mrf.mxu0  ;;  %v1296_v19 = vadd.f32 %v1743_v2, %v1231_v3 }
 0x138   :  { %v1409_v0 = vpop.f32.mrf.mxu1  ;;  %v1350_v22 = vadd.f32 %v1774_v32, %v1285_v25 }
 0x139   :  { %v1410_v39 = vadd.f32 %v1409_v0, %v1345_v61  ;;  %v1776_v41 = vpop.f32.mrf.mxu0 }
 0x13a   :  { %v1411_v48 = vpop.f32.mrf.mxu1  ;;  %v1777_v20 = vadd.f32 %v1776_v41, %v1775_v34 }
 0x13b   :  { %1432 = vst [vmem:[%s2568_s3 + $0x18] sm:$0xff] %v1410_v39  ;;  %v1778_v1 = vpop.f32.mrf.mxu0 }
 0x13c   :  { %v1414_v11 = vpop.f32.mrf.mxu1  ;;  %v1353_v33 = vadd.f32 %v1777_v20, %v1288_v8 }
 0x13d   :  { %v1415_v4 = vadd.f32 %v1414_v11, %v1350_v22  ;;  %v1779_v24 = vpop.f32.mrf.mxu0 }
 0x13e   :  { %v1416_v26 = vpop.f32.mrf.mxu1  ;;  %v1780_v54 = vadd.f32 %v1779_v24, %v1778_v1 }
 0x13f   :  { %1433 = vst [vmem:[%s2568_s3 + $0x20] sm:$0xff] %v1415_v4  ;;  %v1781_v31 = vpop.f32.mrf.mxu0 }
 0x140   :  { %v1417_v55 = vpop.f32.mrf.mxu1  ;;  %v1358_v28 = vadd.f32 %v1780_v54, %v1293_v56 }
 0x141   :  { %v1418_v15 = vadd.f32 %v1417_v55, %v1353_v33  ;;  %v1782_v17 = vpop.f32.mrf.mxu0 }
 0x142   :  { %v1419_v42 = vpop.f32.mrf.mxu1  ;;  %v1783_v14 = vadd.f32 %v1782_v17, %v1781_v31 }
 0x143   :  { %1434 = vst [vmem:[%s2568_s3 + $0x28] sm:$0xff] %v1418_v15 }
 0x144   :  { %v1422_v30 = vpop.f32.mrf.mxu1  ;;  %v1361_v59 = vadd.f32 %v1783_v14, %v1296_v19 }
 0x145   :  { %v1423_v57 = vadd.f32 %v1422_v30, %v1358_v28 }
 0x146   :  { %v1424_v58 = vpop.f32.mrf.mxu1 }
 0x147   :  { %1435 = vst [vmem:[%s2568_s3 + $0x30] sm:$0xff] %v1423_v57 }
 0x148   :  { %v1425_v60 = vpop.f32.mrf.mxu1 }
 0x149   :  { %v1426_v12 = vadd.f32 %v1425_v60, %v1361_v59 }
 0x14a   :  { %v1427_v40 = vpop.f32.mrf.mxu1 }
 0x14b   :  { %1436 = vst [vmem:[%s2568_s3 + $0x38] sm:$0xff] %v1426_v12 }

// kernel: _net_forward_impl.236
= control target key start
LH: loop header
LB: loop body
LE: loop exit
PB: predicated region body
PF: predicated region fallthrough
CT: control target
= control target key end

     0   :  { %vm1218_vm0 = vcmask 523264   ;;  %s3016_s1 = inlined_call_operand.vmem [shape: bf16[1728,128], index: 1, kind: input, shape index: {}]   ;;  %s3017_s0 = inlined_call_operand.vmem [shape: bf16[64,1728], index: 0, kind: input, shape index: {}]   ;;  %s3018_s2 = inlined_call_operand.vmem [shape: f32[1,128], index: 2, kind: input, shape index: {}]   ;;  %s3019_s3 = inlined_call_operand.vmem [shape: f32[64,128], index: 3, kind: output, shape index: {}]  }
   0x1   :  { %v2108_v0 = vld [vmem:[%s3016_s1 + $0x78] sm:$0xff]   ;;  %v2110_v2 = vld [vmem:[%s3016_s1 + $0x70] sm:$0xff]   ;;  %v2112_v4 = vld [vmem:[%s3016_s1 + $0x68] sm:$0xff]  }
   0x2   :  { %v2109_v1 = vld [vmem:[%s3016_s1 + $0x38] sm:$0xff]   ;;  %1867 = vmatprep.subr.bf16.mxu1 %v2108_v0  ;;  %v2111_v3 = vld [vmem:[%s3016_s1 + $0x30] sm:$0xff]   ;;  %v2113_v5 = vld [vmem:[%s3016_s1 + $0x28] sm:$0xff]  }
   0x3   :  { %1868 = vmatpush3.bf16.msra.mxu1 %v2109_v1  ;;  %v2114_v6 = vld [vmem:[%s3016_s1 + $0x60] sm:$0xff]   ;;  %v2118_v8 = vld [vmem:[%s3016_s1 + $0x178] sm:$0xff]   ;;  %v2122_v12 = vld [vmem:[%s3016_s1 + $0x170] sm:$0xff]  }
   0x4   :  { %1869 = vmatprep.subr.bf16.mxu1 %v2110_v2  ;;  %v2115_v7 = vld [vmem:[%s3016_s1 + $0x20] sm:$0xff]   ;;  %v2119_v9 = vld [vmem:[%s3016_s1 + $0x138] sm:$0xff]   ;;  %1947 = vmatprep.subr.bf16.mxu0 %v2118_v8  ;;  %v2123_v13 = vld [vmem:[%s3016_s1 + $0x130] sm:$0xff]  }
   0x5   :  { %v2116_v10 = vld [vmem:[%s3016_s1 + $0x58] sm:$0xff]   ;;  %1948 = vmatpush3.bf16.msra.mxu0 %v2119_v9  ;;  %v2120_v14 = vld [vmem:[%s3016_s1 + $0x50] sm:$0xff]   ;;  %v2126_v16 = vld [vmem:[%s3016_s1 + $0x168] sm:$0xff]  }
   0x6   :  { %v2117_v11 = vld [vmem:[%s3016_s1 + $0x18] sm:$0xff]   ;;  %1949 = vmatprep.subr.bf16.mxu0 %v2122_v12  ;;  %v2121_v15 = vld [vmem:[%s3016_s1 + $0x10] sm:$0xff]   ;;  %v2127_v17 = vld [vmem:[%s3016_s1 + $0x128] sm:$0xff]  }
   0x7   :  { %1870 = vmatpush3.bf16.msra.mxu1 %v2111_v3  ;;  %v2124_v18 = vld [vmem:[%s3016_s1 + $0x48] sm:$0xff]   ;;  %v2130_v20 = vld [vmem:[%s3016_s1 + $0x160] sm:$0xff]   ;;  %v2135_v25 = vld [vmem:[%s3016_s1 + $0xf8] sm:$0xff]  }
   0x8   :  { %1871 = vmatprep.subr.bf16.mxu1 %v2112_v4  ;;  %v2125_v19 = vld [vmem:[%s3016_s1 + $0x8] sm:$0xff]   ;;  %v2131_v21 = vld [vmem:[%s3016_s1 + $0x120] sm:$0xff]   ;;  %v2137_v27 = vld [vmem:[%s3016_s1 + $0x158] sm:$0xff]  }
   0x9   :  { %1950 = vmatpush3.bf16.msra.mxu0 %v2123_v13  ;;  %v2128_v22 = vld [vmem:[%s3016_s1 + $0x40] sm:$0xff]   ;;  %v2138_v28 = vld [vmem:[%s3016_s1 + $0x118] sm:$0xff]   ;;  %v2139_v30 = vld [vmem:[%s3016_s1 + $0xf0] sm:$0xff]  }
   0xa   :  { %1951 = vmatprep.subr.bf16.mxu0 %v2126_v16  ;;  %v2134_v23 = vld [vmem:[%s3017_s0 + $0x4] ss:$56 sps:$4 sm:$0xff]   ;;  %v2132_v26 = vld [vmem:[%s3017_s0] ss:$56 sps:$4 sm:$0xff]   ;;  %v2141_v31 = vld [vmem:[%s3016_s1 + $0x150] sm:$0xff]  }
   0xb   :  { %1872 = vmatpush3.bf16.msra.mxu1 %v2113_v5  ;;  %v2129_v24 = vld [vmem:[%s3016_s1] sm:$0xff]   ;;  %1263 = vmatprep.mubr.bf16.mxu1 %v2134_v23  ;;  %v2136_v29 = vld [vmem:[%s3016_s1 + $0xb8] sm:$0xff]   ;;  %v2142_v32 = vld [vmem:[%s3016_s1 + $0x110] sm:$0xff]  }
   0xc   :  { %1873 = vmatprep.subr.bf16.mxu1 %v2114_v6  ;;  %v2143_v33 = vld [vmem:[%s3017_s0 + $0x74] ss:$56 sps:$4 sm:$0xff]   ;;  %v2145_v35 = vld [vmem:[%s3017_s0 + $0x70] ss:$56 sps:$4 sm:$0xff]   ;;  %v2150_v40 = vld [vmem:[%s3016_s1 + $0xe0] sm:$0xff]  }
   0xd   :  { %1952 = vmatpush3.bf16.msra.mxu0 %v2127_v17  ;;  %v2140_v34 = vld [vmem:[%s3016_s1 + $0xb0] sm:$0xff]   ;;  %v2146_v36 = vld [vmem:[%s3016_s1 + $0xe8] sm:$0xff]   ;;  %v2152_v41 = vld [vmem:[%s3016_s1 + $0x140] sm:$0xff]  }
   0xe   :  { %1953 = vmatprep.subr.bf16.mxu0 %v2130_v20  ;;  %v2148_v37 = vld [vmem:[%s3016_s1 + $0x148] sm:$0xff]   ;;  %v2153_v42 = vld [vmem:[%s3016_s1 + $0x100] sm:$0xff]   ;;  %v2157_v46 = vld [vmem:[%s3016_s1 + $0xd8] sm:$0xff]  }
   0xf   :  { %1874 = vmatpush3.bf16.msra.mxu1 %v2115_v7  ;;  %v2149_v38 = vld [vmem:[%s3016_s1 + $0x108] sm:$0xff]   ;;  %v2151_v43 = vld [vmem:[%s3016_s1 + $0xa0] sm:$0xff]   ;;  %v2158_v47 = vld [vmem:[%s3016_s1 + $0x98] sm:$0xff]  }
  0x10   :  { %1875 = vmatprep.subr.bf16.mxu1 %v2116_v10  ;;  %v2147_v39 = vld [vmem:[%s3016_s1 + $0xa8] sm:$0xff]   ;;  %v2154_v44 = vld [vmem:[%s3017_s0 + $0xe4] ss:$56 sps:$4 sm:$0xff]   ;;  %v2156_v45 = vld [vmem:[%s3017_s0 + $0xe0] ss:$56 sps:$4 sm:$0xff]  }
  0x11   :  { %1954 = vmatpush3.bf16.msra.mxu0 %v2131_v21  ;;  %v2159_v48 = vld [vmem:[%s3017_s0 + $0x10] ss:$56 sps:$4 sm:$0xff]   ;;  %v2161_v49 = vld [vmem:[%s3017_s0 + $0x14] ss:$56 sps:$4 sm:$0xff]   ;;  %v2162_v50 = vld [vmem:[%s3016_s1 + $0x278] sm:$0xff]  }
  0x12   :  { %1955 = vmatprep.subr.bf16.mxu0 %v2137_v27  ;;  %1393 = vmatprep.mubr.bf16.mxu0 %v2161_v49  ;;  %v2163_v51 = vld [vmem:[%s3016_s1 + $0x238] sm:$0xff]   ;;  %v2164_v52 = vld [vmem:[%s3016_s1 + $0xd0] sm:$0xff]   ;;  %v2171_v58 = vld [vmem:[%s3016_s1 + $0xc8] sm:$0xff]  }
  0x13   :  { %1876 = vmatpush3.bf16.msra.mxu1 %v2117_v11  ;;  %v2165_v53 = vld [vmem:[%s3016_s1 + $0x90] sm:$0xff]   ;;  %v2172_v59 = vld [vmem:[%s3016_s1 + $0x88] sm:$0xff]   ;;  %v2173_v60 = vld [vmem:[%s3017_s0 + $0x84] ss:$56 sps:$4 sm:$0xff]  }
  0x14   :  { %1877 = vmatprep.subr.bf16.mxu1 %v2120_v14  ;;  %v2166_v54 = vld [vmem:[%s3016_s1 + $0x270] sm:$0xff]   ;;  %v2175_v61 = vld [vmem:[%s3016_s1 + $0x268] sm:$0xff]   ;;  %v2176_v62 = vld [vmem:[%s3017_s0 + $0x80] ss:$56 sps:$4 sm:$0xff]  }
  0x15   :  { %1956 = vmatpush3.bf16.msra.mxu0 %v2138_v28  ;;  %v2167_v55 = vld [vmem:[%s3016_s1 + $0x230] sm:$0xff]   ;;  %v2177_v63 = vld [vmem:[%s3016_s1 + $0x228] sm:$0xff]   ;;  %v2178_v0 = vld [vmem:[%s3016_s1 + $0xc0] sm:$0xff]  }
  0x16   :  { %1957 = vmatprep.subr.bf16.mxu0 %v2141_v31  ;;  %v2168_v56 = vld [vmem:[%s3017_s0 + $0x154] ss:$56 sps:$4 sm:$0xff]   ;;  %v2170_v57 = vld [vmem:[%s3017_s0 + $0x150] ss:$56 sps:$4 sm:$0xff]   ;;  %v2179_v1 = vld [vmem:[%s3016_s1 + $0x80] sm:$0xff]  }
  0x17   :  { %1878 = vmatpush3.bf16.msra.mxu1 %v2121_v15  ;;  %v2180_v2 = vld [vmem:[%s3016_s1 + $0x260] sm:$0xff]   ;;  %v2185_v6 = vld [vmem:[%s3016_s1 + $0x1f8] sm:$0xff]   ;;  %v2186_v7 = vld [vmem:[%s3017_s0 + $0xf4] ss:$56 sps:$4 sm:$0xff]  }
  0x18   :  { %1879 = vmatprep.subr.bf16.mxu1 %v2124_v18  ;;  %v2181_v3 = vld [vmem:[%s3016_s1 + $0x220] sm:$0xff]   ;;  %v2188_v8 = vld [vmem:[%s3016_s1 + $0x1b8] sm:$0xff]   ;;  %v2190_v10 = vld [vmem:[%s3017_s0 + $0xf0] ss:$56 sps:$4 sm:$0xff]  }
  0x19   :  { %1958 = vmatpush3.bf16.msra.mxu0 %v2142_v32  ;;  %v2182_v4 = vld [vmem:[%s3017_s0 + $0x8] ss:$56 sps:$4 sm:$0xff]   ;;  %v2184_v5 = vld [vmem:[%s3017_s0 + $0xc] ss:$56 sps:$4 sm:$0xff]   ;;  %v2189_v9 = vld [vmem:[%s3016_s1 + $0x258] sm:$0xff]   ;;  %v2300_v32 = vmov 0  }
  0x1a   :  { %1959 = vmatprep.subr.bf16.mxu0 %v2148_v37  ;;  %v2191_v11 = vld [vmem:[%s3016_s1 + $0x218] sm:$0xff]   ;;  %v2192_v12 = vld [vmem:[%s3016_s1 + $0x1f0] sm:$0xff]   ;;  %v2199_v18 = vld [vmem:[%s3016_s1 + $0x1e8] sm:$0xff]  }
  0x1b   :  { %1880 = vmatpush3.bf16.msra.mxu1 %v2125_v19  ;;  %v2193_v13 = vld [vmem:[%s3016_s1 + $0x1b0] sm:$0xff]   ;;  %v2200_v19 = vld [vmem:[%s3017_s0 + $0x164] ss:$56 sps:$4 sm:$0xff]   ;;  %v2202_v20 = vld [vmem:[%s3016_s1 + $0x1a8] sm:$0xff]  }
  0x1c   :  { %1881 = vmatprep.subr.bf16.mxu1 %v2128_v22  ;;  %v2194_v14 = vld [vmem:[%s3016_s1 + $0x250] sm:$0xff]   ;;  %v2203_v21 = vld [vmem:[%s3016_s1 + $0x248] sm:$0xff]   ;;  %v2204_v22 = vld [vmem:[%s3017_s0 + $0x160] ss:$56 sps:$4 sm:$0xff]  }
  0x1d   :  { %1960 = vmatpush3.bf16.msra.mxu0 %v2149_v38  ;;  %v2195_v15 = vld [vmem:[%s3016_s1 + $0x210] sm:$0xff]   ;;  %v2205_v23 = vld [vmem:[%s3016_s1 + $0x208] sm:$0xff]   ;;  %v2209_v27 = vld [vmem:[%s3016_s1 + $0x200] sm:$0xff]  }
  0x1e   :  { %1961 = vmatprep.subr.bf16.mxu0 %v2152_v41  ;;  %v2196_v16 = vld [vmem:[%s3017_s0 + $0x7c] ss:$56 sps:$4 sm:$0xff]   ;;  %v2198_v17 = vld [vmem:[%s3017_s0 + $0x78] ss:$56 sps:$4 sm:$0xff]   ;;  %v2210_v28 = vld [vmem:[%s3017_s0 + $0xec] ss:$56 sps:$4 sm:$0xff]  }
  0x1f   :  { %1882 = vmatpush3.bf16.msra.mxu1 %v2129_v24  ;;  %v2206_v24 = vld [vmem:[%s3016_s1 + $0x1e0] sm:$0xff]   ;;  %v2214_v31 = vld [vmem:[%s3016_s1 + $0x198] sm:$0xff]   ;;  %v2220_v37 = vld [vmem:[%s3016_s1 + $0x190] sm:$0xff]  }
  0x20   :  { %1907 = vmatprep.subr.bf16.mxu1 %v2135_v25  ;;  %v2207_v25 = vld [vmem:[%s3016_s1 + $0x1a0] sm:$0xff]   ;;  %v2221_v38 = vld [vmem:[%s3016_s1 + $0x330] sm:$0xff]   ;;  %v2225_v41 = vld [vmem:[%s3016_s1 + $0x1c8] sm:$0xff]  }
  0x21   :  { %1962 = vmatpush3.bf16.msra.mxu0 %v2153_v42  ;;  %v2226_v42 = vld [vmem:[%s3016_s1 + $0x188] sm:$0xff]   ;;  %v2234_v49 = vld [vmem:[%s3016_s1 + $0x2f8] sm:$0xff]  }
  0x22   :  { %1264 = vmatmul.mubr.bf16.vlgmr.msra.gmra.mxu1 %v2132_v26  ;;  %2027 = vmatprep.subr.bf16.mxu0 %v2162_v50  ;;  %v2208_v26 = vld [vmem:[%s3016_s1 + $0x240] sm:$0xff]   ;;  %v2235_v50 = vld [vmem:[%s3016_s1 + $0x2b8] sm:$0xff]  }
  0x23   :  { %1908 = vmatpush3.bf16.msra.mxu1 %v2136_v29  ;;  %1271 = vmatprep.mubr.bf16.mxu1 %v2143_v33  ;;  %v2212_v29 = vld [vmem:[%s3017_s0 + $0xe8] ss:$56 sps:$4 sm:$0xff]  }
  0x24   :  { %1909 = vmatprep.subr.bf16.mxu1 %v2139_v30  ;;  %1394 = vmatmul.mubr.bf16.vlgmr.msra.gmra.mxu0 %v2159_v48  ;;  %v2213_v30 = vld [vmem:[%s3016_s1 + $0x1d8] sm:$0xff]  }
  0x25   :  { %2028 = vmatpush3.bf16.msra.mxu0 %v2163_v51  ;;  %1401 = vmatprep.mubr.bf16.mxu0 %v2173_v60  ;;  %v2215_v33 = vld [vmem:[%s3017_s0 + $0x20] ss:$56 sps:$4 sm:$0xff]   ;;  %v2233_v48 = vld [vmem:[%s3017_s0 + $0x1c] ss:$56 sps:$4 sm:$0xff]   ;;  %v2247_v60 = vld [vmem:[%s3016_s1 + $0x2a8] sm:$0xff]  }
  0x26   :  { %2029 = vmatprep.subr.bf16.mxu0 %v2166_v54  ;;  %v2236_v51 = vld [vmem:[%s3016_s1 + $0x318] sm:$0xff]   ;;  %v2239_v54 = vld [vmem:[%s3016_s1 + $0x310] sm:$0xff]  }
  0x27   :  { %1910 = vmatpush3.bf16.msra.mxu1 %v2140_v34  ;;  %v2217_v34 = vld [vmem:[%s3017_s0 + $0x24] ss:$56 sps:$4 sm:$0xff]  }
  0x28   :  { %1911 = vmatprep.subr.bf16.mxu1 %v2146_v36  ;;  %v2219_v36 = vld [vmem:[%s3016_s1 + $0x1d0] sm:$0xff]  }
  0x29   :  { %2030 = vmatpush3.bf16.msra.mxu0 %v2167_v55  ;;  %v2240_v55 = vld [vmem:[%s3017_s0 + $0x8c] ss:$56 sps:$4 sm:$0xff]  }
  0x2a   :  { %1272 = vmatmul.mubr.bf16.gmra.mxu1 %v2145_v35  ;;  %2031 = vmatprep.subr.bf16.mxu0 %v2175_v61  ;;  %v2218_v35 = vld [vmem:[%s3016_s1 + $0x338] sm:$0xff]   ;;  %v2248_v61 = vld [vmem:[%s3016_s1 + $0x308] sm:$0xff]  }
  0x2b   :  { %1912 = vmatpush3.bf16.msra.mxu1 %v2147_v39  ;;  %1279 = vmatprep.mubr.bf16.mxu1 %v2154_v44  ;;  %v2222_v39 = vld [vmem:[%s3017_s0 + $0x15c] ss:$56 sps:$4 sm:$0xff]   ;;  %v2228_v44 = vld [vmem:[%s3016_s1 + $0x1c0] sm:$0xff]  }
  0x2c   :  { %1913 = vmatprep.subr.bf16.mxu1 %v2150_v40  ;;  %1402 = vmatmul.mubr.bf16.gmra.mxu0 %v2176_v62  ;;  %v2224_v40 = vld [vmem:[%s3017_s0 + $0x158] ss:$56 sps:$4 sm:$0xff]   ;;  %v2249_v62 = vld [vmem:[%s3016_s1 + $0x2e0] sm:$0xff]  }
  0x2d   :  { %2032 = vmatpush3.bf16.msra.mxu0 %v2177_v63  ;;  %1409 = vmatprep.mubr.bf16.mxu0 %v2186_v7  ;;  %v2250_v63 = vld [vmem:[%s3016_s1 + $0x2a0] sm:$0xff]   ;;  %v2260_v7 = vld [vmem:[%s3016_s1 + $0x358] sm:$0xff]  }
  0x2e   :  { %2033 = vmatprep.subr.bf16.mxu0 %v2180_v2  ;;  %v2254_v2 = vld [vmem:[%s3017_s0 + $0xf8] ss:$56 sps:$4 sm:$0xff]  }
  0x2f   :  { %1914 = vmatpush3.bf16.msra.mxu1 %v2151_v43  ;;  %v2227_v43 = vld [vmem:[%s3016_s1 + $0x328] sm:$0xff]  }
  0x30   :  { %1915 = vmatprep.subr.bf16.mxu1 %v2157_v46  ;;  %v2230_v46 = vld [vmem:[%s3016_s1 + $0x320] sm:$0xff]  }
  0x31   :  { %2034 = vmatpush3.bf16.msra.mxu0 %v2181_v3  ;;  %v2255_v3 = vld [vmem:[%s3017_s0 + $0x104] ss:$56 sps:$4 sm:$0xff]  }
  0x32   :  { %1280 = vmatmul.mubr.bf16.gmra.mxu1 %v2156_v45  ;;  %2035 = vmatprep.subr.bf16.mxu0 %v2189_v9  ;;  %v2229_v45 = vld [vmem:[%s3016_s1 + $0x180] sm:$0xff]   ;;  %v2262_v9 = vld [vmem:[%s3016_s1 + $0x290] sm:$0xff]  }
  0x33   :  { %1916 = vmatpush3.bf16.msra.mxu1 %v2158_v47  ;;  %1287 = vmatprep.mubr.bf16.mxu1 %v2168_v56  ;;  %v2231_v47 = vld [vmem:[%s3017_s0 + $0x18] ss:$56 sps:$4 sm:$0xff]   ;;  %v2242_v56 = vld [vmem:[%s3017_s0 + $0x88] ss:$56 sps:$4 sm:$0xff]  }
  0x34   :  { %1917 = vmatprep.subr.bf16.mxu1 %v2164_v52  ;;  %1410 = vmatmul.mubr.bf16.gmra.mxu0 %v2190_v10  ;;  %v2237_v52 = vld [vmem:[%s3016_s1 + $0x2f0] sm:$0xff]  }
  0x35   :  { %2036 = vmatpush3.bf16.msra.mxu0 %v2191_v11  ;;  %1417 = vmatprep.mubr.bf16.mxu0 %v2200_v19  ;;  %v2263_v10 = vld [vmem:[%s3016_s1 + $0x350] sm:$0xff]   ;;  %v2264_v11 = vld [vmem:[%s3017_s0 + $0x16c] ss:$56 sps:$4 sm:$0xff]  }
  0x36   :  { %2037 = vmatprep.subr.bf16.mxu0 %v2194_v14  ;;  %v2269_v14 = vld [vmem:[%s3016_s1 + $0x2c8] sm:$0xff]   ;;  %v2274_v19 = vld [vmem:[%s3016_s1 + $0x280] sm:$0xff]  }
  0x37   :  { %1918 = vmatpush3.bf16.msra.mxu1 %v2165_v53  ;;  %v2238_v53 = vld [vmem:[%s3016_s1 + $0x2b0] sm:$0xff]  }
  0x38   :  { %1919 = vmatprep.subr.bf16.mxu1 %v2171_v58  ;;  %v2245_v58 = vld [vmem:[%s3016_s1 + $0x2e8] sm:$0xff]  }
  0x39   :  { %2038 = vmatpush3.bf16.msra.mxu0 %v2195_v15  ;;  %v2270_v15 = vld [vmem:[%s3017_s0 + $0x170] ss:$56 sps:$4 sm:$0xff]  }
  0x3a   :  { %1288 = vmatmul.mubr.bf16.gmra.mxu1 %v2170_v57  ;;  %2039 = vmatprep.subr.bf16.mxu0 %v2203_v21  ;;  %v2243_v57 = vld [vmem:[%s3017_s0 + $0x94] ss:$56 sps:$4 sm:$0xff]   ;;  %v2276_v21 = vld [vmem:[%s3017_s0 + $0x28] ss:$56 sps:$4 sm:$0xff]  }
  0x3b   :  { %1920 = vmatpush3.bf16.msra.mxu1 %v2172_v59  ;;  %1328 = vmatprep.mubr.bf16.mxu1 %v2184_v5  ;;  %v2246_v59 = vld [vmem:[%s3017_s0 + $0x90] ss:$56 sps:$4 sm:$0xff]   ;;  %v2258_v5 = vld [vmem:[%s3017_s0 + $0x100] ss:$56 sps:$4 sm:$0xff]  }
  0x3c   :  { %1921 = vmatprep.subr.bf16.mxu1 %v2178_v0  ;;  %1418 = vmatmul.mubr.bf16.gmra.mxu0 %v2204_v22  ;;  %v2251_v0 = vld [vmem:[%s3016_s1 + $0x300] sm:$0xff]  }
  0x3d   :  { %2040 = vmatpush3.bf16.msra.mxu0 %v2205_v23  ;;  %1523 = vmatprep.mubr.bf16.mxu0 %v2217_v34  ;;  %v2278_v22 = vld [vmem:[%s3017_s0 + $0x2c] ss:$56 sps:$4 sm:$0xff]   ;;  %v2279_v23 = vld [vmem:[%s3017_s0 + $0x30] ss:$56 sps:$4 sm:$0xff]  }
  0x3e   :  { %2041 = vmatprep.subr.bf16.mxu0 %v2208_v26  ;;  %v2285_v26 = vld [vmem:[%s3017_s0 + $0xa4] ss:$56 sps:$4 sm:$0xff]  }
  0x3f   :  { %1922 = vmatpush3.bf16.msra.mxu1 %v2179_v1  ;;  %v2252_v1 = vld [vmem:[%s3017_s0 + $0xfc] ss:$56 sps:$4 sm:$0xff]  }
  0x40   :  { %1987 = vmatprep.subr.bf16.mxu1 %v2185_v6  ;;  %v2259_v6 = vld [vmem:[%s3016_s1 + $0x298] sm:$0xff]  }
  0x41   :  { %2042 = vmatpush3.bf16.msra.mxu0 %v2209_v27  ;;  %v2284_v27 = vld [vmem:[%s3017_s0 + $0x98] ss:$56 sps:$4 sm:$0xff]   ;;  %v2297_v34 = vld [vmem:[%s3017_s0 + $0x184] ss:$56 sps:$4 sm:$0xff]  }
  0x42   :  { %1329 = vmatmul.mubr.bf16.vlgmr.msra.gmra.mxu1 %v2182_v4  ;;  %1621 = vmatprep.subr.bf16.mxu0 %v2300_v32  ;;  %v2257_v4 = vld [vmem:[%s3016_s1 + $0x2d8] sm:$0xff]  }
  0x43   :  { %1988 = vmatpush3.bf16.msra.mxu1 %v2188_v8  ;;  %1336 = vmatprep.mubr.bf16.mxu1 %v2196_v16  ;;  %v2261_v8 = vld [vmem:[%s3016_s1 + $0x2d0] sm:$0xff]   ;;  %v2271_v16 = vld [vmem:[%s3016_s1 + $0x288] sm:$0xff]  }
  0x44   :  { %1989 = vmatprep.subr.bf16.mxu1 %v2192_v12  ;;  %1524 = vmatmul.mubr.bf16.vlgmr.msra.gmra.mxu0 %v2215_v33  ;;  %v2266_v12 = vld [vmem:[%s3017_s0 + $0x168] ss:$56 sps:$4 sm:$0xff]   ;;  %v2294_v33 = vld [vmem:[%s3017_s0 + $0x17c] ss:$56 sps:$4 sm:$0xff]  }
  0x45   :  { %1622 = vmatpush1.bf16.msra.mxu0 %v2218_v35  ;;  %1531 = vmatprep.mubr.bf16.mxu0 %v2243_v57  ;;  %v2296_v35 = vld [vmem:[%s3017_s0 + $0x178] ss:$56 sps:$4 sm:$0xff]  }
  0x46   :  { %1623 = vmatprep.subr.bf16.mxu0 %v2300_v32 }
  0x47   :  { %1990 = vmatpush3.bf16.msra.mxu1 %v2193_v13  ;;  %v2267_v13 = vld [vmem:[%s3017_s0 + $0x174] ss:$56 sps:$4 sm:$0xff]  }
  0x48   :  { %1991 = vmatprep.subr.bf16.mxu1 %v2199_v18  ;;  %v2273_v18 = vld [vmem:[%s3016_s1 + $0x2c0] sm:$0xff]  }
  0x49   :  { %1624 = vmatpush1.bf16.msra.mxu0 %v2221_v38 }
  0x4a   :  { %1337 = vmatmul.mubr.bf16.gmra.mxu1 %v2198_v17  ;;  %1625 = vmatprep.subr.bf16.mxu0 %v2300_v32  ;;  %v2272_v17 = vld [vmem:[%s3016_s1 + $0x348] sm:$0xff]  }
  0x4b   :  { %1992 = vmatpush3.bf16.msra.mxu1 %v2202_v20  ;;  %1344 = vmatprep.mubr.bf16.mxu1 %v2210_v28  ;;  %v2275_v20 = vld [vmem:[%s3016_s1 + $0x340] sm:$0xff]  }
  0x4c   :  { %1993 = vmatprep.subr.bf16.mxu1 %v2206_v24  ;;  %1532 = vmatmul.mubr.bf16.gmra.mxu0 %v2246_v59  ;;  %v2281_v24 = vld [vmem:[%s3017_s0 + $0x34] ss:$56 sps:$4 sm:$0xff]   ;;  %v2287_v28 = vld [vmem:[%s3017_s0 + $0xa0] ss:$56 sps:$4 sm:$0xff]  }
  0x4d   :  { %1626 = vmatpush1.bf16.msra.mxu0 %v2227_v43  ;;  %1539 = vmatprep.mubr.bf16.mxu0 %v2255_v3 }
  0x4e   :  { %1627 = vmatprep.subr.bf16.mxu0 %v2300_v32 }
  0x4f   :  { %1994 = vmatpush3.bf16.msra.mxu1 %v2207_v25  ;;  %v2282_v25 = vld [vmem:[%s3017_s0 + $0x9c] ss:$56 sps:$4 sm:$0xff]  }
  0x50   :  { %1995 = vmatprep.subr.bf16.mxu1 %v2213_v30  ;;  %v2291_v30 = vld [vmem:[%s3017_s0 + $0x114] ss:$56 sps:$4 sm:$0xff]  }
  0x51   :  { %1628 = vmatpush1.bf16.msra.mxu0 %v2230_v46 }
  0x52   :  { %1345 = vmatmul.mubr.bf16.gmra.mxu1 %v2212_v29  ;;  %1629 = vmatprep.subr.bf16.mxu0 %v2300_v32  ;;  %v2288_v29 = vld [vmem:[%s3017_s0 + $0x10c] ss:$56 sps:$4 sm:$0xff]  }
  0x53   :  { %1996 = vmatpush3.bf16.msra.mxu1 %v2214_v31  ;;  %1352 = vmatprep.mubr.bf16.mxu1 %v2222_v39  ;;  %v2290_v31 = vld [vmem:[%s3017_s0 + $0x108] ss:$56 sps:$4 sm:$0xff]  }
  0x54   :  { %1997 = vmatprep.subr.bf16.mxu1 %v2219_v36  ;;  %1540 = vmatmul.mubr.bf16.gmra.mxu0 %v2258_v5  ;;  %v2299_v36 = vld [vmem:[%s3017_s0 + $0x180] ss:$56 sps:$4 sm:$0xff]  }
  0x55   :  { %1630 = vmatpush1.bf16.msra.mxu0 %v2236_v51  ;;  %1547 = vmatprep.mubr.bf16.mxu0 %v2267_v13 }
  0x56   :  { %1631 = vmatprep.subr.bf16.mxu0 %v2300_v32 }
  0x57   :  { %1998 = vmatpush3.bf16.msra.mxu1 %v2220_v37 }
  0x58   :  { %1999 = vmatprep.subr.bf16.mxu1 %v2225_v41 }
  0x59   :  { %1632 = vmatpush1.bf16.msra.mxu0 %v2239_v54 }
  0x5a   :  { %1353 = vmatmul.mubr.bf16.gmra.mxu1 %v2224_v40  ;;  %1633 = vmatprep.subr.bf16.mxu0 %v2300_v32 }
  0x5b   :  { %2000 = vmatpush3.bf16.msra.mxu1 %v2226_v42  ;;  %1458 = vmatprep.mubr.bf16.mxu1 %v2233_v48 }
  0x5c   :  { %2001 = vmatprep.subr.bf16.mxu1 %v2228_v44  ;;  %1548 = vmatmul.mubr.bf16.gmra.mxu0 %v2270_v15 }
  0x5d   :  { %1634 = vmatpush1.bf16.msra.mxu0 %v2248_v61  ;;  %1863 = vmatprep.mubr.msk.bf16.mxu0 %vm1218_vm0, %v2281_v24 }
  0x5e   :  { %1635 = vmatprep.subr.bf16.mxu0 %v2300_v32 }
  0x5f   :  { %2002 = vmatpush3.bf16.msra.mxu1 %v2229_v45 }
  0x60   :  { %2067 = vmatprep.subr.bf16.mxu1 %v2234_v49 }
  0x61   :  { %1636 = vmatpush1.bf16.msra.mxu0 %v2251_v0 }
  0x62   :  { %1459 = vmatmul.mubr.bf16.vlgmr.msra.gmra.mxu1 %v2231_v47  ;;  %1645 = vmatprep.subr.bf16.mxu0 %v2300_v32 }
  0x63   :  { %2068 = vmatpush3.bf16.msra.mxu1 %v2235_v50  ;;  %1466 = vmatprep.mubr.bf16.mxu1 %v2240_v55 }
  0x64   :  { %2069 = vmatprep.subr.bf16.mxu1 %v2237_v52 }
  0x65   :  { %1646 = vmatpush2.bf16.msra.mxu0 %v2260_v7 }
  0x66   :  { %1647 = vmatprep.subr.bf16.mxu0 %v2300_v32 }
  0x67   :  { %2070 = vmatpush3.bf16.msra.mxu1 %v2238_v53 }
  0x68   :  { %2071 = vmatprep.subr.bf16.mxu1 %v2245_v58 }
  0x69   :  { %1648 = vmatpush2.bf16.msra.mxu0 %v2263_v10 }
  0x6a   :  { %1467 = vmatmul.mubr.bf16.gmra.mxu1 %v2242_v56  ;;  %1649 = vmatprep.subr.bf16.mxu0 %v2300_v32 }
  0x6b   :  { %2072 = vmatpush3.bf16.msra.mxu1 %v2247_v60  ;;  %1474 = vmatprep.mubr.bf16.mxu1 %v2252_v1 }
  0x6c   :  { %2073 = vmatprep.subr.bf16.mxu1 %v2249_v62 }
  0x6d   :  { %1650 = vmatpush2.bf16.msra.mxu0 %v2272_v17 }
  0x6e   :  { %1651 = vmatprep.subr.bf16.mxu0 %v2300_v32  ;;  %v2293_v32 = vld [vmem:[%s3017_s0 + $0x110] ss:$56 sps:$4 sm:$0xff]  }
  0x6f   :  { %2074 = vmatpush3.bf16.msra.mxu1 %v2250_v63 }
  0x70   :  { %2075 = vmatprep.subr.bf16.mxu1 %v2257_v4 }
  0x71   :  { %1652 = vmatpush2.bf16.msra.mxu0 %v2275_v20 }
  0x72   :  { %1475 = vmatmul.mubr.bf16.gmra.mxu1 %v2254_v2 }
  0x73   :  { %2076 = vmatpush3.bf16.msra.mxu1 %v2259_v6  ;;  %1482 = vmatprep.mubr.bf16.mxu1 %v2264_v11 }
  0x74   :  { %2077 = vmatprep.subr.bf16.mxu1 %v2261_v8  ;;  %1654 = vmatmul.mubr.bf16.vlgmr.msra.gmra.mxu0 %v2279_v23 }
  0x75   :  { %1864 = vmatprep.mubr.msk.bf16.mxu0 %vm1218_vm0, %v2285_v26 }
  0x77   :  { %2078 = vmatpush3.bf16.msra.mxu1 %v2262_v9 }
  0x78   :  { %2079 = vmatprep.subr.bf16.mxu1 %v2269_v14 }
  0x7a   :  { %1483 = vmatmul.mubr.bf16.gmra.mxu1 %v2266_v12 }
  0x7b   :  { %2080 = vmatpush3.bf16.msra.mxu1 %v2271_v16  ;;  %1588 = vmatprep.mubr.bf16.mxu1 %v2278_v22 }
  0x7c   :  { %2081 = vmatprep.subr.bf16.mxu1 %v2273_v18  ;;  %1662 = vmatmul.mubr.bf16.gmra.mxu0 %v2287_v28 }
  0x7d   :  { %1865 = vmatprep.mubr.msk.bf16.mxu0 %vm1218_vm0, %v2291_v30 }
  0x7f   :  { %2082 = vmatpush3.bf16.msra.mxu1 %v2274_v19 }
  0x82   :  { %1589 = vmatmul.mubr.bf16.vlgmr.msra.gmra.mxu1 %v2276_v21 }
  0x83   :  { %1596 = vmatprep.mubr.bf16.mxu1 %v2282_v25 }
  0x84   :  { %1670 = vmatmul.mubr.bf16.gmra.mxu0 %v2293_v32 }
  0x85   :  { %1866 = vmatprep.mubr.msk.bf16.mxu0 %vm1218_vm0, %v2297_v34 }
  0x8a   :  { %1597 = vmatmul.mubr.bf16.gmra.mxu1 %v2284_v27 }
  0x8b   :  { %1604 = vmatprep.mubr.bf16.mxu1 %v2288_v29 }
  0x8c   :  { %1678 = vmatmul.mubr.bf16.gmra.mxu0 %v2299_v36 }
  0x92   :  { %1605 = vmatmul.mubr.bf16.gmra.mxu1 %v2290_v31 }
  0x93   :  { %1612 = vmatprep.mubr.bf16.mxu1 %v2294_v33 }
  0x9a   :  { %1613 = vmatmul.mubr.bf16.gmra.mxu1 %v2296_v35 }
  0xe2   :  { %v1883_v37 = vpop.f32.mrf.mxu1 }
  0xe4   :  { %v1884_v38 = vpop.f32.mrf.mxu1  ;;  %v2837_v50 = vpop.f32.mrf.mxu0 }
  0xe5   :  { %v2829_v39 = vadd.f32 %v1884_v38, %v1883_v37 }
  0xe6   :  { %v1886_v40 = vpop.f32.mrf.mxu1  ;;  %v2841_v53 = vpop.f32.mrf.mxu0 }
  0xe8   :  { %v1887_v41 = vpop.f32.mrf.mxu1  ;;  %v2843_v55 = vpop.f32.mrf.mxu0 }
  0xe9   :  { %v2831_v42 = vadd.f32 %v1887_v41, %v1886_v40 }
  0xea   :  { %v1889_v43 = vpop.f32.mrf.mxu1  ;;  %v2847_v58 = vpop.f32.mrf.mxu0 }
  0xec   :  { %v1890_v44 = vpop.f32.mrf.mxu1  ;;  %v2849_v61 = vpop.f32.mrf.mxu0 }
  0xed   :  { %v2833_v45 = vadd.f32 %v1890_v44, %v1889_v43 }
  0xee   :  { %v1892_v46 = vpop.f32.mrf.mxu1  ;;  %v2853_v0 = vpop.f32.mrf.mxu0 }
  0xf0   :  { %v1893_v47 = vpop.f32.mrf.mxu1  ;;  %v2855_v2 = vpop.f32.mrf.mxu0 }
  0xf1   :  { %v2835_v48 = vadd.f32 %v1893_v47, %v1892_v46 }
  0xf2   :  { %v1895_v49 = vpop.f32.mrf.mxu1  ;;  %v2859_v4 = vpop.f32.mrf.mxu0 }
  0xf4   :  { %v1896_v51 = vpop.f32.mrf.mxu1  ;;  %v2861_v7 = vpop.f32.mrf.mxu0 }
  0xf5   :  { %v2839_v52 = vadd.f32 %v1896_v51, %v1895_v49 }
  0xf6   :  { %v1898_v54 = vpop.f32.mrf.mxu1  ;;  %v2863_v9 = vpop.f32.mrf.mxu0 }
  0xf8   :  { %v1899_v56 = vpop.f32.mrf.mxu1  ;;  %v2865_v11 = vpop.f32.mrf.mxu0 }
  0xf9   :  { %v2845_v57 = vadd.f32 %v1899_v56, %v1898_v54 }
  0xfa   :  { %v1901_v59 = vpop.f32.mrf.mxu1  ;;  %v2867_v13 = vpop.f32.mrf.mxu0 }
  0xfc   :  { %v1902_v60 = vpop.f32.mrf.mxu1  ;;  %v2869_v16 = vpop.f32.mrf.mxu0 }
  0xfd   :  { %v2851_v62 = vadd.f32 %v1902_v60, %v1901_v59  ;;  %3021 = vst [vmem:[#allocation3_spill] sm:$0xff] %v2869_v16  ;;  %v2910_v60 = vld [vmem:[%s3018_s2] ss:$0 sm:$0xff] }
  0xfe   :  { %v1904_v63 = vpop.f32.mrf.mxu1  ;;  %v2871_v18 = vpop.f32.mrf.mxu0 }
  0xff   :  { %3022 = vst [vmem:[#allocation4_spill] sm:$0xff] %v2871_v18  ;;  %v1266_v18 = vadd.f32 %v2829_v39, %v2910_v60 }
 0x100   :  { %v1905_v1 = vpop.f32.mrf.mxu1  ;;  %v2877_v21 = vpop.f32.mrf.mxu0 }
 0x101   :  { %v2857_v3 = vadd.f32 %v1905_v1, %v1904_v63  ;;  %3023 = vst [vmem:[#allocation5_spill] sm:$0xff] %v2877_v21 }
 0x102   :  { %v1923_v5 = vpop.f32.mrf.mxu1  ;;  %v2883_v24 = vpop.f32.mrf.mxu0 }
 0x103   :  { %3020 = vst [vmem:[#allocation2_spill] sm:$0xff] %v2857_v3  ;;  %3024 = vst [vmem:[#allocation6_spill] sm:$0xff] %v2883_v24 }
 0x104   :  { %v1924_v6 = vpop.f32.mrf.mxu1  ;;  %v2043_v27 = vpop.f32.mrf.mxu0 }
 0x105   :  { %v1925_v1 = vadd.f32 %v1924_v6, %v1923_v5  ;;  %v1269_v5 = vadd.f32 %v2831_v42, %v2910_v60  ;;  %v1965_v6 = vadd.f32 %v2841_v53, %v2837_v50  ;;  %v1968_v42 = vadd.f32 %v2847_v58, %v2843_v55 }
 0x106   :  { %v1926_v8 = vpop.f32.mrf.mxu1  ;;  %v2044_v30 = vpop.f32.mrf.mxu0 }
 0x108   :  { %v1927_v10 = vpop.f32.mrf.mxu1  ;;  %v2046_v32 = vpop.f32.mrf.mxu0 }
 0x10a   :  { %v1929_v12 = vpop.f32.mrf.mxu1  ;;  %v2047_v35 = vpop.f32.mrf.mxu0 }
 0x10c   :  { %v1930_v14 = vpop.f32.mrf.mxu1  ;;  %v2049_v38 = vpop.f32.mrf.mxu0 }
 0x10e   :  { %v1932_v15 = vpop.f32.mrf.mxu1  ;;  %v2050_v41 = vpop.f32.mrf.mxu0 }
 0x110   :  { %v1933_v17 = vpop.f32.mrf.mxu1  ;;  %v2893_v44 = vpop.f32.mrf.mxu0 }
 0x111   :  { %v1934_v53 = vadd.f32 %v1933_v17, %v1932_v15  ;;  %v2048_v17 = vadd.f32 %v2047_v35, %v2046_v32 }
 0x112   :  { %v2873_v19 = vpop.f32.mrf.mxu1  ;;  %v2895_v47 = vpop.f32.mrf.mxu0 }
 0x114   :  { %v2875_v20 = vpop.f32.mrf.mxu1  ;;  %v2899_v51 = vpop.f32.mrf.mxu0 }
 0x115   :  { %3027 = vst [vmem:[#allocation9_spill] sm:$0xff] %v2899_v51  ;;  %v1937_v15 = vadd.f32 %v2875_v20, %v2873_v19 }
 0x116   :  { %v2879_v22 = vpop.f32.mrf.mxu1  ;;  %v2903_v56 = vpop.f32.mrf.mxu0 }
 0x117   :  { %3028 = vst [vmem:[#allocation10_spill] sm:$0xff] %v2903_v56 }
 0x118   :  { %v2881_v23 = vpop.f32.mrf.mxu1  ;;  %v2912_v63 = vpop.f32.mrf.mxu0 }
 0x119   :  { %3029 = vst [vmem:[#allocation11_spill] sm:$0xff] %v2912_v63  ;;  %v1940_v19 = vadd.f32 %v2881_v23, %v2879_v22 }
 0x11a   :  { %v2885_v25 = vpop.f32.mrf.mxu1  ;;  %v2916_v21 = vpop.f32.mrf.mxu0 }
 0x11b   :  { %3031 = vst [vmem:[#allocation13_spill] sm:$0xff] %v2916_v21 }
 0x11c   :  { %v2887_v26 = vpop.f32.mrf.mxu1  ;;  %v2922_v3 = vpop.f32.mrf.mxu0 }
 0x11d   :  { %3033 = vst [vmem:[#allocation15_spill] sm:$0xff] %v2922_v3 }
 0x11e   :  { %v2889_v28 = vpop.f32.mrf.mxu1  ;;  %v2926_v51 = vpop.f32.mrf.mxu0 }
 0x11f   :  { %3025 = vst [vmem:[#allocation7_spill] sm:$0xff] %v2889_v28  ;;  %v1928_v28 = vadd.f32 %v1927_v10, %v1926_v8  ;;  %v1274_v10 = vadd.f32 %v2833_v45, %v2910_v60 }
 0x120   :  { %v2891_v29 = vpop.f32.mrf.mxu1  ;;  %v2934_v39 = vpop.f32.mrf.mxu0 }
 0x121   :  { %3026 = vst [vmem:[#allocation8_spill] sm:$0xff] %v2891_v29  ;;  %v1331_v29 = vadd.f32 %v1925_v1, %v1266_v18  ;;  %3035 = vst [vmem:[#allocation17_spill] sm:$0xff] %v2934_v39 }
 0x122   :  { %v2003_v31 = vpop.f32.mrf.mxu1  ;;  %v2938_v8 = vpop.f32.mrf.mxu0 }
 0x123   :  { %v1396_v3 = vadd.f32 %v1965_v6, %v1331_v29  ;;  %3036 = vst [vmem:[#allocation18_spill] sm:$0xff] %v2938_v8 }
 0x124   :  { %v2004_v33 = vpop.f32.mrf.mxu1 }
 0x125   :  { %v2005_v21 = vadd.f32 %v2004_v33, %v2003_v31 }
 0x126   :  { %v2006_v34 = vpop.f32.mrf.mxu1 }
 0x127   :  { %v1461_v1 = vadd.f32 %v2005_v21, %v1396_v3 }
 0x128   :  { %v2007_v36 = vpop.f32.mrf.mxu1 }
 0x129   :  { %v2008_v50 = vadd.f32 %v2007_v36, %v2006_v34 }
 0x12a   :  { %v2009_v37 = vpop.f32.mrf.mxu1 }
 0x12c   :  { %v2010_v40 = vpop.f32.mrf.mxu1 }
 0x12d   :  { %v2011_v45 = vadd.f32 %v2010_v40, %v2009_v37 }
 0x12e   :  { %v2012_v43 = vpop.f32.mrf.mxu1 }
 0x130   :  { %v2013_v46 = vpop.f32.mrf.mxu1 }
 0x132   :  { %v2897_v49 = vpop.f32.mrf.mxu1 }
 0x134   :  { %v2901_v54 = vpop.f32.mrf.mxu1 }
 0x135   :  { %v2017_v22 = vadd.f32 %v2901_v54, %v2897_v49  ;;  %v1290_v49 = vadd.f32 %v2851_v62, %v2910_v60  ;;  %v1980_v54 = vadd.f32 %v2867_v13, %v2865_v11  ;;  %v3041_v62 = vld [vmem:[#allocation8_spill] sm:$0xff] }
 0x136   :  { %v2905_v59 = vpop.f32.mrf.mxu1 }
 0x138   :  { %v2914_v24 = vpop.f32.mrf.mxu1 }
 0x139   :  { %3030 = vst [vmem:[#allocation12_spill] sm:$0xff] %v2914_v24  ;;  %v1931_v24 = vadd.f32 %v1930_v14, %v1929_v12  ;;  %v1277_v12 = vadd.f32 %v2835_v48, %v2910_v60  ;;  %v1971_v14 = vadd.f32 %v2853_v0, %v2849_v61  ;;  %v1282_v48 = vadd.f32 %v2839_v52, %v2910_v60 }
 0x13a   :  { %v2920_v16 = vpop.f32.mrf.mxu1  ;;  %v1974_v61 = vadd.f32 %v2859_v4, %v2855_v2  ;;  %v2051_v0 = vadd.f32 %v2050_v41, %v2049_v38  ;;  %v1285_v4 = vadd.f32 %v2845_v57, %v2910_v60  ;;  %v1977_v38 = vadd.f32 %v2863_v9, %v2861_v7 }
 0x13b   :  { %3032 = vst [vmem:[#allocation14_spill] sm:$0xff] %v2920_v16  ;;  %v1334_v16 = vadd.f32 %v1928_v28, %v1269_v5  ;;  %v1339_v33 = vadd.f32 %v1931_v24, %v1274_v10  ;;  %v1655_v28 = vpop.f32.mrf.mxu0  ;;  %v1342_v58 = vadd.f32 %v1934_v53, %v1277_v12  ;;  %v1347_v35 = vadd.f32 %v1937_v15, %v1282_v48  ;;  %v3043_v15 = vld [vmem:[#allocation3_spill] sm:$0xff] }
 0x13c   :  { %v2924_v56 = vpop.f32.mrf.mxu1  ;;  %v1350_v10 = vadd.f32 %v1940_v19, %v1285_v4  ;;  %v1943_v57 = vadd.f32 %v2887_v26, %v2885_v25  ;;  %v3038_v25 = vld [vmem:[#allocation9_spill] sm:$0xff]  ;;  %v3039_v26 = vld [vmem:[#allocation10_spill] sm:$0xff] }
 0x13d   :  { %v1399_v39 = vadd.f32 %v1968_v42, %v1334_v16  ;;  %v1657_v55 = vpop.f32.mrf.mxu0  ;;  %v1404_v16 = vadd.f32 %v1971_v14, %v1339_v33  ;;  %v1407_v20 = vadd.f32 %v1974_v61, %v1342_v58  ;;  %v2054_v42 = vadd.f32 %v2895_v47, %v2893_v44 }
 0x13e   :  { %v2932_v63 = vpop.f32.mrf.mxu1  ;;  %v3040_v55 = vld [vmem:[#allocation7_spill] sm:$0xff] }
 0x13f   :  { %3034 = vst [vmem:[#allocation16_spill] sm:$0xff] %v2932_v63  ;;  %v2045_v63 = vadd.f32 %v2044_v30, %v2043_v27  ;;  %v1464_v5 = vadd.f32 %v2008_v50, %v1399_v39  ;;  %v1658_v24 = vpop.f32.mrf.mxu0  ;;  %v2014_v27 = vadd.f32 %v2013_v46, %v2012_v43  ;;  %v1469_v34 = vadd.f32 %v2011_v45, %v1404_v16 }
 0x140   :  { %v2936_v18 = vpop.f32.mrf.mxu1  ;;  %v1412_v50 = vadd.f32 %v1977_v38, %v1347_v35  ;;  %v3037_v44 = vld [vmem:[#allocation12_spill] sm:$0xff]  ;;  %v1946_v58 = vadd.f32 %v3041_v62, %v3040_v55  ;;  %v3048_v35 = vld [vmem:[#allocation5_spill] sm:$0xff] }
 0x141   :  { %v1526_v6 = vadd.f32 %v2045_v63, %v1461_v1  ;;  %v1529_v37 = vadd.f32 %v2048_v17, %v1464_v5  ;;  %v1660_v63 = vpop.f32.mrf.mxu0  ;;  %v1472_v41 = vadd.f32 %v2014_v27, %v1407_v20  ;;  %v1534_v46 = vadd.f32 %v2051_v0, %v1469_v34  ;;  %v3044_v17 = vld [vmem:[#allocation4_spill] sm:$0xff] }
 0x142   :  { %v2083_v31 = vpop.f32.mrf.mxu1  ;;  %v2020_v47 = vadd.f32 %v3037_v44, %v2905_v59  ;;  %v1477_v33 = vadd.f32 %v2017_v22, %v1412_v50  ;;  %v1415_v5 = vadd.f32 %v1980_v54, %v1350_v10  ;;  %v3042_v59 = vld [vmem:[#allocation2_spill] sm:$0xff]  ;;  %v1983_v16 = vadd.f32 %v3044_v17, %v3043_v15  ;;  %v3052_v44 = vld [vmem:[#allocation17_spill] sm:$0xff] }
 0x143   :  { %v1663_v2 = vpop.f32.mrf.mxu0  ;;  %v1537_v53 = vadd.f32 %v2054_v42, %v1472_v41  ;;  %v3045_v61 = vld [vmem:[#allocation14_spill] sm:$0xff] }
 0x144   :  { %v2084_v29 = vpop.f32.mrf.mxu1  ;;  %v2023_v0 = vadd.f32 %v2924_v56, %v3045_v61  ;;  %v3050_v56 = vld [vmem:[#allocation15_spill] sm:$0xff] }
 0x145   :  { %v2085_v8 = vadd.f32 %v2084_v29, %v2083_v31  ;;  %v2063_v38 = vadd.f32 %v2926_v51, %v3050_v56 }
 0x146   :  { %v2086_v3 = vpop.f32.mrf.mxu1 }
 0x147   :  { %v1591_v21 = vadd.f32 %v2085_v8, %v1526_v6  ;;  %v1665_v8 = vpop.f32.mrf.mxu0  ;;  %v1355_v6 = vadd.f32 %v1943_v57, %v1290_v49 }
 0x148   :  { %v2087_v30 = vpop.f32.mrf.mxu1 }
 0x149   :  { %v1656_v36 = vadd.f32 %v1655_v28, %v1591_v21  ;;  %v2088_v40 = vadd.f32 %v2087_v30, %v2086_v3  ;;  %v1666_v9 = vpop.f32.mrf.mxu0  ;;  %v2057_v28 = vadd.f32 %v3039_v26, %v3038_v25  ;;  %v1293_v3 = vadd.f32 %v3042_v59, %v2910_v60 }
 0x14a   :  { %v2089_v32 = vpop.f32.mrf.mxu1  ;;  %v1480_v21 = vadd.f32 %v2020_v47, %v1415_v5  ;;  %v1420_v20 = vadd.f32 %v1983_v16, %v1355_v6 }
 0x14b   :  { %1686 = vst [vmem:[%s3019_s3] sm:$0xff] %v1656_v36  ;;  %v1594_v52 = vadd.f32 %v2088_v40, %v1529_v37  ;;  %v1668_v29 = vpop.f32.mrf.mxu0  ;;  %v1542_v48 = vadd.f32 %v2057_v28, %v1477_v33  ;;  %v3046_v36 = vld [vmem:[#allocation11_spill] sm:$0xff]  ;;  %v3047_v37 = vld [vmem:[#allocation13_spill] sm:$0xff]  ;;  %v1358_v19 = vadd.f32 %v1946_v58, %v1293_v3 }
 0x14c   :  { %v2090_v43 = vpop.f32.mrf.mxu1  ;;  %v2060_v40 = vadd.f32 %v3047_v37, %v3046_v36 }
 0x14d   :  { %v1659_v23 = vadd.f32 %v1658_v24, %v1594_v52  ;;  %v2091_v39 = vadd.f32 %v2090_v43, %v2089_v32  ;;  %v1671_v13 = vpop.f32.mrf.mxu0  ;;  %v3049_v52 = vld [vmem:[#allocation6_spill] sm:$0xff]  ;;  %v1485_v43 = vadd.f32 %v2023_v0, %v1420_v20 }
 0x14e   :  { %v2092_v1 = vpop.f32.mrf.mxu1  ;;  %v1545_v4 = vadd.f32 %v2060_v40, %v1480_v21 }
 0x14f   :  { %1687 = vst [vmem:[%s3019_s3 + $0x8] sm:$0xff] %v1659_v23  ;;  %v1599_v7 = vadd.f32 %v2091_v39, %v1534_v46  ;;  %v1673_v34 = vpop.f32.mrf.mxu0  ;;  %v3051_v46 = vld [vmem:[#allocation16_spill] sm:$0xff] }
 0x150   :  { %v2093_v31 = vpop.f32.mrf.mxu1  ;;  %v2026_v22 = vadd.f32 %v2936_v18, %v3051_v46  ;;  %v3053_v18 = vld [vmem:[#allocation18_spill] sm:$0xff] }
 0x151   :  { %v1664_v12 = vadd.f32 %v1663_v2, %v1599_v7  ;;  %v2094_v14 = vadd.f32 %v2093_v31, %v2092_v1  ;;  %v1674_v32 = vpop.f32.mrf.mxu0  ;;  %v1986_v2 = vadd.f32 %v3049_v52, %v3048_v35  ;;  %v1550_v7 = vadd.f32 %v2063_v38, %v1485_v43 }
 0x152   :  { %v2095_v45 = vpop.f32.mrf.mxu1  ;;  %v2066_v47 = vadd.f32 %v3053_v18, %v3052_v44 }
 0x153   :  { %1688 = vst [vmem:[%s3019_s3 + $0x10] sm:$0xff] %v1664_v12  ;;  %v1602_v11 = vadd.f32 %v2094_v14, %v1537_v53  ;;  %v1676_v8 = vpop.f32.mrf.mxu0  ;;  %v1423_v42 = vadd.f32 %v1986_v2, %v1358_v19 }
 0x154   :  { %v2096_v24 = vpop.f32.mrf.mxu1 }
 0x155   :  { %v1667_v27 = vadd.f32 %v1666_v9, %v1602_v11  ;;  %v2097_v30 = vadd.f32 %v2096_v24, %v2095_v45  ;;  %v1679_v57 = vpop.f32.mrf.mxu0  ;;  %v1488_v9 = vadd.f32 %v2026_v22, %v1423_v42 }
 0x156   :  { %v2098_v63 = vpop.f32.mrf.mxu1 }
 0x157   :  { %1689 = vst [vmem:[%s3019_s3 + $0x18] sm:$0xff] %v1667_v27  ;;  %v1607_v60 = vadd.f32 %v2097_v30, %v1542_v48  ;;  %v1681_v54 = vpop.f32.mrf.mxu0  ;;  %v1553_v26 = vadd.f32 %v2066_v47, %v1488_v9 }
 0x158   :  { %v2099_v41 = vpop.f32.mrf.mxu1 }
 0x159   :  { %v1672_v23 = vadd.f32 %v1671_v13, %v1607_v60  ;;  %v2100_v39 = vadd.f32 %v2099_v41, %v2098_v63  ;;  %v1682_v33 = vpop.f32.mrf.mxu0 }
 0x15a   :  { %v2101_v10 = vpop.f32.mrf.mxu1 }
 0x15b   :  { %1690 = vst [vmem:[%s3019_s3 + $0x20] sm:$0xff] %v1672_v23  ;;  %v1610_v1 = vadd.f32 %v2100_v39, %v1545_v4  ;;  %v1684_v14 = vpop.f32.mrf.mxu0 }
 0x15c   :  { %v2102_v50 = vpop.f32.mrf.mxu1 }
 0x15d   :  { %v1675_v51 = vadd.f32 %v1674_v32, %v1610_v1  ;;  %v2103_v49 = vadd.f32 %v2102_v50, %v2101_v10 }
 0x15e   :  { %v2104_v53 = vpop.f32.mrf.mxu1 }
 0x15f   :  { %1691 = vst [vmem:[%s3019_s3 + $0x28] sm:$0xff] %v1675_v51  ;;  %v1615_v31 = vadd.f32 %v2103_v49, %v1550_v7 }
 0x160   :  { %v2105_v25 = vpop.f32.mrf.mxu1 }
 0x161   :  { %v1680_v28 = vadd.f32 %v1679_v57, %v1615_v31  ;;  %v2106_v12 = vadd.f32 %v2105_v25, %v2104_v53 }
 0x163   :  { %1692 = vst [vmem:[%s3019_s3 + $0x30] sm:$0xff] %v1680_v28  ;;  %v1618_v29 = vadd.f32 %v2106_v12, %v1553_v26 }
 0x165   :  { %v1683_v5 = vadd.f32 %v1682_v33, %v1618_v29 }
 0x167   :  { %1693 = vst [vmem:[%s3019_s3 + $0x38] sm:$0xff] %v1683_v5 }

// kernel: _net_forward_impl.237
= control target key start
LH: loop header
LB: loop body
LE: loop exit
PB: predicated region body
PF: predicated region fallthrough
CT: control target
= control target key end

     0   :  { %vm1410_vm0 = vcmask 785408   ;;  %s3364_s1 = inlined_call_operand.vmem [shape: bf16[2016,128], index: 1, kind: input, shape index: {}]   ;;  %s3365_s0 = inlined_call_operand.vmem [shape: bf16[64,2016], index: 0, kind: input, shape index: {}]   ;;  %s3366_s2 = inlined_call_operand.vmem [shape: f32[1,128], index: 2, kind: input, shape index: {}]   ;;  %s3367_s3 = inlined_call_operand.vmem [shape: f32[64,128], index: 3, kind: output, shape index: {}]  }
   0x1   :  { %v2431_v0 = vld [vmem:[%s3364_s1 + $0x78] sm:$0xff]   ;;  %v2435_v4 = vld [vmem:[%s3364_s1 + $0x70] sm:$0xff]   ;;  %v2439_v8 = vld [vmem:[%s3364_s1 + $0x68] sm:$0xff]  }
   0x2   :  { %v2432_v1 = vld [vmem:[%s3364_s1 + $0xf8] sm:$0xff]   ;;  %2150 = vmatprep.subr.bf16.mxu0 %v2431_v0  ;;  %v2436_v5 = vld [vmem:[%s3364_s1 + $0xf0] sm:$0xff]   ;;  %v2440_v9 = vld [vmem:[%s3364_s1 + $0xe8] sm:$0xff]  }
   0x3   :  { %v2433_v2 = vld [vmem:[%s3364_s1 + $0x38] sm:$0xff]   ;;  %2190 = vmatprep.subr.bf16.mxu1 %v2432_v1  ;;  %v2437_v6 = vld [vmem:[%s3364_s1 + $0x30] sm:$0xff]   ;;  %v2441_v10 = vld [vmem:[%s3364_s1 + $0x28] sm:$0xff]  }
   0x4   :  { %v2434_v3 = vld [vmem:[%s3364_s1 + $0xb8] sm:$0xff]   ;;  %2151 = vmatpush3.bf16.msra.mxu0 %v2433_v2  ;;  %v2438_v7 = vld [vmem:[%s3364_s1 + $0xb0] sm:$0xff]   ;;  %v2442_v11 = vld [vmem:[%s3364_s1 + $0xa8] sm:$0xff]  }
   0x5   :  { %2191 = vmatpush3.bf16.msra.mxu1 %v2434_v3  ;;  %2152 = vmatprep.subr.bf16.mxu0 %v2435_v4  ;;  %v2443_v12 = vld [vmem:[%s3364_s1 + $0x60] sm:$0xff]   ;;  %v2447_v16 = vld [vmem:[%s3364_s1 + $0x58] sm:$0xff]   ;;  %v2451_v20 = vld [vmem:[%s3364_s1 + $0x50] sm:$0xff]  }
   0x6   :  { %2192 = vmatprep.subr.bf16.mxu1 %v2436_v5  ;;  %v2444_v13 = vld [vmem:[%s3364_s1 + $0xe0] sm:$0xff]   ;;  %v2448_v17 = vld [vmem:[%s3364_s1 + $0xd8] sm:$0xff]   ;;  %v2452_v21 = vld [vmem:[%s3364_s1 + $0xd0] sm:$0xff]  }
   0x7   :  { %v2445_v14 = vld [vmem:[%s3364_s1 + $0x20] sm:$0xff]   ;;  %v2449_v18 = vld [vmem:[%s3364_s1 + $0x18] sm:$0xff]   ;;  %v2453_v22 = vld [vmem:[%s3364_s1 + $0x10] sm:$0xff]  }
   0x8   :  { %2153 = vmatpush3.bf16.msra.mxu0 %v2437_v6  ;;  %v2446_v15 = vld [vmem:[%s3364_s1 + $0xa0] sm:$0xff]   ;;  %v2450_v19 = vld [vmem:[%s3364_s1 + $0x98] sm:$0xff]   ;;  %v2454_v23 = vld [vmem:[%s3364_s1 + $0x90] sm:$0xff]  }
   0x9   :  { %2193 = vmatpush3.bf16.msra.mxu1 %v2438_v7  ;;  %2154 = vmatprep.subr.bf16.mxu0 %v2439_v8  ;;  %v2455_v24 = vld [vmem:[%s3364_s1 + $0x48] sm:$0xff]   ;;  %v2459_v28 = vld [vmem:[%s3364_s1 + $0x40] sm:$0xff]   ;;  %v2463_v40 = vld [vmem:[%s3364_s1 + $0x178] sm:$0xff]  }
   0xa   :  { %2194 = vmatprep.subr.bf16.mxu1 %v2440_v9  ;;  %v2456_v25 = vld [vmem:[%s3364_s1 + $0xc8] sm:$0xff]   ;;  %v2460_v29 = vld [vmem:[%s3364_s1 + $0xc0] sm:$0xff]   ;;  %v2464_v41 = vld [vmem:[%s3364_s1 + $0x1f8] sm:$0xff]  }
   0xb   :  { %v2457_v26 = vld [vmem:[%s3364_s1 + $0x8] sm:$0xff]   ;;  %v2461_v30 = vld [vmem:[%s3364_s1] sm:$0xff]   ;;  %v2465_v42 = vld [vmem:[%s3364_s1 + $0x138] sm:$0xff]  }
   0xc   :  { %2155 = vmatpush3.bf16.msra.mxu0 %v2441_v10  ;;  %v2458_v27 = vld [vmem:[%s3364_s1 + $0x88] sm:$0xff]   ;;  %v2462_v31 = vld [vmem:[%s3364_s1 + $0x80] sm:$0xff]   ;;  %v2466_v43 = vld [vmem:[%s3364_s1 + $0x1b8] sm:$0xff]  }
   0xd   :  { %2195 = vmatpush3.bf16.msra.mxu1 %v2442_v11  ;;  %2156 = vmatprep.subr.bf16.mxu0 %v2443_v12  ;;  %v15_v32 = vld [vmem:[%s3365_s0] sm:$0xff]  ;;  %v16_v34 = vld [vmem:[%s3365_s0 + $0x8] sm:$0xff]  ;;  %v2467_v44 = vld [vmem:[%s3364_s1 + $0x170] sm:$0xff]  }
   0xe   :  { %2196 = vmatprep.subr.bf16.mxu1 %v2444_v13  ;;  %v23_v33 = vld [vmem:[%s3365_s0 + $0x40] sm:$0xff]  ;;  %v24_v37 = vld [vmem:[%s3365_s0 + $0x48] sm:$0xff]  ;;  %v2468_v45 = vld [vmem:[%s3364_s1 + $0x1f0] sm:$0xff]  }
   0xf   :  { %v1956_v35 = vcombine.low %v15_v32, %v23_v33  ;;  %v1957_v36 = vcombine.high %v15_v32, %v23_v33  ;;  %v1958_v38 = vcombine.low %v16_v34, %v24_v37  ;;  %v1959_v39 = vcombine.high %v16_v34, %v24_v37  ;;  %v2469_v46 = vld [vmem:[%s3364_s1 + $0x130] sm:$0xff]   ;;  %v31_v48 = vld [vmem:[%s3365_s0 + $0x80] sm:$0xff]  ;;  %v32_v51 = vld [vmem:[%s3365_s0 + $0x88] sm:$0xff] }
  0x10   :  { %2157 = vmatpush3.bf16.msra.mxu0 %v2445_v14  ;;  %v2470_v47 = vld [vmem:[%s3364_s1 + $0x1b0] sm:$0xff]   ;;  %v39_v49 = vld [vmem:[%s3365_s0 + $0xc0] sm:$0xff]  ;;  %v40_v52 = vld [vmem:[%s3365_s0 + $0xc8] sm:$0xff] }
  0x11   :  { %2197 = vmatpush3.bf16.msra.mxu1 %v2446_v15  ;;  %2158 = vmatprep.subr.bf16.mxu0 %v2447_v16  ;;  %v1973_v50 = vcombine.high %v31_v48, %v39_v49  ;;  %v1972_v53 = vcombine.low %v31_v48, %v39_v49  ;;  %v1975_v54 = vcombine.high %v32_v51, %v40_v52  ;;  %v2471_v56 = vld [vmem:[%s3364_s1 + $0x168] sm:$0xff]   ;;  %v2475_v60 = vld [vmem:[%s3364_s1 + $0x160] sm:$0xff]   ;;  %v2479_v8 = vld [vmem:[%s3364_s1 + $0x158] sm:$0xff]  }
  0x12   :  { %2198 = vmatprep.subr.bf16.mxu1 %v2448_v17  ;;  %1455 = vmatprep.mubr.bf16.mxu0 %v1957_v36  ;;  %v1974_v55 = vcombine.low %v32_v51, %v40_v52  ;;  %v2472_v57 = vld [vmem:[%s3364_s1 + $0x1e8] sm:$0xff]   ;;  %v2476_v61 = vld [vmem:[%s3364_s1 + $0x1e0] sm:$0xff]   ;;  %v2480_v9 = vld [vmem:[%s3364_s1 + $0x1d8] sm:$0xff]  }
  0x13   :  { %1520 = vmatprep.mubr.bf16.mxu1 %v1959_v39  ;;  %v2473_v58 = vld [vmem:[%s3364_s1 + $0x128] sm:$0xff]   ;;  %v2477_v62 = vld [vmem:[%s3364_s1 + $0x120] sm:$0xff]   ;;  %v2481_v10 = vld [vmem:[%s3364_s1 + $0x118] sm:$0xff]  }
  0x14   :  { %2159 = vmatpush3.bf16.msra.mxu0 %v2449_v18  ;;  %v2474_v59 = vld [vmem:[%s3364_s1 + $0x1a8] sm:$0xff]   ;;  %v2478_v63 = vld [vmem:[%s3364_s1 + $0x1a0] sm:$0xff]   ;;  %v2482_v11 = vld [vmem:[%s3364_s1 + $0x198] sm:$0xff]  }
  0x15   :  { %2199 = vmatpush3.bf16.msra.mxu1 %v2450_v19  ;;  %2160 = vmatprep.subr.bf16.mxu0 %v2451_v20  ;;  %v47_v0 = vld [vmem:[%s3365_s0 + $0x100] sm:$0xff]  ;;  %v48_v2 = vld [vmem:[%s3365_s0 + $0x108] sm:$0xff]  ;;  %v2483_v12 = vld [vmem:[%s3364_s1 + $0x150] sm:$0xff]  }
  0x16   :  { %2200 = vmatprep.subr.bf16.mxu1 %v2452_v21  ;;  %v55_v1 = vld [vmem:[%s3365_s0 + $0x140] sm:$0xff]  ;;  %v56_v3 = vld [vmem:[%s3365_s0 + $0x148] sm:$0xff]  ;;  %v2484_v13 = vld [vmem:[%s3364_s1 + $0x1d0] sm:$0xff]  }
  0x17   :  { %v1989_v4 = vcombine.high %v47_v0, %v55_v1  ;;  %v1991_v5 = vcombine.high %v48_v2, %v56_v3  ;;  %v1988_v6 = vcombine.low %v47_v0, %v55_v1  ;;  %v1990_v7 = vcombine.low %v48_v2, %v56_v3  ;;  %v2485_v14 = vld [vmem:[%s3364_s1 + $0x110] sm:$0xff]   ;;  %v63_v16 = vld [vmem:[%s3365_s0 + $0x180] sm:$0xff]  ;;  %v64_v18 = vld [vmem:[%s3365_s0 + $0x188] sm:$0xff] }
  0x18   :  { %2161 = vmatpush3.bf16.msra.mxu0 %v2453_v22  ;;  %v2486_v15 = vld [vmem:[%s3364_s1 + $0x190] sm:$0xff]   ;;  %v71_v17 = vld [vmem:[%s3365_s0 + $0x1c0] sm:$0xff]  ;;  %v72_v20 = vld [vmem:[%s3365_s0 + $0x1c8] sm:$0xff] }
  0x19   :  { %2201 = vmatpush3.bf16.msra.mxu1 %v2454_v23  ;;  %2162 = vmatprep.subr.bf16.mxu0 %v2455_v24  ;;  %v2005_v19 = vcombine.high %v63_v16, %v71_v17  ;;  %v2004_v21 = vcombine.low %v63_v16, %v71_v17  ;;  %v2007_v22 = vcombine.high %v64_v18, %v72_v20  ;;  %v2487_v24 = vld [vmem:[%s3364_s1 + $0x148] sm:$0xff]   ;;  %v17_v32 = vld [vmem:[%s3365_s0 + $0x10] sm:$0xff]  ;;  %v18_v36 = vld [vmem:[%s3365_s0 + $0x18] sm:$0xff] }
  0x1a   :  { %2202 = vmatprep.subr.bf16.mxu1 %v2456_v25  ;;  %v2006_v23 = vcombine.low %v64_v18, %v72_v20  ;;  %v2488_v25 = vld [vmem:[%s3364_s1 + $0x1c8] sm:$0xff]   ;;  %v25_v33 = vld [vmem:[%s3365_s0 + $0x50] sm:$0xff]  ;;  %v26_v37 = vld [vmem:[%s3365_s0 + $0x58] sm:$0xff] }
  0x1b   :  { %v1960_v34 = vcombine.low %v17_v32, %v25_v33  ;;  %v1963_v39 = vcombine.high %v18_v36, %v26_v37  ;;  %v33_v48 = vld [vmem:[%s3365_s0 + $0x90] sm:$0xff]  ;;  %v42_v51 = vld [vmem:[%s3365_s0 + $0xd8] sm:$0xff] }
  0x1c   :  { %2163 = vmatpush3.bf16.msra.mxu0 %v2457_v26  ;;  %v2489_v26 = vld [vmem:[%s3364_s1 + $0x108] sm:$0xff]   ;;  %v41_v49 = vld [vmem:[%s3365_s0 + $0xd0] sm:$0xff]  ;;  %v50_v2 = vld [vmem:[%s3365_s0 + $0x118] sm:$0xff] }
  0x1d   :  { %2203 = vmatpush3.bf16.msra.mxu1 %v2458_v27  ;;  %2164 = vmatprep.subr.bf16.mxu0 %v2459_v28  ;;  %v2490_v27 = vld [vmem:[%s3364_s1 + $0x188] sm:$0xff]   ;;  %v2491_v28 = vld [vmem:[%s3364_s1 + $0x140] sm:$0xff]   ;;  %v1977_v52 = vcombine.high %v33_v48, %v41_v49  ;;  %v49_v0 = vld [vmem:[%s3365_s0 + $0x110] sm:$0xff] }
  0x1e   :  { %2204 = vmatprep.subr.bf16.mxu1 %v2460_v29  ;;  %v2492_v29 = vld [vmem:[%s3364_s1 + $0x1c0] sm:$0xff]   ;;  %v57_v1 = vld [vmem:[%s3365_s0 + $0x150] sm:$0xff]  ;;  %v74_v20 = vld [vmem:[%s3365_s0 + $0x1d8] sm:$0xff] }
  0x1f   :  { %v1993_v3 = vcombine.high %v49_v0, %v57_v1  ;;  %v65_v16 = vld [vmem:[%s3365_s0 + $0x190] sm:$0xff] }
  0x20   :  { %2165 = vmatpush3.bf16.msra.mxu0 %v2461_v30  ;;  %v2493_v30 = vld [vmem:[%s3364_s1 + $0x100] sm:$0xff]   ;;  %v73_v17 = vld [vmem:[%s3365_s0 + $0x1d0] sm:$0xff] }
  0x21   :  { %2205 = vmatpush3.bf16.msra.mxu1 %v2462_v31  ;;  %2230 = vmatprep.subr.bf16.mxu0 %v2463_v40  ;;  %v2494_v31 = vld [vmem:[%s3364_s1 + $0x180] sm:$0xff]   ;;  %v2495_v40 = vld [vmem:[%s3364_s1 + $0x278] sm:$0xff]   ;;  %v2009_v18 = vcombine.high %v65_v16, %v73_v17 }
  0x22   :  { %2270 = vmatprep.subr.bf16.mxu1 %v2464_v41  ;;  %v2496_v41 = vld [vmem:[%s3364_s1 + $0x2f8] sm:$0xff]  }
  0x23   :  { %1456 = vmatmul.mubr.bf16.vlgmr.msra.gmra.mxu0 %v1956_v35  ;;  %v1961_v35 = vcombine.high %v17_v32, %v25_v33  ;;  %v19_v32 = vld [vmem:[%s3365_s0 + $0x20] sm:$0xff] }
  0x24   :  { %1521 = vmatmul.mubr.bf16.vlgmr.msra.gmra.mxu1 %v1958_v38  ;;  %2231 = vmatpush3.bf16.msra.mxu0 %v2465_v42  ;;  %v1962_v38 = vcombine.low %v18_v36, %v26_v37  ;;  %v2497_v42 = vld [vmem:[%s3364_s1 + $0x238] sm:$0xff]   ;;  %v27_v33 = vld [vmem:[%s3365_s0 + $0x60] sm:$0xff] }
  0x25   :  { %2271 = vmatpush3.bf16.msra.mxu1 %v2466_v43  ;;  %2232 = vmatprep.subr.bf16.mxu0 %v2467_v44  ;;  %v2498_v43 = vld [vmem:[%s3364_s1 + $0x2b8] sm:$0xff]   ;;  %v2499_v44 = vld [vmem:[%s3364_s1 + $0x270] sm:$0xff]   ;;  %v1964_v36 = vcombine.low %v19_v32, %v27_v33  ;;  %v1965_v37 = vcombine.high %v19_v32, %v27_v33  ;;  %v2552_v33 = vld [vmem:[%s3364_s1 + $0x3e0] sm:$0xff]  }
  0x26   :  { %2272 = vmatprep.subr.bf16.mxu1 %v2468_v45  ;;  %1463 = vmatprep.mubr.bf16.mxu0 %v1973_v50  ;;  %v2500_v45 = vld [vmem:[%s3364_s1 + $0x2f0] sm:$0xff]   ;;  %v34_v50 = vld [vmem:[%s3365_s0 + $0x98] sm:$0xff] }
  0x27   :  { %1528 = vmatprep.mubr.bf16.mxu1 %v1975_v54  ;;  %v1976_v54 = vcombine.low %v33_v48, %v41_v49  ;;  %v43_v48 = vld [vmem:[%s3365_s0 + $0xe0] sm:$0xff] }
  0x28   :  { %2233 = vmatpush3.bf16.msra.mxu0 %v2469_v46  ;;  %v2501_v46 = vld [vmem:[%s3364_s1 + $0x230] sm:$0xff]  }
  0x29   :  { %2273 = vmatpush3.bf16.msra.mxu1 %v2470_v47  ;;  %2234 = vmatprep.subr.bf16.mxu0 %v2471_v56  ;;  %v2502_v47 = vld [vmem:[%s3364_s1 + $0x2b0] sm:$0xff]   ;;  %v2503_v56 = vld [vmem:[%s3364_s1 + $0x268] sm:$0xff]  }
  0x2a   :  { %2274 = vmatprep.subr.bf16.mxu1 %v2472_v57  ;;  %v2504_v57 = vld [vmem:[%s3364_s1 + $0x2e8] sm:$0xff]  }
  0x2b   :  { %1464 = vmatmul.mubr.bf16.gmra.mxu0 %v1972_v53  ;;  %v1979_v53 = vcombine.high %v34_v50, %v42_v51 }
  0x2c   :  { %1529 = vmatmul.mubr.bf16.gmra.mxu1 %v1974_v55  ;;  %2235 = vmatpush3.bf16.msra.mxu0 %v2473_v58  ;;  %v1978_v55 = vcombine.low %v34_v50, %v42_v51  ;;  %v2505_v58 = vld [vmem:[%s3364_s1 + $0x228] sm:$0xff]  }
  0x2d   :  { %2275 = vmatpush3.bf16.msra.mxu1 %v2474_v59  ;;  %2236 = vmatprep.subr.bf16.mxu0 %v2475_v60  ;;  %v2506_v59 = vld [vmem:[%s3364_s1 + $0x2a8] sm:$0xff]   ;;  %v2507_v60 = vld [vmem:[%s3364_s1 + $0x260] sm:$0xff]  }
  0x2e   :  { %2276 = vmatprep.subr.bf16.mxu1 %v2476_v61  ;;  %1471 = vmatprep.mubr.bf16.mxu0 %v1989_v4  ;;  %v2508_v61 = vld [vmem:[%s3364_s1 + $0x2e0] sm:$0xff]   ;;  %v58_v4 = vld [vmem:[%s3365_s0 + $0x158] sm:$0xff]  ;;  %v2533_v51 = vld [vmem:[%s3364_s1 + $0x368] sm:$0xff]  }
  0x2f   :  { %1536 = vmatprep.mubr.bf16.mxu1 %v1991_v5  ;;  %v1992_v5 = vcombine.low %v49_v0, %v57_v1  ;;  %v2539_v0 = vld [vmem:[%s3364_s1 + $0x358] sm:$0xff]  }
  0x30   :  { %2237 = vmatpush3.bf16.msra.mxu0 %v2477_v62  ;;  %v2509_v62 = vld [vmem:[%s3364_s1 + $0x220] sm:$0xff]  }
  0x31   :  { %2277 = vmatpush3.bf16.msra.mxu1 %v2478_v63  ;;  %2238 = vmatprep.subr.bf16.mxu0 %v2479_v8  ;;  %v2510_v63 = vld [vmem:[%s3364_s1 + $0x2a0] sm:$0xff]   ;;  %v2511_v8 = vld [vmem:[%s3364_s1 + $0x258] sm:$0xff]  }
  0x32   :  { %2278 = vmatprep.subr.bf16.mxu1 %v2480_v9  ;;  %v2512_v9 = vld [vmem:[%s3364_s1 + $0x2d8] sm:$0xff]  }
  0x33   :  { %1472 = vmatmul.mubr.bf16.gmra.mxu0 %v1988_v6  ;;  %v1995_v6 = vcombine.high %v50_v2, %v58_v4 }
  0x34   :  { %1537 = vmatmul.mubr.bf16.gmra.mxu1 %v1990_v7  ;;  %2239 = vmatpush3.bf16.msra.mxu0 %v2481_v10  ;;  %v1994_v7 = vcombine.low %v50_v2, %v58_v4  ;;  %v2513_v10 = vld [vmem:[%s3364_s1 + $0x218] sm:$0xff]   ;;  %v52_v2 = vld [vmem:[%s3365_s0 + $0x128] sm:$0xff] }
  0x35   :  { %2279 = vmatpush3.bf16.msra.mxu1 %v2482_v11  ;;  %2240 = vmatprep.subr.bf16.mxu0 %v2483_v12  ;;  %v2514_v11 = vld [vmem:[%s3364_s1 + $0x298] sm:$0xff]   ;;  %v2515_v12 = vld [vmem:[%s3364_s1 + $0x250] sm:$0xff]  }
  0x36   :  { %2280 = vmatprep.subr.bf16.mxu1 %v2484_v13  ;;  %1479 = vmatprep.mubr.bf16.mxu0 %v2005_v19  ;;  %v2516_v13 = vld [vmem:[%s3364_s1 + $0x2d0] sm:$0xff]   ;;  %v66_v19 = vld [vmem:[%s3365_s0 + $0x198] sm:$0xff] }
  0x37   :  { %1544 = vmatprep.mubr.bf16.mxu1 %v2007_v22  ;;  %v2011_v22 = vcombine.high %v66_v19, %v74_v20 }
  0x38   :  { %2241 = vmatpush3.bf16.msra.mxu0 %v2485_v14  ;;  %v2517_v14 = vld [vmem:[%s3364_s1 + $0x210] sm:$0xff]  }
  0x39   :  { %2281 = vmatpush3.bf16.msra.mxu1 %v2486_v15  ;;  %2242 = vmatprep.subr.bf16.mxu0 %v2487_v24  ;;  %v2518_v15 = vld [vmem:[%s3364_s1 + $0x290] sm:$0xff]   ;;  %v2519_v24 = vld [vmem:[%s3364_s1 + $0x248] sm:$0xff]  }
  0x3a   :  { %2282 = vmatprep.subr.bf16.mxu1 %v2488_v25  ;;  %v2520_v25 = vld [vmem:[%s3364_s1 + $0x2c8] sm:$0xff]  }
  0x3b   :  { %1480 = vmatmul.mubr.bf16.gmra.mxu0 %v2004_v21  ;;  %v2008_v21 = vcombine.low %v65_v16, %v73_v17  ;;  %v76_v16 = vld [vmem:[%s3365_s0 + $0x1e8] sm:$0xff] }
  0x3c   :  { %1545 = vmatmul.mubr.bf16.gmra.mxu1 %v2006_v23  ;;  %2243 = vmatpush3.bf16.msra.mxu0 %v2489_v26  ;;  %v2010_v23 = vcombine.low %v66_v19, %v74_v20  ;;  %v2521_v26 = vld [vmem:[%s3364_s1 + $0x208] sm:$0xff]  }
  0x3d   :  { %2283 = vmatpush3.bf16.msra.mxu1 %v2490_v27  ;;  %2244 = vmatprep.subr.bf16.mxu0 %v2491_v28  ;;  %v2522_v27 = vld [vmem:[%s3364_s1 + $0x288] sm:$0xff]   ;;  %v2523_v28 = vld [vmem:[%s3364_s1 + $0x240] sm:$0xff]  }
  0x3e   :  { %2284 = vmatprep.subr.bf16.mxu1 %v2492_v29  ;;  %1585 = vmatprep.mubr.bf16.mxu0 %v1961_v35  ;;  %v2524_v29 = vld [vmem:[%s3364_s1 + $0x2c0] sm:$0xff]   ;;  %v28_v35 = vld [vmem:[%s3365_s0 + $0x68] sm:$0xff] }
  0x3f   :  { %1650 = vmatprep.mubr.bf16.mxu1 %v1963_v39  ;;  %v2547_v19 = vld [vmem:[%s3364_s1 + $0x388] sm:$0xff]  }
  0x40   :  { %2245 = vmatpush3.bf16.msra.mxu0 %v2493_v30  ;;  %v2525_v30 = vld [vmem:[%s3364_s1 + $0x200] sm:$0xff]   ;;  %v2546_v20 = vld [vmem:[%s3364_s1 + $0x308] sm:$0xff]  }
  0x41   :  { %2285 = vmatpush3.bf16.msra.mxu1 %v2494_v31  ;;  %2310 = vmatprep.subr.bf16.mxu0 %v2495_v40  ;;  %v2526_v31 = vld [vmem:[%s3364_s1 + $0x280] sm:$0xff]   ;;  %v2527_v40 = vld [vmem:[%s3364_s1 + $0x378] sm:$0xff]  }
  0x42   :  { %2350 = vmatprep.subr.bf16.mxu1 %v2496_v41  ;;  %v2557_v41 = vmov 0  }
  0x43   :  { %1586 = vmatmul.mubr.bf16.vlgmr.msra.gmra.mxu0 %v1960_v34  ;;  %v20_v34 = vld [vmem:[%s3365_s0 + $0x28] sm:$0xff] }
  0x44   :  { %1651 = vmatmul.mubr.bf16.vlgmr.msra.gmra.mxu1 %v1962_v38  ;;  %2311 = vmatpush3.bf16.msra.mxu0 %v2497_v42  ;;  %v1966_v38 = vcombine.low %v20_v34, %v28_v35  ;;  %v1967_v39 = vcombine.high %v20_v34, %v28_v35  ;;  %v2528_v42 = vld [vmem:[%s3364_s1 + $0x338] sm:$0xff]  }
  0x45   :  { %2351 = vmatpush3.bf16.msra.mxu1 %v2498_v43  ;;  %2312 = vmatprep.subr.bf16.mxu0 %v2499_v44  ;;  %v2529_v43 = vld [vmem:[%s3364_s1 + $0x3b8] sm:$0xff]   ;;  %v2530_v44 = vld [vmem:[%s3364_s1 + $0x370] sm:$0xff]  }
  0x46   :  { %2352 = vmatprep.subr.bf16.mxu1 %v2500_v45  ;;  %1593 = vmatprep.mubr.bf16.mxu0 %v1977_v52  ;;  %v2531_v45 = vld [vmem:[%s3364_s1 + $0x330] sm:$0xff]   ;;  %v36_v52 = vld [vmem:[%s3365_s0 + $0xa8] sm:$0xff]  ;;  %v22_v34 = vld [vmem:[%s3365_s0 + $0x38] sm:$0xff] }
  0x47   :  { %1658 = vmatprep.mubr.bf16.mxu1 %v1979_v53  ;;  %v44_v53 = vld [vmem:[%s3365_s0 + $0xe8] sm:$0xff]  ;;  %v30_v35 = vld [vmem:[%s3365_s0 + $0x78] sm:$0xff] }
  0x48   :  { %2313 = vmatpush3.bf16.msra.mxu0 %v2501_v46  ;;  %v2532_v46 = vld [vmem:[%s3364_s1 + $0x3b0] sm:$0xff]  }
  0x49   :  { %2353 = vmatpush3.bf16.msra.mxu1 %v2502_v47  ;;  %2314 = vmatprep.subr.bf16.mxu0 %v2503_v56  ;;  %v35_v47 = vld [vmem:[%s3365_s0 + $0xa0] sm:$0xff]  ;;  %v1982_v56 = vcombine.low %v36_v52, %v44_v53 }
  0x4a   :  { %2354 = vmatprep.subr.bf16.mxu1 %v2504_v57  ;;  %v1981_v49 = vcombine.high %v35_v47, %v43_v48  ;;  %v1980_v50 = vcombine.low %v35_v47, %v43_v48  ;;  %v2535_v57 = vld [vmem:[%s3364_s1 + $0x3a8] sm:$0xff]  }
  0x4b   :  { %1594 = vmatmul.mubr.bf16.gmra.mxu0 %v1976_v54  ;;  %v1983_v54 = vcombine.high %v36_v52, %v44_v53  ;;  %v2555_v47 = vld [vmem:[%s3364_s1 + $0x3c8] sm:$0xff]   ;;  %v1970_v52 = vcombine.low %v22_v34, %v30_v35 }
  0x4c   :  { %1659 = vmatmul.mubr.bf16.gmra.mxu1 %v1978_v55  ;;  %2315 = vmatpush3.bf16.msra.mxu0 %v2505_v58  ;;  %v2534_v55 = vld [vmem:[%s3364_s1 + $0x328] sm:$0xff]   ;;  %v2536_v58 = vld [vmem:[%s3364_s1 + $0x360] sm:$0xff]  }
  0x4d   :  { %2355 = vmatpush3.bf16.msra.mxu1 %v2506_v59  ;;  %2316 = vmatprep.subr.bf16.mxu0 %v2507_v60  ;;  %v2537_v59 = vld [vmem:[%s3364_s1 + $0x320] sm:$0xff]  }
  0x4e   :  { %2356 = vmatprep.subr.bf16.mxu1 %v2508_v61  ;;  %1601 = vmatprep.mubr.bf16.mxu0 %v1993_v3  ;;  %v2538_v60 = vld [vmem:[%s3364_s1 + $0x3a0] sm:$0xff]   ;;  %v60_v3 = vld [vmem:[%s3365_s0 + $0x168] sm:$0xff] }
  0x4f   :  { %1666 = vmatprep.mubr.bf16.mxu1 %v1995_v6  ;;  %v51_v61 = vld [vmem:[%s3365_s0 + $0x120] sm:$0xff]  ;;  %v1999_v4 = vcombine.high %v52_v2, %v60_v3  ;;  %v2541_v6 = vld [vmem:[%s3364_s1 + $0x398] sm:$0xff]  }
  0x50   :  { %2317 = vmatpush3.bf16.msra.mxu0 %v2509_v62  ;;  %v59_v62 = vld [vmem:[%s3365_s0 + $0x160] sm:$0xff] }
  0x51   :  { %2357 = vmatpush3.bf16.msra.mxu1 %v2510_v63  ;;  %2318 = vmatprep.subr.bf16.mxu0 %v2511_v8  ;;  %v1997_v63 = vcombine.high %v51_v61, %v59_v62  ;;  %v1996_v1 = vcombine.low %v51_v61, %v59_v62  ;;  %v2542_v8 = vld [vmem:[%s3364_s1 + $0x350] sm:$0xff]  }
  0x52   :  { %2358 = vmatprep.subr.bf16.mxu1 %v2512_v9  ;;  %v2543_v9 = vld [vmem:[%s3364_s1 + $0x310] sm:$0xff]  }
  0x53   :  { %1602 = vmatmul.mubr.bf16.gmra.mxu0 %v1992_v5  ;;  %v2540_v5 = vld [vmem:[%s3364_s1 + $0x318] sm:$0xff]  }
  0x54   :  { %1667 = vmatmul.mubr.bf16.gmra.mxu1 %v1994_v7  ;;  %2319 = vmatpush3.bf16.msra.mxu0 %v2513_v10  ;;  %v1998_v7 = vcombine.low %v52_v2, %v60_v3  ;;  %v2544_v10 = vld [vmem:[%s3364_s1 + $0x390] sm:$0xff]  }
  0x55   :  { %2359 = vmatpush3.bf16.msra.mxu1 %v2514_v11  ;;  %2320 = vmatprep.subr.bf16.mxu0 %v2515_v12  ;;  %v67_v11 = vld [vmem:[%s3365_s0 + $0x1a0] sm:$0xff] }
  0x56   :  { %2360 = vmatprep.subr.bf16.mxu1 %v2516_v13  ;;  %1609 = vmatprep.mubr.bf16.mxu0 %v2009_v18  ;;  %v75_v12 = vld [vmem:[%s3365_s0 + $0x1e0] sm:$0xff] }
  0x57   :  { %1674 = vmatprep.mubr.bf16.mxu1 %v2011_v22  ;;  %v2013_v13 = vcombine.high %v67_v11, %v75_v12  ;;  %v2012_v17 = vcombine.low %v67_v11, %v75_v12  ;;  %v2548_v22 = vld [vmem:[%s3364_s1 + $0x340] sm:$0xff]  }
  0x58   :  { %2321 = vmatpush3.bf16.msra.mxu0 %v2517_v14  ;;  %v2545_v14 = vld [vmem:[%s3364_s1 + $0x348] sm:$0xff]  }
  0x59   :  { %2361 = vmatpush3.bf16.msra.mxu1 %v2518_v15  ;;  %2322 = vmatprep.subr.bf16.mxu0 %v2519_v24  ;;  %v68_v15 = vld [vmem:[%s3365_s0 + $0x1a8] sm:$0xff]  ;;  %v21_v24 = vld [vmem:[%s3365_s0 + $0x30] sm:$0xff] }
  0x5a   :  { %2362 = vmatprep.subr.bf16.mxu1 %v2520_v25  ;;  %v2015_v18 = vcombine.high %v68_v15, %v76_v16  ;;  %v29_v25 = vld [vmem:[%s3365_s0 + $0x70] sm:$0xff] }
  0x5b   :  { %1610 = vmatmul.mubr.bf16.gmra.mxu0 %v2008_v21  ;;  %v2014_v21 = vcombine.low %v68_v15, %v76_v16 }
  0x5c   :  { %1675 = vmatmul.mubr.bf16.gmra.mxu1 %v2010_v23  ;;  %2323 = vmatpush3.bf16.msra.mxu0 %v2521_v26  ;;  %v2550_v23 = vld [vmem:[%s3364_s1 + $0x380] sm:$0xff]  }
  0x5d   :  { %2363 = vmatpush3.bf16.msra.mxu1 %v2522_v27  ;;  %2324 = vmatprep.subr.bf16.mxu0 %v2523_v28  ;;  %v2549_v26 = vld [vmem:[%s3364_s1 + $0x300] sm:$0xff]   ;;  %v1969_v27 = vcombine.high %v21_v24, %v29_v25  ;;  %v37_v28 = vld [vmem:[%s3365_s0 + $0xb0] sm:$0xff] }
  0x5e   :  { %2364 = vmatprep.subr.bf16.mxu1 %v2524_v29  ;;  %1715 = vmatprep.mubr.bf16.mxu0 %v1965_v37  ;;  %v45_v29 = vld [vmem:[%s3365_s0 + $0xf0] sm:$0xff] }
  0x5f   :  { %1780 = vmatprep.mubr.bf16.mxu1 %v1967_v39  ;;  %v1985_v32 = vcombine.high %v37_v28, %v45_v29  ;;  %v61_v37 = vld [vmem:[%s3365_s0 + $0x170] sm:$0xff]  ;;  %v1984_v39 = vcombine.low %v37_v28, %v45_v29 }
  0x60   :  { %2325 = vmatpush3.bf16.msra.mxu0 %v2525_v30  ;;  %v1968_v30 = vcombine.low %v21_v24, %v29_v25 }
  0x61   :  { %2365 = vmatpush3.bf16.msra.mxu1 %v2526_v31  ;;  %2390 = vmatprep.subr.bf16.mxu0 %v2527_v40  ;;  %v2551_v31 = vld [vmem:[%s3364_s1 + $0x3e8] sm:$0xff]   ;;  %v2553_v40 = vld [vmem:[%s3364_s1 + $0x3d8] sm:$0xff]  }
  0x62   :  { %1878 = vmatprep.subr.bf16.mxu1 %v2557_v41 }
  0x63   :  { %1716 = vmatmul.mubr.bf16.vlgmr.msra.gmra.mxu0 %v1964_v36  ;;  %v53_v36 = vld [vmem:[%s3365_s0 + $0x130] sm:$0xff] }
  0x64   :  { %1781 = vmatmul.mubr.bf16.vlgmr.msra.gmra.mxu1 %v1966_v38  ;;  %2391 = vmatpush3.bf16.msra.mxu0 %v2528_v42  ;;  %v1971_v38 = vcombine.high %v22_v34, %v30_v35  ;;  %v2001_v42 = vcombine.high %v53_v36, %v61_v37 }
  0x65   :  { %1879 = vmatpush1.bf16.msra.mxu1 %v2529_v43  ;;  %2392 = vmatprep.subr.bf16.mxu0 %v2530_v44  ;;  %v2554_v43 = vld [vmem:[%s3364_s1 + $0x3d0] sm:$0xff]  }
  0x66   :  { %1880 = vmatprep.subr.bf16.mxu1 %v2557_v41  ;;  %1723 = vmatprep.mubr.bf16.mxu0 %v1981_v49  ;;  %v69_v44 = vld [vmem:[%s3365_s0 + $0x1b0] sm:$0xff]  ;;  %v2556_v49 = vld [vmem:[%s3364_s1 + $0x3c0] sm:$0xff]  }
  0x67   :  { %1788 = vmatprep.mubr.bf16.mxu1 %v1983_v54 }
  0x68   :  { %2393 = vmatpush3.bf16.msra.mxu0 %v2531_v45  ;;  %v77_v45 = vld [vmem:[%s3365_s0 + $0x1f0] sm:$0xff] }
  0x69   :  { %1881 = vmatpush1.bf16.msra.mxu1 %v2532_v46  ;;  %2394 = vmatprep.subr.bf16.mxu0 %v2533_v51  ;;  %v2000_v46 = vcombine.low %v53_v36, %v61_v37  ;;  %v2017_v48 = vcombine.high %v69_v44, %v77_v45  ;;  %v46_v51 = vld [vmem:[%s3365_s0 + $0xf8] sm:$0xff]  ;;  %v2016_v53 = vcombine.low %v69_v44, %v77_v45 }
  0x6a   :  { %1882 = vmatprep.subr.bf16.mxu1 %v2557_v41 }
  0x6b   :  { %1724 = vmatmul.mubr.bf16.gmra.mxu0 %v1980_v50  ;;  %v38_v50 = vld [vmem:[%s3365_s0 + $0xb8] sm:$0xff] }
  0x6c   :  { %2395 = vmatpush3.bf16.msra.mxu0 %v2534_v55  ;;  %1789 = vmatmul.mubr.bf16.gmra.mxu1 %v1982_v56  ;;  %v1987_v54 = vcombine.high %v38_v50, %v46_v51  ;;  %v62_v55 = vld [vmem:[%s3365_s0 + $0x178] sm:$0xff]  ;;  %v1986_v56 = vcombine.low %v38_v50, %v46_v51 }
  0x6d   :  { %1883 = vmatpush1.bf16.msra.mxu1 %v2535_v57  ;;  %2396 = vmatprep.subr.bf16.mxu0 %v2536_v58  ;;  %v70_v58 = vld [vmem:[%s3365_s0 + $0x1b8] sm:$0xff] }
  0x6e   :  { %1884 = vmatprep.subr.bf16.mxu1 %v2557_v41  ;;  %1731 = vmatprep.mubr.bf16.mxu0 %v1997_v63 }
  0x6f   :  { %1796 = vmatprep.mubr.bf16.mxu1 %v1999_v4 }
  0x70   :  { %2397 = vmatpush3.bf16.msra.mxu0 %v2537_v59  ;;  %v78_v59 = vld [vmem:[%s3365_s0 + $0x1f8] sm:$0xff] }
  0x71   :  { %1885 = vmatpush1.bf16.msra.mxu1 %v2538_v60  ;;  %2398 = vmatprep.subr.bf16.mxu0 %v2539_v0  ;;  %v2019_v61 = vcombine.high %v70_v58, %v78_v59  ;;  %v2018_v62 = vcombine.low %v70_v58, %v78_v59 }
  0x72   :  { %1886 = vmatprep.subr.bf16.mxu1 %v2557_v41 }
  0x73   :  { %1732 = vmatmul.mubr.bf16.gmra.mxu0 %v1996_v1  ;;  %v1955_v1 = vld [vmem:[%s3366_s2] ss:$0 sm:$0xff] }
  0x74   :  { %2399 = vmatpush3.bf16.msra.mxu0 %v2540_v5  ;;  %1797 = vmatmul.mubr.bf16.gmra.mxu1 %v1998_v7 }
  0x75   :  { %1887 = vmatpush1.bf16.msra.mxu1 %v2541_v6  ;;  %2400 = vmatprep.subr.bf16.mxu0 %v2542_v8 }
  0x76   :  { %1888 = vmatprep.subr.bf16.mxu1 %v2557_v41  ;;  %1739 = vmatprep.mubr.bf16.mxu0 %v2013_v13 }
  0x77   :  { %1804 = vmatprep.mubr.bf16.mxu1 %v2015_v18 }
  0x78   :  { %2401 = vmatpush3.bf16.msra.mxu0 %v2543_v9 }
  0x79   :  { %1889 = vmatpush1.bf16.msra.mxu1 %v2544_v10  ;;  %2402 = vmatprep.subr.bf16.mxu0 %v2545_v14 }
  0x7a   :  { %1890 = vmatprep.subr.bf16.mxu1 %v2557_v41 }
  0x7b   :  { %1740 = vmatmul.mubr.bf16.gmra.mxu0 %v2012_v17 }
  0x7c   :  { %2403 = vmatpush3.bf16.msra.mxu0 %v2546_v20  ;;  %1805 = vmatmul.mubr.bf16.gmra.mxu1 %v2014_v21 }
  0x7d   :  { %1891 = vmatpush1.bf16.msra.mxu1 %v2547_v19  ;;  %2404 = vmatprep.subr.bf16.mxu0 %v2548_v22 }
  0x7e   :  { %1892 = vmatprep.subr.bf16.mxu1 %v2557_v41  ;;  %1845 = vmatprep.mubr.bf16.mxu0 %v1969_v27 }
  0x7f   :  { %2146 = vmatprep.mubr.msk.bf16.mxu1 %vm1410_vm0, %v1971_v38 }
  0x80   :  { %2405 = vmatpush3.bf16.msra.mxu0 %v2549_v26 }
  0x81   :  { %1893 = vmatpush1.bf16.msra.mxu1 %v2550_v23 }
  0x82   :  { %1898 = vmatprep.subr.bf16.mxu1 %v2557_v41 }
  0x83   :  { %1846 = vmatmul.mubr.bf16.vlgmr.msra.gmra.mxu0 %v1968_v30 }
  0x84   :  { %1853 = vmatprep.mubr.bf16.mxu0 %v1985_v32 }
  0x85   :  { %1899 = vmatpush2.bf16.msra.mxu1 %v2551_v31 }
  0x86   :  { %1900 = vmatprep.subr.bf16.mxu1 %v2557_v41 }
  0x89   :  { %1901 = vmatpush2.bf16.msra.mxu1 %v2552_v33 }
  0x8a   :  { %1902 = vmatprep.subr.bf16.mxu1 %v2557_v41 }
  0x8b   :  { %1854 = vmatmul.mubr.bf16.gmra.mxu0 %v1984_v39 }
  0x8c   :  { %1861 = vmatprep.mubr.bf16.mxu0 %v2001_v42 }
  0x8d   :  { %1903 = vmatpush2.bf16.msra.mxu1 %v2553_v40 }
  0x8e   :  { %1904 = vmatprep.subr.bf16.mxu1 %v2557_v41 }
  0x91   :  { %1905 = vmatpush2.bf16.msra.mxu1 %v2554_v43 }
  0x92   :  { %1906 = vmatprep.subr.bf16.mxu1 %v2557_v41 }
  0x93   :  { %1862 = vmatmul.mubr.bf16.gmra.mxu0 %v2000_v46 }
  0x94   :  { %1869 = vmatprep.mubr.bf16.mxu0 %v2017_v48 }
  0x95   :  { %1907 = vmatpush2.bf16.msra.mxu1 %v2555_v47 }
  0x96   :  { %1908 = vmatprep.subr.bf16.mxu1 %v2557_v41  ;;  %v54_v41 = vld [vmem:[%s3365_s0 + $0x138] sm:$0xff] }
  0x97   :  { %v2003_v57 = vcombine.high %v54_v41, %v62_v55  ;;  %v2002_v60 = vcombine.low %v54_v41, %v62_v55 }
  0x99   :  { %1909 = vmatpush2.bf16.msra.mxu1 %v2556_v49 }
  0x9b   :  { %1870 = vmatmul.mubr.bf16.gmra.mxu0 %v2016_v53 }
  0x9c   :  { %1911 = vmatmul.mubr.bf16.vlgmr.msra.gmra.mxu1 %v1970_v52 }
  0x9d   :  { %2147 = vmatprep.mubr.msk.bf16.mxu1 %vm1410_vm0, %v1987_v54 }
  0xa4   :  { %1919 = vmatmul.mubr.bf16.gmra.mxu1 %v1986_v56 }
  0xa5   :  { %2148 = vmatprep.mubr.msk.bf16.mxu1 %vm1410_vm0, %v2003_v57 }
  0xac   :  { %1927 = vmatmul.mubr.bf16.gmra.mxu1 %v2002_v60 }
  0xad   :  { %2149 = vmatprep.mubr.msk.bf16.mxu1 %vm1410_vm0, %v2019_v61 }
  0xb4   :  { %1935 = vmatmul.mubr.bf16.gmra.mxu1 %v2018_v62 }
  0xe3   :  { %v2166_v63 = vpop.f32.mrf.mxu0 }
  0xe4   :  { %v2206_v0 = vpop.f32.mrf.mxu1 }
  0xe5   :  { %v2167_v2 = vpop.f32.mrf.mxu0 }
  0xe6   :  { %v2168_v3 = vadd.f32 %v2167_v2, %v2166_v63  ;;  %v2207_v4 = vpop.f32.mrf.mxu1 }
  0xe7   :  { %v2208_v5 = vadd.f32 %v2207_v4, %v2206_v0  ;;  %v2169_v6 = vpop.f32.mrf.mxu0 }
  0xe8   :  { %v1458_v7 = vadd.f32 %v2168_v3, %v1955_v1  ;;  %v2209_v8 = vpop.f32.mrf.mxu1 }
  0xe9   :  { %v2170_v9 = vpop.f32.mrf.mxu0 }
  0xea   :  { %v3169_v10 = vadd.f32 %v2208_v5, %v1458_v7  ;;  %v2171_v11 = vadd.f32 %v2170_v9, %v2169_v6  ;;  %v2210_v12 = vpop.f32.mrf.mxu1 }
  0xeb   :  { %v2211_v13 = vadd.f32 %v2210_v12, %v2209_v8  ;;  %v2172_v15 = vpop.f32.mrf.mxu0 }
  0xec   :  { %v1461_v14 = vadd.f32 %v2171_v11, %v1955_v1  ;;  %v2212_v16 = vpop.f32.mrf.mxu1 }
  0xed   :  { %v2173_v18 = vpop.f32.mrf.mxu0 }
  0xee   :  { %v3171_v17 = vadd.f32 %v2211_v13, %v1461_v14  ;;  %v2174_v19 = vadd.f32 %v2173_v18, %v2172_v15  ;;  %v2213_v20 = vpop.f32.mrf.mxu1 }
  0xef   :  { %v2214_v21 = vadd.f32 %v2213_v20, %v2212_v16  ;;  %v2175_v22 = vpop.f32.mrf.mxu0 }
  0xf0   :  { %v1466_v23 = vadd.f32 %v2174_v19, %v1955_v1  ;;  %v2215_v24 = vpop.f32.mrf.mxu1 }
  0xf1   :  { %v2176_v25 = vpop.f32.mrf.mxu0 }
  0xf2   :  { %v3173_v26 = vadd.f32 %v2214_v21, %v1466_v23  ;;  %v2177_v27 = vadd.f32 %v2176_v25, %v2175_v22  ;;  %v2216_v28 = vpop.f32.mrf.mxu1 }
  0xf3   :  { %v2217_v29 = vadd.f32 %v2216_v28, %v2215_v24  ;;  %v2178_v31 = vpop.f32.mrf.mxu0 }
  0xf4   :  { %v1469_v30 = vadd.f32 %v2177_v27, %v1955_v1  ;;  %v2218_v32 = vpop.f32.mrf.mxu1 }
  0xf5   :  { %v2179_v34 = vpop.f32.mrf.mxu0 }
  0xf6   :  { %v3175_v33 = vadd.f32 %v2217_v29, %v1469_v30  ;;  %v2219_v35 = vpop.f32.mrf.mxu1  ;;  %v2180_v36 = vadd.f32 %v2179_v34, %v2178_v31 }
  0xf7   :  { %v2220_v37 = vadd.f32 %v2219_v35, %v2218_v32  ;;  %v2181_v38 = vpop.f32.mrf.mxu0 }
  0xf8   :  { %v2221_v39 = vpop.f32.mrf.mxu1  ;;  %v1474_v40 = vadd.f32 %v2180_v36, %v1955_v1 }
  0xf9   :  { %v2182_v42 = vpop.f32.mrf.mxu0 }
  0xfa   :  { %v2222_v43 = vpop.f32.mrf.mxu1  ;;  %v3177_v44 = vadd.f32 %v2220_v37, %v1474_v40  ;;  %v2183_v45 = vadd.f32 %v2182_v42, %v2181_v38 }
  0xfb   :  { %v2223_v46 = vadd.f32 %v2222_v43, %v2221_v39  ;;  %v2184_v48 = vpop.f32.mrf.mxu0 }
  0xfc   :  { %v1477_v47 = vadd.f32 %v2183_v45, %v1955_v1  ;;  %v2224_v49 = vpop.f32.mrf.mxu1 }
  0xfd   :  { %v2185_v51 = vpop.f32.mrf.mxu0 }
  0xfe   :  { %v3179_v50 = vadd.f32 %v2223_v46, %v1477_v47  ;;  %v2186_v52 = vadd.f32 %v2185_v51, %v2184_v48  ;;  %v2225_v53 = vpop.f32.mrf.mxu1 }
  0xff   :  { %v2226_v54 = vadd.f32 %v2225_v53, %v2224_v49  ;;  %v2187_v41 = vpop.f32.mrf.mxu0 }
 0x100   :  { %v1482_v55 = vadd.f32 %v2186_v52, %v1955_v1  ;;  %v2227_v56 = vpop.f32.mrf.mxu1 }
 0x101   :  { %v2188_v57 = vpop.f32.mrf.mxu0 }
 0x102   :  { %v3181_v58 = vadd.f32 %v2226_v54, %v1482_v55  ;;  %v2189_v59 = vadd.f32 %v2188_v57, %v2187_v41  ;;  %v2228_v60 = vpop.f32.mrf.mxu1 }
 0x103   :  { %v2229_v61 = vadd.f32 %v2228_v60, %v2227_v56  ;;  %v3183_v63 = vpop.f32.mrf.mxu0 }
 0x104   :  { %3368 = vst [vmem:[#allocation2_spill] sm:$0xff] %v3181_v58  ;;  %v1485_v62 = vadd.f32 %v2189_v59, %v1955_v1  ;;  %v3185_v0 = vpop.f32.mrf.mxu1 }
 0x105   :  { %v2247_v3 = vpop.f32.mrf.mxu0 }
 0x106   :  { %v3187_v2 = vadd.f32 %v2229_v61, %v1485_v62  ;;  %v3189_v4 = vpop.f32.mrf.mxu1  ;;  %v2248_v58 = vadd.f32 %v2247_v3, %v3183_v63 }
 0x107   :  { %v3191_v5 = vpop.f32.mrf.mxu0 }
 0x108   :  { %3369 = vst [vmem:[#allocation3_spill] sm:$0xff] %v3187_v2  ;;  %v3193_v6 = vpop.f32.mrf.mxu1 }
 0x109   :  { %v2250_v7 = vpop.f32.mrf.mxu0 }
 0x10a   :  { %v3195_v8 = vpop.f32.mrf.mxu1 }
 0x10b   :  { %v3197_v9 = vpop.f32.mrf.mxu0 }
 0x10c   :  { %v3199_v11 = vpop.f32.mrf.mxu1 }
 0x10d   :  { %v3201_v1 = vpop.f32.mrf.mxu0 }
 0x10e   :  { %v3203_v12 = vpop.f32.mrf.mxu1 }
 0x10f   :  { %v3205_v13 = vpop.f32.mrf.mxu0 }
 0x110   :  { %v3207_v14 = vpop.f32.mrf.mxu1 }
 0x111   :  { %v3209_v15 = vpop.f32.mrf.mxu0 }
 0x112   :  { %v3211_v16 = vpop.f32.mrf.mxu1 }
 0x113   :  { %v3213_v18 = vpop.f32.mrf.mxu0 }
 0x114   :  { %v3215_v19 = vpop.f32.mrf.mxu1 }
 0x115   :  { %v3217_v20 = vpop.f32.mrf.mxu0 }
 0x116   :  { %v3219_v21 = vpop.f32.mrf.mxu1 }
 0x117   :  { %v3221_v22 = vpop.f32.mrf.mxu0 }
 0x118   :  { %v3223_v23 = vpop.f32.mrf.mxu1 }
 0x119   :  { %3370 = vst [vmem:[#allocation4_spill] sm:$0xff] %v3223_v23  ;;  %v3225_v24 = vpop.f32.mrf.mxu0 }
 0x11a   :  { %v3227_v25 = vpop.f32.mrf.mxu1 }
 0x11b   :  { %3371 = vst [vmem:[#allocation5_spill] sm:$0xff] %v3227_v25  ;;  %v3229_v27 = vpop.f32.mrf.mxu0  ;;  %v2254_v25 = vadd.f32 %v3201_v1, %v3197_v9 }
 0x11c   :  { %v3231_v28 = vpop.f32.mrf.mxu1 }
 0x11d   :  { %3372 = vst [vmem:[#allocation6_spill] sm:$0xff] %v3231_v28  ;;  %v3233_v29 = vpop.f32.mrf.mxu0 }
 0x11e   :  { %v3235_v30 = vpop.f32.mrf.mxu1 }
 0x11f   :  { %3373 = vst [vmem:[#allocation7_spill] sm:$0xff] %v3235_v30  ;;  %v3237_v31 = vpop.f32.mrf.mxu0 }
 0x120   :  { %3374 = vst [vmem:[#allocation8_spill] sm:$0xff] %v3237_v31  ;;  %v3239_v32 = vpop.f32.mrf.mxu1 }
 0x121   :  { %3375 = vst [vmem:[#allocation9_spill] sm:$0xff] %v3239_v32  ;;  %v3241_v34 = vpop.f32.mrf.mxu0 }
 0x122   :  { %3376 = vst [vmem:[#allocation10_spill] sm:$0xff] %v3241_v34  ;;  %v3243_v35 = vpop.f32.mrf.mxu1 }
 0x123   :  { %3377 = vst [vmem:[#allocation11_spill] sm:$0xff] %v3243_v35  ;;  %v2326_v36 = vpop.f32.mrf.mxu0 }
 0x124   :  { %v2366_v37 = vpop.f32.mrf.mxu1 }
 0x125   :  { %v2327_v38 = vpop.f32.mrf.mxu0 }
 0x126   :  { %v2367_v39 = vpop.f32.mrf.mxu1 }
 0x127   :  { %v2329_v40 = vpop.f32.mrf.mxu0  ;;  %v2368_v1 = vadd.f32 %v2367_v39, %v2366_v37 }
 0x128   :  { %v2369_v42 = vpop.f32.mrf.mxu1 }
 0x129   :  { %v2330_v43 = vpop.f32.mrf.mxu0 }
 0x12a   :  { %v2370_v45 = vpop.f32.mrf.mxu1 }
 0x12b   :  { %v2332_v46 = vpop.f32.mrf.mxu0 }
 0x12c   :  { %v2372_v48 = vpop.f32.mrf.mxu1 }
 0x12d   :  { %v2333_v47 = vpop.f32.mrf.mxu0 }
 0x12e   :  { %v2373_v51 = vpop.f32.mrf.mxu1 }
 0x12f   :  { %v3245_v49 = vpop.f32.mrf.mxu0 }
 0x130   :  { %v3249_v54 = vpop.f32.mrf.mxu1 }
 0x131   :  { %v2336_v52 = vpop.f32.mrf.mxu0 }
 0x132   :  { %v3255_v56 = vpop.f32.mrf.mxu1 }
 0x133   :  { %v3247_v53 = vpop.f32.mrf.mxu0 }
 0x134   :  { %v3261_v60 = vpop.f32.mrf.mxu1 }
 0x135   :  { %v3251_v41 = vpop.f32.mrf.mxu0  ;;  %3381 = vst [vmem:[#allocation15_spill] sm:$0xff] %v3261_v60 }
 0x136   :  { %v3267_v35 = vpop.f32.mrf.mxu1 }
 0x137   :  { %v3253_v55 = vpop.f32.mrf.mxu0  ;;  %3384 = vst [vmem:[#allocation18_spill] sm:$0xff] %v3267_v35 }
 0x138   :  { %3378 = vst [vmem:[#allocation12_spill] sm:$0xff] %v3253_v55  ;;  %v3271_v30 = vpop.f32.mrf.mxu1  ;;  %v2328_v55 = vadd.f32 %v2327_v38, %v2326_v36 }
 0x139   :  { %v3257_v57 = vpop.f32.mrf.mxu0  ;;  %3386 = vst [vmem:[#allocation20_spill] sm:$0xff] %v3271_v30 }
 0x13a   :  { %3379 = vst [vmem:[#allocation13_spill] sm:$0xff] %v3257_v57  ;;  %v3273_v31 = vpop.f32.mrf.mxu1 }
 0x13b   :  { %v3259_v59 = vpop.f32.mrf.mxu0  ;;  %3387 = vst [vmem:[#allocation21_spill] sm:$0xff] %v3273_v31 }
 0x13c   :  { %3380 = vst [vmem:[#allocation14_spill] sm:$0xff] %v3259_v59  ;;  %v3276_v60 = vpop.f32.mrf.mxu1 }
 0x13d   :  { %v3263_v61 = vpop.f32.mrf.mxu0  ;;  %3388 = vst [vmem:[#allocation22_spill] sm:$0xff] %v3276_v60  ;;  %v1596_v60 = vadd.f32 %v2254_v25, %v3173_v26  ;;  %v2260_v26 = vadd.f32 %v3217_v20, %v3213_v18 }
 0x13e   :  { %3382 = vst [vmem:[#allocation16_spill] sm:$0xff] %v3263_v61  ;;  %v1588_v61 = vadd.f32 %v2248_v58, %v3169_v10  ;;  %v3284_v31 = vpop.f32.mrf.mxu1  ;;  %v2291_v10 = vadd.f32 %v3195_v8, %v3193_v6 }
 0x13f   :  { %v3265_v62 = vpop.f32.mrf.mxu0  ;;  %v1604_v18 = vadd.f32 %v2260_v26, %v3177_v44 }
 0x140   :  { %3383 = vst [vmem:[#allocation17_spill] sm:$0xff] %v3265_v62  ;;  %v2251_v62 = vadd.f32 %v2250_v7, %v3191_v5  ;;  %v2331_v5 = vadd.f32 %v2330_v43, %v2329_v40 }
 0x141   :  { %v3269_v32 = vpop.f32.mrf.mxu0 }
 0x142   :  { %3385 = vst [vmem:[#allocation19_spill] sm:$0xff] %v3269_v32  ;;  %v2288_v32 = vadd.f32 %v3189_v4, %v3185_v0  ;;  %v1591_v3 = vadd.f32 %v2251_v62, %v3171_v17  ;;  %v2257_v0 = vadd.f32 %v3209_v15, %v3205_v13  ;;  %v3292_v4 = vpop.f32.mrf.mxu1  ;;  %v2294_v17 = vadd.f32 %v3203_v12, %v3199_v11  ;;  %v3392_v62 = vld [vmem:[#allocation13_spill] sm:$0xff] }
 0x143   :  { %v2406_v2 = vpop.f32.mrf.mxu0  ;;  %v2371_v13 = vadd.f32 %v2370_v45, %v2369_v42  ;;  %v2297_v11 = vadd.f32 %v3211_v16, %v3207_v14  ;;  %v2300_v14 = vadd.f32 %v3219_v21, %v3215_v19  ;;  %v3389_v21 = vld [vmem:[#allocation4_spill] sm:$0xff] }
 0x144   :  { %v1653_v63 = vadd.f32 %v2288_v32, %v1588_v61  ;;  %v1656_v9 = vadd.f32 %v2291_v10, %v1591_v3  ;;  %v2334_v32 = vadd.f32 %v2333_v47, %v2332_v46  ;;  %v1661_v8 = vadd.f32 %v2294_v17, %v1596_v60  ;;  %v3297_v43 = vpop.f32.mrf.mxu1  ;;  %v3393_v10 = vld [vmem:[#allocation15_spill] sm:$0xff] }
 0x145   :  { %v2407_v28 = vpop.f32.mrf.mxu0  ;;  %v1599_v40 = vadd.f32 %v2257_v0, %v3175_v33  ;;  %v2337_v46 = vadd.f32 %v2336_v52, %v3245_v49  ;;  %v2263_v33 = vadd.f32 %v3225_v24, %v3221_v22  ;;  %v2377_v22 = vadd.f32 %v3255_v56, %v3249_v54  ;;  %v3391_v56 = vld [vmem:[#allocation12_spill] sm:$0xff] }
 0x146   :  { %v1718_v58 = vadd.f32 %v2328_v55, %v1653_v63  ;;  %v2408_v36 = vadd.f32 %v2407_v28, %v2406_v2  ;;  %v1721_v6 = vadd.f32 %v2331_v5, %v1656_v9  ;;  %v1726_v37 = vadd.f32 %v2334_v32, %v1661_v8  ;;  %v3396_v9 = vld [vmem:[#allocation8_spill] sm:$0xff]  ;;  %v3399_v8 = vld [vmem:[#allocation21_spill] sm:$0xff] }
 0x147   :  { %v2409_v34 = vpop.f32.mrf.mxu0  ;;  %v2374_v2 = vadd.f32 %v2373_v51, %v2372_v48  ;;  %v1664_v60 = vadd.f32 %v2297_v11, %v1599_v40  ;;  %v2340_v24 = vadd.f32 %v3251_v41, %v3247_v53  ;;  %v1669_v51 = vadd.f32 %v2300_v14, %v1604_v18  ;;  %v3403_v11 = vld [vmem:[#allocation16_spill] sm:$0xff]  ;;  %v3405_v18 = vld [vmem:[#allocation9_spill] sm:$0xff] }
 0x148   :  { %v1783_v61 = vadd.f32 %v2368_v1, %v1718_v58  ;;  %v1786_v12 = vadd.f32 %v2371_v13, %v1721_v6  ;;  %v2266_v52 = vadd.f32 %v3233_v29, %v3229_v27  ;;  %v2343_v53 = vadd.f32 %v3392_v62, %v3391_v56  ;;  %v3394_v58 = vld [vmem:[#allocation18_spill] sm:$0xff]  ;;  %v3398_v6 = vld [vmem:[#allocation20_spill] sm:$0xff] }
 0x149   :  { %v2410_v59 = vpop.f32.mrf.mxu0  ;;  %v1791_v16 = vadd.f32 %v2374_v2, %v1726_v37  ;;  %v1729_v48 = vadd.f32 %v2337_v46, %v1664_v60  ;;  %v1734_v3 = vadd.f32 %v2340_v24, %v1669_v51  ;;  %v2380_v5 = vadd.f32 %v3394_v58, %v3393_v10  ;;  %v3397_v1 = vld [vmem:[#allocation10_spill] sm:$0xff] }
 0x14a   :  { %v2411_v15 = vadd.f32 %v2410_v59, %v2409_v34  ;;  %v1848_v25 = vadd.f32 %v2408_v36, %v1783_v61  ;;  %v3390_v59 = vld [vmem:[#allocation5_spill] sm:$0xff]  ;;  %v2269_v36 = vadd.f32 %v3397_v1, %v3396_v9  ;;  %v2383_v40 = vadd.f32 %v3399_v8, %v3398_v6 }
 0x14b   :  { %v2412_v57 = vpop.f32.mrf.mxu0  ;;  %v2303_v54 = vadd.f32 %v3390_v59, %v3389_v21  ;;  %v1799_v2 = vadd.f32 %v2380_v5, %v1734_v3  ;;  %v2389_v56 = vadd.f32 %v3297_v43, %v3292_v4 }
 0x14c   :  { %v1851_v34 = vadd.f32 %v2411_v15, %v1786_v12  ;;  %v3400_v15 = vld [vmem:[#allocation6_spill] sm:$0xff] }
 0x14d   :  { %v2413_v35 = vpop.f32.mrf.mxu0 }
 0x14e   :  { %v2414_v20 = vadd.f32 %v2413_v35, %v2412_v57  ;;  %v1607_v35 = vadd.f32 %v2263_v33, %v3179_v50  ;;  %v1794_v50 = vadd.f32 %v2377_v22, %v1729_v48  ;;  %v3407_v22 = vld [vmem:[#allocation22_spill] sm:$0xff] }
 0x14f   :  { %v2415_v30 = vpop.f32.mrf.mxu0  ;;  %v2386_v24 = vadd.f32 %v3284_v31, %v3407_v22 }
 0x150   :  { %v1856_v19 = vadd.f32 %v2414_v20, %v1791_v16  ;;  %v3406_v20 = vld [vmem:[#allocation11_spill] sm:$0xff] }
 0x151   :  { %v2416_v23 = vpop.f32.mrf.mxu0 }
 0x152   :  { %v2417_v57 = vadd.f32 %v2416_v23, %v2415_v30  ;;  %v1672_v23 = vadd.f32 %v2303_v54, %v1607_v35  ;;  %v3395_v30 = vld [vmem:[#allocation2_spill] sm:$0xff]  ;;  %v3409_v35 = vld [vmem:[#allocation19_spill] sm:$0xff] }
 0x153   :  { %v2418_v7 = vpop.f32.mrf.mxu0  ;;  %v1612_v0 = vadd.f32 %v2266_v52, %v3395_v30 }
 0x154   :  { %v1859_v32 = vadd.f32 %v2417_v57, %v1794_v50  ;;  %v1737_v61 = vadd.f32 %v2343_v53, %v1672_v23 }
 0x155   :  { %v2419_v38 = vpop.f32.mrf.mxu0 }
 0x156   :  { %v2420_v17 = vadd.f32 %v2419_v38, %v2418_v7  ;;  %v1802_v14 = vadd.f32 %v2383_v40, %v1737_v61 }
 0x157   :  { %v2421_v28 = vpop.f32.mrf.mxu0 }
 0x158   :  { %v1864_v60 = vadd.f32 %v2420_v17, %v1799_v2 }
 0x159   :  { %v2422_v42 = vpop.f32.mrf.mxu0 }
 0x15b   :  { %v2424_v41 = vpop.f32.mrf.mxu0 }
 0x15c   :  { %v1912_v39 = vpop.f32.mrf.mxu1 }
 0x15d   :  { %v1913_v47 = vadd.f32 %v1912_v39, %v1848_v25  ;;  %v2425_v26 = vpop.f32.mrf.mxu0  ;;  %v3401_v25 = vld [vmem:[#allocation7_spill] sm:$0xff]  ;;  %v3402_v39 = vld [vmem:[#allocation14_spill] sm:$0xff] }
 0x15e   :  { %v1914_v55 = vpop.f32.mrf.mxu1  ;;  %v2306_v37 = vadd.f32 %v3401_v25, %v3400_v15  ;;  %v2346_v12 = vadd.f32 %v3403_v11, %v3402_v39  ;;  %v2426_v52 = vadd.f32 %v2425_v26, %v2424_v41 }
 0x15f   :  { %1943 = vst [vmem:[%s3367_s3] sm:$0xff] %v1913_v47  ;;  %v3404_v47 = vld [vmem:[#allocation3_spill] sm:$0xff]  ;;  %v2423_v55 = vadd.f32 %v2422_v42, %v2421_v28  ;;  %v2427_v16 = vpop.f32.mrf.mxu0 }
 0x160   :  { %v1915_v45 = vpop.f32.mrf.mxu1  ;;  %v1677_v38 = vadd.f32 %v2306_v37, %v1612_v0  ;;  %v1615_v33 = vadd.f32 %v2269_v36, %v3404_v47 }
 0x161   :  { %v1916_v44 = vadd.f32 %v1915_v45, %v1851_v34  ;;  %v2309_v34 = vadd.f32 %v3406_v20, %v3405_v18  ;;  %v1867_v57 = vadd.f32 %v2423_v55, %v1802_v14 }
 0x162   :  { %v1917_v49 = vpop.f32.mrf.mxu1  ;;  %v1742_v48 = vadd.f32 %v2346_v12, %v1677_v38 }
 0x163   :  { %1944 = vst [vmem:[%s3367_s3 + $0x8] sm:$0xff] %v1916_v44  ;;  %v3408_v44 = vld [vmem:[#allocation17_spill] sm:$0xff]  ;;  %v1680_v42 = vadd.f32 %v2309_v34, %v1615_v33 }
 0x164   :  { %v1920_v63 = vpop.f32.mrf.mxu1  ;;  %v2349_v49 = vadd.f32 %v3409_v35, %v3408_v44  ;;  %v1807_v59 = vadd.f32 %v2386_v24, %v1742_v48 }
 0x165   :  { %v1921_v27 = vadd.f32 %v1920_v63, %v1856_v19  ;;  %v2428_v19 = vpop.f32.mrf.mxu0 }
 0x166   :  { %v1922_v29 = vpop.f32.mrf.mxu1  ;;  %v1745_v54 = vadd.f32 %v2349_v49, %v1680_v42  ;;  %v2429_v53 = vadd.f32 %v2428_v19, %v2427_v16  ;;  %v1872_v41 = vadd.f32 %v2426_v52, %v1807_v59 }
 0x167   :  { %1945 = vst [vmem:[%s3367_s3 + $0x10] sm:$0xff] %v1921_v27 }
 0x168   :  { %v1923_v13 = vpop.f32.mrf.mxu1  ;;  %v1810_v50 = vadd.f32 %v2389_v56, %v1745_v54 }
 0x169   :  { %v1924_v46 = vadd.f32 %v1923_v13, %v1859_v32 }
 0x16a   :  { %v1925_v7 = vpop.f32.mrf.mxu1  ;;  %v1875_v58 = vadd.f32 %v2429_v53, %v1810_v50 }
 0x16b   :  { %1946 = vst [vmem:[%s3367_s3 + $0x18] sm:$0xff] %v1924_v46 }
 0x16c   :  { %v1928_v45 = vpop.f32.mrf.mxu1 }
 0x16d   :  { %v1929_v51 = vadd.f32 %v1928_v45, %v1864_v60 }
 0x16e   :  { %v1930_v28 = vpop.f32.mrf.mxu1 }
 0x16f   :  { %1947 = vst [vmem:[%s3367_s3 + $0x20] sm:$0xff] %v1929_v51 }
 0x170   :  { %v1931_v21 = vpop.f32.mrf.mxu1 }
 0x171   :  { %v1932_v31 = vadd.f32 %v1931_v21, %v1867_v57 }
 0x172   :  { %v1933_v62 = vpop.f32.mrf.mxu1 }
 0x173   :  { %1948 = vst [vmem:[%s3367_s3 + $0x28] sm:$0xff] %v1932_v31 }
 0x174   :  { %v1936_v63 = vpop.f32.mrf.mxu1 }
 0x175   :  { %v1937_v3 = vadd.f32 %v1936_v63, %v1872_v41 }
 0x176   :  { %v1938_v10 = vpop.f32.mrf.mxu1 }
 0x177   :  { %1949 = vst [vmem:[%s3367_s3 + $0x30] sm:$0xff] %v1937_v3 }
 0x178   :  { %v1939_v5 = vpop.f32.mrf.mxu1 }
 0x179   :  { %v1940_v27 = vadd.f32 %v1939_v5, %v1875_v58 }
 0x17a   :  { %v1941_v4 = vpop.f32.mrf.mxu1 }
 0x17b   :  { %1950 = vst [vmem:[%s3367_s3 + $0x38] sm:$0xff] %v1940_v27 }

// kernel: _net_forward_impl.238
= control target key start
LH: loop header
LB: loop body
LE: loop exit
PB: predicated region body
PF: predicated region fallthrough
CT: control target
= control target key end

     0   :  { %s3869_s1 = inlined_call_operand.vmem [shape: bf16[2304,128], index: 1, kind: input, shape index: {}]   ;;  %s3870_s0 = inlined_call_operand.vmem [shape: bf16[64,2304], index: 0, kind: input, shape index: {}]   ;;  %s3871_s2 = inlined_call_operand.vmem [shape: f32[1,128], index: 2, kind: input, shape index: {}]   ;;  %s3872_s3 = inlined_call_operand.vmem [shape: f32[64,128], index: 3, kind: output, shape index: {}]  }
   0x1   :  { %v2796_v0 = vld [vmem:[%s3869_s1 + $0x78] sm:$0xff]   ;;  %v2800_v4 = vld [vmem:[%s3869_s1 + $0x70] sm:$0xff]   ;;  %v2804_v8 = vld [vmem:[%s3869_s1 + $0x68] sm:$0xff]  }
   0x2   :  { %v2797_v1 = vld [vmem:[%s3869_s1 + $0xf8] sm:$0xff]   ;;  %2420 = vmatprep.subr.bf16.mxu0 %v2796_v0  ;;  %v2801_v5 = vld [vmem:[%s3869_s1 + $0xf0] sm:$0xff]   ;;  %v2805_v9 = vld [vmem:[%s3869_s1 + $0xe8] sm:$0xff]  }
   0x3   :  { %v2798_v2 = vld [vmem:[%s3869_s1 + $0x38] sm:$0xff]   ;;  %2460 = vmatprep.subr.bf16.mxu1 %v2797_v1  ;;  %v2802_v6 = vld [vmem:[%s3869_s1 + $0x30] sm:$0xff]   ;;  %v2806_v10 = vld [vmem:[%s3869_s1 + $0x28] sm:$0xff]  }
   0x4   :  { %v2799_v3 = vld [vmem:[%s3869_s1 + $0xb8] sm:$0xff]   ;;  %2421 = vmatpush3.bf16.msra.mxu0 %v2798_v2  ;;  %v2803_v7 = vld [vmem:[%s3869_s1 + $0xb0] sm:$0xff]   ;;  %v2807_v11 = vld [vmem:[%s3869_s1 + $0xa8] sm:$0xff]  }
   0x5   :  { %2461 = vmatpush3.bf16.msra.mxu1 %v2799_v3  ;;  %2422 = vmatprep.subr.bf16.mxu0 %v2800_v4  ;;  %v2808_v12 = vld [vmem:[%s3869_s1 + $0x60] sm:$0xff]   ;;  %v2812_v16 = vld [vmem:[%s3869_s1 + $0x58] sm:$0xff]   ;;  %v2816_v20 = vld [vmem:[%s3869_s1 + $0x50] sm:$0xff]  }
   0x6   :  { %2462 = vmatprep.subr.bf16.mxu1 %v2801_v5  ;;  %v2809_v13 = vld [vmem:[%s3869_s1 + $0xe0] sm:$0xff]   ;;  %v2813_v17 = vld [vmem:[%s3869_s1 + $0xd8] sm:$0xff]   ;;  %v2817_v21 = vld [vmem:[%s3869_s1 + $0xd0] sm:$0xff]  }
   0x7   :  { %v2810_v14 = vld [vmem:[%s3869_s1 + $0x20] sm:$0xff]   ;;  %v2814_v18 = vld [vmem:[%s3869_s1 + $0x18] sm:$0xff]   ;;  %v2818_v22 = vld [vmem:[%s3869_s1 + $0x10] sm:$0xff]  }
   0x8   :  { %2423 = vmatpush3.bf16.msra.mxu0 %v2802_v6  ;;  %v2811_v15 = vld [vmem:[%s3869_s1 + $0xa0] sm:$0xff]   ;;  %v2815_v19 = vld [vmem:[%s3869_s1 + $0x98] sm:$0xff]   ;;  %v2819_v23 = vld [vmem:[%s3869_s1 + $0x90] sm:$0xff]  }
   0x9   :  { %2463 = vmatpush3.bf16.msra.mxu1 %v2803_v7  ;;  %2424 = vmatprep.subr.bf16.mxu0 %v2804_v8  ;;  %v2820_v24 = vld [vmem:[%s3869_s1 + $0x48] sm:$0xff]   ;;  %v2824_v28 = vld [vmem:[%s3869_s1 + $0x40] sm:$0xff]   ;;  %v2834_v36 = vld [vmem:[%s3869_s1 + $0x178] sm:$0xff]  }
   0xa   :  { %2464 = vmatprep.subr.bf16.mxu1 %v2805_v9  ;;  %v2821_v25 = vld [vmem:[%s3869_s1 + $0xc8] sm:$0xff]   ;;  %v2825_v29 = vld [vmem:[%s3869_s1 + $0xc0] sm:$0xff]   ;;  %v2835_v37 = vld [vmem:[%s3869_s1 + $0x1f8] sm:$0xff]  }
   0xb   :  { %v2822_v26 = vld [vmem:[%s3869_s1 + $0x8] sm:$0xff]   ;;  %v2826_v30 = vld [vmem:[%s3869_s1] sm:$0xff]   ;;  %v2836_v38 = vld [vmem:[%s3869_s1 + $0x138] sm:$0xff]  }
   0xc   :  { %2425 = vmatpush3.bf16.msra.mxu0 %v2806_v10  ;;  %v2823_v27 = vld [vmem:[%s3869_s1 + $0x88] sm:$0xff]   ;;  %v2827_v31 = vld [vmem:[%s3869_s1 + $0x80] sm:$0xff]   ;;  %v2837_v39 = vld [vmem:[%s3869_s1 + $0x1b8] sm:$0xff]  }
   0xd   :  { %2465 = vmatpush3.bf16.msra.mxu1 %v2807_v11  ;;  %2426 = vmatprep.subr.bf16.mxu0 %v2808_v12  ;;  %v2828_v32 = vld [vmem:[%s3870_s0] ss:$72 sps:$4 sm:$0xff]   ;;  %v2830_v33 = vld [vmem:[%s3870_s0 + $0x4] ss:$72 sps:$4 sm:$0xff]   ;;  %v2838_v40 = vld [vmem:[%s3869_s1 + $0x170] sm:$0xff]  }
   0xe   :  { %2466 = vmatprep.subr.bf16.mxu1 %v2809_v13  ;;  %v2831_v34 = vld [vmem:[%s3870_s0 + $0x8] ss:$72 sps:$4 sm:$0xff]   ;;  %v2833_v35 = vld [vmem:[%s3870_s0 + $0xc] ss:$72 sps:$4 sm:$0xff]   ;;  %1638 = vmatprep.mubr.bf16.mxu0 %v2830_v33  ;;  %v2844_v45 = vld [vmem:[%s3870_s0 + $0x9c] ss:$72 sps:$4 sm:$0xff]  }
   0xf   :  { %1703 = vmatprep.mubr.bf16.mxu1 %v2833_v35  ;;  %v2839_v41 = vld [vmem:[%s3869_s1 + $0x1f0] sm:$0xff]   ;;  %v2847_v47 = vld [vmem:[%s3870_s0 + $0x98] ss:$72 sps:$4 sm:$0xff]   ;;  %v2848_v48 = vld [vmem:[%s3869_s1 + $0x168] sm:$0xff]  }
  0x10   :  { %2427 = vmatpush3.bf16.msra.mxu0 %v2810_v14  ;;  %v2840_v42 = vld [vmem:[%s3869_s1 + $0x130] sm:$0xff]   ;;  %v2849_v49 = vld [vmem:[%s3869_s1 + $0x1e8] sm:$0xff]   ;;  %v2852_v52 = vld [vmem:[%s3869_s1 + $0x160] sm:$0xff]  }
  0x11   :  { %2467 = vmatpush3.bf16.msra.mxu1 %v2811_v15  ;;  %2428 = vmatprep.subr.bf16.mxu0 %v2812_v16  ;;  %v2841_v43 = vld [vmem:[%s3869_s1 + $0x1b0] sm:$0xff]   ;;  %v2850_v50 = vld [vmem:[%s3869_s1 + $0x128] sm:$0xff]   ;;  %v2853_v53 = vld [vmem:[%s3869_s1 + $0x1e0] sm:$0xff]  }
  0x12   :  { %2468 = vmatprep.subr.bf16.mxu1 %v2813_v17  ;;  %v2842_v44 = vld [vmem:[%s3870_s0 + $0x94] ss:$72 sps:$4 sm:$0xff]   ;;  %v2846_v46 = vld [vmem:[%s3870_s0 + $0x90] ss:$72 sps:$4 sm:$0xff]   ;;  %v2851_v51 = vld [vmem:[%s3869_s1 + $0x1a8] sm:$0xff]  }
  0x13   :  { %v2854_v54 = vld [vmem:[%s3869_s1 + $0x120] sm:$0xff]   ;;  %v2858_v57 = vld [vmem:[%s3870_s0 + $0x12c] ss:$72 sps:$4 sm:$0xff]   ;;  %v2861_v59 = vld [vmem:[%s3870_s0 + $0x128] ss:$72 sps:$4 sm:$0xff]  }
  0x14   :  { %2429 = vmatpush3.bf16.msra.mxu0 %v2814_v18  ;;  %v2855_v55 = vld [vmem:[%s3869_s1 + $0x1a0] sm:$0xff]   ;;  %v2862_v60 = vld [vmem:[%s3869_s1 + $0x158] sm:$0xff]   ;;  %v2866_v0 = vld [vmem:[%s3869_s1 + $0x150] sm:$0xff]  }
  0x15   :  { %2469 = vmatpush3.bf16.msra.mxu1 %v2815_v19  ;;  %2430 = vmatprep.subr.bf16.mxu0 %v2816_v20  ;;  %v2856_v56 = vld [vmem:[%s3870_s0 + $0x124] ss:$72 sps:$4 sm:$0xff]   ;;  %v2860_v58 = vld [vmem:[%s3870_s0 + $0x120] ss:$72 sps:$4 sm:$0xff]   ;;  %v2863_v61 = vld [vmem:[%s3869_s1 + $0x1d8] sm:$0xff]  }
  0x16   :  { %2470 = vmatprep.subr.bf16.mxu1 %v2817_v21  ;;  %v2864_v62 = vld [vmem:[%s3869_s1 + $0x118] sm:$0xff]   ;;  %v2867_v1 = vld [vmem:[%s3869_s1 + $0x1d0] sm:$0xff]   ;;  %v2876_v8 = vld [vmem:[%s3869_s1 + $0x148] sm:$0xff]  }
  0x17   :  { %v2865_v63 = vld [vmem:[%s3869_s1 + $0x198] sm:$0xff]   ;;  %v2868_v2 = vld [vmem:[%s3869_s1 + $0x110] sm:$0xff]   ;;  %v2877_v9 = vld [vmem:[%s3869_s1 + $0x1c8] sm:$0xff]  }
  0x18   :  { %2431 = vmatpush3.bf16.msra.mxu0 %v2818_v22  ;;  %v2869_v3 = vld [vmem:[%s3869_s1 + $0x190] sm:$0xff]   ;;  %v2872_v5 = vld [vmem:[%s3870_s0 + $0x1bc] ss:$72 sps:$4 sm:$0xff]   ;;  %v2875_v7 = vld [vmem:[%s3870_s0 + $0x1b8] ss:$72 sps:$4 sm:$0xff]  }
  0x19   :  { %2471 = vmatpush3.bf16.msra.mxu1 %v2819_v23  ;;  %2432 = vmatprep.subr.bf16.mxu0 %v2820_v24  ;;  %v2870_v4 = vld [vmem:[%s3870_s0 + $0x1b4] ss:$72 sps:$4 sm:$0xff]   ;;  %v2874_v6 = vld [vmem:[%s3870_s0 + $0x1b0] ss:$72 sps:$4 sm:$0xff]   ;;  %v2878_v10 = vld [vmem:[%s3869_s1 + $0x108] sm:$0xff]  }
  0x1a   :  { %2472 = vmatprep.subr.bf16.mxu1 %v2821_v25  ;;  %v2879_v11 = vld [vmem:[%s3869_s1 + $0x188] sm:$0xff]   ;;  %v2880_v12 = vld [vmem:[%s3869_s1 + $0x140] sm:$0xff]   ;;  %v2884_v16 = vld [vmem:[%s3870_s0 + $0x10] ss:$72 sps:$4 sm:$0xff]  }
  0x1b   :  { %v2881_v13 = vld [vmem:[%s3869_s1 + $0x1c0] sm:$0xff]   ;;  %v2886_v17 = vld [vmem:[%s3870_s0 + $0x14] ss:$72 sps:$4 sm:$0xff]   ;;  %v2905_v33 = vld [vmem:[%s3869_s1 + $0x2e8] sm:$0xff]  }
  0x1c   :  { %2433 = vmatpush3.bf16.msra.mxu0 %v2822_v26  ;;  %v2882_v14 = vld [vmem:[%s3869_s1 + $0x100] sm:$0xff]   ;;  %v2890_v20 = vld [vmem:[%s3869_s1 + $0x278] sm:$0xff]   ;;  %v2894_v24 = vld [vmem:[%s3869_s1 + $0x270] sm:$0xff]  }
  0x1d   :  { %2473 = vmatpush3.bf16.msra.mxu1 %v2823_v27  ;;  %2434 = vmatprep.subr.bf16.mxu0 %v2824_v28  ;;  %v2883_v15 = vld [vmem:[%s3869_s1 + $0x180] sm:$0xff]   ;;  %v2891_v21 = vld [vmem:[%s3869_s1 + $0x2f8] sm:$0xff]   ;;  %v2895_v25 = vld [vmem:[%s3869_s1 + $0x2f0] sm:$0xff]  }
  0x1e   :  { %2474 = vmatprep.subr.bf16.mxu1 %v2825_v29  ;;  %v2887_v18 = vld [vmem:[%s3870_s0 + $0x18] ss:$72 sps:$4 sm:$0xff]   ;;  %v2889_v19 = vld [vmem:[%s3870_s0 + $0x1c] ss:$72 sps:$4 sm:$0xff]   ;;  %v2896_v26 = vld [vmem:[%s3869_s1 + $0x230] sm:$0xff]  }
  0x1f   :  { %v2892_v22 = vld [vmem:[%s3869_s1 + $0x238] sm:$0xff]   ;;  %v2897_v27 = vld [vmem:[%s3869_s1 + $0x2b0] sm:$0xff]   ;;  %v2898_v28 = vld [vmem:[%s3870_s0 + $0xa4] ss:$72 sps:$4 sm:$0xff]  }
  0x20   :  { %2435 = vmatpush3.bf16.msra.mxu0 %v2826_v30  ;;  %v2893_v23 = vld [vmem:[%s3869_s1 + $0x2b8] sm:$0xff]   ;;  %v2900_v29 = vld [vmem:[%s3870_s0 + $0xac] ss:$72 sps:$4 sm:$0xff]   ;;  %v2902_v30 = vld [vmem:[%s3870_s0 + $0xa0] ss:$72 sps:$4 sm:$0xff]  }
  0x21   :  { %2475 = vmatpush3.bf16.msra.mxu1 %v2827_v31  ;;  %2500 = vmatprep.subr.bf16.mxu0 %v2834_v36  ;;  %v2903_v31 = vld [vmem:[%s3870_s0 + $0xa8] ss:$72 sps:$4 sm:$0xff]   ;;  %v2908_v36 = vld [vmem:[%s3869_s1 + $0x260] sm:$0xff]  }
  0x22   :  { %2540 = vmatprep.subr.bf16.mxu1 %v2835_v37  ;;  %v2907_v35 = vld [vmem:[%s3869_s1 + $0x2a8] sm:$0xff]   ;;  %v2909_v37 = vld [vmem:[%s3869_s1 + $0x2e0] sm:$0xff]  }
  0x23   :  { %1639 = vmatmul.mubr.bf16.vlgmr.msra.gmra.mxu0 %v2828_v32  ;;  %v2904_v32 = vld [vmem:[%s3869_s1 + $0x268] sm:$0xff]  }
  0x24   :  { %1704 = vmatmul.mubr.bf16.vlgmr.msra.gmra.mxu1 %v2831_v34  ;;  %2501 = vmatpush3.bf16.msra.mxu0 %v2836_v38  ;;  %v2906_v34 = vld [vmem:[%s3869_s1 + $0x228] sm:$0xff]   ;;  %v2910_v38 = vld [vmem:[%s3869_s1 + $0x220] sm:$0xff]  }
  0x25   :  { %2541 = vmatpush3.bf16.msra.mxu1 %v2837_v39  ;;  %2502 = vmatprep.subr.bf16.mxu0 %v2838_v40  ;;  %v2911_v39 = vld [vmem:[%s3869_s1 + $0x2a0] sm:$0xff]   ;;  %v2912_v40 = vld [vmem:[%s3870_s0 + $0x134] ss:$72 sps:$4 sm:$0xff]  }
  0x26   :  { %2542 = vmatprep.subr.bf16.mxu1 %v2839_v41  ;;  %1646 = vmatprep.mubr.bf16.mxu0 %v2842_v44  ;;  %v2914_v41 = vld [vmem:[%s3870_s0 + $0x13c] ss:$72 sps:$4 sm:$0xff]  }
  0x27   :  { %1711 = vmatprep.mubr.bf16.mxu1 %v2844_v45  ;;  %v2918_v44 = vld [vmem:[%s3869_s1 + $0x258] sm:$0xff]  }
  0x28   :  { %2503 = vmatpush3.bf16.msra.mxu0 %v2840_v42  ;;  %v2916_v42 = vld [vmem:[%s3870_s0 + $0x130] ss:$72 sps:$4 sm:$0xff]  }
  0x29   :  { %2543 = vmatpush3.bf16.msra.mxu1 %v2841_v43  ;;  %2504 = vmatprep.subr.bf16.mxu0 %v2848_v48  ;;  %v2917_v43 = vld [vmem:[%s3870_s0 + $0x138] ss:$72 sps:$4 sm:$0xff]   ;;  %v2922_v48 = vld [vmem:[%s3869_s1 + $0x250] sm:$0xff]  }
  0x2a   :  { %2544 = vmatprep.subr.bf16.mxu1 %v2849_v49  ;;  %v2919_v45 = vld [vmem:[%s3869_s1 + $0x2d8] sm:$0xff]   ;;  %v2923_v49 = vld [vmem:[%s3869_s1 + $0x2d0] sm:$0xff]  }
  0x2b   :  { %1647 = vmatmul.mubr.bf16.gmra.mxu0 %v2846_v46  ;;  %v2920_v46 = vld [vmem:[%s3869_s1 + $0x218] sm:$0xff]  }
  0x2c   :  { %1712 = vmatmul.mubr.bf16.gmra.mxu1 %v2847_v47  ;;  %2505 = vmatpush3.bf16.msra.mxu0 %v2850_v50  ;;  %v2921_v47 = vld [vmem:[%s3869_s1 + $0x298] sm:$0xff]   ;;  %v2924_v50 = vld [vmem:[%s3869_s1 + $0x210] sm:$0xff]  }
  0x2d   :  { %2545 = vmatpush3.bf16.msra.mxu1 %v2851_v51  ;;  %2506 = vmatprep.subr.bf16.mxu0 %v2852_v52  ;;  %v2925_v51 = vld [vmem:[%s3869_s1 + $0x290] sm:$0xff]   ;;  %v2926_v52 = vld [vmem:[%s3870_s0 + $0x1c4] ss:$72 sps:$4 sm:$0xff]  }
  0x2e   :  { %2546 = vmatprep.subr.bf16.mxu1 %v2853_v53  ;;  %1654 = vmatprep.mubr.bf16.mxu0 %v2856_v56  ;;  %v2928_v53 = vld [vmem:[%s3870_s0 + $0x1cc] ss:$72 sps:$4 sm:$0xff]  }
  0x2f   :  { %1719 = vmatprep.mubr.bf16.mxu1 %v2858_v57  ;;  %v2932_v56 = vld [vmem:[%s3869_s1 + $0x248] sm:$0xff]  }
  0x30   :  { %2507 = vmatpush3.bf16.msra.mxu0 %v2854_v54  ;;  %v2930_v54 = vld [vmem:[%s3870_s0 + $0x1c0] ss:$72 sps:$4 sm:$0xff]  }
  0x31   :  { %2547 = vmatpush3.bf16.msra.mxu1 %v2855_v55  ;;  %2508 = vmatprep.subr.bf16.mxu0 %v2862_v60  ;;  %v2931_v55 = vld [vmem:[%s3870_s0 + $0x1c8] ss:$72 sps:$4 sm:$0xff]   ;;  %v2936_v60 = vld [vmem:[%s3869_s1 + $0x240] sm:$0xff]  }
  0x32   :  { %2548 = vmatprep.subr.bf16.mxu1 %v2863_v61  ;;  %v2933_v57 = vld [vmem:[%s3869_s1 + $0x2c8] sm:$0xff]   ;;  %v2937_v61 = vld [vmem:[%s3869_s1 + $0x2c0] sm:$0xff]  }
  0x33   :  { %1655 = vmatmul.mubr.bf16.gmra.mxu0 %v2860_v58  ;;  %v2934_v58 = vld [vmem:[%s3869_s1 + $0x208] sm:$0xff]  }
  0x34   :  { %1720 = vmatmul.mubr.bf16.gmra.mxu1 %v2861_v59  ;;  %2509 = vmatpush3.bf16.msra.mxu0 %v2864_v62  ;;  %v2935_v59 = vld [vmem:[%s3869_s1 + $0x288] sm:$0xff]   ;;  %v2938_v62 = vld [vmem:[%s3869_s1 + $0x200] sm:$0xff]  }
  0x35   :  { %2549 = vmatpush3.bf16.msra.mxu1 %v2865_v63  ;;  %2510 = vmatprep.subr.bf16.mxu0 %v2866_v0  ;;  %v2939_v63 = vld [vmem:[%s3869_s1 + $0x280] sm:$0xff]  }
  0x36   :  { %2550 = vmatprep.subr.bf16.mxu1 %v2867_v1  ;;  %1662 = vmatprep.mubr.bf16.mxu0 %v2870_v4  ;;  %v2940_v0 = vld [vmem:[%s3870_s0 + $0x20] ss:$72 sps:$4 sm:$0xff]   ;;  %v2942_v1 = vld [vmem:[%s3870_s0 + $0x24] ss:$72 sps:$4 sm:$0xff]   ;;  %v2946_v4 = vld [vmem:[%s3869_s1 + $0x378] sm:$0xff]  }
  0x37   :  { %1727 = vmatprep.mubr.bf16.mxu1 %v2872_v5  ;;  %v2947_v5 = vld [vmem:[%s3869_s1 + $0x3f8] sm:$0xff]  }
  0x38   :  { %2511 = vmatpush3.bf16.msra.mxu0 %v2868_v2  ;;  %v2943_v2 = vld [vmem:[%s3870_s0 + $0x28] ss:$72 sps:$4 sm:$0xff]  }
  0x39   :  { %2551 = vmatpush3.bf16.msra.mxu1 %v2869_v3  ;;  %2512 = vmatprep.subr.bf16.mxu0 %v2876_v8  ;;  %v2945_v3 = vld [vmem:[%s3870_s0 + $0x2c] ss:$72 sps:$4 sm:$0xff]  }
  0x3a   :  { %2552 = vmatprep.subr.bf16.mxu1 %v2877_v9  ;;  %v2950_v8 = vld [vmem:[%s3869_s1 + $0x370] sm:$0xff]  }
  0x3b   :  { %1663 = vmatmul.mubr.bf16.gmra.mxu0 %v2874_v6  ;;  %v2948_v6 = vld [vmem:[%s3869_s1 + $0x338] sm:$0xff]   ;;  %v2951_v9 = vld [vmem:[%s3869_s1 + $0x3f0] sm:$0xff]  }
  0x3c   :  { %1728 = vmatmul.mubr.bf16.gmra.mxu1 %v2875_v7  ;;  %2513 = vmatpush3.bf16.msra.mxu0 %v2878_v10  ;;  %v2949_v7 = vld [vmem:[%s3869_s1 + $0x3b8] sm:$0xff]   ;;  %v2952_v10 = vld [vmem:[%s3869_s1 + $0x330] sm:$0xff]  }
  0x3d   :  { %2553 = vmatpush3.bf16.msra.mxu1 %v2879_v11  ;;  %2514 = vmatprep.subr.bf16.mxu0 %v2880_v12  ;;  %v2953_v11 = vld [vmem:[%s3869_s1 + $0x3b0] sm:$0xff]  }
  0x3e   :  { %2554 = vmatprep.subr.bf16.mxu1 %v2881_v13  ;;  %1768 = vmatprep.mubr.bf16.mxu0 %v2886_v17  ;;  %v2954_v12 = vld [vmem:[%s3870_s0 + $0xb4] ss:$72 sps:$4 sm:$0xff]   ;;  %v2961_v17 = vld [vmem:[%s3869_s1 + $0x3e8] sm:$0xff]  }
  0x3f   :  { %1833 = vmatprep.mubr.bf16.mxu1 %v2889_v19  ;;  %v2956_v13 = vld [vmem:[%s3870_s0 + $0xbc] ss:$72 sps:$4 sm:$0xff]   ;;  %v2963_v19 = vld [vmem:[%s3869_s1 + $0x3a8] sm:$0xff]  }
  0x40   :  { %2515 = vmatpush3.bf16.msra.mxu0 %v2882_v14  ;;  %v2958_v14 = vld [vmem:[%s3870_s0 + $0xb0] ss:$72 sps:$4 sm:$0xff]  }
  0x41   :  { %2555 = vmatpush3.bf16.msra.mxu1 %v2883_v15  ;;  %2580 = vmatprep.subr.bf16.mxu0 %v2890_v20  ;;  %v2959_v15 = vld [vmem:[%s3870_s0 + $0xb8] ss:$72 sps:$4 sm:$0xff]  }
  0x42   :  { %2620 = vmatprep.subr.bf16.mxu1 %v2891_v21  ;;  %v2964_v20 = vld [vmem:[%s3869_s1 + $0x360] sm:$0xff]  }
  0x43   :  { %1769 = vmatmul.mubr.bf16.vlgmr.msra.gmra.mxu0 %v2884_v16  ;;  %v2960_v16 = vld [vmem:[%s3869_s1 + $0x368] sm:$0xff]   ;;  %v2965_v21 = vld [vmem:[%s3869_s1 + $0x3e0] sm:$0xff]  }
  0x44   :  { %1834 = vmatmul.mubr.bf16.vlgmr.msra.gmra.mxu1 %v2887_v18  ;;  %2581 = vmatpush3.bf16.msra.mxu0 %v2892_v22  ;;  %v2962_v18 = vld [vmem:[%s3869_s1 + $0x328] sm:$0xff]   ;;  %v2966_v22 = vld [vmem:[%s3869_s1 + $0x320] sm:$0xff]  }
  0x45   :  { %2621 = vmatpush3.bf16.msra.mxu1 %v2893_v23  ;;  %2582 = vmatprep.subr.bf16.mxu0 %v2894_v24  ;;  %v2967_v23 = vld [vmem:[%s3869_s1 + $0x3a0] sm:$0xff]  }
  0x46   :  { %2622 = vmatprep.subr.bf16.mxu1 %v2895_v25  ;;  %1776 = vmatprep.mubr.bf16.mxu0 %v2898_v28  ;;  %v2968_v24 = vld [vmem:[%s3870_s0 + $0x144] ss:$72 sps:$4 sm:$0xff]   ;;  %v2974_v28 = vld [vmem:[%s3869_s1 + $0x358] sm:$0xff]  }
  0x47   :  { %1841 = vmatprep.mubr.bf16.mxu1 %v2900_v29  ;;  %v2970_v25 = vld [vmem:[%s3870_s0 + $0x14c] ss:$72 sps:$4 sm:$0xff]   ;;  %v2975_v29 = vld [vmem:[%s3869_s1 + $0x3d8] sm:$0xff]  }
  0x48   :  { %2583 = vmatpush3.bf16.msra.mxu0 %v2896_v26  ;;  %v2972_v26 = vld [vmem:[%s3870_s0 + $0x140] ss:$72 sps:$4 sm:$0xff]  }
  0x49   :  { %2623 = vmatpush3.bf16.msra.mxu1 %v2897_v27  ;;  %2584 = vmatprep.subr.bf16.mxu0 %v2904_v32  ;;  %v2973_v27 = vld [vmem:[%s3870_s0 + $0x148] ss:$72 sps:$4 sm:$0xff]  }
  0x4a   :  { %2624 = vmatprep.subr.bf16.mxu1 %v2905_v33  ;;  %v2978_v32 = vld [vmem:[%s3869_s1 + $0x350] sm:$0xff]  }
  0x4b   :  { %1777 = vmatmul.mubr.bf16.gmra.mxu0 %v2902_v30  ;;  %v2976_v30 = vld [vmem:[%s3869_s1 + $0x318] sm:$0xff]   ;;  %v2979_v33 = vld [vmem:[%s3869_s1 + $0x3d0] sm:$0xff]  }
  0x4c   :  { %1842 = vmatmul.mubr.bf16.gmra.mxu1 %v2903_v31  ;;  %2585 = vmatpush3.bf16.msra.mxu0 %v2906_v34  ;;  %v2977_v31 = vld [vmem:[%s3869_s1 + $0x398] sm:$0xff]   ;;  %v2980_v34 = vld [vmem:[%s3869_s1 + $0x310] sm:$0xff]  }
  0x4d   :  { %2625 = vmatpush3.bf16.msra.mxu1 %v2907_v35  ;;  %2586 = vmatprep.subr.bf16.mxu0 %v2908_v36  ;;  %v2981_v35 = vld [vmem:[%s3869_s1 + $0x390] sm:$0xff]  }
  0x4e   :  { %2626 = vmatprep.subr.bf16.mxu1 %v2909_v37  ;;  %1784 = vmatprep.mubr.bf16.mxu0 %v2912_v40  ;;  %v2982_v36 = vld [vmem:[%s3870_s0 + $0x1d4] ss:$72 sps:$4 sm:$0xff]   ;;  %v2988_v40 = vld [vmem:[%s3869_s1 + $0x348] sm:$0xff]  }
  0x4f   :  { %1849 = vmatprep.mubr.bf16.mxu1 %v2914_v41  ;;  %v2984_v37 = vld [vmem:[%s3870_s0 + $0x1dc] ss:$72 sps:$4 sm:$0xff]   ;;  %v2989_v41 = vld [vmem:[%s3869_s1 + $0x3c8] sm:$0xff]  }
  0x50   :  { %2587 = vmatpush3.bf16.msra.mxu0 %v2910_v38  ;;  %v2986_v38 = vld [vmem:[%s3870_s0 + $0x1d0] ss:$72 sps:$4 sm:$0xff]  }
  0x51   :  { %2627 = vmatpush3.bf16.msra.mxu1 %v2911_v39  ;;  %2588 = vmatprep.subr.bf16.mxu0 %v2918_v44  ;;  %v2987_v39 = vld [vmem:[%s3870_s0 + $0x1d8] ss:$72 sps:$4 sm:$0xff]  }
  0x52   :  { %2628 = vmatprep.subr.bf16.mxu1 %v2919_v45  ;;  %v2992_v44 = vld [vmem:[%s3869_s1 + $0x340] sm:$0xff]  }
  0x53   :  { %1785 = vmatmul.mubr.bf16.gmra.mxu0 %v2916_v42  ;;  %v2990_v42 = vld [vmem:[%s3869_s1 + $0x308] sm:$0xff]   ;;  %v2993_v45 = vld [vmem:[%s3869_s1 + $0x3c0] sm:$0xff]  }
  0x54   :  { %1850 = vmatmul.mubr.bf16.gmra.mxu1 %v2917_v43  ;;  %2589 = vmatpush3.bf16.msra.mxu0 %v2920_v46  ;;  %v2991_v43 = vld [vmem:[%s3869_s1 + $0x388] sm:$0xff]   ;;  %v2994_v46 = vld [vmem:[%s3869_s1 + $0x300] sm:$0xff]  }
  0x55   :  { %2629 = vmatpush3.bf16.msra.mxu1 %v2921_v47  ;;  %2590 = vmatprep.subr.bf16.mxu0 %v2922_v48  ;;  %v2995_v47 = vld [vmem:[%s3869_s1 + $0x380] sm:$0xff]   ;;  %v2996_v48 = vld [vmem:[%s3870_s0 + $0x30] ss:$72 sps:$4 sm:$0xff]  }
  0x56   :  { %2630 = vmatprep.subr.bf16.mxu1 %v2923_v49  ;;  %1792 = vmatprep.mubr.bf16.mxu0 %v2926_v52  ;;  %v2998_v49 = vld [vmem:[%s3870_s0 + $0x34] ss:$72 sps:$4 sm:$0xff]  }
  0x57   :  { %1857 = vmatprep.mubr.bf16.mxu1 %v2928_v53  ;;  %v3002_v52 = vld [vmem:[%s3869_s1 + $0x478] sm:$0xff]  }
  0x58   :  { %2591 = vmatpush3.bf16.msra.mxu0 %v2924_v50  ;;  %v2999_v50 = vld [vmem:[%s3870_s0 + $0x38] ss:$72 sps:$4 sm:$0xff]  }
  0x59   :  { %2631 = vmatpush3.bf16.msra.mxu1 %v2925_v51  ;;  %2592 = vmatprep.subr.bf16.mxu0 %v2932_v56  ;;  %v3001_v51 = vld [vmem:[%s3870_s0 + $0x3c] ss:$72 sps:$4 sm:$0xff]  }
  0x5a   :  { %2632 = vmatprep.subr.bf16.mxu1 %v2933_v57  ;;  %v3003_v53 = vld [vmem:[%s3869_s1 + $0x438] sm:$0xff]   ;;  %v3006_v56 = vld [vmem:[%s3870_s0 + $0xc4] ss:$72 sps:$4 sm:$0xff]  }
  0x5b   :  { %1793 = vmatmul.mubr.bf16.gmra.mxu0 %v2930_v54  ;;  %v3004_v54 = vld [vmem:[%s3869_s1 + $0x470] sm:$0xff]  }
  0x5c   :  { %1858 = vmatmul.mubr.bf16.gmra.mxu1 %v2931_v55  ;;  %2593 = vmatpush3.bf16.msra.mxu0 %v2934_v58  ;;  %v3005_v55 = vld [vmem:[%s3869_s1 + $0x430] sm:$0xff]   ;;  %v3010_v58 = vld [vmem:[%s3870_s0 + $0xc0] ss:$72 sps:$4 sm:$0xff]  }
  0x5d   :  { %2633 = vmatpush3.bf16.msra.mxu1 %v2935_v59  ;;  %2594 = vmatprep.subr.bf16.mxu0 %v2936_v60  ;;  %v3008_v57 = vld [vmem:[%s3870_s0 + $0xcc] ss:$72 sps:$4 sm:$0xff]   ;;  %v3011_v59 = vld [vmem:[%s3870_s0 + $0xc8] ss:$72 sps:$4 sm:$0xff]  }
  0x5e   :  { %2634 = vmatprep.subr.bf16.mxu1 %v2937_v61  ;;  %1898 = vmatprep.mubr.bf16.mxu0 %v2942_v1  ;;  %v3012_v60 = vld [vmem:[%s3869_s1 + $0x468] sm:$0xff]   ;;  %v3018_v1 = vld [vmem:[%s3870_s0 + $0x15c] ss:$72 sps:$4 sm:$0xff]  }
  0x5f   :  { %1963 = vmatprep.mubr.bf16.mxu1 %v2945_v3  ;;  %v3013_v61 = vld [vmem:[%s3869_s1 + $0x428] sm:$0xff]   ;;  %v3022_v3 = vld [vmem:[%s3869_s1 + $0x458] sm:$0xff]  }
  0x60   :  { %2595 = vmatpush3.bf16.msra.mxu0 %v2938_v62  ;;  %v3014_v62 = vld [vmem:[%s3869_s1 + $0x460] sm:$0xff]  }
  0x61   :  { %2635 = vmatpush3.bf16.msra.mxu1 %v2939_v63  ;;  %2660 = vmatprep.subr.bf16.mxu0 %v2946_v4  ;;  %v3015_v63 = vld [vmem:[%s3869_s1 + $0x420] sm:$0xff]  }
  0x62   :  { %2700 = vmatprep.subr.bf16.mxu1 %v2947_v5  ;;  %v3021_v4 = vld [vmem:[%s3870_s0 + $0x158] ss:$72 sps:$4 sm:$0xff]  }
  0x63   :  { %1899 = vmatmul.mubr.bf16.vlgmr.msra.gmra.mxu0 %v2940_v0  ;;  %v3016_v0 = vld [vmem:[%s3870_s0 + $0x154] ss:$72 sps:$4 sm:$0xff]  }
  0x64   :  { %1964 = vmatmul.mubr.bf16.vlgmr.msra.gmra.mxu1 %v2943_v2  ;;  %2661 = vmatpush3.bf16.msra.mxu0 %v2948_v6  ;;  %v3020_v2 = vld [vmem:[%s3870_s0 + $0x150] ss:$72 sps:$4 sm:$0xff]  }
  0x65   :  { %2701 = vmatpush3.bf16.msra.mxu1 %v2949_v7  ;;  %2662 = vmatprep.subr.bf16.mxu0 %v2950_v8  ;;  %v3023_v5 = vld [vmem:[%s3869_s1 + $0x418] sm:$0xff]   ;;  %v3024_v6 = vld [vmem:[%s3869_s1 + $0x450] sm:$0xff]   ;;  %v3026_v7 = vld [vmem:[%s3870_s0 + $0x1e4] ss:$72 sps:$4 sm:$0xff]  }
  0x66   :  { %2702 = vmatprep.subr.bf16.mxu1 %v2951_v9  ;;  %1906 = vmatprep.mubr.bf16.mxu0 %v2954_v12  ;;  %v3028_v8 = vld [vmem:[%s3870_s0 + $0x1ec] ss:$72 sps:$4 sm:$0xff]   ;;  %v3031_v12 = vld [vmem:[%s3870_s0 + $0x1e8] ss:$72 sps:$4 sm:$0xff]  }
  0x67   :  { %1971 = vmatprep.mubr.bf16.mxu1 %v2956_v13  ;;  %v3025_v9 = vld [vmem:[%s3869_s1 + $0x410] sm:$0xff]   ;;  %v3033_v13 = vld [vmem:[%s3869_s1 + $0x408] sm:$0xff]  }
  0x68   :  { %2663 = vmatpush3.bf16.msra.mxu0 %v2952_v10  ;;  %v3032_v10 = vld [vmem:[%s3869_s1 + $0x448] sm:$0xff]  }
  0x69   :  { %2703 = vmatpush3.bf16.msra.mxu1 %v2953_v11  ;;  %2664 = vmatprep.subr.bf16.mxu0 %v2960_v16  ;;  %v3030_v11 = vld [vmem:[%s3870_s0 + $0x1e0] ss:$72 sps:$4 sm:$0xff]   ;;  %v3041_v16 = vld [vmem:[%s3870_s0 + $0x164] ss:$72 sps:$4 sm:$0xff]  }
  0x6a   :  { %2704 = vmatprep.subr.bf16.mxu1 %v2961_v17  ;;  %v3035_v17 = vld [vmem:[%s3869_s1 + $0x400] sm:$0xff]  }
  0x6b   :  { %1907 = vmatmul.mubr.bf16.gmra.mxu0 %v2958_v14  ;;  %v3034_v14 = vld [vmem:[%s3869_s1 + $0x440] sm:$0xff]  }
  0x6c   :  { %1972 = vmatmul.mubr.bf16.gmra.mxu1 %v2959_v15  ;;  %2665 = vmatpush3.bf16.msra.mxu0 %v2962_v18  ;;  %v3038_v15 = vld [vmem:[%s3870_s0 + $0x44] ss:$72 sps:$4 sm:$0xff]   ;;  %v3036_v18 = vld [vmem:[%s3870_s0 + $0x40] ss:$72 sps:$4 sm:$0xff]  }
  0x6d   :  { %2705 = vmatpush3.bf16.msra.mxu1 %v2963_v19  ;;  %2666 = vmatprep.subr.bf16.mxu0 %v2964_v20  ;;  %v3039_v19 = vld [vmem:[%s3870_s0 + $0x160] ss:$72 sps:$4 sm:$0xff]   ;;  %v3042_v20 = vld [vmem:[%s3870_s0 + $0xd4] ss:$72 sps:$4 sm:$0xff]  }
  0x6e   :  { %2706 = vmatprep.subr.bf16.mxu1 %v2965_v21  ;;  %1914 = vmatprep.mubr.bf16.mxu0 %v2968_v24  ;;  %v3044_v21 = vld [vmem:[%s3870_s0 + $0x1f4] ss:$72 sps:$4 sm:$0xff]  }
  0x6f   :  { %1979 = vmatprep.mubr.bf16.mxu1 %v2970_v25 }
  0x70   :  { %2667 = vmatpush3.bf16.msra.mxu0 %v2966_v22  ;;  %v3046_v22 = vld [vmem:[%s3870_s0 + $0xd0] ss:$72 sps:$4 sm:$0xff]  }
  0x71   :  { %2707 = vmatpush3.bf16.msra.mxu1 %v2967_v23  ;;  %2668 = vmatprep.subr.bf16.mxu0 %v2974_v28  ;;  %v3047_v23 = vld [vmem:[%s3870_s0 + $0x1f0] ss:$72 sps:$4 sm:$0xff]  }
  0x72   :  { %2708 = vmatprep.subr.bf16.mxu1 %v2975_v29 }
  0x73   :  { %1915 = vmatmul.mubr.bf16.gmra.mxu0 %v2972_v26  ;;  %v2203_v26 = vld [vmem:[%s3871_s2] ss:$0 sm:$0xff] }
  0x74   :  { %1980 = vmatmul.mubr.bf16.gmra.mxu1 %v2973_v27  ;;  %2669 = vmatpush3.bf16.msra.mxu0 %v2976_v30 }
  0x75   :  { %2709 = vmatpush3.bf16.msra.mxu1 %v2977_v31  ;;  %2670 = vmatprep.subr.bf16.mxu0 %v2978_v32 }
  0x76   :  { %2710 = vmatprep.subr.bf16.mxu1 %v2979_v33  ;;  %1922 = vmatprep.mubr.bf16.mxu0 %v2982_v36 }
  0x77   :  { %1987 = vmatprep.mubr.bf16.mxu1 %v2984_v37 }
  0x78   :  { %2671 = vmatpush3.bf16.msra.mxu0 %v2980_v34 }
  0x79   :  { %2711 = vmatpush3.bf16.msra.mxu1 %v2981_v35  ;;  %2672 = vmatprep.subr.bf16.mxu0 %v2988_v40 }
  0x7a   :  { %2712 = vmatprep.subr.bf16.mxu1 %v2989_v41 }
  0x7b   :  { %1923 = vmatmul.mubr.bf16.gmra.mxu0 %v2986_v38 }
  0x7c   :  { %1988 = vmatmul.mubr.bf16.gmra.mxu1 %v2987_v39  ;;  %2673 = vmatpush3.bf16.msra.mxu0 %v2990_v42 }
  0x7d   :  { %2713 = vmatpush3.bf16.msra.mxu1 %v2991_v43  ;;  %2674 = vmatprep.subr.bf16.mxu0 %v2992_v44 }
  0x7e   :  { %2714 = vmatprep.subr.bf16.mxu1 %v2993_v45  ;;  %2028 = vmatprep.mubr.bf16.mxu0 %v2998_v49 }
  0x7f   :  { %2093 = vmatprep.mubr.bf16.mxu1 %v3001_v51 }
  0x80   :  { %2675 = vmatpush3.bf16.msra.mxu0 %v2994_v46 }
  0x81   :  { %2715 = vmatpush3.bf16.msra.mxu1 %v2995_v47  ;;  %2740 = vmatprep.subr.bf16.mxu0 %v3002_v52 }
  0x82   :  { %2780 = vmatprep.subr.bf16.mxu1 %v3002_v52 }
  0x83   :  { %2029 = vmatmul.mubr.bf16.vlgmr.msra.gmra.mxu0 %v2996_v48 }
  0x84   :  { %2094 = vmatmul.mubr.bf16.vlgmr.msra.gmra.mxu1 %v2999_v50  ;;  %2741 = vmatpush3.bf16.msra.mxu0 %v3003_v53 }
  0x85   :  { %2788 = vmatpush3.bf16.msra.mxu1 %v3003_v53  ;;  %2742 = vmatprep.subr.bf16.mxu0 %v3004_v54 }
  0x86   :  { %2781 = vmatprep.subr.bf16.mxu1 %v3004_v54  ;;  %2036 = vmatprep.mubr.bf16.mxu0 %v3006_v56 }
  0x87   :  { %2101 = vmatprep.mubr.bf16.mxu1 %v3008_v57 }
  0x88   :  { %2743 = vmatpush3.bf16.msra.mxu0 %v3005_v55 }
  0x89   :  { %2789 = vmatpush3.bf16.msra.mxu1 %v3005_v55  ;;  %2744 = vmatprep.subr.bf16.mxu0 %v3012_v60 }
  0x8a   :  { %2782 = vmatprep.subr.bf16.mxu1 %v3012_v60 }
  0x8b   :  { %2037 = vmatmul.mubr.bf16.gmra.mxu0 %v3010_v58 }
  0x8c   :  { %2102 = vmatmul.mubr.bf16.gmra.mxu1 %v3011_v59  ;;  %2745 = vmatpush3.bf16.msra.mxu0 %v3013_v61 }
  0x8d   :  { %2790 = vmatpush3.bf16.msra.mxu1 %v3013_v61  ;;  %2746 = vmatprep.subr.bf16.mxu0 %v3014_v62 }
  0x8e   :  { %2783 = vmatprep.subr.bf16.mxu1 %v3014_v62  ;;  %2044 = vmatprep.mubr.bf16.mxu0 %v3016_v0 }
  0x8f   :  { %2109 = vmatprep.mubr.bf16.mxu1 %v3018_v1 }
  0x90   :  { %2747 = vmatpush3.bf16.msra.mxu0 %v3015_v63 }
  0x91   :  { %2791 = vmatpush3.bf16.msra.mxu1 %v3015_v63  ;;  %2748 = vmatprep.subr.bf16.mxu0 %v3022_v3 }
  0x92   :  { %2784 = vmatprep.subr.bf16.mxu1 %v3022_v3 }
  0x93   :  { %2045 = vmatmul.mubr.bf16.gmra.mxu0 %v3020_v2 }
  0x94   :  { %2110 = vmatmul.mubr.bf16.gmra.mxu1 %v3021_v4  ;;  %2749 = vmatpush3.bf16.msra.mxu0 %v3023_v5 }
  0x95   :  { %2052 = vmatprep.mubr.bf16.mxu0 %v3026_v7  ;;  %2792 = vmatpush3.bf16.msra.mxu1 %v3023_v5 }
  0x96   :  { %2750 = vmatprep.subr.bf16.mxu0 %v3024_v6  ;;  %2785 = vmatprep.subr.bf16.mxu1 %v3024_v6 }
  0x97   :  { %2117 = vmatprep.mubr.bf16.mxu1 %v3028_v8 }
  0x98   :  { %2751 = vmatpush3.bf16.msra.mxu0 %v3025_v9 }
  0x99   :  { %2793 = vmatpush3.bf16.msra.mxu1 %v3025_v9  ;;  %2752 = vmatprep.subr.bf16.mxu0 %v3032_v10 }
  0x9a   :  { %2786 = vmatprep.subr.bf16.mxu1 %v3032_v10 }
  0x9b   :  { %2053 = vmatmul.mubr.bf16.gmra.mxu0 %v3030_v11 }
  0x9c   :  { %2118 = vmatmul.mubr.bf16.gmra.mxu1 %v3031_v12  ;;  %2158 = vmatprep.mubr.bf16.mxu0 %v3038_v15 }
  0x9d   :  { %2753 = vmatpush3.bf16.msra.mxu0 %v3033_v13  ;;  %2794 = vmatpush3.bf16.msra.mxu1 %v3033_v13 }
  0x9e   :  { %2754 = vmatprep.subr.bf16.mxu0 %v3034_v14  ;;  %2787 = vmatprep.subr.bf16.mxu1 %v3034_v14 }
  0x9f   :  { %2174 = vmatprep.mubr.bf16.mxu1 %v3041_v16 }
  0xa1   :  { %2755 = vmatpush3.bf16.msra.mxu0 %v3035_v17  ;;  %2795 = vmatpush3.bf16.msra.mxu1 %v3035_v17 }
  0xa4   :  { %2159 = vmatmul.mubr.bf16.vlgmr.msra.gmra.mxu0 %v3036_v18  ;;  %2175 = vmatmul.mubr.bf16.vlgmr.msra.gmra.mxu1 %v3039_v19 }
  0xa5   :  { %2166 = vmatprep.mubr.bf16.mxu0 %v3042_v20  ;;  %2182 = vmatprep.mubr.bf16.mxu1 %v3044_v21 }
  0xac   :  { %2167 = vmatmul.mubr.bf16.gmra.mxu0 %v3046_v22  ;;  %2183 = vmatmul.mubr.bf16.gmra.mxu1 %v3047_v23 }
  0xe3   :  { %v2436_v24 = vpop.f32.mrf.mxu0 }
  0xe4   :  { %v2476_v25 = vpop.f32.mrf.mxu1 }
  0xe5   :  { %v2437_v27 = vpop.f32.mrf.mxu0 }
  0xe6   :  { %v2438_v28 = vadd.f32 %v2437_v27, %v2436_v24  ;;  %v2477_v29 = vpop.f32.mrf.mxu1 }
  0xe7   :  { %v2478_v30 = vadd.f32 %v2477_v29, %v2476_v25  ;;  %v2439_v31 = vpop.f32.mrf.mxu0 }
  0xe8   :  { %v1641_v32 = vadd.f32 %v2438_v28, %v2203_v26  ;;  %v2479_v33 = vpop.f32.mrf.mxu1 }
  0xe9   :  { %v2440_v34 = vpop.f32.mrf.mxu0 }
  0xea   :  { %v1706_v35 = vadd.f32 %v2478_v30, %v1641_v32  ;;  %v2441_v36 = vadd.f32 %v2440_v34, %v2439_v31  ;;  %v2480_v37 = vpop.f32.mrf.mxu1 }
  0xeb   :  { %v2481_v38 = vadd.f32 %v2480_v37, %v2479_v33  ;;  %v2442_v40 = vpop.f32.mrf.mxu0 }
  0xec   :  { %v1644_v39 = vadd.f32 %v2441_v36, %v2203_v26  ;;  %v2482_v42 = vpop.f32.mrf.mxu1 }
  0xed   :  { %v2443_v43 = vpop.f32.mrf.mxu0 }
  0xee   :  { %v1709_v41 = vadd.f32 %v2481_v38, %v1644_v39  ;;  %v2444_v44 = vadd.f32 %v2443_v43, %v2442_v40  ;;  %v2483_v45 = vpop.f32.mrf.mxu1 }
  0xef   :  { %v2484_v46 = vadd.f32 %v2483_v45, %v2482_v42  ;;  %v2445_v47 = vpop.f32.mrf.mxu0 }
  0xf0   :  { %v1649_v48 = vadd.f32 %v2444_v44, %v2203_v26  ;;  %v2485_v49 = vpop.f32.mrf.mxu1 }
  0xf1   :  { %v2446_v50 = vpop.f32.mrf.mxu0 }
  0xf2   :  { %v1714_v51 = vadd.f32 %v2484_v46, %v1649_v48  ;;  %v2447_v52 = vadd.f32 %v2446_v50, %v2445_v47  ;;  %v2486_v53 = vpop.f32.mrf.mxu1 }
  0xf3   :  { %v2487_v54 = vadd.f32 %v2486_v53, %v2485_v49  ;;  %v2448_v57 = vpop.f32.mrf.mxu0 }
  0xf4   :  { %v1652_v55 = vadd.f32 %v2447_v52, %v2203_v26  ;;  %v2488_v58 = vpop.f32.mrf.mxu1 }
  0xf5   :  { %v2449_v59 = vpop.f32.mrf.mxu0 }
  0xf6   :  { %v3719_v56 = vadd.f32 %v2487_v54, %v1652_v55  ;;  %v2450_v60 = vadd.f32 %v2449_v59, %v2448_v57  ;;  %v2489_v61 = vpop.f32.mrf.mxu1 }
  0xf7   :  { %v2490_v62 = vadd.f32 %v2489_v61, %v2488_v58  ;;  %v2451_v63 = vpop.f32.mrf.mxu0 }
  0xf8   :  { %v1657_v0 = vadd.f32 %v2450_v60, %v2203_v26  ;;  %v2491_v1 = vpop.f32.mrf.mxu1 }
  0xf9   :  { %v2452_v2 = vpop.f32.mrf.mxu0 }
  0xfa   :  { %v1722_v3 = vadd.f32 %v2490_v62, %v1657_v0  ;;  %v2453_v4 = vadd.f32 %v2452_v2, %v2451_v63  ;;  %v2492_v5 = vpop.f32.mrf.mxu1 }
  0xfb   :  { %v2493_v6 = vadd.f32 %v2492_v5, %v2491_v1  ;;  %v2454_v9 = vpop.f32.mrf.mxu0 }
  0xfc   :  { %v1660_v7 = vadd.f32 %v2453_v4, %v2203_v26  ;;  %v2494_v10 = vpop.f32.mrf.mxu1 }
  0xfd   :  { %v2455_v11 = vpop.f32.mrf.mxu0 }
  0xfe   :  { %v3721_v8 = vadd.f32 %v2493_v6, %v1660_v7  ;;  %v2495_v12 = vpop.f32.mrf.mxu1  ;;  %v2456_v13 = vadd.f32 %v2455_v11, %v2454_v9 }
  0xff   :  { %v2496_v14 = vadd.f32 %v2495_v12, %v2494_v10  ;;  %v2457_v15 = vpop.f32.mrf.mxu0 }
 0x100   :  { %v2497_v16 = vpop.f32.mrf.mxu1  ;;  %v1665_v17 = vadd.f32 %v2456_v13, %v2203_v26 }
 0x101   :  { %v2458_v18 = vpop.f32.mrf.mxu0 }
 0x102   :  { %v2498_v19 = vpop.f32.mrf.mxu1  ;;  %v1730_v20 = vadd.f32 %v2496_v14, %v1665_v17  ;;  %v2459_v21 = vadd.f32 %v2458_v18, %v2457_v15 }
 0x103   :  { %v2499_v22 = vadd.f32 %v2498_v19, %v2497_v16  ;;  %v2516_v24 = vpop.f32.mrf.mxu0 }
 0x104   :  { %v1668_v23 = vadd.f32 %v2459_v21, %v2203_v26  ;;  %v2556_v27 = vpop.f32.mrf.mxu1 }
 0x105   :  { %v2517_v28 = vpop.f32.mrf.mxu0 }
 0x106   :  { %v1733_v25 = vadd.f32 %v2499_v22, %v1668_v23  ;;  %v2518_v29 = vadd.f32 %v2517_v28, %v2516_v24  ;;  %v2557_v30 = vpop.f32.mrf.mxu1 }
 0x107   :  { %v2519_v31 = vpop.f32.mrf.mxu0  ;;  %v2558_v33 = vadd.f32 %v2557_v30, %v2556_v27 }
 0x108   :  { %v1771_v32 = vadd.f32 %v2518_v29, %v1706_v35  ;;  %v2559_v34 = vpop.f32.mrf.mxu1 }
 0x109   :  { %v2520_v36 = vpop.f32.mrf.mxu0 }
 0x10a   :  { %v3723_v37 = vadd.f32 %v2558_v33, %v1771_v32  ;;  %v2521_v38 = vadd.f32 %v2520_v36, %v2519_v31  ;;  %v2560_v39 = vpop.f32.mrf.mxu1 }
 0x10b   :  { %v2561_v42 = vadd.f32 %v2560_v39, %v2559_v34  ;;  %v2522_v26 = vpop.f32.mrf.mxu0 }
 0x10c   :  { %v1774_v40 = vadd.f32 %v2521_v38, %v1709_v41  ;;  %v2562_v44 = vpop.f32.mrf.mxu1 }
 0x10d   :  { %v2523_v45 = vpop.f32.mrf.mxu0 }
 0x10e   :  { %v3725_v43 = vadd.f32 %v2561_v42, %v1774_v40  ;;  %v2524_v46 = vadd.f32 %v2523_v45, %v2522_v26  ;;  %v2563_v47 = vpop.f32.mrf.mxu1 }
 0x10f   :  { %v2564_v48 = vadd.f32 %v2563_v47, %v2562_v44  ;;  %v2525_v49 = vpop.f32.mrf.mxu0 }
 0x110   :  { %v1779_v50 = vadd.f32 %v2524_v46, %v1714_v51  ;;  %v2565_v35 = vpop.f32.mrf.mxu1 }
 0x111   :  { %v2526_v52 = vpop.f32.mrf.mxu0 }
 0x112   :  { %v3727_v53 = vadd.f32 %v2564_v48, %v1779_v50  ;;  %v2527_v54 = vadd.f32 %v2526_v52, %v2525_v49  ;;  %v2566_v55 = vpop.f32.mrf.mxu1 }
 0x113   :  { %v2567_v57 = vadd.f32 %v2566_v55, %v2565_v35  ;;  %v2528_v59 = vpop.f32.mrf.mxu0 }
 0x114   :  { %v1782_v41 = vadd.f32 %v2527_v54, %v3719_v56  ;;  %v2568_v60 = vpop.f32.mrf.mxu1 }
 0x115   :  { %v2529_v61 = vpop.f32.mrf.mxu0 }
 0x116   :  { %v3730_v58 = vadd.f32 %v2567_v57, %v1782_v41  ;;  %v2569_v62 = vpop.f32.mrf.mxu1  ;;  %v2530_v63 = vadd.f32 %v2529_v61, %v2528_v59 }
 0x117   :  { %v2570_v0 = vadd.f32 %v2569_v62, %v2568_v60  ;;  %v2531_v1 = vpop.f32.mrf.mxu0 }
 0x118   :  { %v2571_v2 = vpop.f32.mrf.mxu1  ;;  %v1787_v51 = vadd.f32 %v2530_v63, %v1722_v3 }
 0x119   :  { %v2532_v4 = vpop.f32.mrf.mxu0 }
 0x11a   :  { %v2572_v5 = vpop.f32.mrf.mxu1  ;;  %v3732_v6 = vadd.f32 %v2570_v0, %v1787_v51  ;;  %v2533_v7 = vadd.f32 %v2532_v4, %v2531_v1 }
 0x11b   :  { %v2573_v9 = vadd.f32 %v2572_v5, %v2571_v2  ;;  %v2534_v56 = vpop.f32.mrf.mxu0 }
 0x11c   :  { %v1790_v10 = vadd.f32 %v2533_v7, %v3721_v8  ;;  %v2574_v12 = vpop.f32.mrf.mxu1 }
 0x11d   :  { %v2535_v13 = vpop.f32.mrf.mxu0 }
 0x11e   :  { %v3735_v11 = vadd.f32 %v2573_v9, %v1790_v10  ;;  %v2536_v14 = vadd.f32 %v2535_v13, %v2534_v56  ;;  %v2575_v15 = vpop.f32.mrf.mxu1 }
 0x11f   :  { %v2576_v16 = vadd.f32 %v2575_v15, %v2574_v12  ;;  %v2537_v17 = vpop.f32.mrf.mxu0 }
 0x120   :  { %v1795_v18 = vadd.f32 %v2536_v14, %v1730_v20  ;;  %v2577_v19 = vpop.f32.mrf.mxu1 }
 0x121   :  { %v2538_v3 = vpop.f32.mrf.mxu0 }
 0x122   :  { %v3737_v21 = vadd.f32 %v2576_v16, %v1795_v18  ;;  %v2539_v22 = vadd.f32 %v2538_v3, %v2537_v17  ;;  %v2578_v23 = vpop.f32.mrf.mxu1 }
 0x123   :  { %v2579_v24 = vadd.f32 %v2578_v23, %v2577_v19  ;;  %v2596_v8 = vpop.f32.mrf.mxu0 }
 0x124   :  { %v1798_v27 = vadd.f32 %v2539_v22, %v1733_v25  ;;  %v3741_v29 = vpop.f32.mrf.mxu1 }
 0x125   :  { %v2597_v30 = vpop.f32.mrf.mxu0 }
 0x126   :  { %v3739_v28 = vadd.f32 %v2579_v24, %v1798_v27  ;;  %v3743_v31 = vpop.f32.mrf.mxu1  ;;  %v2598_v24 = vadd.f32 %v2597_v30, %v2596_v8 }
 0x127   :  { %v2599_v32 = vpop.f32.mrf.mxu0 }
 0x128   :  { %3873 = vst [vmem:[#allocation2_spill] sm:$0xff] %v3739_v28  ;;  %v3745_v33 = vpop.f32.mrf.mxu1 }
 0x129   :  { %v2600_v20 = vpop.f32.mrf.mxu0 }
 0x12a   :  { %v3747_v34 = vpop.f32.mrf.mxu1 }
 0x12b   :  { %v2602_v36 = vpop.f32.mrf.mxu0 }
 0x12c   :  { %v3749_v38 = vpop.f32.mrf.mxu1 }
 0x12d   :  { %v2603_v39 = vpop.f32.mrf.mxu0 }
 0x12e   :  { %v3751_v40 = vpop.f32.mrf.mxu1 }
 0x12f   :  { %v3753_v25 = vpop.f32.mrf.mxu0 }
 0x130   :  { %v3755_v42 = vpop.f32.mrf.mxu1 }
 0x131   :  { %v3757_v26 = vpop.f32.mrf.mxu0 }
 0x132   :  { %v3759_v44 = vpop.f32.mrf.mxu1 }
 0x133   :  { %v2608_v45 = vpop.f32.mrf.mxu0 }
 0x134   :  { %v2648_v46 = vpop.f32.mrf.mxu1 }
 0x135   :  { %v2609_v47 = vpop.f32.mrf.mxu0 }
 0x136   :  { %v2649_v48 = vpop.f32.mrf.mxu1 }
 0x137   :  { %v2611_v49 = vpop.f32.mrf.mxu0 }
 0x138   :  { %v3761_v50 = vpop.f32.mrf.mxu1 }
 0x139   :  { %v2612_v35 = vpop.f32.mrf.mxu0 }
 0x13a   :  { %v3763_v52 = vpop.f32.mrf.mxu1 }
 0x13b   :  { %v2614_v54 = vpop.f32.mrf.mxu0 }
 0x13c   :  { %v3765_v55 = vpop.f32.mrf.mxu1 }
 0x13d   :  { %v2615_v57 = vpop.f32.mrf.mxu0 }
 0x13e   :  { %v3767_v41 = vpop.f32.mrf.mxu1 }
 0x13f   :  { %v3769_v59 = vpop.f32.mrf.mxu0 }
 0x140   :  { %v3771_v60 = vpop.f32.mrf.mxu1 }
 0x141   :  { %3874 = vst [vmem:[#allocation3_spill] sm:$0xff] %v3771_v60  ;;  %v3773_v61 = vpop.f32.mrf.mxu0 }
 0x142   :  { %v3775_v62 = vpop.f32.mrf.mxu1 }
 0x143   :  { %3875 = vst [vmem:[#allocation4_spill] sm:$0xff] %v3775_v62  ;;  %v2676_v63 = vpop.f32.mrf.mxu0 }
 0x144   :  { %v2716_v0 = vpop.f32.mrf.mxu1 }
 0x145   :  { %v2677_v1 = vpop.f32.mrf.mxu0 }
 0x146   :  { %v2717_v2 = vpop.f32.mrf.mxu1  ;;  %v2678_v30 = vadd.f32 %v2677_v1, %v2676_v63  ;;  %v2653_v1 = vadd.f32 %v3763_v52, %v3761_v50  ;;  %v2619_v50 = vadd.f32 %v3773_v61, %v3769_v59 }
 0x147   :  { %v2679_v51 = vpop.f32.mrf.mxu0 }
 0x148   :  { %v3777_v4 = vpop.f32.mrf.mxu1 }
 0x149   :  { %3876 = vst [vmem:[#allocation5_spill] sm:$0xff] %v3777_v4  ;;  %v2680_v5 = vpop.f32.mrf.mxu0 }
 0x14a   :  { %v3779_v7 = vpop.f32.mrf.mxu1 }
 0x14b   :  { %3877 = vst [vmem:[#allocation6_spill] sm:$0xff] %v3779_v7  ;;  %v3781_v9 = vpop.f32.mrf.mxu0  ;;  %v2613_v7 = vadd.f32 %v2612_v35, %v2611_v49  ;;  %v2644_v35 = vadd.f32 %v3751_v40, %v3749_v38  ;;  %v2647_v38 = vadd.f32 %v3759_v44, %v3755_v42  ;;  %v2718_v40 = vadd.f32 %v2717_v2, %v2716_v0 }
 0x14c   :  { %v3783_v10 = vpop.f32.mrf.mxu1 }
 0x14d   :  { %3878 = vst [vmem:[#allocation7_spill] sm:$0xff] %v3783_v10  ;;  %v2683_v56 = vpop.f32.mrf.mxu0  ;;  %v2610_v10 = vadd.f32 %v2609_v47, %v2608_v45  ;;  %v2616_v47 = vadd.f32 %v2615_v57, %v2614_v54 }
 0x14e   :  { %v3785_v12 = vpop.f32.mrf.mxu1 }
 0x14f   :  { %3879 = vst [vmem:[#allocation8_spill] sm:$0xff] %v3785_v12  ;;  %v3787_v13 = vpop.f32.mrf.mxu0  ;;  %v2601_v12 = vadd.f32 %v2600_v20, %v2599_v32  ;;  %v2650_v20 = vadd.f32 %v2649_v48, %v2648_v46  ;;  %v2681_v46 = vadd.f32 %v2680_v5, %v2679_v51  ;;  %v2656_v51 = vadd.f32 %v3767_v41, %v3765_v55 }
 0x150   :  { %3880 = vst [vmem:[#allocation9_spill] sm:$0xff] %v3787_v13  ;;  %v3789_v14 = vpop.f32.mrf.mxu1  ;;  %v2604_v13 = vadd.f32 %v2603_v39, %v2602_v36  ;;  %v3885_v55 = vld [vmem:[#allocation5_spill] sm:$0xff] }
 0x151   :  { %3881 = vst [vmem:[#allocation10_spill] sm:$0xff] %v3789_v14  ;;  %v3791_v15 = vpop.f32.mrf.mxu0  ;;  %v1901_v14 = vadd.f32 %v2598_v24, %v3723_v37  ;;  %v1904_v8 = vadd.f32 %v2601_v12, %v3725_v43  ;;  %v1920_v43 = vadd.f32 %v2613_v7, %v3735_v11  ;;  %v1925_v11 = vadd.f32 %v2616_v47, %v3737_v21 }
 0x152   :  { %3882 = vst [vmem:[#allocation11_spill] sm:$0xff] %v3791_v15  ;;  %v3793_v16 = vpop.f32.mrf.mxu1  ;;  %v1909_v32 = vadd.f32 %v2604_v13, %v3727_v53  ;;  %v3886_v41 = vld [vmem:[#allocation6_spill] sm:$0xff] }
 0x153   :  { %3883 = vst [vmem:[#allocation12_spill] sm:$0xff] %v3793_v16  ;;  %v2688_v17 = vpop.f32.mrf.mxu0  ;;  %v1917_v16 = vadd.f32 %v2610_v10, %v3732_v6  ;;  %v2641_v6 = vadd.f32 %v3747_v34, %v3745_v33  ;;  %v2607_v34 = vadd.f32 %v3757_v26, %v3753_v25  ;;  %v1985_v57 = vadd.f32 %v2653_v1, %v1920_v43 }
 0x154   :  { %v2728_v18 = vpop.f32.mrf.mxu1  ;;  %v1974_v48 = vadd.f32 %v2644_v35, %v1909_v32  ;;  %v2684_v25 = vadd.f32 %v2683_v56, %v3781_v9  ;;  %v3893_v43 = vld [vmem:[#allocation7_spill] sm:$0xff] }
 0x155   :  { %v2689_v19 = vpop.f32.mrf.mxu0  ;;  %v1969_v63 = vadd.f32 %v2641_v6, %v1904_v8 }
 0x156   :  { %v2729_v3 = vpop.f32.mrf.mxu1  ;;  %v2690_v36 = vadd.f32 %v2689_v19, %v2688_v17  ;;  %v1990_v17 = vadd.f32 %v2656_v51, %v1925_v11  ;;  %v2721_v19 = vadd.f32 %v3886_v41, %v3885_v55 }
 0x157   :  { %v2691_v22 = vpop.f32.mrf.mxu0  ;;  %v2730_v52 = vadd.f32 %v2729_v3, %v2728_v18  ;;  %v2034_v13 = vadd.f32 %v2681_v46, %v1969_v63  ;;  %v3887_v18 = vld [vmem:[#allocation2_spill] sm:$0xff]  ;;  %v3894_v63 = vld [vmem:[#allocation8_spill] sm:$0xff] }
 0x158   :  { %v3795_v23 = vpop.f32.mrf.mxu1  ;;  %v1928_v3 = vadd.f32 %v2619_v50, %v3887_v18  ;;  %v3895_v51 = vld [vmem:[#allocation10_spill] sm:$0xff] }
 0x159   :  { %3884 = vst [vmem:[#allocation13_spill] sm:$0xff] %v3795_v23  ;;  %v2692_v27 = vpop.f32.mrf.mxu0  ;;  %v2638_v23 = vadd.f32 %v3743_v31, %v3741_v29  ;;  %v1982_v29 = vadd.f32 %v2650_v20, %v1917_v16  ;;  %v1912_v16 = vadd.f32 %v2607_v34, %v3730_v58  ;;  %v3892_v32 = vld [vmem:[#allocation11_spill] sm:$0xff] }
 0x15a   :  { %v2732_v62 = vpop.f32.mrf.mxu1  ;;  %v2693_v12 = vadd.f32 %v2692_v27, %v2691_v22  ;;  %v3888_v22 = vld [vmem:[#allocation3_spill] sm:$0xff] }
 0x15b   :  { %v2694_v60 = vpop.f32.mrf.mxu0  ;;  %v1966_v37 = vadd.f32 %v2638_v23, %v1901_v14  ;;  %v2047_v10 = vadd.f32 %v2690_v36, %v1982_v29  ;;  %v3889_v23 = vld [vmem:[#allocation4_spill] sm:$0xff]  ;;  %v1977_v29 = vadd.f32 %v2647_v38, %v1912_v16 }
 0x15c   :  { %v3797_v28 = vpop.f32.mrf.mxu1  ;;  %v2050_v44 = vadd.f32 %v2693_v12, %v1985_v57  ;;  %v2659_v9 = vadd.f32 %v3889_v23, %v3888_v22 }
 0x15d   :  { %v2695_v15 = vpop.f32.mrf.mxu0  ;;  %v2031_v53 = vadd.f32 %v2678_v30, %v1966_v37  ;;  %v2112_v42 = vadd.f32 %v2730_v52, %v2047_v10  ;;  %v3891_v30 = vld [vmem:[#allocation9_spill] sm:$0xff] }
 0x15e   :  { %v3801_v4 = vpop.f32.mrf.mxu1  ;;  %v2696_v21 = vadd.f32 %v2695_v15, %v2694_v60  ;;  %v2099_v60 = vadd.f32 %v2721_v19, %v2034_v13  ;;  %v2039_v15 = vadd.f32 %v2684_v25, %v1974_v48  ;;  %v2687_v58 = vadd.f32 %v3892_v32, %v3891_v30 }
 0x15f   :  { %v2697_v45 = vpop.f32.mrf.mxu0  ;;  %v2096_v7 = vadd.f32 %v2718_v40, %v2031_v53  ;;  %v2724_v53 = vadd.f32 %v3894_v63, %v3893_v43  ;;  %v1993_v1 = vadd.f32 %v2659_v9, %v1928_v3  ;;  %v2736_v10 = vadd.f32 %v3801_v4, %v3797_v28  ;;  %v3896_v28 = vld [vmem:[#allocation12_spill] sm:$0xff] }
 0x160   :  { %v3807_v39 = vpop.f32.mrf.mxu1  ;;  %v3890_v56 = vld [vmem:[#allocation13_spill] sm:$0xff]  ;;  %v2055_v6 = vadd.f32 %v2696_v21, %v1990_v17  ;;  %v2727_v4 = vadd.f32 %v3896_v28, %v3895_v51 }
 0x161   :  { %v2698_v49 = vpop.f32.mrf.mxu0  ;;  %v2733_v24 = vadd.f32 %v2732_v62, %v3890_v56  ;;  %v2104_v34 = vadd.f32 %v2724_v53, %v2039_v15 }
 0x162   :  { %v3814_v31 = vpop.f32.mrf.mxu1  ;;  %v2699_v47 = vadd.f32 %v2698_v49, %v2697_v45  ;;  %v2042_v45 = vadd.f32 %v2687_v58, %v1977_v29  ;;  %v2120_v38 = vadd.f32 %v2736_v10, %v2055_v6 }
 0x163   :  { %v2115_v37 = vadd.f32 %v2733_v24, %v2050_v44 }
 0x164   :  { %v2756_v33 = vpop.f32.mrf.mxu0  ;;  %v2768_v54 = vpop.f32.mrf.mxu1  ;;  %v2058_v40 = vadd.f32 %v2699_v47, %v1993_v1  ;;  %v2107_v25 = vadd.f32 %v2727_v4, %v2042_v45 }
 0x166   :  { %v2757_v5 = vpop.f32.mrf.mxu0  ;;  %v2769_v14 = vpop.f32.mrf.mxu1 }
 0x167   :  { %v2758_v26 = vadd.f32 %v2757_v5, %v2756_v33  ;;  %v2770_v0 = vadd.f32 %v2769_v14, %v2768_v54  ;;  %v2739_v5 = vadd.f32 %v3814_v31, %v3807_v39 }
 0x168   :  { %v2759_v2 = vpop.f32.mrf.mxu0  ;;  %v2771_v61 = vpop.f32.mrf.mxu1 }
 0x169   :  { %v2161_v59 = vadd.f32 %v2758_v26, %v2096_v7  ;;  %v2177_v27 = vadd.f32 %v2770_v0, %v2112_v42  ;;  %v2123_v42 = vadd.f32 %v2739_v5, %v2058_v40 }
 0x16a   :  { %v2760_v8 = vpop.f32.mrf.mxu0  ;;  %v2772_v36 = vpop.f32.mrf.mxu1 }
 0x16b   :  { %2191 = vst [vmem:[%s3872_s3] sm:$0xff] %v2161_v59  ;;  %v2761_v20 = vadd.f32 %v2760_v8, %v2759_v2  ;;  %2195 = vst [vmem:[%s3872_s3 + $0x20] sm:$0xff] %v2177_v27  ;;  %v2773_v62 = vadd.f32 %v2772_v36, %v2771_v61 }
 0x16c   :  { %v2762_v35 = vpop.f32.mrf.mxu0  ;;  %v2774_v48 = vpop.f32.mrf.mxu1 }
 0x16d   :  { %v2164_v46 = vadd.f32 %v2761_v20, %v2099_v60  ;;  %v2180_v12 = vadd.f32 %v2773_v62, %v2115_v37 }
 0x16e   :  { %v2763_v33 = vpop.f32.mrf.mxu0  ;;  %v2775_v11 = vpop.f32.mrf.mxu1 }
 0x16f   :  { %2192 = vst [vmem:[%s3872_s3 + $0x8] sm:$0xff] %v2164_v46  ;;  %v2764_v49 = vadd.f32 %v2763_v33, %v2762_v35  ;;  %2196 = vst [vmem:[%s3872_s3 + $0x28] sm:$0xff] %v2180_v12  ;;  %v2776_v54 = vadd.f32 %v2775_v11, %v2774_v48 }
 0x170   :  { %v2765_v57 = vpop.f32.mrf.mxu0  ;;  %v2777_v52 = vpop.f32.mrf.mxu1 }
 0x171   :  { %v2169_v50 = vadd.f32 %v2764_v49, %v2104_v34  ;;  %v2185_v7 = vadd.f32 %v2776_v54, %v2120_v38 }
 0x172   :  { %v2766_v13 = vpop.f32.mrf.mxu0  ;;  %v2778_v14 = vpop.f32.mrf.mxu1 }
 0x173   :  { %2193 = vst [vmem:[%s3872_s3 + $0x10] sm:$0xff] %v2169_v50  ;;  %v2767_v26 = vadd.f32 %v2766_v13, %v2765_v57  ;;  %2197 = vst [vmem:[%s3872_s3 + $0x30] sm:$0xff] %v2185_v7  ;;  %v2779_v44 = vadd.f32 %v2778_v14, %v2777_v52 }
 0x175   :  { %v2172_v21 = vadd.f32 %v2767_v26, %v2107_v25  ;;  %v2188_v0 = vadd.f32 %v2779_v44, %v2123_v42 }
 0x177   :  { %2194 = vst [vmem:[%s3872_s3 + $0x18] sm:$0xff] %v2172_v21  ;;  %2198 = vst [vmem:[%s3872_s3 + $0x38] sm:$0xff] %v2188_v0 }

// kernel: _net_forward_impl.240
= control target key start
LH: loop header
LB: loop body
LE: loop exit
PB: predicated region body
PF: predicated region fallthrough
CT: control target
= control target key end

     0   :  { %vm258_vm0 = vcmask 523264   ;;  %s697_s1 = inlined_call_operand.vmem [shape: bf16[320,128], index: 1, kind: input, shape index: {}]   ;;  %s698_s0 = inlined_call_operand.vmem [shape: bf16[64,320], index: 0, kind: input, shape index: {}]   ;;  %s699_s2 = inlined_call_operand.vmem [shape: f32[1,128], index: 2, kind: input, shape index: {}]   ;;  %s700_s3 = inlined_call_operand.vmem [shape: f32[64,128], index: 3, kind: output, shape index: {}]  }
   0x1   :  { %v514_v0 = vld [vmem:[%s697_s1 + $0x78] sm:$0xff]   ;;  %v516_v2 = vld [vmem:[%s697_s1 + $0x70] sm:$0xff]   ;;  %v518_v4 = vld [vmem:[%s697_s1 + $0x68] sm:$0xff]  }
   0x2   :  { %v515_v1 = vld [vmem:[%s697_s1 + $0x38] sm:$0xff]   ;;  %450 = vmatprep.subr.bf16.mxu0 %v514_v0  ;;  %v517_v3 = vld [vmem:[%s697_s1 + $0x30] sm:$0xff]   ;;  %v519_v5 = vld [vmem:[%s697_s1 + $0x28] sm:$0xff]  }
   0x3   :  { %451 = vmatpush3.bf16.msra.mxu0 %v515_v1  ;;  %v520_v6 = vld [vmem:[%s697_s1 + $0x60] sm:$0xff]   ;;  %v525_v8 = vld [vmem:[%s697_s1 + $0x98] sm:$0xff]   ;;  %v528_v10 = vld [vmem:[%s697_s1 + $0x90] sm:$0xff]  }
   0x4   :  { %452 = vmatprep.subr.bf16.mxu0 %v516_v2  ;;  %v521_v7 = vld [vmem:[%s697_s1 + $0x20] sm:$0xff]   ;;  %v522_v9 = vld [vmem:[%s697_s1 + $0x58] sm:$0xff]   ;;  %498 = vmatprep.subr.bf16.mxu1 %v525_v8  ;;  %v524_v12 = vld [vmem:[%s697_s1 + $0x50] sm:$0xff]  }
   0x5   :  { %499 = vmatpush3.bf16.msra.mxu1 %v525_v8  ;;  %v523_v11 = vld [vmem:[%s697_s1 + $0x18] sm:$0xff]   ;;  %v531_v13 = vld [vmem:[%s697_s1 + $0x88] sm:$0xff]   ;;  %v526_v14 = vld [vmem:[%s697_s1 + $0x10] sm:$0xff]  }
   0x6   :  { %500 = vmatprep.subr.bf16.mxu1 %v528_v10  ;;  %v527_v15 = vld [vmem:[%s697_s1 + $0x48] sm:$0xff]   ;;  %v535_v16 = vld [vmem:[%s698_s0 + $0x4] ss:$12 sps:$4 sm:$0xff]   ;;  %v542_v28 = vld [vmem:[%s698_s0 + $0x34] ss:$12 sps:$4 sm:$0xff]  }
   0x7   :  { %453 = vmatpush3.bf16.msra.mxu0 %v517_v3  ;;  %v536_v17 = vld [vmem:[%s697_s1 + $0x80] sm:$0xff]   ;;  %303 = vmatprep.mubr.bf16.mxu0 %v535_v16  ;;  %v537_v18 = vld [vmem:[%s698_s0 + $0x8] ss:$12 sps:$4 sm:$0xff]   ;;  %v546_v26 = vld [vmem:[%s698_s0 + $0x50] ss:$12 sps:$4 sm:$0xff]  }
   0x8   :  { %454 = vmatprep.subr.bf16.mxu0 %v518_v4  ;;  %v529_v19 = vld [vmem:[%s697_s1 + $0x8] sm:$0xff]   ;;  %v530_v20 = vld [vmem:[%s697_s1 + $0x40] sm:$0xff]   ;;  %506 = vmatprep.mubr.msk.bf16.mxu1 %vm258_vm0, %v537_v18  ;;  %v544_v29 = vld [vmem:[%s698_s0 + $0x30] ss:$12 sps:$4 sm:$0xff]  }
   0x9   :  { %501 = vmatpush3.bf16.msra.mxu1 %v528_v10  ;;  %v538_v21 = vld [vmem:[%s698_s0 + $0x20] ss:$12 sps:$4 sm:$0xff]   ;;  %v545_v22 = vld [vmem:[%s698_s0 + $0x38] ss:$12 sps:$4 sm:$0xff]   ;;  %v539_v25 = vld [vmem:[%s698_s0 + $0x1c] ss:$12 sps:$4 sm:$0xff]  }
   0xa   :  { %502 = vmatprep.subr.bf16.mxu1 %v531_v13  ;;  %v532_v23 = vld [vmem:[%s697_s1] sm:$0xff]   ;;  %v547_v30 = vld [vmem:[%s698_s0 + $0x4c] ss:$12 sps:$4 sm:$0xff]   ;;  %v549_v31 = vld [vmem:[%s698_s0 + $0x48] ss:$12 sps:$4 sm:$0xff]  }
   0xb   :  { %455 = vmatpush3.bf16.msra.mxu0 %v519_v5  ;;  %v533_v24 = vld [vmem:[%s698_s0] ss:$12 sps:$4 sm:$0xff]   ;;  %v541_v27 = vld [vmem:[%s698_s0 + $0x18] ss:$12 sps:$4 sm:$0xff]  }
   0xc   :  { %456 = vmatprep.subr.bf16.mxu0 %v520_v6  ;;  %v413_v36 = vld [vmem:[%s699_s2] ss:$0 sm:$0xff] }
   0xd   :  { %503 = vmatpush3.bf16.msra.mxu1 %v531_v13 }
   0xe   :  { %504 = vmatprep.subr.bf16.mxu1 %v536_v17 }
   0xf   :  { %457 = vmatpush3.bf16.msra.mxu0 %v521_v7 }
  0x10   :  { %458 = vmatprep.subr.bf16.mxu0 %v522_v9 }
  0x11   :  { %505 = vmatpush3.bf16.msra.mxu1 %v536_v17 }
  0x13   :  { %459 = vmatpush3.bf16.msra.mxu0 %v523_v11 }
  0x14   :  { %460 = vmatprep.subr.bf16.mxu0 %v524_v12  ;;  %507 = vmatmul.mubr.msk.bf16.vlgmr.msra.gmra.mxu1 %vm258_vm0, %v538_v21 }
  0x15   :  { %510 = vmatprep.mubr.msk.bf16.mxu1 %vm258_vm0, %v545_v22 }
  0x17   :  { %461 = vmatpush3.bf16.msra.mxu0 %v526_v14 }
  0x18   :  { %462 = vmatprep.subr.bf16.mxu0 %v527_v15 }
  0x1b   :  { %463 = vmatpush3.bf16.msra.mxu0 %v529_v19 }
  0x1c   :  { %464 = vmatprep.subr.bf16.mxu0 %v530_v20  ;;  %511 = vmatmul.mubr.msk.bf16.gmra.mxu1 %vm258_vm0, %v546_v26 }
  0x1f   :  { %465 = vmatpush3.bf16.msra.mxu0 %v532_v23 }
  0x22   :  { %304 = vmatmul.mubr.bf16.vlgmr.msra.gmra.mxu0 %v533_v24 }
  0x23   :  { %311 = vmatprep.mubr.bf16.mxu0 %v539_v25 }
  0x2a   :  { %312 = vmatmul.mubr.bf16.gmra.mxu0 %v541_v27 }
  0x2b   :  { %319 = vmatprep.mubr.bf16.mxu0 %v542_v28 }
  0x32   :  { %320 = vmatmul.mubr.bf16.gmra.mxu0 %v544_v29 }
  0x33   :  { %327 = vmatprep.mubr.bf16.mxu0 %v547_v30 }
  0x3a   :  { %328 = vmatmul.mubr.bf16.gmra.mxu0 %v549_v31 }
  0xd4   :  { %v508_v32 = vpop.f32.mrf.mxu1 }
  0xd6   :  { %v370_v34 = vpop.f32.mrf.mxu1 }
  0xd8   :  { %v509_v39 = vpop.f32.mrf.mxu1 }
  0xda   :  { %v373_v45 = vpop.f32.mrf.mxu1 }
  0xdc   :  { %v512_v51 = vpop.f32.mrf.mxu1 }
  0xde   :  { %v386_v57 = vpop.f32.mrf.mxu1 }
  0xe0   :  { %v513_v63 = vpop.f32.mrf.mxu1 }
  0xe2   :  { %v466_v33 = vpop.f32.mrf.mxu0  ;;  %v389_v5 = vpop.f32.mrf.mxu1 }
  0xe4   :  { %v467_v35 = vpop.f32.mrf.mxu0 }
  0xe5   :  { %v468_v37 = vadd.f32 %v467_v35, %v466_v33 }
  0xe6   :  { %v469_v38 = vpop.f32.mrf.mxu0 }
  0xe7   :  { %v306_v40 = vadd.f32 %v468_v37, %v413_v36 }
  0xe8   :  { %v470_v41 = vpop.f32.mrf.mxu0 }
  0xe9   :  { %v471_v42 = vadd.f32 %v470_v41, %v469_v38  ;;  %v371_v43 = vadd.f32 %v370_v34, %v306_v40 }
  0xea   :  { %v472_v44 = vpop.f32.mrf.mxu0 }
  0xeb   :  { %401 = vst [vmem:[%s700_s3] sm:$0xff] %v371_v43  ;;  %v309_v46 = vadd.f32 %v471_v42, %v413_v36 }
  0xec   :  { %v473_v47 = vpop.f32.mrf.mxu0 }
  0xed   :  { %v474_v48 = vadd.f32 %v473_v47, %v472_v44  ;;  %v374_v49 = vadd.f32 %v373_v45, %v309_v46 }
  0xee   :  { %v475_v50 = vpop.f32.mrf.mxu0 }
  0xef   :  { %v314_v52 = vadd.f32 %v474_v48, %v413_v36  ;;  %402 = vst [vmem:[%s700_s3 + $0x8] sm:$0xff] %v374_v49 }
  0xf0   :  { %v476_v53 = vpop.f32.mrf.mxu0 }
  0xf1   :  { %v379_v54 = vadd.f32 %v508_v32, %v314_v52  ;;  %v477_v55 = vadd.f32 %v476_v53, %v475_v50 }
  0xf2   :  { %v478_v56 = vpop.f32.mrf.mxu0 }
  0xf3   :  { %403 = vst [vmem:[%s700_s3 + $0x10] sm:$0xff] %v379_v54  ;;  %v317_v58 = vadd.f32 %v477_v55, %v413_v36 }
  0xf4   :  { %v479_v59 = vpop.f32.mrf.mxu0 }
  0xf5   :  { %v382_v60 = vadd.f32 %v509_v39, %v317_v58  ;;  %v480_v61 = vadd.f32 %v479_v59, %v478_v56 }
  0xf6   :  { %v481_v62 = vpop.f32.mrf.mxu0 }
  0xf7   :  { %404 = vst [vmem:[%s700_s3 + $0x18] sm:$0xff] %v382_v60  ;;  %v322_v0 = vadd.f32 %v480_v61, %v413_v36 }
  0xf8   :  { %v482_v1 = vpop.f32.mrf.mxu0 }
  0xf9   :  { %v483_v2 = vadd.f32 %v482_v1, %v481_v62  ;;  %v387_v3 = vadd.f32 %v386_v57, %v322_v0 }
  0xfa   :  { %v484_v4 = vpop.f32.mrf.mxu0 }
  0xfb   :  { %405 = vst [vmem:[%s700_s3 + $0x20] sm:$0xff] %v387_v3  ;;  %v325_v6 = vadd.f32 %v483_v2, %v413_v36 }
  0xfc   :  { %v485_v7 = vpop.f32.mrf.mxu0 }
  0xfd   :  { %v486_v8 = vadd.f32 %v485_v7, %v484_v4  ;;  %v390_v9 = vadd.f32 %v389_v5, %v325_v6 }
  0xfe   :  { %v487_v10 = vpop.f32.mrf.mxu0 }
  0xff   :  { %v330_v11 = vadd.f32 %v486_v8, %v413_v36  ;;  %406 = vst [vmem:[%s700_s3 + $0x28] sm:$0xff] %v390_v9 }
 0x100   :  { %v488_v12 = vpop.f32.mrf.mxu0 }
 0x101   :  { %v395_v13 = vadd.f32 %v512_v51, %v330_v11  ;;  %v489_v14 = vadd.f32 %v488_v12, %v487_v10 }
 0x103   :  { %407 = vst [vmem:[%s700_s3 + $0x30] sm:$0xff] %v395_v13  ;;  %v333_v15 = vadd.f32 %v489_v14, %v413_v36 }
 0x105   :  { %v398_v16 = vadd.f32 %v513_v63, %v333_v15 }
 0x107   :  { %408 = vst [vmem:[%s700_s3 + $0x38] sm:$0xff] %v398_v16 }

// kernel: _net_forward_impl.239
= control target key start
LH: loop header
LB: loop body
LE: loop exit
PB: predicated region body
PF: predicated region fallthrough
CT: control target
= control target key end

     0   :  { %vm1826_vm0 = vcmask 261120   ;;  %s4453_s1 = inlined_call_operand.vmem [shape: bf16[2592,128], index: 1, kind: input, shape index: {}]   ;;  %s4454_s0 = inlined_call_operand.vmem [shape: bf16[64,2592], index: 0, kind: input, shape index: {}]   ;;  %s4455_s2 = inlined_call_operand.vmem [shape: f32[1,128], index: 2, kind: input, shape index: {}]   ;;  %s4456_s3 = inlined_call_operand.vmem [shape: f32[64,128], index: 3, kind: output, shape index: {}]  }
   0x1   :  { %v3239_v0 = vld [vmem:[%s4453_s1 + $0x78] sm:$0xff]   ;;  %v3243_v4 = vld [vmem:[%s4453_s1 + $0x70] sm:$0xff]   ;;  %v3247_v8 = vld [vmem:[%s4453_s1 + $0x68] sm:$0xff]  }
   0x2   :  { %v3240_v1 = vld [vmem:[%s4453_s1 + $0xf8] sm:$0xff]   ;;  %2817 = vmatprep.subr.bf16.mxu0 %v3239_v0  ;;  %v3244_v5 = vld [vmem:[%s4453_s1 + $0xf0] sm:$0xff]   ;;  %v3248_v9 = vld [vmem:[%s4453_s1 + $0xe8] sm:$0xff]  }
   0x3   :  { %v3241_v2 = vld [vmem:[%s4453_s1 + $0x38] sm:$0xff]   ;;  %2857 = vmatprep.subr.bf16.mxu1 %v3240_v1  ;;  %v3245_v6 = vld [vmem:[%s4453_s1 + $0x30] sm:$0xff]   ;;  %v3249_v10 = vld [vmem:[%s4453_s1 + $0x28] sm:$0xff]  }
   0x4   :  { %v3242_v3 = vld [vmem:[%s4453_s1 + $0xb8] sm:$0xff]   ;;  %2818 = vmatpush3.bf16.msra.mxu0 %v3241_v2  ;;  %v3246_v7 = vld [vmem:[%s4453_s1 + $0xb0] sm:$0xff]   ;;  %v3250_v11 = vld [vmem:[%s4453_s1 + $0xa8] sm:$0xff]  }
   0x5   :  { %2858 = vmatpush3.bf16.msra.mxu1 %v3242_v3  ;;  %2819 = vmatprep.subr.bf16.mxu0 %v3243_v4  ;;  %v3251_v12 = vld [vmem:[%s4453_s1 + $0x60] sm:$0xff]   ;;  %v3255_v16 = vld [vmem:[%s4453_s1 + $0x58] sm:$0xff]   ;;  %v3259_v20 = vld [vmem:[%s4453_s1 + $0x50] sm:$0xff]  }
   0x6   :  { %2859 = vmatprep.subr.bf16.mxu1 %v3244_v5  ;;  %v3252_v13 = vld [vmem:[%s4453_s1 + $0xe0] sm:$0xff]   ;;  %v3256_v17 = vld [vmem:[%s4453_s1 + $0xd8] sm:$0xff]   ;;  %v3260_v21 = vld [vmem:[%s4453_s1 + $0xd0] sm:$0xff]  }
   0x7   :  { %v3253_v14 = vld [vmem:[%s4453_s1 + $0x20] sm:$0xff]   ;;  %v3257_v18 = vld [vmem:[%s4453_s1 + $0x18] sm:$0xff]   ;;  %v3261_v22 = vld [vmem:[%s4453_s1 + $0x10] sm:$0xff]  }
   0x8   :  { %2820 = vmatpush3.bf16.msra.mxu0 %v3245_v6  ;;  %v3254_v15 = vld [vmem:[%s4453_s1 + $0xa0] sm:$0xff]   ;;  %v3258_v19 = vld [vmem:[%s4453_s1 + $0x98] sm:$0xff]   ;;  %v3262_v23 = vld [vmem:[%s4453_s1 + $0x90] sm:$0xff]  }
   0x9   :  { %2860 = vmatpush3.bf16.msra.mxu1 %v3246_v7  ;;  %2821 = vmatprep.subr.bf16.mxu0 %v3247_v8  ;;  %v3263_v24 = vld [vmem:[%s4453_s1 + $0x48] sm:$0xff]   ;;  %v3267_v28 = vld [vmem:[%s4453_s1 + $0x40] sm:$0xff]   ;;  %v3277_v36 = vld [vmem:[%s4453_s1 + $0x178] sm:$0xff]  }
   0xa   :  { %2861 = vmatprep.subr.bf16.mxu1 %v3248_v9  ;;  %v3264_v25 = vld [vmem:[%s4453_s1 + $0xc8] sm:$0xff]   ;;  %v3268_v29 = vld [vmem:[%s4453_s1 + $0xc0] sm:$0xff]   ;;  %v3278_v37 = vld [vmem:[%s4453_s1 + $0x1f8] sm:$0xff]  }
   0xb   :  { %v3265_v26 = vld [vmem:[%s4453_s1 + $0x8] sm:$0xff]   ;;  %v3269_v30 = vld [vmem:[%s4453_s1] sm:$0xff]   ;;  %v3279_v38 = vld [vmem:[%s4453_s1 + $0x138] sm:$0xff]  }
   0xc   :  { %2822 = vmatpush3.bf16.msra.mxu0 %v3249_v10  ;;  %v3266_v27 = vld [vmem:[%s4453_s1 + $0x88] sm:$0xff]   ;;  %v3270_v31 = vld [vmem:[%s4453_s1 + $0x80] sm:$0xff]   ;;  %v3280_v39 = vld [vmem:[%s4453_s1 + $0x1b8] sm:$0xff]  }
   0xd   :  { %2862 = vmatpush3.bf16.msra.mxu1 %v3250_v11  ;;  %2823 = vmatprep.subr.bf16.mxu0 %v3251_v12  ;;  %v3271_v32 = vld [vmem:[%s4454_s0] ss:$84 sps:$4 sm:$0xff]   ;;  %v3273_v33 = vld [vmem:[%s4454_s0 + $0x4] ss:$84 sps:$4 sm:$0xff]   ;;  %v3274_v34 = vld [vmem:[%s4454_s0 + $0x8] ss:$84 sps:$4 sm:$0xff]  }
   0xe   :  { %2863 = vmatprep.subr.bf16.mxu1 %v3252_v13  ;;  %v3276_v35 = vld [vmem:[%s4454_s0 + $0xc] ss:$84 sps:$4 sm:$0xff]   ;;  %1871 = vmatprep.mubr.bf16.mxu0 %v3273_v33  ;;  %v3281_v40 = vld [vmem:[%s4453_s1 + $0x170] sm:$0xff]   ;;  %v3289_v46 = vld [vmem:[%s4454_s0 + $0xa8] ss:$84 sps:$4 sm:$0xff]  }
   0xf   :  { %1936 = vmatprep.mubr.bf16.mxu1 %v3276_v35  ;;  %v3282_v41 = vld [vmem:[%s4453_s1 + $0x1f0] sm:$0xff]   ;;  %v3285_v44 = vld [vmem:[%s4454_s0 + $0xac] ss:$84 sps:$4 sm:$0xff]   ;;  %v3305_v60 = vld [vmem:[%s4453_s1 + $0x158] sm:$0xff]  }
  0x10   :  { %2824 = vmatpush3.bf16.msra.mxu0 %v3253_v14  ;;  %v3283_v42 = vld [vmem:[%s4453_s1 + $0x130] sm:$0xff]   ;;  %v3291_v48 = vld [vmem:[%s4453_s1 + $0x168] sm:$0xff]   ;;  %v3295_v52 = vld [vmem:[%s4453_s1 + $0x160] sm:$0xff]  }
  0x11   :  { %2864 = vmatpush3.bf16.msra.mxu1 %v3254_v15  ;;  %2825 = vmatprep.subr.bf16.mxu0 %v3255_v16  ;;  %v3284_v43 = vld [vmem:[%s4453_s1 + $0x1b0] sm:$0xff]   ;;  %v3292_v49 = vld [vmem:[%s4453_s1 + $0x1e8] sm:$0xff]   ;;  %v3296_v53 = vld [vmem:[%s4453_s1 + $0x1e0] sm:$0xff]  }
  0x12   :  { %2865 = vmatprep.subr.bf16.mxu1 %v3256_v17  ;;  %v3287_v45 = vld [vmem:[%s4454_s0 + $0xb4] ss:$84 sps:$4 sm:$0xff]   ;;  %v3290_v47 = vld [vmem:[%s4454_s0 + $0xb0] ss:$84 sps:$4 sm:$0xff]   ;;  %v3304_v59 = vld [vmem:[%s4454_s0 + $0x158] ss:$84 sps:$4 sm:$0xff]  }
  0x13   :  { %v3293_v50 = vld [vmem:[%s4453_s1 + $0x128] sm:$0xff]   ;;  %v3297_v54 = vld [vmem:[%s4453_s1 + $0x120] sm:$0xff]   ;;  %v3301_v57 = vld [vmem:[%s4454_s0 + $0x15c] ss:$84 sps:$4 sm:$0xff]  }
  0x14   :  { %2826 = vmatpush3.bf16.msra.mxu0 %v3257_v18  ;;  %v3294_v51 = vld [vmem:[%s4453_s1 + $0x1a8] sm:$0xff]   ;;  %v3298_v55 = vld [vmem:[%s4453_s1 + $0x1a0] sm:$0xff]   ;;  %v3306_v61 = vld [vmem:[%s4453_s1 + $0x1d8] sm:$0xff]  }
  0x15   :  { %2866 = vmatpush3.bf16.msra.mxu1 %v3258_v19  ;;  %2827 = vmatprep.subr.bf16.mxu0 %v3259_v20  ;;  %v3299_v56 = vld [vmem:[%s4454_s0 + $0x154] ss:$84 sps:$4 sm:$0xff]   ;;  %v3303_v58 = vld [vmem:[%s4454_s0 + $0x150] ss:$84 sps:$4 sm:$0xff]   ;;  %v3307_v62 = vld [vmem:[%s4453_s1 + $0x118] sm:$0xff]  }
  0x16   :  { %2867 = vmatprep.subr.bf16.mxu1 %v3260_v21  ;;  %v3308_v63 = vld [vmem:[%s4453_s1 + $0x198] sm:$0xff]   ;;  %v3309_v0 = vld [vmem:[%s4453_s1 + $0x150] sm:$0xff]   ;;  %v3319_v8 = vld [vmem:[%s4453_s1 + $0x148] sm:$0xff]  }
  0x17   :  { %v3310_v1 = vld [vmem:[%s4453_s1 + $0x1d0] sm:$0xff]   ;;  %v3315_v5 = vld [vmem:[%s4454_s0 + $0x204] ss:$84 sps:$4 sm:$0xff]   ;;  %v3320_v9 = vld [vmem:[%s4453_s1 + $0x1c8] sm:$0xff]  }
  0x18   :  { %2828 = vmatpush3.bf16.msra.mxu0 %v3261_v22  ;;  %v3311_v2 = vld [vmem:[%s4453_s1 + $0x110] sm:$0xff]   ;;  %v3317_v6 = vld [vmem:[%s4454_s0 + $0x1f8] ss:$84 sps:$4 sm:$0xff]   ;;  %v3323_v12 = vld [vmem:[%s4453_s1 + $0x140] sm:$0xff]  }
  0x19   :  { %2868 = vmatpush3.bf16.msra.mxu1 %v3262_v23  ;;  %2829 = vmatprep.subr.bf16.mxu0 %v3263_v24  ;;  %v3312_v3 = vld [vmem:[%s4453_s1 + $0x190] sm:$0xff]   ;;  %v3321_v10 = vld [vmem:[%s4453_s1 + $0x108] sm:$0xff]   ;;  %v3324_v13 = vld [vmem:[%s4453_s1 + $0x1c0] sm:$0xff]  }
  0x1a   :  { %2869 = vmatprep.subr.bf16.mxu1 %v3264_v25  ;;  %v3313_v4 = vld [vmem:[%s4454_s0 + $0x1fc] ss:$84 sps:$4 sm:$0xff]   ;;  %v3318_v7 = vld [vmem:[%s4454_s0 + $0x200] ss:$84 sps:$4 sm:$0xff]   ;;  %v3322_v11 = vld [vmem:[%s4453_s1 + $0x188] sm:$0xff]  }
  0x1b   :  { %v3325_v14 = vld [vmem:[%s4453_s1 + $0x100] sm:$0xff]   ;;  %v3329_v17 = vld [vmem:[%s4454_s0 + $0x14] ss:$84 sps:$4 sm:$0xff]   ;;  %v3330_v18 = vld [vmem:[%s4454_s0 + $0x18] ss:$84 sps:$4 sm:$0xff]  }
  0x1c   :  { %2830 = vmatpush3.bf16.msra.mxu0 %v3265_v26  ;;  %v3326_v15 = vld [vmem:[%s4453_s1 + $0x180] sm:$0xff]   ;;  %v3332_v19 = vld [vmem:[%s4454_s0 + $0x1c] ss:$84 sps:$4 sm:$0xff]   ;;  %v3348_v33 = vld [vmem:[%s4453_s1 + $0x2e8] sm:$0xff]  }
  0x1d   :  { %2870 = vmatpush3.bf16.msra.mxu1 %v3266_v27  ;;  %2831 = vmatprep.subr.bf16.mxu0 %v3267_v28  ;;  %v3327_v16 = vld [vmem:[%s4454_s0 + $0x10] ss:$84 sps:$4 sm:$0xff]   ;;  %v3333_v20 = vld [vmem:[%s4453_s1 + $0x278] sm:$0xff]   ;;  %v3350_v35 = vld [vmem:[%s4453_s1 + $0x2a8] sm:$0xff]  }
  0x1e   :  { %2871 = vmatprep.subr.bf16.mxu1 %v3268_v29  ;;  %v3334_v21 = vld [vmem:[%s4453_s1 + $0x2f8] sm:$0xff]   ;;  %v3337_v24 = vld [vmem:[%s4453_s1 + $0x270] sm:$0xff]  }
  0x1f   :  { %v3335_v22 = vld [vmem:[%s4453_s1 + $0x238] sm:$0xff]   ;;  %v3338_v25 = vld [vmem:[%s4453_s1 + $0x2f0] sm:$0xff]  }
  0x20   :  { %2832 = vmatpush3.bf16.msra.mxu0 %v3269_v30  ;;  %v3336_v23 = vld [vmem:[%s4453_s1 + $0x2b8] sm:$0xff]   ;;  %v3339_v26 = vld [vmem:[%s4453_s1 + $0x230] sm:$0xff]  }
  0x21   :  { %2872 = vmatpush3.bf16.msra.mxu1 %v3270_v31  ;;  %2897 = vmatprep.subr.bf16.mxu0 %v3277_v36  ;;  %v3340_v27 = vld [vmem:[%s4453_s1 + $0x2b0] sm:$0xff]   ;;  %v3343_v29 = vld [vmem:[%s4454_s0 + $0xc4] ss:$84 sps:$4 sm:$0xff]  }
  0x22   :  { %2937 = vmatprep.subr.bf16.mxu1 %v3278_v37  ;;  %v3341_v28 = vld [vmem:[%s4454_s0 + $0xbc] ss:$84 sps:$4 sm:$0xff]   ;;  %v3345_v30 = vld [vmem:[%s4454_s0 + $0xb8] ss:$84 sps:$4 sm:$0xff]   ;;  %v3346_v31 = vld [vmem:[%s4454_s0 + $0xc0] ss:$84 sps:$4 sm:$0xff]  }
  0x23   :  { %1872 = vmatmul.mubr.bf16.vlgmr.msra.gmra.mxu0 %v3271_v32  ;;  %v3347_v32 = vld [vmem:[%s4453_s1 + $0x268] sm:$0xff]   ;;  %v3351_v36 = vld [vmem:[%s4453_s1 + $0x260] sm:$0xff]  }
  0x24   :  { %1937 = vmatmul.mubr.bf16.vlgmr.msra.gmra.mxu1 %v3274_v34  ;;  %2898 = vmatpush3.bf16.msra.mxu0 %v3279_v38  ;;  %v3349_v34 = vld [vmem:[%s4453_s1 + $0x228] sm:$0xff]   ;;  %v3352_v37 = vld [vmem:[%s4453_s1 + $0x2e0] sm:$0xff]  }
  0x25   :  { %2938 = vmatpush3.bf16.msra.mxu1 %v3280_v39  ;;  %2899 = vmatprep.subr.bf16.mxu0 %v3281_v40  ;;  %v3353_v38 = vld [vmem:[%s4453_s1 + $0x220] sm:$0xff]  }
  0x26   :  { %2939 = vmatprep.subr.bf16.mxu1 %v3282_v41  ;;  %1879 = vmatprep.mubr.bf16.mxu0 %v3285_v44  ;;  %v3354_v39 = vld [vmem:[%s4453_s1 + $0x2a0] sm:$0xff]   ;;  %v3361_v44 = vld [vmem:[%s4453_s1 + $0x258] sm:$0xff]  }
  0x27   :  { %1944 = vmatprep.mubr.bf16.mxu1 %v3287_v45  ;;  %v3355_v40 = vld [vmem:[%s4454_s0 + $0x164] ss:$84 sps:$4 sm:$0xff]   ;;  %v3357_v41 = vld [vmem:[%s4454_s0 + $0x16c] ss:$84 sps:$4 sm:$0xff]  }
  0x28   :  { %2900 = vmatpush3.bf16.msra.mxu0 %v3283_v42  ;;  %v3359_v42 = vld [vmem:[%s4454_s0 + $0x160] ss:$84 sps:$4 sm:$0xff]   ;;  %v3362_v45 = vld [vmem:[%s4453_s1 + $0x2d8] sm:$0xff]  }
  0x29   :  { %2940 = vmatpush3.bf16.msra.mxu1 %v3284_v43  ;;  %2901 = vmatprep.subr.bf16.mxu0 %v3291_v48  ;;  %v3360_v43 = vld [vmem:[%s4454_s0 + $0x168] ss:$84 sps:$4 sm:$0xff]   ;;  %v3365_v48 = vld [vmem:[%s4453_s1 + $0x250] sm:$0xff]  }
  0x2a   :  { %2941 = vmatprep.subr.bf16.mxu1 %v3292_v49  ;;  %v3366_v49 = vld [vmem:[%s4453_s1 + $0x2d0] sm:$0xff]  }
  0x2b   :  { %1880 = vmatmul.mubr.bf16.gmra.mxu0 %v3289_v46  ;;  %v3363_v46 = vld [vmem:[%s4453_s1 + $0x218] sm:$0xff]  }
  0x2c   :  { %1945 = vmatmul.mubr.bf16.gmra.mxu1 %v3290_v47  ;;  %2902 = vmatpush3.bf16.msra.mxu0 %v3293_v50  ;;  %v3364_v47 = vld [vmem:[%s4453_s1 + $0x298] sm:$0xff]   ;;  %v3367_v50 = vld [vmem:[%s4453_s1 + $0x210] sm:$0xff]  }
  0x2d   :  { %2942 = vmatpush3.bf16.msra.mxu1 %v3294_v51  ;;  %2903 = vmatprep.subr.bf16.mxu0 %v3295_v52  ;;  %v3368_v51 = vld [vmem:[%s4453_s1 + $0x290] sm:$0xff]   ;;  %v3369_v52 = vld [vmem:[%s4454_s0 + $0x20c] ss:$84 sps:$4 sm:$0xff]  }
  0x2e   :  { %2943 = vmatprep.subr.bf16.mxu1 %v3296_v53  ;;  %1887 = vmatprep.mubr.bf16.mxu0 %v3299_v56  ;;  %v3371_v53 = vld [vmem:[%s4454_s0 + $0x214] ss:$84 sps:$4 sm:$0xff]  }
  0x2f   :  { %1952 = vmatprep.mubr.bf16.mxu1 %v3301_v57  ;;  %v3375_v56 = vld [vmem:[%s4453_s1 + $0x248] sm:$0xff]  }
  0x30   :  { %2904 = vmatpush3.bf16.msra.mxu0 %v3297_v54  ;;  %v3373_v54 = vld [vmem:[%s4454_s0 + $0x208] ss:$84 sps:$4 sm:$0xff]  }
  0x31   :  { %2944 = vmatpush3.bf16.msra.mxu1 %v3298_v55  ;;  %2905 = vmatprep.subr.bf16.mxu0 %v3305_v60  ;;  %v3374_v55 = vld [vmem:[%s4454_s0 + $0x210] ss:$84 sps:$4 sm:$0xff]   ;;  %v3376_v57 = vld [vmem:[%s4453_s1 + $0x2c8] sm:$0xff]  }
  0x32   :  { %2945 = vmatprep.subr.bf16.mxu1 %v3306_v61  ;;  %v3379_v60 = vld [vmem:[%s4453_s1 + $0x240] sm:$0xff]  }
  0x33   :  { %1888 = vmatmul.mubr.bf16.gmra.mxu0 %v3303_v58  ;;  %v3377_v58 = vld [vmem:[%s4453_s1 + $0x208] sm:$0xff]   ;;  %v3380_v61 = vld [vmem:[%s4453_s1 + $0x2c0] sm:$0xff]  }
  0x34   :  { %1953 = vmatmul.mubr.bf16.gmra.mxu1 %v3304_v59  ;;  %2906 = vmatpush3.bf16.msra.mxu0 %v3307_v62  ;;  %v3378_v59 = vld [vmem:[%s4453_s1 + $0x288] sm:$0xff]   ;;  %v3381_v62 = vld [vmem:[%s4453_s1 + $0x200] sm:$0xff]  }
  0x35   :  { %2946 = vmatpush3.bf16.msra.mxu1 %v3308_v63  ;;  %2907 = vmatprep.subr.bf16.mxu0 %v3309_v0  ;;  %v3382_v63 = vld [vmem:[%s4453_s1 + $0x280] sm:$0xff]  }
  0x36   :  { %2947 = vmatprep.subr.bf16.mxu1 %v3310_v1  ;;  %1895 = vmatprep.mubr.bf16.mxu0 %v3313_v4  ;;  %v3383_v0 = vld [vmem:[%s4454_s0 + $0x20] ss:$84 sps:$4 sm:$0xff]   ;;  %v3385_v1 = vld [vmem:[%s4454_s0 + $0x24] ss:$84 sps:$4 sm:$0xff]  }
  0x37   :  { %1960 = vmatprep.mubr.bf16.mxu1 %v3315_v5  ;;  %v3389_v4 = vld [vmem:[%s4453_s1 + $0x378] sm:$0xff]  }
  0x38   :  { %2908 = vmatpush3.bf16.msra.mxu0 %v3311_v2  ;;  %v3386_v2 = vld [vmem:[%s4454_s0 + $0x28] ss:$84 sps:$4 sm:$0xff]  }
  0x39   :  { %2948 = vmatpush3.bf16.msra.mxu1 %v3312_v3  ;;  %2909 = vmatprep.subr.bf16.mxu0 %v3319_v8  ;;  %v3388_v3 = vld [vmem:[%s4454_s0 + $0x2c] ss:$84 sps:$4 sm:$0xff]   ;;  %v3390_v5 = vld [vmem:[%s4453_s1 + $0x3f8] sm:$0xff]   ;;  %v3393_v8 = vld [vmem:[%s4453_s1 + $0x370] sm:$0xff]  }
  0x3a   :  { %2949 = vmatprep.subr.bf16.mxu1 %v3320_v9  ;;  %v3394_v9 = vld [vmem:[%s4453_s1 + $0x3f0] sm:$0xff]  }
  0x3b   :  { %1896 = vmatmul.mubr.bf16.gmra.mxu0 %v3317_v6  ;;  %v3391_v6 = vld [vmem:[%s4453_s1 + $0x338] sm:$0xff]  }
  0x3c   :  { %1961 = vmatmul.mubr.bf16.gmra.mxu1 %v3318_v7  ;;  %2910 = vmatpush3.bf16.msra.mxu0 %v3321_v10  ;;  %v3392_v7 = vld [vmem:[%s4453_s1 + $0x3b8] sm:$0xff]   ;;  %v3395_v10 = vld [vmem:[%s4453_s1 + $0x330] sm:$0xff]  }
  0x3d   :  { %2950 = vmatpush3.bf16.msra.mxu1 %v3322_v11  ;;  %2911 = vmatprep.subr.bf16.mxu0 %v3323_v12  ;;  %v3396_v11 = vld [vmem:[%s4453_s1 + $0x3b0] sm:$0xff]   ;;  %v3397_v12 = vld [vmem:[%s4454_s0 + $0xcc] ss:$84 sps:$4 sm:$0xff]  }
  0x3e   :  { %2951 = vmatprep.subr.bf16.mxu1 %v3324_v13  ;;  %2001 = vmatprep.mubr.bf16.mxu0 %v3329_v17  ;;  %v3399_v13 = vld [vmem:[%s4454_s0 + $0xd4] ss:$84 sps:$4 sm:$0xff]  }
  0x3f   :  { %2066 = vmatprep.mubr.bf16.mxu1 %v3332_v19  ;;  %v3404_v17 = vld [vmem:[%s4453_s1 + $0x3e8] sm:$0xff]  }
  0x40   :  { %2912 = vmatpush3.bf16.msra.mxu0 %v3325_v14  ;;  %v3401_v14 = vld [vmem:[%s4454_s0 + $0xc8] ss:$84 sps:$4 sm:$0xff]  }
  0x41   :  { %2952 = vmatpush3.bf16.msra.mxu1 %v3326_v15  ;;  %2977 = vmatprep.subr.bf16.mxu0 %v3333_v20  ;;  %v3402_v15 = vld [vmem:[%s4454_s0 + $0xd0] ss:$84 sps:$4 sm:$0xff]   ;;  %v3406_v19 = vld [vmem:[%s4453_s1 + $0x3a8] sm:$0xff]  }
  0x42   :  { %3017 = vmatprep.subr.bf16.mxu1 %v3334_v21  ;;  %v3407_v20 = vld [vmem:[%s4453_s1 + $0x360] sm:$0xff]  }
  0x43   :  { %2002 = vmatmul.mubr.bf16.vlgmr.msra.gmra.mxu0 %v3327_v16  ;;  %v3403_v16 = vld [vmem:[%s4453_s1 + $0x368] sm:$0xff]   ;;  %v3408_v21 = vld [vmem:[%s4453_s1 + $0x3e0] sm:$0xff]  }
  0x44   :  { %2067 = vmatmul.mubr.bf16.vlgmr.msra.gmra.mxu1 %v3330_v18  ;;  %2978 = vmatpush3.bf16.msra.mxu0 %v3335_v22  ;;  %v3405_v18 = vld [vmem:[%s4453_s1 + $0x328] sm:$0xff]   ;;  %v3409_v22 = vld [vmem:[%s4453_s1 + $0x320] sm:$0xff]  }
  0x45   :  { %3018 = vmatpush3.bf16.msra.mxu1 %v3336_v23  ;;  %2979 = vmatprep.subr.bf16.mxu0 %v3337_v24  ;;  %v3410_v23 = vld [vmem:[%s4453_s1 + $0x3a0] sm:$0xff]   ;;  %v3411_v24 = vld [vmem:[%s4454_s0 + $0x174] ss:$84 sps:$4 sm:$0xff]  }
  0x46   :  { %3019 = vmatprep.subr.bf16.mxu1 %v3338_v25  ;;  %2009 = vmatprep.mubr.bf16.mxu0 %v3341_v28  ;;  %v3413_v25 = vld [vmem:[%s4454_s0 + $0x17c] ss:$84 sps:$4 sm:$0xff]  }
  0x47   :  { %2074 = vmatprep.mubr.bf16.mxu1 %v3343_v29  ;;  %v3417_v28 = vld [vmem:[%s4453_s1 + $0x358] sm:$0xff]  }
  0x48   :  { %2980 = vmatpush3.bf16.msra.mxu0 %v3339_v26  ;;  %v3415_v26 = vld [vmem:[%s4454_s0 + $0x170] ss:$84 sps:$4 sm:$0xff]   ;;  %v3418_v29 = vld [vmem:[%s4453_s1 + $0x3d8] sm:$0xff]  }
  0x49   :  { %3020 = vmatpush3.bf16.msra.mxu1 %v3340_v27  ;;  %2981 = vmatprep.subr.bf16.mxu0 %v3347_v32  ;;  %v3416_v27 = vld [vmem:[%s4454_s0 + $0x178] ss:$84 sps:$4 sm:$0xff]   ;;  %v3421_v32 = vld [vmem:[%s4453_s1 + $0x350] sm:$0xff]  }
  0x4a   :  { %3021 = vmatprep.subr.bf16.mxu1 %v3348_v33  ;;  %v3422_v33 = vld [vmem:[%s4453_s1 + $0x3d0] sm:$0xff]  }
  0x4b   :  { %2010 = vmatmul.mubr.bf16.gmra.mxu0 %v3345_v30  ;;  %v3419_v30 = vld [vmem:[%s4453_s1 + $0x318] sm:$0xff]  }
  0x4c   :  { %2075 = vmatmul.mubr.bf16.gmra.mxu1 %v3346_v31  ;;  %2982 = vmatpush3.bf16.msra.mxu0 %v3349_v34  ;;  %v3420_v31 = vld [vmem:[%s4453_s1 + $0x398] sm:$0xff]   ;;  %v3423_v34 = vld [vmem:[%s4453_s1 + $0x310] sm:$0xff]  }
  0x4d   :  { %3022 = vmatpush3.bf16.msra.mxu1 %v3350_v35  ;;  %2983 = vmatprep.subr.bf16.mxu0 %v3351_v36  ;;  %v3424_v35 = vld [vmem:[%s4453_s1 + $0x390] sm:$0xff]  }
  0x4e   :  { %3023 = vmatprep.subr.bf16.mxu1 %v3352_v37  ;;  %2017 = vmatprep.mubr.bf16.mxu0 %v3355_v40  ;;  %v3425_v36 = vld [vmem:[%s4454_s0 + $0x21c] ss:$84 sps:$4 sm:$0xff]   ;;  %v3427_v37 = vld [vmem:[%s4454_s0 + $0x224] ss:$84 sps:$4 sm:$0xff]   ;;  %v3431_v40 = vld [vmem:[%s4453_s1 + $0x348] sm:$0xff]  }
  0x4f   :  { %2082 = vmatprep.mubr.bf16.mxu1 %v3357_v41  ;;  %v3432_v41 = vld [vmem:[%s4453_s1 + $0x3c8] sm:$0xff]  }
  0x50   :  { %2984 = vmatpush3.bf16.msra.mxu0 %v3353_v38  ;;  %v3429_v38 = vld [vmem:[%s4454_s0 + $0x218] ss:$84 sps:$4 sm:$0xff]  }
  0x51   :  { %3024 = vmatpush3.bf16.msra.mxu1 %v3354_v39  ;;  %2985 = vmatprep.subr.bf16.mxu0 %v3361_v44  ;;  %v3430_v39 = vld [vmem:[%s4454_s0 + $0x220] ss:$84 sps:$4 sm:$0xff]  }
  0x52   :  { %3025 = vmatprep.subr.bf16.mxu1 %v3362_v45  ;;  %v3435_v44 = vld [vmem:[%s4453_s1 + $0x340] sm:$0xff]  }
  0x53   :  { %2018 = vmatmul.mubr.bf16.gmra.mxu0 %v3359_v42  ;;  %v3433_v42 = vld [vmem:[%s4453_s1 + $0x308] sm:$0xff]   ;;  %v3436_v45 = vld [vmem:[%s4453_s1 + $0x3c0] sm:$0xff]  }
  0x54   :  { %2083 = vmatmul.mubr.bf16.gmra.mxu1 %v3360_v43  ;;  %2986 = vmatpush3.bf16.msra.mxu0 %v3363_v46  ;;  %v3434_v43 = vld [vmem:[%s4453_s1 + $0x388] sm:$0xff]   ;;  %v3437_v46 = vld [vmem:[%s4453_s1 + $0x300] sm:$0xff]  }
  0x55   :  { %3026 = vmatpush3.bf16.msra.mxu1 %v3364_v47  ;;  %2987 = vmatprep.subr.bf16.mxu0 %v3365_v48  ;;  %v3438_v47 = vld [vmem:[%s4453_s1 + $0x380] sm:$0xff]  }
  0x56   :  { %3027 = vmatprep.subr.bf16.mxu1 %v3366_v49  ;;  %2025 = vmatprep.mubr.bf16.mxu0 %v3369_v52  ;;  %v3439_v48 = vld [vmem:[%s4454_s0 + $0x30] ss:$84 sps:$4 sm:$0xff]   ;;  %v3441_v49 = vld [vmem:[%s4454_s0 + $0x34] ss:$84 sps:$4 sm:$0xff]   ;;  %v3445_v52 = vld [vmem:[%s4453_s1 + $0x478] sm:$0xff]  }
  0x57   :  { %2090 = vmatprep.mubr.bf16.mxu1 %v3371_v53  ;;  %v3446_v53 = vld [vmem:[%s4453_s1 + $0x4f8] sm:$0xff]  }
  0x58   :  { %2988 = vmatpush3.bf16.msra.mxu0 %v3367_v50  ;;  %v3442_v50 = vld [vmem:[%s4454_s0 + $0x38] ss:$84 sps:$4 sm:$0xff]  }
  0x59   :  { %3028 = vmatpush3.bf16.msra.mxu1 %v3368_v51  ;;  %2989 = vmatprep.subr.bf16.mxu0 %v3375_v56  ;;  %v3444_v51 = vld [vmem:[%s4454_s0 + $0x3c] ss:$84 sps:$4 sm:$0xff]  }
  0x5a   :  { %3029 = vmatprep.subr.bf16.mxu1 %v3376_v57  ;;  %v3449_v56 = vld [vmem:[%s4453_s1 + $0x470] sm:$0xff]  }
  0x5b   :  { %2026 = vmatmul.mubr.bf16.gmra.mxu0 %v3373_v54  ;;  %v3447_v54 = vld [vmem:[%s4453_s1 + $0x438] sm:$0xff]   ;;  %v3450_v57 = vld [vmem:[%s4453_s1 + $0x4f0] sm:$0xff]  }
  0x5c   :  { %2091 = vmatmul.mubr.bf16.gmra.mxu1 %v3374_v55  ;;  %2990 = vmatpush3.bf16.msra.mxu0 %v3377_v58  ;;  %v3448_v55 = vld [vmem:[%s4453_s1 + $0x4b8] sm:$0xff]   ;;  %v3451_v58 = vld [vmem:[%s4453_s1 + $0x430] sm:$0xff]  }
  0x5d   :  { %3030 = vmatpush3.bf16.msra.mxu1 %v3378_v59  ;;  %2991 = vmatprep.subr.bf16.mxu0 %v3379_v60  ;;  %v3452_v59 = vld [vmem:[%s4453_s1 + $0x4b0] sm:$0xff]  }
  0x5e   :  { %3031 = vmatprep.subr.bf16.mxu1 %v3380_v61  ;;  %2131 = vmatprep.mubr.bf16.mxu0 %v3385_v1  ;;  %v3453_v60 = vld [vmem:[%s4454_s0 + $0xdc] ss:$84 sps:$4 sm:$0xff]   ;;  %v3455_v61 = vld [vmem:[%s4454_s0 + $0xe4] ss:$84 sps:$4 sm:$0xff]   ;;  %v3460_v1 = vld [vmem:[%s4453_s1 + $0x4e8] sm:$0xff]  }
  0x5f   :  { %2196 = vmatprep.mubr.bf16.mxu1 %v3388_v3  ;;  %v3462_v3 = vld [vmem:[%s4453_s1 + $0x4a8] sm:$0xff]  }
  0x60   :  { %2992 = vmatpush3.bf16.msra.mxu0 %v3381_v62  ;;  %v3457_v62 = vld [vmem:[%s4454_s0 + $0xd8] ss:$84 sps:$4 sm:$0xff]  }
  0x61   :  { %3032 = vmatpush3.bf16.msra.mxu1 %v3382_v63  ;;  %3057 = vmatprep.subr.bf16.mxu0 %v3389_v4  ;;  %v3458_v63 = vld [vmem:[%s4454_s0 + $0xe0] ss:$84 sps:$4 sm:$0xff]  }
  0x62   :  { %3097 = vmatprep.subr.bf16.mxu1 %v3390_v5  ;;  %v3463_v4 = vld [vmem:[%s4453_s1 + $0x460] sm:$0xff]  }
  0x63   :  { %2132 = vmatmul.mubr.bf16.vlgmr.msra.gmra.mxu0 %v3383_v0  ;;  %v3459_v0 = vld [vmem:[%s4453_s1 + $0x468] sm:$0xff]   ;;  %v3464_v5 = vld [vmem:[%s4453_s1 + $0x4e0] sm:$0xff]  }
  0x64   :  { %2197 = vmatmul.mubr.bf16.vlgmr.msra.gmra.mxu1 %v3386_v2  ;;  %3058 = vmatpush3.bf16.msra.mxu0 %v3391_v6  ;;  %v3461_v2 = vld [vmem:[%s4453_s1 + $0x428] sm:$0xff]   ;;  %v3465_v6 = vld [vmem:[%s4453_s1 + $0x420] sm:$0xff]  }
  0x65   :  { %3098 = vmatpush3.bf16.msra.mxu1 %v3392_v7  ;;  %3059 = vmatprep.subr.bf16.mxu0 %v3393_v8  ;;  %v3466_v7 = vld [vmem:[%s4453_s1 + $0x4a0] sm:$0xff]  }
  0x66   :  { %3099 = vmatprep.subr.bf16.mxu1 %v3394_v9  ;;  %2139 = vmatprep.mubr.bf16.mxu0 %v3397_v12  ;;  %v3467_v8 = vld [vmem:[%s4454_s0 + $0x184] ss:$84 sps:$4 sm:$0xff]   ;;  %v3469_v9 = vld [vmem:[%s4454_s0 + $0x18c] ss:$84 sps:$4 sm:$0xff]  }
  0x67   :  { %2204 = vmatprep.mubr.bf16.mxu1 %v3399_v13  ;;  %v3473_v12 = vld [vmem:[%s4453_s1 + $0x458] sm:$0xff]  }
  0x68   :  { %3060 = vmatpush3.bf16.msra.mxu0 %v3395_v10  ;;  %v3471_v10 = vld [vmem:[%s4454_s0 + $0x180] ss:$84 sps:$4 sm:$0xff]   ;;  %v3474_v13 = vld [vmem:[%s4453_s1 + $0x4d8] sm:$0xff]  }
  0x69   :  { %3100 = vmatpush3.bf16.msra.mxu1 %v3396_v11  ;;  %3061 = vmatprep.subr.bf16.mxu0 %v3403_v16  ;;  %v3472_v11 = vld [vmem:[%s4454_s0 + $0x188] ss:$84 sps:$4 sm:$0xff]   ;;  %v3477_v16 = vld [vmem:[%s4453_s1 + $0x450] sm:$0xff]  }
  0x6a   :  { %3101 = vmatprep.subr.bf16.mxu1 %v3404_v17  ;;  %v3478_v17 = vld [vmem:[%s4453_s1 + $0x4d0] sm:$0xff]  }
  0x6b   :  { %2140 = vmatmul.mubr.bf16.gmra.mxu0 %v3401_v14  ;;  %v3475_v14 = vld [vmem:[%s4453_s1 + $0x418] sm:$0xff]  }
  0x6c   :  { %2205 = vmatmul.mubr.bf16.gmra.mxu1 %v3402_v15  ;;  %3062 = vmatpush3.bf16.msra.mxu0 %v3405_v18  ;;  %v3476_v15 = vld [vmem:[%s4453_s1 + $0x498] sm:$0xff]   ;;  %v3479_v18 = vld [vmem:[%s4453_s1 + $0x410] sm:$0xff]  }
  0x6d   :  { %3102 = vmatpush3.bf16.msra.mxu1 %v3406_v19  ;;  %3063 = vmatprep.subr.bf16.mxu0 %v3407_v20  ;;  %v3480_v19 = vld [vmem:[%s4453_s1 + $0x490] sm:$0xff]   ;;  %v3481_v20 = vld [vmem:[%s4454_s0 + $0x22c] ss:$84 sps:$4 sm:$0xff]  }
  0x6e   :  { %3103 = vmatprep.subr.bf16.mxu1 %v3408_v21  ;;  %2147 = vmatprep.mubr.bf16.mxu0 %v3411_v24  ;;  %v3483_v21 = vld [vmem:[%s4454_s0 + $0x234] ss:$84 sps:$4 sm:$0xff]  }
  0x6f   :  { %2212 = vmatprep.mubr.bf16.mxu1 %v3413_v25  ;;  %v3487_v24 = vld [vmem:[%s4453_s1 + $0x448] sm:$0xff]  }
  0x70   :  { %3064 = vmatpush3.bf16.msra.mxu0 %v3409_v22  ;;  %v3485_v22 = vld [vmem:[%s4454_s0 + $0x228] ss:$84 sps:$4 sm:$0xff]  }
  0x71   :  { %3104 = vmatpush3.bf16.msra.mxu1 %v3410_v23  ;;  %3065 = vmatprep.subr.bf16.mxu0 %v3417_v28  ;;  %v3486_v23 = vld [vmem:[%s4454_s0 + $0x230] ss:$84 sps:$4 sm:$0xff]   ;;  %v3488_v25 = vld [vmem:[%s4453_s1 + $0x4c8] sm:$0xff]  }
  0x72   :  { %3105 = vmatprep.subr.bf16.mxu1 %v3418_v29  ;;  %v3491_v28 = vld [vmem:[%s4453_s1 + $0x440] sm:$0xff]  }
  0x73   :  { %2148 = vmatmul.mubr.bf16.gmra.mxu0 %v3415_v26  ;;  %v3489_v26 = vld [vmem:[%s4453_s1 + $0x408] sm:$0xff]   ;;  %v3492_v29 = vld [vmem:[%s4453_s1 + $0x4c0] sm:$0xff]  }
  0x74   :  { %2213 = vmatmul.mubr.bf16.gmra.mxu1 %v3416_v27  ;;  %3066 = vmatpush3.bf16.msra.mxu0 %v3419_v30  ;;  %v3490_v27 = vld [vmem:[%s4453_s1 + $0x488] sm:$0xff]   ;;  %v3493_v30 = vld [vmem:[%s4453_s1 + $0x400] sm:$0xff]  }
  0x75   :  { %3106 = vmatpush3.bf16.msra.mxu1 %v3420_v31  ;;  %3067 = vmatprep.subr.bf16.mxu0 %v3421_v32  ;;  %v3494_v31 = vld [vmem:[%s4453_s1 + $0x480] sm:$0xff]  }
  0x76   :  { %3107 = vmatprep.subr.bf16.mxu1 %v3422_v33  ;;  %2155 = vmatprep.mubr.bf16.mxu0 %v3425_v36  ;;  %v3495_v32 = vld [vmem:[%s4454_s0 + $0x40] ss:$84 sps:$4 sm:$0xff]   ;;  %v3497_v33 = vld [vmem:[%s4454_s0 + $0x44] ss:$84 sps:$4 sm:$0xff]   ;;  %v3501_v36 = vld [vmem:[%s4453_s1 + $0x508] sm:$0xff]  }
  0x77   :  { %2220 = vmatprep.mubr.bf16.mxu1 %v3427_v37  ;;  %v3502_v37 = vld [vmem:[%s4454_s0 + $0xec] ss:$84 sps:$4 sm:$0xff]  }
  0x78   :  { %3068 = vmatpush3.bf16.msra.mxu0 %v3423_v34  ;;  %v3498_v34 = vld [vmem:[%s4454_s0 + $0x48] ss:$84 sps:$4 sm:$0xff]  }
  0x79   :  { %3108 = vmatpush3.bf16.msra.mxu1 %v3424_v35  ;;  %3069 = vmatprep.subr.bf16.mxu0 %v3431_v40  ;;  %v3500_v35 = vld [vmem:[%s4454_s0 + $0x4c] ss:$84 sps:$4 sm:$0xff]   ;;  %v3507_v40 = vld [vmem:[%s4454_s0 + $0xf0] ss:$84 sps:$4 sm:$0xff]  }
  0x7a   :  { %3109 = vmatprep.subr.bf16.mxu1 %v3432_v41  ;;  %v3508_v41 = vld [vmem:[%s4454_s0 + $0x194] ss:$84 sps:$4 sm:$0xff]  }
  0x7b   :  { %2156 = vmatmul.mubr.bf16.gmra.mxu0 %v3429_v38  ;;  %v3504_v38 = vld [vmem:[%s4454_s0 + $0xf4] ss:$84 sps:$4 sm:$0xff]  }
  0x7c   :  { %2221 = vmatmul.mubr.bf16.gmra.mxu1 %v3430_v39  ;;  %3070 = vmatpush3.bf16.msra.mxu0 %v3433_v42  ;;  %v3506_v39 = vld [vmem:[%s4454_s0 + $0xe8] ss:$84 sps:$4 sm:$0xff]   ;;  %v3514_v42 = vld [vmem:[%s4453_s1 + $0x500] sm:$0xff]  }
  0x7d   :  { %3110 = vmatpush3.bf16.msra.mxu1 %v3434_v43  ;;  %3071 = vmatprep.subr.bf16.mxu0 %v3435_v44  ;;  %v3510_v43 = vld [vmem:[%s4454_s0 + $0x19c] ss:$84 sps:$4 sm:$0xff]  }
  0x7e   :  { %3111 = vmatprep.subr.bf16.mxu1 %v3436_v45  ;;  %2261 = vmatprep.mubr.bf16.mxu0 %v3441_v49  ;;  %v3512_v44 = vld [vmem:[%s4454_s0 + $0x190] ss:$84 sps:$4 sm:$0xff]  }
  0x7f   :  { %2326 = vmatprep.mubr.bf16.mxu1 %v3444_v51  ;;  %v3515_v45 = vld [vmem:[%s4454_s0 + $0x23c] ss:$84 sps:$4 sm:$0xff]  }
  0x80   :  { %3072 = vmatpush3.bf16.msra.mxu0 %v3437_v46  ;;  %v3513_v46 = vld [vmem:[%s4454_s0 + $0x198] ss:$84 sps:$4 sm:$0xff]   ;;  %v3521_v49 = vld [vmem:[%s4454_s0 + $0x50] ss:$84 sps:$4 sm:$0xff]  }
  0x81   :  { %3112 = vmatpush3.bf16.msra.mxu1 %v3438_v47  ;;  %3137 = vmatprep.subr.bf16.mxu0 %v3445_v52  ;;  %v3517_v47 = vld [vmem:[%s4454_s0 + $0x244] ss:$84 sps:$4 sm:$0xff]   ;;  %v3522_v52 = vld [vmem:[%s4454_s0 + $0x1a0] ss:$84 sps:$4 sm:$0xff]  }
  0x82   :  { %3177 = vmatprep.subr.bf16.mxu1 %v3446_v53 }
  0x83   :  { %2262 = vmatmul.mubr.bf16.vlgmr.msra.gmra.mxu0 %v3439_v48  ;;  %v3519_v48 = vld [vmem:[%s4454_s0 + $0x238] ss:$84 sps:$4 sm:$0xff]  }
  0x84   :  { %2327 = vmatmul.mubr.bf16.vlgmr.msra.gmra.mxu1 %v3442_v50  ;;  %3138 = vmatpush3.bf16.msra.mxu0 %v3447_v54  ;;  %v3520_v50 = vld [vmem:[%s4454_s0 + $0x240] ss:$84 sps:$4 sm:$0xff]  }
  0x85   :  { %3178 = vmatpush3.bf16.msra.mxu1 %v3448_v55  ;;  %3139 = vmatprep.subr.bf16.mxu0 %v3449_v56  ;;  %v4280_v54 = vld [vmem:[%s4455_s2] ss:$0 sm:$0xff] }
  0x86   :  { %3179 = vmatprep.subr.bf16.mxu1 %v3450_v57  ;;  %2269 = vmatprep.mubr.bf16.mxu0 %v3453_v60 }
  0x87   :  { %2334 = vmatprep.mubr.bf16.mxu1 %v3455_v61 }
  0x88   :  { %3140 = vmatpush3.bf16.msra.mxu0 %v3451_v58 }
  0x89   :  { %3180 = vmatpush3.bf16.msra.mxu1 %v3452_v59  ;;  %3141 = vmatprep.subr.bf16.mxu0 %v3459_v0 }
  0x8a   :  { %3181 = vmatprep.subr.bf16.mxu1 %v3460_v1 }
  0x8b   :  { %2270 = vmatmul.mubr.bf16.gmra.mxu0 %v3457_v62  ;;  %v3523_v62 = vld [vmem:[%s4454_s0 + $0xf8] ss:$84 sps:$4 sm:$0xff]  }
  0x8c   :  { %2335 = vmatmul.mubr.bf16.gmra.mxu1 %v3458_v63  ;;  %3142 = vmatpush3.bf16.msra.mxu0 %v3461_v2 }
  0x8d   :  { %3182 = vmatpush3.bf16.msra.mxu1 %v3462_v3  ;;  %3143 = vmatprep.subr.bf16.mxu0 %v3463_v4  ;;  %v3524_v3 = vld [vmem:[%s4454_s0 + $0x248] ss:$84 sps:$4 sm:$0xff]  }
  0x8e   :  { %3183 = vmatprep.subr.bf16.mxu1 %v3464_v5  ;;  %2277 = vmatprep.mubr.bf16.mxu0 %v3467_v8 }
  0x8f   :  { %2342 = vmatprep.mubr.bf16.mxu1 %v3469_v9 }
  0x90   :  { %3144 = vmatpush3.bf16.msra.mxu0 %v3465_v6 }
  0x91   :  { %3184 = vmatpush3.bf16.msra.mxu1 %v3466_v7  ;;  %3145 = vmatprep.subr.bf16.mxu0 %v3473_v12 }
  0x92   :  { %3185 = vmatprep.subr.bf16.mxu1 %v3474_v13 }
  0x93   :  { %2278 = vmatmul.mubr.bf16.gmra.mxu0 %v3471_v10 }
  0x94   :  { %2343 = vmatmul.mubr.bf16.gmra.mxu1 %v3472_v11  ;;  %3146 = vmatpush3.bf16.msra.mxu0 %v3475_v14 }
  0x95   :  { %3186 = vmatpush3.bf16.msra.mxu1 %v3476_v15  ;;  %3147 = vmatprep.subr.bf16.mxu0 %v3477_v16 }
  0x96   :  { %3187 = vmatprep.subr.bf16.mxu1 %v3478_v17  ;;  %2285 = vmatprep.mubr.bf16.mxu0 %v3481_v20 }
  0x97   :  { %2350 = vmatprep.mubr.bf16.mxu1 %v3483_v21 }
  0x98   :  { %3148 = vmatpush3.bf16.msra.mxu0 %v3479_v18 }
  0x99   :  { %3188 = vmatpush3.bf16.msra.mxu1 %v3480_v19  ;;  %3149 = vmatprep.subr.bf16.mxu0 %v3487_v24 }
  0x9a   :  { %3189 = vmatprep.subr.bf16.mxu1 %v3488_v25 }
  0x9b   :  { %2286 = vmatmul.mubr.bf16.gmra.mxu0 %v3485_v22 }
  0x9c   :  { %2351 = vmatmul.mubr.bf16.gmra.mxu1 %v3486_v23  ;;  %3150 = vmatpush3.bf16.msra.mxu0 %v3489_v26 }
  0x9d   :  { %3190 = vmatpush3.bf16.msra.mxu1 %v3490_v27  ;;  %3151 = vmatprep.subr.bf16.mxu0 %v3491_v28 }
  0x9e   :  { %3191 = vmatprep.subr.bf16.mxu1 %v3492_v29  ;;  %2391 = vmatprep.mubr.bf16.mxu0 %v3497_v33 }
  0x9f   :  { %2456 = vmatprep.mubr.bf16.mxu1 %v3500_v35 }
  0xa0   :  { %3152 = vmatpush3.bf16.msra.mxu0 %v3493_v30 }
  0xa1   :  { %3192 = vmatpush3.bf16.msra.mxu1 %v3494_v31  ;;  %3223 = vmatprep.subr.bf16.mxu0 %v3501_v36 }
  0xa2   :  { %3235 = vmatprep.subr.bf16.mxu1 %v3501_v36 }
  0xa3   :  { %2392 = vmatmul.mubr.bf16.vlgmr.msra.gmra.mxu0 %v3495_v32 }
  0xa4   :  { %2457 = vmatmul.mubr.bf16.vlgmr.msra.gmra.mxu1 %v3498_v34  ;;  %3224 = vmatpush3.bf16.msra.mxu0 %v3501_v36 }
  0xa5   :  { %3237 = vmatpush3.bf16.msra.mxu1 %v3501_v36  ;;  %2399 = vmatprep.mubr.bf16.mxu0 %v3502_v37 }
  0xa6   :  { %2464 = vmatprep.mubr.bf16.mxu1 %v3504_v38  ;;  %3225 = vmatprep.subr.bf16.mxu0 %v3514_v42 }
  0xa7   :  { %3236 = vmatprep.subr.bf16.mxu1 %v3514_v42 }
  0xa8   :  { %3226 = vmatpush3.bf16.msra.mxu0 %v3514_v42 }
  0xa9   :  { %3238 = vmatpush3.bf16.msra.mxu1 %v3514_v42 }
  0xab   :  { %2400 = vmatmul.mubr.bf16.gmra.mxu0 %v3506_v39 }
  0xac   :  { %2407 = vmatprep.mubr.bf16.mxu0 %v3508_v41  ;;  %2465 = vmatmul.mubr.bf16.gmra.mxu1 %v3507_v40 }
  0xad   :  { %2472 = vmatprep.mubr.bf16.mxu1 %v3510_v43 }
  0xb3   :  { %2408 = vmatmul.mubr.bf16.gmra.mxu0 %v3512_v44 }
  0xb4   :  { %2415 = vmatprep.mubr.bf16.mxu0 %v3515_v45  ;;  %2473 = vmatmul.mubr.bf16.gmra.mxu1 %v3513_v46 }
  0xb5   :  { %2480 = vmatprep.mubr.bf16.mxu1 %v3517_v47 }
  0xbb   :  { %2416 = vmatmul.mubr.bf16.gmra.mxu0 %v3519_v48 }
  0xbc   :  { %3227 = vmatprep.mubr.msk.bf16.mxu0 %vm1826_vm0, %v3521_v49  ;;  %2481 = vmatmul.mubr.bf16.gmra.mxu1 %v3520_v50 }
  0xbd   :  { %3231 = vmatprep.mubr.msk.bf16.mxu1 %vm1826_vm0, %v3522_v52 }
  0xc3   :  { %3228 = vmatmul.mubr.msk.bf16.vlgmr.msra.gmra.mxu0 %vm1826_vm0, %v3523_v62 }
  0xc4   :  { %3232 = vmatmul.mubr.msk.bf16.vlgmr.msra.gmra.mxu1 %vm1826_vm0, %v3524_v3 }
  0xe3   :  { %v2833_v51 = vpop.f32.mrf.mxu0 }
  0xe4   :  { %v2873_v53 = vpop.f32.mrf.mxu1 }
  0xe5   :  { %v2834_v55 = vpop.f32.mrf.mxu0 }
  0xe6   :  { %v2835_v56 = vadd.f32 %v2834_v55, %v2833_v51  ;;  %v2874_v57 = vpop.f32.mrf.mxu1 }
  0xe7   :  { %v2875_v58 = vadd.f32 %v2874_v57, %v2873_v53  ;;  %v2836_v59 = vpop.f32.mrf.mxu0 }
  0xe8   :  { %v1874_v60 = vadd.f32 %v2835_v56, %v4280_v54  ;;  %v2876_v61 = vpop.f32.mrf.mxu1 }
  0xe9   :  { %v2837_v63 = vpop.f32.mrf.mxu0 }
  0xea   :  { %v4288_v0 = vadd.f32 %v2875_v58, %v1874_v60  ;;  %v2838_v1 = vadd.f32 %v2837_v63, %v2836_v59  ;;  %v2877_v2 = vpop.f32.mrf.mxu1 }
  0xeb   :  { %v2878_v4 = vadd.f32 %v2877_v2, %v2876_v61  ;;  %v2839_v6 = vpop.f32.mrf.mxu0 }
  0xec   :  { %v1877_v5 = vadd.f32 %v2838_v1, %v4280_v54  ;;  %v2879_v8 = vpop.f32.mrf.mxu1 }
  0xed   :  { %v2840_v9 = vpop.f32.mrf.mxu0 }
  0xee   :  { %v1942_v7 = vadd.f32 %v2878_v4, %v1877_v5  ;;  %v2841_v10 = vadd.f32 %v2840_v9, %v2839_v6  ;;  %v2880_v11 = vpop.f32.mrf.mxu1 }
  0xef   :  { %v2881_v12 = vadd.f32 %v2880_v11, %v2879_v8  ;;  %v2842_v13 = vpop.f32.mrf.mxu0 }
  0xf0   :  { %v1882_v14 = vadd.f32 %v2841_v10, %v4280_v54  ;;  %v2882_v15 = vpop.f32.mrf.mxu1 }
  0xf1   :  { %v2843_v16 = vpop.f32.mrf.mxu0 }
  0xf2   :  { %v1947_v17 = vadd.f32 %v2881_v12, %v1882_v14  ;;  %v2844_v18 = vadd.f32 %v2843_v16, %v2842_v13  ;;  %v2883_v19 = vpop.f32.mrf.mxu1 }
  0xf3   :  { %v2884_v20 = vadd.f32 %v2883_v19, %v2882_v15  ;;  %v2845_v23 = vpop.f32.mrf.mxu0 }
  0xf4   :  { %v1885_v21 = vadd.f32 %v2844_v18, %v4280_v54  ;;  %v2885_v24 = vpop.f32.mrf.mxu1 }
  0xf5   :  { %v2846_v25 = vpop.f32.mrf.mxu0 }
  0xf6   :  { %v4298_v22 = vadd.f32 %v2884_v20, %v1885_v21  ;;  %v2847_v26 = vadd.f32 %v2846_v25, %v2845_v23  ;;  %v2886_v27 = vpop.f32.mrf.mxu1 }
  0xf7   :  { %v2887_v28 = vadd.f32 %v2886_v27, %v2885_v24  ;;  %v2848_v29 = vpop.f32.mrf.mxu0 }
  0xf8   :  { %v1890_v30 = vadd.f32 %v2847_v26, %v4280_v54  ;;  %v2888_v31 = vpop.f32.mrf.mxu1 }
  0xf9   :  { %v2849_v32 = vpop.f32.mrf.mxu0 }
  0xfa   :  { %v1955_v33 = vadd.f32 %v2887_v28, %v1890_v30  ;;  %v2850_v34 = vadd.f32 %v2849_v32, %v2848_v29  ;;  %v2889_v35 = vpop.f32.mrf.mxu1 }
  0xfb   :  { %v2890_v36 = vadd.f32 %v2889_v35, %v2888_v31  ;;  %v2851_v39 = vpop.f32.mrf.mxu0 }
  0xfc   :  { %v1893_v37 = vadd.f32 %v2850_v34, %v4280_v54  ;;  %v2891_v40 = vpop.f32.mrf.mxu1 }
  0xfd   :  { %v2852_v41 = vpop.f32.mrf.mxu0 }
  0xfe   :  { %v4302_v38 = vadd.f32 %v2890_v36, %v1893_v37  ;;  %v2892_v42 = vpop.f32.mrf.mxu1  ;;  %v2853_v43 = vadd.f32 %v2852_v41, %v2851_v39 }
  0xff   :  { %v2893_v44 = vadd.f32 %v2892_v42, %v2891_v40  ;;  %v2854_v45 = vpop.f32.mrf.mxu0 }
 0x100   :  { %v2894_v46 = vpop.f32.mrf.mxu1  ;;  %v1898_v47 = vadd.f32 %v2853_v43, %v4280_v54 }
 0x101   :  { %v2855_v48 = vpop.f32.mrf.mxu0 }
 0x102   :  { %v2895_v49 = vpop.f32.mrf.mxu1  ;;  %v1963_v50 = vadd.f32 %v2893_v44, %v1898_v47  ;;  %v2856_v51 = vadd.f32 %v2855_v48, %v2854_v45 }
 0x103   :  { %v2896_v52 = vadd.f32 %v2895_v49, %v2894_v46  ;;  %v2913_v55 = vpop.f32.mrf.mxu0 }
 0x104   :  { %v1901_v53 = vadd.f32 %v2856_v51, %v4280_v54  ;;  %v2953_v57 = vpop.f32.mrf.mxu1 }
 0x105   :  { %v2914_v58 = vpop.f32.mrf.mxu0 }
 0x106   :  { %v1966_v56 = vadd.f32 %v2896_v52, %v1901_v53  ;;  %v2915_v59 = vadd.f32 %v2914_v58, %v2913_v55  ;;  %v2954_v60 = vpop.f32.mrf.mxu1 }
 0x107   :  { %v2916_v61 = vpop.f32.mrf.mxu0  ;;  %v2955_v63 = vadd.f32 %v2954_v60, %v2953_v57 }
 0x108   :  { %v2004_v62 = vadd.f32 %v2915_v59, %v4288_v0  ;;  %v2956_v1 = vpop.f32.mrf.mxu1 }
 0x109   :  { %v2917_v2 = vpop.f32.mrf.mxu0 }
 0x10a   :  { %v2069_v3 = vadd.f32 %v2955_v63, %v2004_v62  ;;  %v2918_v4 = vadd.f32 %v2917_v2, %v2916_v61  ;;  %v2957_v5 = vpop.f32.mrf.mxu1 }
 0x10b   :  { %v2958_v8 = vadd.f32 %v2957_v5, %v2956_v1  ;;  %v2919_v54 = vpop.f32.mrf.mxu0 }
 0x10c   :  { %v2007_v6 = vadd.f32 %v2918_v4, %v1942_v7  ;;  %v2959_v10 = vpop.f32.mrf.mxu1 }
 0x10d   :  { %v2920_v11 = vpop.f32.mrf.mxu0 }
 0x10e   :  { %v4307_v9 = vadd.f32 %v2958_v8, %v2007_v6  ;;  %v2921_v12 = vadd.f32 %v2920_v11, %v2919_v54  ;;  %v2960_v13 = vpop.f32.mrf.mxu1 }
 0x10f   :  { %v2961_v14 = vadd.f32 %v2960_v13, %v2959_v10  ;;  %v2922_v15 = vpop.f32.mrf.mxu0 }
 0x110   :  { %v2012_v16 = vadd.f32 %v2921_v12, %v1947_v17  ;;  %v2962_v18 = vpop.f32.mrf.mxu1 }
 0x111   :  { %v2923_v0 = vpop.f32.mrf.mxu0 }
 0x112   :  { %v2077_v19 = vadd.f32 %v2961_v14, %v2012_v16  ;;  %v2924_v20 = vadd.f32 %v2923_v0, %v2922_v15  ;;  %v2963_v21 = vpop.f32.mrf.mxu1 }
 0x113   :  { %v2964_v23 = vadd.f32 %v2963_v21, %v2962_v18  ;;  %v2925_v25 = vpop.f32.mrf.mxu0 }
 0x114   :  { %v2015_v24 = vadd.f32 %v2924_v20, %v4298_v22  ;;  %v2965_v26 = vpop.f32.mrf.mxu1 }
 0x115   :  { %v2926_v27 = vpop.f32.mrf.mxu0 }
 0x116   :  { %v4310_v7 = vadd.f32 %v2964_v23, %v2015_v24  ;;  %v2966_v28 = vpop.f32.mrf.mxu1  ;;  %v2927_v29 = vadd.f32 %v2926_v27, %v2925_v25 }
 0x117   :  { %v2967_v30 = vadd.f32 %v2966_v28, %v2965_v26  ;;  %v2928_v31 = vpop.f32.mrf.mxu0 }
 0x118   :  { %v2968_v32 = vpop.f32.mrf.mxu1  ;;  %v2020_v34 = vadd.f32 %v2927_v29, %v1955_v33 }
 0x119   :  { %v2929_v17 = vpop.f32.mrf.mxu0 }
 0x11a   :  { %v2969_v35 = vpop.f32.mrf.mxu1  ;;  %v2085_v36 = vadd.f32 %v2967_v30, %v2020_v34  ;;  %v2930_v37 = vadd.f32 %v2929_v17, %v2928_v31 }
 0x11b   :  { %v2970_v39 = vadd.f32 %v2969_v35, %v2968_v32  ;;  %v2931_v41 = vpop.f32.mrf.mxu0 }
 0x11c   :  { %v2023_v40 = vadd.f32 %v2930_v37, %v4302_v38  ;;  %v2971_v42 = vpop.f32.mrf.mxu1 }
 0x11d   :  { %v2932_v43 = vpop.f32.mrf.mxu0 }
 0x11e   :  { %v2088_v22 = vadd.f32 %v2970_v39, %v2023_v40  ;;  %v2933_v44 = vadd.f32 %v2932_v43, %v2931_v41  ;;  %v2972_v45 = vpop.f32.mrf.mxu1 }
 0x11f   :  { %v2973_v46 = vadd.f32 %v2972_v45, %v2971_v42  ;;  %v2934_v47 = vpop.f32.mrf.mxu0 }
 0x120   :  { %v2028_v48 = vadd.f32 %v2933_v44, %v1963_v50  ;;  %v2974_v49 = vpop.f32.mrf.mxu1 }
 0x121   :  { %v2935_v51 = vpop.f32.mrf.mxu0 }
 0x122   :  { %v4313_v52 = vadd.f32 %v2973_v46, %v2028_v48  ;;  %v2936_v33 = vadd.f32 %v2935_v51, %v2934_v47  ;;  %v2975_v53 = vpop.f32.mrf.mxu1 }
 0x123   :  { %v2976_v55 = vadd.f32 %v2975_v53, %v2974_v49  ;;  %v2993_v38 = vpop.f32.mrf.mxu0 }
 0x124   :  { %v2031_v57 = vadd.f32 %v2936_v33, %v1966_v56  ;;  %v3033_v59 = vpop.f32.mrf.mxu1 }
 0x125   :  { %v2994_v60 = vpop.f32.mrf.mxu0 }
 0x126   :  { %v4315_v58 = vadd.f32 %v2976_v55, %v2031_v57  ;;  %v2995_v61 = vadd.f32 %v2994_v60, %v2993_v38  ;;  %v3034_v62 = vpop.f32.mrf.mxu1 }
 0x127   :  { %v3035_v63 = vadd.f32 %v3034_v62, %v3033_v59  ;;  %v2996_v1 = vpop.f32.mrf.mxu0 }
 0x128   :  { %v2134_v2 = vadd.f32 %v2995_v61, %v2069_v3  ;;  %v3036_v4 = vpop.f32.mrf.mxu1 }
 0x129   :  { %v2997_v50 = vpop.f32.mrf.mxu0 }
 0x12a   :  { %v4317_v5 = vadd.f32 %v3035_v63, %v2134_v2  ;;  %v2998_v6 = vadd.f32 %v2997_v50, %v2996_v1  ;;  %v3037_v8 = vpop.f32.mrf.mxu1 }
 0x12b   :  { %v3038_v54 = vadd.f32 %v3037_v8, %v3036_v4  ;;  %v2999_v11 = vpop.f32.mrf.mxu0 }
 0x12c   :  { %v2137_v10 = vadd.f32 %v2998_v6, %v4307_v9  ;;  %v3039_v12 = vpop.f32.mrf.mxu1 }
 0x12d   :  { %v3000_v13 = vpop.f32.mrf.mxu0 }
 0x12e   :  { %v4320_v56 = vadd.f32 %v3038_v54, %v2137_v10  ;;  %v3040_v14 = vpop.f32.mrf.mxu1  ;;  %v3001_v15 = vadd.f32 %v3000_v13, %v2999_v11 }
 0x12f   :  { %v3041_v16 = vadd.f32 %v3040_v14, %v3039_v12  ;;  %v3002_v18 = vpop.f32.mrf.mxu0 }
 0x130   :  { %v3042_v0 = vpop.f32.mrf.mxu1  ;;  %v2142_v3 = vadd.f32 %v3001_v15, %v2077_v19 }
 0x131   :  { %v3003_v20 = vpop.f32.mrf.mxu0 }
 0x132   :  { %v3043_v21 = vpop.f32.mrf.mxu1  ;;  %v4322_v23 = vadd.f32 %v3041_v16, %v2142_v3  ;;  %v3004_v24 = vadd.f32 %v3003_v20, %v3002_v18 }
 0x133   :  { %v3044_v25 = vadd.f32 %v3043_v21, %v3042_v0  ;;  %v3005_v9 = vpop.f32.mrf.mxu0 }
 0x134   :  { %v2145_v26 = vadd.f32 %v3004_v24, %v4310_v7  ;;  %v3045_v28 = vpop.f32.mrf.mxu1 }
 0x135   :  { %v3006_v29 = vpop.f32.mrf.mxu0 }
 0x136   :  { %v4325_v27 = vadd.f32 %v3044_v25, %v2145_v26  ;;  %v3007_v30 = vadd.f32 %v3006_v29, %v3005_v9  ;;  %v3046_v31 = vpop.f32.mrf.mxu1 }
 0x137   :  { %v3047_v32 = vadd.f32 %v3046_v31, %v3045_v28  ;;  %v3008_v34 = vpop.f32.mrf.mxu0 }
 0x138   :  { %v2150_v17 = vadd.f32 %v3007_v30, %v2085_v36  ;;  %v3048_v35 = vpop.f32.mrf.mxu1 }
 0x139   :  { %v3009_v19 = vpop.f32.mrf.mxu0 }
 0x13a   :  { %v4327_v37 = vadd.f32 %v3047_v32, %v2150_v17  ;;  %v3010_v39 = vadd.f32 %v3009_v19, %v3008_v34  ;;  %v3049_v40 = vpop.f32.mrf.mxu1 }
 0x13b   :  { %v3050_v41 = vadd.f32 %v3049_v40, %v3048_v35  ;;  %v3011_v7 = vpop.f32.mrf.mxu0 }
 0x13c   :  { %v2153_v42 = vadd.f32 %v3010_v39, %v2088_v22  ;;  %v4331_v44 = vpop.f32.mrf.mxu1 }
 0x13d   :  { %v3012_v45 = vpop.f32.mrf.mxu0 }
 0x13e   :  { %v4329_v43 = vadd.f32 %v3050_v41, %v2153_v42  ;;  %v4333_v46 = vpop.f32.mrf.mxu1  ;;  %v3013_v40 = vadd.f32 %v3012_v45, %v3011_v7 }
 0x13f   :  { %v3014_v47 = vpop.f32.mrf.mxu0  ;;  %v3053_v7 = vadd.f32 %v4333_v46, %v4331_v44 }
 0x140   :  { %v4335_v48 = vpop.f32.mrf.mxu1 }
 0x141   :  { %v3015_v36 = vpop.f32.mrf.mxu0 }
 0x142   :  { %v3055_v49 = vpop.f32.mrf.mxu1  ;;  %v3016_v41 = vadd.f32 %v3015_v36, %v3014_v47 }
 0x143   :  { %v3073_v51 = vpop.f32.mrf.mxu0  ;;  %v3056_v45 = vadd.f32 %v3055_v49, %v4335_v48 }
 0x144   :  { %v4337_v33 = vpop.f32.mrf.mxu1 }
 0x145   :  { %v3074_v53 = vpop.f32.mrf.mxu0 }
 0x146   :  { %v4339_v55 = vpop.f32.mrf.mxu1 }
 0x147   :  { %v3076_v22 = vpop.f32.mrf.mxu0 }
 0x148   :  { %v4341_v57 = vpop.f32.mrf.mxu1 }
 0x149   :  { %v3077_v38 = vpop.f32.mrf.mxu0 }
 0x14a   :  { %v4343_v59 = vpop.f32.mrf.mxu1 }
 0x14b   :  { %v3079_v60 = vpop.f32.mrf.mxu0  ;;  %v3118_v44 = vadd.f32 %v4343_v59, %v4341_v57 }
 0x14c   :  { %v4345_v61 = vpop.f32.mrf.mxu1 }
 0x14d   :  { %v3080_v62 = vpop.f32.mrf.mxu0 }
 0x14e   :  { %v4347_v63 = vpop.f32.mrf.mxu1 }
 0x14f   :  { %v3082_v1 = vpop.f32.mrf.mxu0 }
 0x150   :  { %v4349_v2 = vpop.f32.mrf.mxu1 }
 0x151   :  { %v3083_v4 = vpop.f32.mrf.mxu0 }
 0x152   :  { %v4351_v50 = vpop.f32.mrf.mxu1 }
 0x153   :  { %v3085_v6 = vpop.f32.mrf.mxu0 }
 0x154   :  { %v4353_v8 = vpop.f32.mrf.mxu1 }
 0x155   :  { %v3086_v54 = vpop.f32.mrf.mxu0 }
 0x156   :  { %v4355_v10 = vpop.f32.mrf.mxu1  ;;  %v3087_v47 = vadd.f32 %v3086_v54, %v3085_v6 }
 0x157   :  { %v3088_v11 = vpop.f32.mrf.mxu0  ;;  %v3127_v54 = vadd.f32 %v4355_v10, %v4353_v8 }
 0x158   :  { %v4357_v12 = vpop.f32.mrf.mxu1 }
 0x159   :  { %v3089_v13 = vpop.f32.mrf.mxu0 }
 0x15a   :  { %v4359_v14 = vpop.f32.mrf.mxu1 }
 0x15b   :  { %4457 = vst [vmem:[#allocation2_spill] sm:$0xff] %v4359_v14  ;;  %v3091_v15 = vpop.f32.mrf.mxu0 }
 0x15c   :  { %v4361_v16 = vpop.f32.mrf.mxu1 }
 0x15d   :  { %v3092_v18 = vpop.f32.mrf.mxu0 }
 0x15e   :  { %v3132_v0 = vpop.f32.mrf.mxu1  ;;  %v3093_v36 = vadd.f32 %v3092_v18, %v3091_v15 }
 0x15f   :  { %v3094_v3 = vpop.f32.mrf.mxu0  ;;  %v3133_v15 = vadd.f32 %v3132_v0, %v4361_v16 }
 0x160   :  { %v4363_v20 = vpop.f32.mrf.mxu1 }
 0x161   :  { %4458 = vst [vmem:[#allocation3_spill] sm:$0xff] %v4363_v20  ;;  %v3095_v21 = vpop.f32.mrf.mxu0  ;;  %v3081_v20 = vadd.f32 %v3080_v62, %v3079_v60  ;;  %v3121_v60 = vadd.f32 %v4347_v63, %v4345_v61  ;;  %v2280_v62 = vadd.f32 %v3087_v47, %v4327_v37 }
 0x162   :  { %v4365_v24 = vpop.f32.mrf.mxu1  ;;  %v3096_v48 = vadd.f32 %v3095_v21, %v3094_v3 }
 0x163   :  { %4459 = vst [vmem:[#allocation4_spill] sm:$0xff] %v4365_v24  ;;  %v3153_v25 = vpop.f32.mrf.mxu0  ;;  %v3078_v24 = vadd.f32 %v3077_v38, %v3076_v22  ;;  %v2272_v22 = vadd.f32 %v3081_v20, %v4322_v23  ;;  %v3115_v38 = vadd.f32 %v4339_v55, %v4337_v33  ;;  %v3124_v33 = vadd.f32 %v4351_v50, %v4349_v2 }
 0x164   :  { %v4367_v26 = vpop.f32.mrf.mxu1  ;;  %v3090_v55 = vadd.f32 %v3089_v13, %v3088_v11  ;;  %v2345_v21 = vadd.f32 %v3127_v54, %v2280_v62  ;;  %v4469_v13 = vld [vmem:[#allocation2_spill] sm:$0xff] }
 0x165   :  { %4460 = vst [vmem:[#allocation5_spill] sm:$0xff] %v4367_v26  ;;  %v3154_v9 = vpop.f32.mrf.mxu0  ;;  %v3075_v26 = vadd.f32 %v3074_v53, %v3073_v51  ;;  %v2337_v6 = vadd.f32 %v3121_v60, %v2272_v22 }
 0x166   :  { %v4369_v28 = vpop.f32.mrf.mxu1  ;;  %v2283_v11 = vadd.f32 %v3090_v55, %v4329_v43 }
 0x167   :  { %4461 = vst [vmem:[#allocation6_spill] sm:$0xff] %v4369_v28  ;;  %v4371_v29 = vpop.f32.mrf.mxu0  ;;  %v2264_v51 = vadd.f32 %v3075_v26, %v4317_v5 }
 0x168   :  { %4462 = vst [vmem:[#allocation7_spill] sm:$0xff] %v4371_v29  ;;  %v4373_v30 = vpop.f32.mrf.mxu1  ;;  %v4470_v26 = vld [vmem:[#allocation3_spill] sm:$0xff] }
 0x169   :  { %4463 = vst [vmem:[#allocation8_spill] sm:$0xff] %v4373_v30  ;;  %v4375_v31 = vpop.f32.mrf.mxu0  ;;  %v2329_v23 = vadd.f32 %v3115_v38, %v2264_v51 }
 0x16a   :  { %4464 = vst [vmem:[#allocation9_spill] sm:$0xff] %v4375_v31  ;;  %v4377_v32 = vpop.f32.mrf.mxu1  ;;  %v2158_v31 = vadd.f32 %v3013_v40, %v4313_v52 }
 0x16b   :  { %4465 = vst [vmem:[#allocation10_spill] sm:$0xff] %v4377_v32  ;;  %v3159_v34 = vpop.f32.mrf.mxu0  ;;  %v2161_v32 = vadd.f32 %v3016_v41, %v4315_v58  ;;  %v2267_v58 = vadd.f32 %v3078_v24, %v4320_v56 }
 0x16c   :  { %v4379_v17 = vpop.f32.mrf.mxu1  ;;  %v2223_v52 = vadd.f32 %v3053_v7, %v2158_v31  ;;  %v4476_v41 = vld [vmem:[#allocation5_spill] sm:$0xff] }
 0x16d   :  { %4466 = vst [vmem:[#allocation11_spill] sm:$0xff] %v4379_v17  ;;  %v3160_v35 = vpop.f32.mrf.mxu0  ;;  %v3084_v17 = vadd.f32 %v3083_v4, %v3082_v1  ;;  %v2226_v40 = vadd.f32 %v3056_v45, %v2161_v32  ;;  %v3155_v4 = vadd.f32 %v3154_v9, %v3153_v25  ;;  %v3130_v25 = vadd.f32 %v4469_v13, %v4357_v12  ;;  %v4471_v9 = vld [vmem:[#allocation4_spill] sm:$0xff] }
 0x16e   :  { %v4381_v19 = vpop.f32.mrf.mxu1  ;;  %v2288_v56 = vadd.f32 %v3093_v36, %v2223_v52  ;;  %v3161_v1 = vadd.f32 %v3160_v35, %v3159_v34  ;;  %v3136_v8 = vadd.f32 %v4471_v9, %v4470_v26  ;;  %v4477_v43 = vld [vmem:[#allocation6_spill] sm:$0xff] }
 0x16f   :  { %4467 = vst [vmem:[#allocation12_spill] sm:$0xff] %v4381_v19  ;;  %v3162_v39 = vpop.f32.mrf.mxu0  ;;  %v2275_v46 = vadd.f32 %v3084_v17, %v4325_v27  ;;  %v2332_v27 = vadd.f32 %v3118_v44, %v2267_v58  ;;  %v2291_v63 = vadd.f32 %v3096_v48, %v2226_v40  ;;  %v2394_v10 = vadd.f32 %v3155_v4, %v2329_v23  ;;  %v4472_v31 = vld [vmem:[#allocation7_spill] sm:$0xff] }
 0x170   :  { %v4383_v42 = vpop.f32.mrf.mxu1  ;;  %v2353_v24 = vadd.f32 %v3133_v15, %v2288_v56  ;;  %v2402_v2 = vadd.f32 %v3161_v1, %v2337_v6  ;;  %v3195_v7 = vadd.f32 %v4477_v43, %v4476_v41  ;;  %v2348_v22 = vadd.f32 %v3130_v25, %v2283_v11  ;;  %v4479_v55 = vld [vmem:[#allocation8_spill] sm:$0xff] }
 0x171   :  { %v3163_v28 = vpop.f32.mrf.mxu0  ;;  %v2340_v61 = vadd.f32 %v3124_v33, %v2275_v46 }
 0x172   :  { %v4385_v29 = vpop.f32.mrf.mxu1  ;;  %v3164_v37 = vadd.f32 %v3163_v28, %v3162_v39  ;;  %v4473_v28 = vld [vmem:[#allocation9_spill] sm:$0xff]  ;;  %v2356_v39 = vadd.f32 %v3136_v8, %v2291_v63  ;;  %v2459_v62 = vadd.f32 %v3195_v7, %v2394_v10  ;;  %v4480_v4 = vld [vmem:[#allocation10_spill] sm:$0xff] }
 0x173   :  { %4468 = vst [vmem:[#allocation13_spill] sm:$0xff] %v4385_v29  ;;  %v3165_v30 = vpop.f32.mrf.mxu0 }
 0x174   :  { %v4389_v14 = vpop.f32.mrf.mxu1  ;;  %v4474_v32 = vld [vmem:[#allocation11_spill] sm:$0xff]  ;;  %v2405_v45 = vadd.f32 %v3164_v37, %v2340_v61 }
 0x175   :  { %v3166_v19 = vpop.f32.mrf.mxu0 }
 0x176   :  { %v3206_v53 = vpop.f32.mrf.mxu1  ;;  %v3167_v18 = vadd.f32 %v3166_v19, %v3165_v30  ;;  %v3158_v30 = vadd.f32 %v4473_v28, %v4472_v31  ;;  %v4475_v34 = vld [vmem:[#allocation12_spill] sm:$0xff] }
 0x177   :  { %v3168_v29 = vpop.f32.mrf.mxu0  ;;  %v3201_v17 = vadd.f32 %v4475_v34, %v4474_v32  ;;  %v3207_v46 = vadd.f32 %v3206_v53, %v4389_v14 }
 0x178   :  { %v4402_v49 = vpop.f32.mrf.mxu1  ;;  %v2410_v12 = vadd.f32 %v3167_v18, %v2345_v21  ;;  %v2397_v56 = vadd.f32 %v3158_v30, %v2332_v27 }
 0x179   :  { %v3169_v5 = vpop.f32.mrf.mxu0  ;;  %v2467_v40 = vadd.f32 %v3201_v17, %v2402_v2 }
 0x17a   :  { %v3209_v57 = vpop.f32.mrf.mxu1  ;;  %v3170_v51 = vadd.f32 %v3169_v5, %v3168_v29  ;;  %v4478_v38 = vld [vmem:[#allocation13_spill] sm:$0xff]  ;;  %v2475_v6 = vadd.f32 %v3207_v46, %v2410_v12 }
 0x17b   :  { %v3171_v59 = vpop.f32.mrf.mxu0  ;;  %v3204_v44 = vadd.f32 %v4478_v38, %v4383_v42  ;;  %v3210_v63 = vadd.f32 %v3209_v57, %v4402_v49 }
 0x17c   :  { %v3211_v3 = vpop.f32.mrf.mxu1  ;;  %v2413_v15 = vadd.f32 %v3170_v51, %v2348_v22 }
 0x17d   :  { %v3172_v20 = vpop.f32.mrf.mxu0  ;;  %v2470_v54 = vadd.f32 %v3204_v44, %v2405_v45 }
 0x17e   :  { %v3173_v50 = vadd.f32 %v3172_v20, %v3171_v59  ;;  %v3212_v16 = vpop.f32.mrf.mxu1  ;;  %v3198_v59 = vadd.f32 %v4480_v4, %v4479_v55 }
 0x17f   :  { %v3174_v0 = vpop.f32.mrf.mxu0  ;;  %v3213_v19 = vadd.f32 %v3212_v16, %v3211_v3 }
 0x180   :  { %v2418_v35 = vadd.f32 %v3173_v50, %v2353_v24  ;;  %v3214_v47 = vpop.f32.mrf.mxu1  ;;  %v2462_v3 = vadd.f32 %v3198_v59, %v2397_v56  ;;  %v2478_v24 = vadd.f32 %v3210_v63, %v2413_v15 }
 0x181   :  { %v3175_v36 = vpop.f32.mrf.mxu0 }
 0x182   :  { %v3176_v52 = vadd.f32 %v3175_v36, %v3174_v0  ;;  %v2483_v58 = vadd.f32 %v3213_v19, %v2418_v35  ;;  %v3215_v48 = vpop.f32.mrf.mxu1 }
 0x183   :  { %v3229_v60 = vpop.f32.mrf.mxu0  ;;  %v3216_v23 = vadd.f32 %v3215_v48, %v3214_v47 }
 0x184   :  { %v2421_v1 = vadd.f32 %v3176_v52, %v2356_v39  ;;  %v2532_v33 = vadd.f32 %v3229_v60, %v2467_v40  ;;  %v3233_v29 = vpop.f32.mrf.mxu1 }
 0x185   :  { %v2523_v5 = vpop.f32.mrf.mxu0  ;;  %v2548_v14 = vadd.f32 %v3233_v29, %v2483_v58 }
 0x186   :  { %2556 = vst [vmem:[%s4456_s3 + $0x10] sm:$0xff] %v2532_v33  ;;  %v2524_v42 = vadd.f32 %v2523_v5, %v2459_v62  ;;  %v2486_v53 = vadd.f32 %v3216_v23, %v2421_v1  ;;  %v2539_v61 = vpop.f32.mrf.mxu1 }
 0x187   :  { %v3230_v27 = vpop.f32.mrf.mxu0  ;;  %2560 = vst [vmem:[%s4456_s3 + $0x30] sm:$0xff] %v2548_v14  ;;  %v2540_v37 = vadd.f32 %v2539_v61, %v2475_v6 }
 0x188   :  { %2554 = vst [vmem:[%s4456_s3] sm:$0xff] %v2524_v42  ;;  %v2535_v18 = vadd.f32 %v3230_v27, %v2470_v54  ;;  %v3234_v20 = vpop.f32.mrf.mxu1 }
 0x189   :  { %v2526_v21 = vpop.f32.mrf.mxu0  ;;  %2558 = vst [vmem:[%s4456_s3 + $0x20] sm:$0xff] %v2540_v37  ;;  %v2551_v49 = vadd.f32 %v3234_v20, %v2486_v53 }
 0x18a   :  { %2557 = vst [vmem:[%s4456_s3 + $0x18] sm:$0xff] %v2535_v18  ;;  %v2527_v57 = vadd.f32 %v2526_v21, %v2462_v3  ;;  %v2542_v2 = vpop.f32.mrf.mxu1 }
 0x18b   :  { %2561 = vst [vmem:[%s4456_s3 + $0x38] sm:$0xff] %v2551_v49  ;;  %v2543_v50 = vadd.f32 %v2542_v2, %v2478_v24 }
 0x18c   :  { %2555 = vst [vmem:[%s4456_s3 + $0x8] sm:$0xff] %v2527_v57 }
 0x18d   :  { %2559 = vst [vmem:[%s4456_s3 + $0x28] sm:$0xff] %v2543_v50 }

// kernel: _net_forward_impl.262
= control target key start
LH: loop header
LB: loop body
LE: loop exit
PB: predicated region body
PF: predicated region fallthrough
CT: control target
= control target key end

     0   :  { %v326_v0 = vmov 0   ;;  %vm162_vm0 = vcmask 523264   ;;  %s462_s1 = inlined_call_operand.vmem [shape: bf16[192,128], index: 1, kind: input, shape index: {}]   ;;  %s463_s0 = inlined_call_operand.vmem [shape: bf16[64,192], index: 0, kind: input, shape index: {}]   ;;  %s464_s2 = inlined_call_operand.vmem [shape: f32[1,128], index: 2, kind: input, shape index: {}]   ;;  %s465_s3 = inlined_call_operand.vmem [shape: f32[64,128], index: 3, kind: output, shape index: {}]  }
   0x1   :  { %175 = vmatprep.subr.bf16.mxu0 %v326_v0  ;;  %277 = vmatprep.subr.bf16.mxu1 %v326_v0  ;;  %v302_v1 = vld [vmem:[%s462_s1 + $0x38] sm:$0xff]   ;;  %v303_v2 = vld [vmem:[%s462_s1 + $0x30] sm:$0xff]   ;;  %v304_v3 = vld [vmem:[%s462_s1 + $0x28] sm:$0xff]  }
   0x2   :  { %176 = vmatpush1.bf16.msra.mxu0 %v302_v1  ;;  %289 = vmatpush1.bf16.msra.mxu1 %v302_v1  ;;  %v305_v4 = vld [vmem:[%s462_s1 + $0x20] sm:$0xff]   ;;  %v306_v6 = vld [vmem:[%s462_s1 + $0x18] sm:$0xff]   ;;  %v307_v8 = vld [vmem:[%s462_s1 + $0x10] sm:$0xff]  }
   0x3   :  { %177 = vmatprep.subr.bf16.mxu0 %v326_v0  ;;  %278 = vmatprep.subr.bf16.mxu1 %v326_v0  ;;  %v316_v5 = vld [vmem:[%s463_s0 + $0x4] ss:$8 sps:$4 sm:$0xff]   ;;  %v310_v11 = vld [vmem:[%s462_s1 + $0x58] sm:$0xff]   ;;  %v311_v12 = vld [vmem:[%s462_s1 + $0x50] sm:$0xff]  }
   0x4   :  { %v319_v7 = vld [vmem:[%s463_s0 + $0x24] ss:$8 sps:$4 sm:$0xff]   ;;  %273 = vmatprep.mubr.msk.bf16.mxu0 %vm162_vm0, %v316_v5  ;;  %v314_v15 = vld [vmem:[%s463_s0] ss:$8 sps:$4 sm:$0xff]   ;;  %v320_v17 = vld [vmem:[%s463_s0 + $0x14] ss:$8 sps:$4 sm:$0xff]  }
   0x5   :  { %275 = vmatprep.mubr.msk.bf16.mxu1 %vm162_vm0, %v319_v7  ;;  %v308_v9 = vld [vmem:[%s462_s1 + $0x8] sm:$0xff]   ;;  %v309_v10 = vld [vmem:[%s462_s1] sm:$0xff]   ;;  %v322_v18 = vld [vmem:[%s463_s0 + $0x34] ss:$8 sps:$4 sm:$0xff]  }
   0x6   :  { %178 = vmatpush1.bf16.msra.mxu0 %v303_v2  ;;  %290 = vmatpush1.bf16.msra.mxu1 %v303_v2  ;;  %v312_v13 = vld [vmem:[%s462_s1 + $0x48] sm:$0xff]   ;;  %v313_v14 = vld [vmem:[%s462_s1 + $0x40] sm:$0xff]   ;;  %v324_v19 = vld [vmem:[%s463_s0 + $0x10] ss:$8 sps:$4 sm:$0xff]  }
   0x7   :  { %179 = vmatprep.subr.bf16.mxu0 %v326_v0  ;;  %279 = vmatprep.subr.bf16.mxu1 %v326_v0  ;;  %v317_v16 = vld [vmem:[%s463_s0 + $0x20] ss:$8 sps:$4 sm:$0xff]   ;;  %v325_v20 = vld [vmem:[%s463_s0 + $0x30] ss:$8 sps:$4 sm:$0xff]  }
   0x8   :  { %v252_v21 = vld [vmem:[%s464_s2] ss:$0 sm:$0xff] }
   0xa   :  { %180 = vmatpush1.bf16.msra.mxu0 %v304_v3  ;;  %291 = vmatpush1.bf16.msra.mxu1 %v304_v3 }
   0xb   :  { %181 = vmatprep.subr.bf16.mxu0 %v326_v0  ;;  %280 = vmatprep.subr.bf16.mxu1 %v326_v0 }
   0xe   :  { %182 = vmatpush1.bf16.msra.mxu0 %v305_v4  ;;  %292 = vmatpush1.bf16.msra.mxu1 %v305_v4 }
   0xf   :  { %183 = vmatprep.subr.bf16.mxu0 %v326_v0  ;;  %281 = vmatprep.subr.bf16.mxu1 %v326_v0 }
  0x12   :  { %184 = vmatpush1.bf16.msra.mxu0 %v306_v6  ;;  %293 = vmatpush1.bf16.msra.mxu1 %v306_v6 }
  0x13   :  { %185 = vmatprep.subr.bf16.mxu0 %v326_v0  ;;  %282 = vmatprep.subr.bf16.mxu1 %v326_v0 }
  0x16   :  { %186 = vmatpush1.bf16.msra.mxu0 %v307_v8  ;;  %294 = vmatpush1.bf16.msra.mxu1 %v307_v8 }
  0x17   :  { %187 = vmatprep.subr.bf16.mxu0 %v326_v0  ;;  %283 = vmatprep.subr.bf16.mxu1 %v326_v0 }
  0x1a   :  { %188 = vmatpush1.bf16.msra.mxu0 %v308_v9  ;;  %295 = vmatpush1.bf16.msra.mxu1 %v308_v9 }
  0x1b   :  { %189 = vmatprep.subr.bf16.mxu0 %v326_v0  ;;  %284 = vmatprep.subr.bf16.mxu1 %v326_v0 }
  0x1e   :  { %190 = vmatpush1.bf16.msra.mxu0 %v309_v10  ;;  %296 = vmatpush1.bf16.msra.mxu1 %v309_v10 }
  0x1f   :  { %199 = vmatprep.subr.bf16.mxu0 %v326_v0  ;;  %285 = vmatprep.subr.bf16.mxu1 %v326_v0 }
  0x22   :  { %200 = vmatpush2.bf16.msra.mxu0 %v310_v11  ;;  %297 = vmatpush2.bf16.msra.mxu1 %v310_v11 }
  0x23   :  { %201 = vmatprep.subr.bf16.mxu0 %v326_v0  ;;  %286 = vmatprep.subr.bf16.mxu1 %v326_v0 }
  0x26   :  { %202 = vmatpush2.bf16.msra.mxu0 %v311_v12  ;;  %298 = vmatpush2.bf16.msra.mxu1 %v311_v12 }
  0x27   :  { %203 = vmatprep.subr.bf16.mxu0 %v326_v0  ;;  %287 = vmatprep.subr.bf16.mxu1 %v326_v0 }
  0x2a   :  { %204 = vmatpush2.bf16.msra.mxu0 %v312_v13  ;;  %299 = vmatpush2.bf16.msra.mxu1 %v312_v13 }
  0x2b   :  { %205 = vmatprep.subr.bf16.mxu0 %v326_v0  ;;  %288 = vmatprep.subr.bf16.mxu1 %v326_v0 }
  0x2e   :  { %206 = vmatpush2.bf16.msra.mxu0 %v313_v14  ;;  %300 = vmatpush2.bf16.msra.mxu1 %v313_v14 }
  0x31   :  { %208 = vmatmul.mubr.bf16.vlgmr.msra.gmra.mxu0 %v314_v15  ;;  %224 = vmatmul.mubr.bf16.vlgmr.msra.gmra.mxu1 %v317_v16 }
  0x32   :  { %274 = vmatprep.mubr.msk.bf16.mxu0 %vm162_vm0, %v320_v17  ;;  %276 = vmatprep.mubr.msk.bf16.mxu1 %vm162_vm0, %v322_v18 }
  0x39   :  { %216 = vmatmul.mubr.bf16.gmra.mxu0 %v324_v19  ;;  %232 = vmatmul.mubr.bf16.gmra.mxu1 %v325_v20 }
  0xf1   :  { %v209_v22 = vpop.f32.mrf.mxu0  ;;  %v225_v23 = vpop.f32.mrf.mxu1 }
  0xf2   :  { %v210_v24 = vadd.f32 %v252_v21, %v209_v22  ;;  %v226_v25 = vadd.f32 %v252_v21, %v225_v23 }
  0xf3   :  { %v211_v26 = vpop.f32.mrf.mxu0  ;;  %v227_v27 = vpop.f32.mrf.mxu1 }
  0xf4   :  { %240 = vst [vmem:[%s465_s3] sm:$0xff] %v210_v24  ;;  %244 = vst [vmem:[%s465_s3 + $0x20] sm:$0xff] %v226_v25 }
  0xf5   :  { %v212_v28 = vpop.f32.mrf.mxu0  ;;  %v228_v29 = vpop.f32.mrf.mxu1 }
  0xf6   :  { %v213_v30 = vadd.f32 %v252_v21, %v212_v28  ;;  %v229_v31 = vadd.f32 %v252_v21, %v228_v29 }
  0xf7   :  { %v214_v32 = vpop.f32.mrf.mxu0  ;;  %v230_v33 = vpop.f32.mrf.mxu1 }
  0xf8   :  { %241 = vst [vmem:[%s465_s3 + $0x8] sm:$0xff] %v213_v30  ;;  %245 = vst [vmem:[%s465_s3 + $0x28] sm:$0xff] %v229_v31 }
  0xf9   :  { %v217_v34 = vpop.f32.mrf.mxu0  ;;  %v233_v35 = vpop.f32.mrf.mxu1 }
  0xfa   :  { %v218_v36 = vadd.f32 %v252_v21, %v217_v34  ;;  %v234_v37 = vadd.f32 %v252_v21, %v233_v35 }
  0xfb   :  { %v219_v38 = vpop.f32.mrf.mxu0  ;;  %v235_v39 = vpop.f32.mrf.mxu1 }
  0xfc   :  { %242 = vst [vmem:[%s465_s3 + $0x10] sm:$0xff] %v218_v36  ;;  %246 = vst [vmem:[%s465_s3 + $0x30] sm:$0xff] %v234_v37 }
  0xfd   :  { %v220_v40 = vpop.f32.mrf.mxu0  ;;  %v236_v41 = vpop.f32.mrf.mxu1 }
  0xfe   :  { %v221_v42 = vadd.f32 %v252_v21, %v220_v40  ;;  %v237_v43 = vadd.f32 %v252_v21, %v236_v41 }
  0xff   :  { %v222_v44 = vpop.f32.mrf.mxu0  ;;  %v238_v45 = vpop.f32.mrf.mxu1 }
 0x100   :  { %243 = vst [vmem:[%s465_s3 + $0x18] sm:$0xff] %v221_v42  ;;  %247 = vst [vmem:[%s465_s3 + $0x38] sm:$0xff] %v237_v43 }

// kernel: _net_forward_impl.264
= control target key start
LH: loop header
LB: loop body
LE: loop exit
PB: predicated region body
PF: predicated region fallthrough
CT: control target
= control target key end

     0   :  { %vm583_vm0 = vcmask 523264   ;;  %s1445_s1 = inlined_call_operand.vmem [shape: bf16[576,256], index: 1, kind: input, shape index: {}]   ;;  %s1446_s0 = inlined_call_operand.vmem [shape: bf16[64,576], index: 0, kind: input, shape index: {}]   ;;  %s1447_s2 = inlined_call_operand.vmem [shape: f32[1,256], index: 2, kind: input, shape index: {}]   ;;  %s1448_s3 = inlined_call_operand.vmem [shape: f32[64,256], index: 3, kind: output, shape index: {}]  }
   0x1   :  { %v940_v0 = vld [vmem:[%s1445_s1 + $0x74] ss:$8 sps:$4 sm:$0xff]   ;;  %v944_v2 = vld [vmem:[%s1445_s1 + $0x70] ss:$8 sps:$4 sm:$0xff]   ;;  %v946_v4 = vld [vmem:[%s1445_s1 + $0x64] ss:$8 sps:$4 sm:$0xff]  }
   0x2   :  { %v942_v1 = vld [vmem:[%s1445_s1 + $0x174] ss:$8 sps:$4 sm:$0xff]   ;;  %596 = vmatprep.subr.bf16.mxu0 %v940_v0  ;;  %v945_v3 = vld [vmem:[%s1445_s1 + $0x170] ss:$8 sps:$4 sm:$0xff]   ;;  %v948_v5 = vld [vmem:[%s1445_s1 + $0x164] ss:$8 sps:$4 sm:$0xff]  }
   0x3   :  { %669 = vmatprep.subr.bf16.mxu1 %v942_v1  ;;  %597 = vmatpush1.bf16.msra.mxu0 %v944_v2  ;;  %v950_v6 = vld [vmem:[%s1445_s1 + $0x60] ss:$8 sps:$4 sm:$0xff]   ;;  %v952_v8 = vld [vmem:[%s1445_s1 + $0x54] ss:$8 sps:$4 sm:$0xff]   ;;  %v956_v10 = vld [vmem:[%s1445_s1 + $0x50] ss:$8 sps:$4 sm:$0xff]  }
   0x4   :  { %670 = vmatpush1.bf16.msra.mxu1 %v945_v3  ;;  %598 = vmatprep.subr.bf16.mxu0 %v946_v4  ;;  %v951_v7 = vld [vmem:[%s1445_s1 + $0x160] ss:$8 sps:$4 sm:$0xff]   ;;  %v954_v9 = vld [vmem:[%s1445_s1 + $0x154] ss:$8 sps:$4 sm:$0xff]   ;;  %v957_v11 = vld [vmem:[%s1445_s1 + $0x150] ss:$8 sps:$4 sm:$0xff]  }
   0x5   :  { %671 = vmatprep.subr.bf16.mxu1 %v948_v5  ;;  %v958_v12 = vld [vmem:[%s1445_s1 + $0x44] ss:$8 sps:$4 sm:$0xff]   ;;  %v962_v14 = vld [vmem:[%s1445_s1 + $0x40] ss:$8 sps:$4 sm:$0xff]   ;;  %v964_v16 = vld [vmem:[%s1445_s1 + $0x34] ss:$8 sps:$4 sm:$0xff]  }
   0x6   :  { %v960_v13 = vld [vmem:[%s1445_s1 + $0x144] ss:$8 sps:$4 sm:$0xff]   ;;  %v963_v15 = vld [vmem:[%s1445_s1 + $0x140] ss:$8 sps:$4 sm:$0xff]   ;;  %v966_v17 = vld [vmem:[%s1445_s1 + $0x134] ss:$8 sps:$4 sm:$0xff]  }
   0x7   :  { %599 = vmatpush1.bf16.msra.mxu0 %v950_v6  ;;  %v968_v18 = vld [vmem:[%s1445_s1 + $0x30] ss:$8 sps:$4 sm:$0xff]   ;;  %v970_v20 = vld [vmem:[%s1445_s1 + $0x24] ss:$8 sps:$4 sm:$0xff]   ;;  %v974_v22 = vld [vmem:[%s1445_s1 + $0x20] ss:$8 sps:$4 sm:$0xff]  }
   0x8   :  { %672 = vmatpush1.bf16.msra.mxu1 %v951_v7  ;;  %600 = vmatprep.subr.bf16.mxu0 %v952_v8  ;;  %v969_v19 = vld [vmem:[%s1445_s1 + $0x130] ss:$8 sps:$4 sm:$0xff]   ;;  %v972_v21 = vld [vmem:[%s1445_s1 + $0x124] ss:$8 sps:$4 sm:$0xff]   ;;  %v975_v23 = vld [vmem:[%s1445_s1 + $0x120] ss:$8 sps:$4 sm:$0xff]  }
   0x9   :  { %673 = vmatprep.subr.bf16.mxu1 %v954_v9  ;;  %v976_v24 = vld [vmem:[%s1445_s1 + $0x14] ss:$8 sps:$4 sm:$0xff]   ;;  %v980_v26 = vld [vmem:[%s1445_s1 + $0x10] ss:$8 sps:$4 sm:$0xff]   ;;  %v982_v28 = vld [vmem:[%s1445_s1 + $0x4] ss:$8 sps:$4 sm:$0xff]  }
   0xa   :  { %v978_v25 = vld [vmem:[%s1445_s1 + $0x114] ss:$8 sps:$4 sm:$0xff]   ;;  %v981_v27 = vld [vmem:[%s1445_s1 + $0x110] ss:$8 sps:$4 sm:$0xff]   ;;  %v984_v29 = vld [vmem:[%s1445_s1 + $0x104] ss:$8 sps:$4 sm:$0xff]  }
   0xb   :  { %601 = vmatpush1.bf16.msra.mxu0 %v956_v10  ;;  %v986_v30 = vld [vmem:[%s1445_s1] ss:$8 sps:$4 sm:$0xff]   ;;  %v988_v32 = vld [vmem:[%s1445_s1 + $0xf4] ss:$8 sps:$4 sm:$0xff]   ;;  %v992_v34 = vld [vmem:[%s1445_s1 + $0xf0] ss:$8 sps:$4 sm:$0xff]  }
   0xc   :  { %674 = vmatpush1.bf16.msra.mxu1 %v957_v11  ;;  %602 = vmatprep.subr.bf16.mxu0 %v958_v12  ;;  %v987_v31 = vld [vmem:[%s1445_s1 + $0x100] ss:$8 sps:$4 sm:$0xff]   ;;  %v990_v33 = vld [vmem:[%s1445_s1 + $0x1f4] ss:$8 sps:$4 sm:$0xff]   ;;  %v993_v35 = vld [vmem:[%s1445_s1 + $0x1f0] ss:$8 sps:$4 sm:$0xff]  }
   0xd   :  { %675 = vmatprep.subr.bf16.mxu1 %v960_v13  ;;  %v994_v36 = vld [vmem:[%s1445_s1 + $0xe4] ss:$8 sps:$4 sm:$0xff]   ;;  %v998_v38 = vld [vmem:[%s1445_s1 + $0xe0] ss:$8 sps:$4 sm:$0xff]   ;;  %v1000_v40 = vld [vmem:[%s1445_s1 + $0xd4] ss:$8 sps:$4 sm:$0xff]  }
   0xe   :  { %v996_v37 = vld [vmem:[%s1445_s1 + $0x1e4] ss:$8 sps:$4 sm:$0xff]   ;;  %v999_v39 = vld [vmem:[%s1445_s1 + $0x1e0] ss:$8 sps:$4 sm:$0xff]   ;;  %v1002_v41 = vld [vmem:[%s1445_s1 + $0x1d4] ss:$8 sps:$4 sm:$0xff]  }
   0xf   :  { %603 = vmatpush1.bf16.msra.mxu0 %v962_v14  ;;  %v1004_v42 = vld [vmem:[%s1445_s1 + $0xd0] ss:$8 sps:$4 sm:$0xff]   ;;  %v1006_v44 = vld [vmem:[%s1445_s1 + $0xc4] ss:$8 sps:$4 sm:$0xff]   ;;  %v1010_v46 = vld [vmem:[%s1445_s1 + $0xc0] ss:$8 sps:$4 sm:$0xff]  }
  0x10   :  { %676 = vmatpush1.bf16.msra.mxu1 %v963_v15  ;;  %604 = vmatprep.subr.bf16.mxu0 %v964_v16  ;;  %v1005_v43 = vld [vmem:[%s1445_s1 + $0x1d0] ss:$8 sps:$4 sm:$0xff]   ;;  %v1008_v45 = vld [vmem:[%s1445_s1 + $0x1c4] ss:$8 sps:$4 sm:$0xff]   ;;  %v1011_v47 = vld [vmem:[%s1445_s1 + $0x1c0] ss:$8 sps:$4 sm:$0xff]  }
  0x11   :  { %677 = vmatprep.subr.bf16.mxu1 %v966_v17  ;;  %v1012_v48 = vld [vmem:[%s1445_s1 + $0xb4] ss:$8 sps:$4 sm:$0xff]   ;;  %v1038_v49 = vld [vmem:[%s1446_s0 + $0x4] ss:$20 sps:$4 sm:$0xff]   ;;  %v1041_v51 = vld [vmem:[%s1446_s0 + $0xc] ss:$20 sps:$4 sm:$0xff]  }
  0x12   :  { %v1014_v50 = vld [vmem:[%s1445_s1 + $0x1b4] ss:$8 sps:$4 sm:$0xff]   ;;  %628 = vmatprep.mubr.bf16.mxu0 %v1038_v49  ;;  %v1016_v52 = vld [vmem:[%s1445_s1 + $0xb0] ss:$8 sps:$4 sm:$0xff]   ;;  %701 = vmatprep.mubr.bf16.mxu1 %v1041_v51  ;;  %v1018_v54 = vld [vmem:[%s1445_s1 + $0xa4] ss:$8 sps:$4 sm:$0xff]  }
  0x13   :  { %605 = vmatpush1.bf16.msra.mxu0 %v968_v18  ;;  %v1017_v53 = vld [vmem:[%s1445_s1 + $0x1b0] ss:$8 sps:$4 sm:$0xff]   ;;  %v1020_v55 = vld [vmem:[%s1445_s1 + $0x1a4] ss:$8 sps:$4 sm:$0xff]   ;;  %v1022_v56 = vld [vmem:[%s1445_s1 + $0xa0] ss:$8 sps:$4 sm:$0xff]  }
  0x14   :  { %678 = vmatpush1.bf16.msra.mxu1 %v969_v19  ;;  %606 = vmatprep.subr.bf16.mxu0 %v970_v20  ;;  %v1023_v57 = vld [vmem:[%s1445_s1 + $0x1a0] ss:$8 sps:$4 sm:$0xff]   ;;  %v1024_v58 = vld [vmem:[%s1445_s1 + $0x94] ss:$8 sps:$4 sm:$0xff]   ;;  %v1028_v60 = vld [vmem:[%s1445_s1 + $0x90] ss:$8 sps:$4 sm:$0xff]  }
  0x15   :  { %679 = vmatprep.subr.bf16.mxu1 %v972_v21  ;;  %v1026_v59 = vld [vmem:[%s1445_s1 + $0x194] ss:$8 sps:$4 sm:$0xff]   ;;  %v1029_v61 = vld [vmem:[%s1445_s1 + $0x190] ss:$8 sps:$4 sm:$0xff]   ;;  %v1030_v62 = vld [vmem:[%s1445_s1 + $0x84] ss:$8 sps:$4 sm:$0xff]  }
  0x16   :  { %v1032_v63 = vld [vmem:[%s1445_s1 + $0x184] ss:$8 sps:$4 sm:$0xff]   ;;  %v1034_v0 = vld [vmem:[%s1445_s1 + $0x80] ss:$8 sps:$4 sm:$0xff]   ;;  %v1044_v2 = vld [vmem:[%s1445_s1 + $0x234] ss:$8 sps:$4 sm:$0xff]  }
  0x17   :  { %607 = vmatpush1.bf16.msra.mxu0 %v974_v22  ;;  %v1035_v1 = vld [vmem:[%s1445_s1 + $0x180] ss:$8 sps:$4 sm:$0xff]   ;;  %v1042_v5 = vld [vmem:[%s1445_s1 + $0x230] ss:$8 sps:$4 sm:$0xff]   ;;  %v1053_v8 = vld [vmem:[%s1445_s1 + $0x224] ss:$8 sps:$4 sm:$0xff]  }
  0x18   :  { %680 = vmatpush1.bf16.msra.mxu1 %v975_v23  ;;  %608 = vmatprep.subr.bf16.mxu0 %v976_v24  ;;  %v1036_v3 = vld [vmem:[%s1446_s0] ss:$20 sps:$4 sm:$0xff]   ;;  %v1039_v4 = vld [vmem:[%s1446_s0 + $0x8] ss:$20 sps:$4 sm:$0xff]   ;;  %v1050_v12 = vld [vmem:[%s1446_s0 + $0x30] ss:$20 sps:$4 sm:$0xff]  }
  0x19   :  { %681 = vmatprep.subr.bf16.mxu1 %v978_v25  ;;  %v1045_v6 = vld [vmem:[%s1446_s0 + $0x2c] ss:$20 sps:$4 sm:$0xff]   ;;  %v1047_v7 = vld [vmem:[%s1446_s0 + $0x34] ss:$20 sps:$4 sm:$0xff]   ;;  %v1056_v14 = vld [vmem:[%s1446_s0 + $0x5c] ss:$20 sps:$4 sm:$0xff]  }
  0x1a   :  { %v1051_v9 = vld [vmem:[%s1445_s1 + $0x220] ss:$8 sps:$4 sm:$0xff]   ;;  %v1062_v10 = vld [vmem:[%s1445_s1 + $0x214] ss:$8 sps:$4 sm:$0xff]   ;;  %v1060_v15 = vld [vmem:[%s1445_s1 + $0x210] ss:$8 sps:$4 sm:$0xff]  }
  0x1b   :  { %609 = vmatpush1.bf16.msra.mxu0 %v980_v26  ;;  %v1049_v11 = vld [vmem:[%s1446_s0 + $0x28] ss:$20 sps:$4 sm:$0xff]   ;;  %v1071_v16 = vld [vmem:[%s1445_s1 + $0x204] ss:$8 sps:$4 sm:$0xff]   ;;  %v1068_v23 = vld [vmem:[%s1446_s0 + $0x80] ss:$20 sps:$4 sm:$0xff]  }
  0x1c   :  { %682 = vmatpush1.bf16.msra.mxu1 %v981_v27  ;;  %610 = vmatprep.subr.bf16.mxu0 %v982_v28  ;;  %v1054_v13 = vld [vmem:[%s1446_s0 + $0x54] ss:$20 sps:$4 sm:$0xff]   ;;  %v1058_v18 = vld [vmem:[%s1446_s0 + $0x50] ss:$20 sps:$4 sm:$0xff]   ;;  %v1059_v19 = vld [vmem:[%s1446_s0 + $0x58] ss:$20 sps:$4 sm:$0xff]  }
  0x1d   :  { %683 = vmatprep.subr.bf16.mxu1 %v984_v29  ;;  %v1069_v17 = vld [vmem:[%s1445_s1 + $0x200] ss:$8 sps:$4 sm:$0xff]   ;;  %v1063_v20 = vld [vmem:[%s1446_s0 + $0x7c] ss:$20 sps:$4 sm:$0xff]   ;;  %v1065_v21 = vld [vmem:[%s1446_s0 + $0x84] ss:$20 sps:$4 sm:$0xff]  }
  0x1e   :  { %v1067_v22 = vld [vmem:[%s1446_s0 + $0x78] ss:$20 sps:$4 sm:$0xff]   ;;  %v1076_v24 = vmov 0   ;;  %v1072_v25 = vld [vmem:[%s1446_s0 + $0x10] ss:$20 sps:$4 sm:$0xff]  }
  0x1f   :  { %611 = vmatpush1.bf16.msra.mxu0 %v986_v30  ;;  %v1073_v26 = vld [vmem:[%s1446_s0 + $0x60] ss:$20 sps:$4 sm:$0xff]   ;;  %v1074_v27 = vld [vmem:[%s1446_s0 + $0x38] ss:$20 sps:$4 sm:$0xff]   ;;  %v1075_v28 = vld [vmem:[%s1446_s0 + $0x88] ss:$20 sps:$4 sm:$0xff]  }
  0x20   :  { %684 = vmatpush1.bf16.msra.mxu1 %v987_v31  ;;  %612 = vmatprep.subr.bf16.mxu0 %v988_v32 }
  0x21   :  { %685 = vmatprep.subr.bf16.mxu1 %v990_v33 }
  0x23   :  { %613 = vmatpush2.bf16.msra.mxu0 %v992_v34 }
  0x24   :  { %686 = vmatpush2.bf16.msra.mxu1 %v993_v35  ;;  %614 = vmatprep.subr.bf16.mxu0 %v994_v36 }
  0x25   :  { %687 = vmatprep.subr.bf16.mxu1 %v996_v37 }
  0x27   :  { %615 = vmatpush2.bf16.msra.mxu0 %v998_v38 }
  0x28   :  { %688 = vmatpush2.bf16.msra.mxu1 %v999_v39  ;;  %616 = vmatprep.subr.bf16.mxu0 %v1000_v40 }
  0x29   :  { %689 = vmatprep.subr.bf16.mxu1 %v1002_v41  ;;  %v113_v41 = vlaneseq }
  0x2b   :  { %617 = vmatpush2.bf16.msra.mxu0 %v1004_v42 }
  0x2c   :  { %690 = vmatpush2.bf16.msra.mxu1 %v1005_v43  ;;  %618 = vmatprep.subr.bf16.mxu0 %v1006_v44 }
  0x2d   :  { %691 = vmatprep.subr.bf16.mxu1 %v1008_v45 }
  0x2f   :  { %619 = vmatpush2.bf16.msra.mxu0 %v1010_v46  ;;  %v114_v46 = vshrl.u32 %v113_v41, 7 }
  0x30   :  { %692 = vmatpush2.bf16.msra.mxu1 %v1011_v47  ;;  %620 = vmatprep.subr.bf16.mxu0 %v1012_v48 }
  0x31   :  { %693 = vmatprep.subr.bf16.mxu1 %v1014_v50  ;;  %v115_v51 = vsub.s32 0, %v114_v46 }
  0x33   :  { %621 = vmatpush2.bf16.msra.mxu0 %v1016_v52  ;;  %v111_v52 = vld [vmem:[%s1447_s2] sm:$0x3] }
  0x34   :  { %694 = vmatpush2.bf16.msra.mxu1 %v1017_v53  ;;  %622 = vmatprep.subr.bf16.mxu0 %v1018_v54  ;;  %v119_v53 = vsub.s32 1, %v114_v46 }
  0x35   :  { %695 = vmatprep.subr.bf16.mxu1 %v1020_v55 }
  0x37   :  { %623 = vmatpush2.bf16.msra.mxu0 %v1022_v56 }
  0x38   :  { %696 = vmatpush2.bf16.msra.mxu1 %v1023_v57  ;;  %624 = vmatprep.subr.bf16.mxu0 %v1024_v58  ;;  %v116_v58 = vrot.slane %v111_v52, %v115_v51 }
  0x39   :  { %697 = vmatprep.subr.bf16.mxu1 %v1026_v59  ;;  %v120_v59 = vrot.slane %v111_v52, %v119_v53 }
  0x3b   :  { %625 = vmatpush2.bf16.msra.mxu0 %v1028_v60 }
  0x3c   :  { %698 = vmatpush2.bf16.msra.mxu1 %v1029_v61  ;;  %626 = vmatprep.subr.bf16.mxu0 %v1030_v62 }
  0x3d   :  { %699 = vmatprep.subr.bf16.mxu1 %v1032_v63 }
  0x3f   :  { %627 = vmatpush2.bf16.msra.mxu0 %v1034_v0 }
  0x40   :  { %700 = vmatpush2.bf16.msra.mxu1 %v1035_v1  ;;  %750 = vmatprep.subr.bf16.mxu0 %v1044_v2 }
  0x41   :  { %931 = vmatprep.subr.bf16.mxu1 %v1044_v2 }
  0x42   :  { %629 = vmatmul.mubr.bf16.vlgmr.msra.gmra.mxu0 %v1036_v3 }
  0x43   :  { %702 = vmatmul.mubr.bf16.vlgmr.msra.gmra.mxu1 %v1039_v4  ;;  %751 = vmatpush1.bf16.msra.mxu0 %v1042_v5 }
  0x44   :  { %935 = vmatpush1.bf16.msra.mxu1 %v1042_v5  ;;  %638 = vmatprep.mubr.bf16.mxu0 %v1045_v6 }
  0x45   :  { %711 = vmatprep.mubr.bf16.mxu1 %v1047_v7  ;;  %752 = vmatprep.subr.bf16.mxu0 %v1053_v8 }
  0x46   :  { %932 = vmatprep.subr.bf16.mxu1 %v1053_v8 }
  0x47   :  { %753 = vmatpush1.bf16.msra.mxu0 %v1051_v9 }
  0x48   :  { %936 = vmatpush1.bf16.msra.mxu1 %v1051_v9  ;;  %754 = vmatprep.subr.bf16.mxu0 %v1062_v10 }
  0x49   :  { %933 = vmatprep.subr.bf16.mxu1 %v1062_v10 }
  0x4a   :  { %639 = vmatmul.mubr.bf16.gmra.mxu0 %v1049_v11 }
  0x4b   :  { %712 = vmatmul.mubr.bf16.gmra.mxu1 %v1050_v12  ;;  %648 = vmatprep.mubr.bf16.mxu0 %v1054_v13 }
  0x4c   :  { %721 = vmatprep.mubr.bf16.mxu1 %v1056_v14  ;;  %755 = vmatpush1.bf16.msra.mxu0 %v1060_v15 }
  0x4d   :  { %937 = vmatpush1.bf16.msra.mxu1 %v1060_v15  ;;  %756 = vmatprep.subr.bf16.mxu0 %v1071_v16 }
  0x4e   :  { %934 = vmatprep.subr.bf16.mxu1 %v1071_v16 }
  0x50   :  { %757 = vmatpush1.bf16.msra.mxu0 %v1069_v17 }
  0x51   :  { %938 = vmatpush1.bf16.msra.mxu1 %v1069_v17 }
  0x52   :  { %649 = vmatmul.mubr.bf16.gmra.mxu0 %v1058_v18 }
  0x53   :  { %722 = vmatmul.mubr.bf16.gmra.mxu1 %v1059_v19  ;;  %658 = vmatprep.mubr.bf16.mxu0 %v1063_v20 }
  0x54   :  { %731 = vmatprep.mubr.bf16.mxu1 %v1065_v21 }
  0x5a   :  { %659 = vmatmul.mubr.bf16.gmra.mxu0 %v1067_v22 }
  0x5b   :  { %732 = vmatmul.mubr.bf16.gmra.mxu1 %v1068_v23  ;;  %774 = vmatprep.mubr.bf16.mxu0 %v1076_v24 }
  0x5c   :  { %794 = vmatprep.mubr.bf16.mxu1 %v1076_v24 }
  0x62   :  { %927 = vmatmul.mubr.msk.bf16.vlgmr.msra.gmra.mxu0 %vm583_vm0, %v1072_v25 }
  0x63   :  { %929 = vmatmul.mubr.msk.bf16.vlgmr.msra.gmra.mxu1 %vm583_vm0, %v1073_v26  ;;  %784 = vmatprep.mubr.bf16.mxu0 %v1076_v24 }
  0x64   :  { %804 = vmatprep.mubr.bf16.mxu1 %v1076_v24 }
  0x6a   :  { %928 = vmatmul.mubr.msk.bf16.gmra.mxu0 %vm583_vm0, %v1074_v27 }
  0x6b   :  { %930 = vmatmul.mubr.msk.bf16.gmra.mxu1 %vm583_vm0, %v1075_v28 }
 0x102   :  { %v630_v29 = vpop.f32.mrf.mxu0 }
 0x103   :  { %v703_v30 = vpop.f32.mrf.mxu1  ;;  %v631_v0 = vadd.f32 %v630_v29, %v116_v58 }
 0x104   :  { %v632_v31 = vpop.f32.mrf.mxu0 }
 0x105   :  { %v705_v32 = vpop.f32.mrf.mxu1  ;;  %v633_v2 = vadd.f32 %v632_v31, %v120_v59  ;;  %v704_v9 = vadd.f32 %v703_v30, %v631_v0 }
 0x106   :  { %v634_v33 = vpop.f32.mrf.mxu0 }
 0x107   :  { %v707_v34 = vpop.f32.mrf.mxu1  ;;  %v635_v6 = vadd.f32 %v634_v33, %v116_v58  ;;  %v706_v12 = vadd.f32 %v705_v32, %v633_v2 }
 0x108   :  { %v636_v35 = vpop.f32.mrf.mxu0 }
 0x109   :  { %v709_v36 = vpop.f32.mrf.mxu1  ;;  %v637_v13 = vadd.f32 %v636_v35, %v120_v59  ;;  %v708_v20 = vadd.f32 %v707_v34, %v635_v6 }
 0x10a   :  { %v640_v37 = vpop.f32.mrf.mxu0 }
 0x10b   :  { %v1373_v38 = vpop.f32.mrf.mxu1  ;;  %v641_v21 = vadd.f32 %v640_v37, %v116_v58  ;;  %v710_v28 = vadd.f32 %v709_v36, %v637_v13 }
 0x10c   :  { %v642_v39 = vpop.f32.mrf.mxu0 }
 0x10d   :  { %v1375_v40 = vpop.f32.mrf.mxu1  ;;  %v643_v29 = vadd.f32 %v642_v39, %v120_v59  ;;  %v714_v37 = vadd.f32 %v1373_v38, %v641_v21 }
 0x10e   :  { %v1377_v42 = vpop.f32.mrf.mxu0 }
 0x10f   :  { %v1379_v43 = vpop.f32.mrf.mxu1  ;;  %v645_v41 = vadd.f32 %v1377_v42, %v116_v58 }
 0x110   :  { %v1381_v44 = vpop.f32.mrf.mxu0 }
 0x111   :  { %v1383_v45 = vpop.f32.mrf.mxu1  ;;  %v647_v38 = vadd.f32 %v1381_v44, %v120_v59 }
 0x112   :  { %v650_v47 = vpop.f32.mrf.mxu0 }
 0x113   :  { %v723_v48 = vpop.f32.mrf.mxu1  ;;  %v651_v1 = vadd.f32 %v650_v47, %v116_v58 }
 0x114   :  { %v652_v49 = vpop.f32.mrf.mxu0 }
 0x115   :  { %v725_v50 = vpop.f32.mrf.mxu1  ;;  %v653_v5 = vadd.f32 %v652_v49, %v120_v59  ;;  %v724_v10 = vadd.f32 %v723_v48, %v651_v1 }
 0x116   :  { %v654_v54 = vpop.f32.mrf.mxu0 }
 0x117   :  { %v727_v55 = vpop.f32.mrf.mxu1  ;;  %v655_v11 = vadd.f32 %v654_v54, %v116_v58  ;;  %v726_v16 = vadd.f32 %v725_v50, %v653_v5  ;;  %v716_v50 = vadd.f32 %v1375_v40, %v643_v29  ;;  %v718_v40 = vadd.f32 %v1379_v43, %v645_v41 }
 0x118   :  { %v656_v56 = vpop.f32.mrf.mxu0 }
 0x119   :  { %v729_v57 = vpop.f32.mrf.mxu1  ;;  %v657_v17 = vadd.f32 %v656_v56, %v120_v59  ;;  %v728_v24 = vadd.f32 %v727_v55, %v655_v11 }
 0x11a   :  { %v660_v60 = vpop.f32.mrf.mxu0 }
 0x11b   :  { %v733_v61 = vpop.f32.mrf.mxu1  ;;  %v661_v25 = vadd.f32 %v660_v60, %v116_v58  ;;  %v730_v32 = vadd.f32 %v729_v57, %v657_v17 }
 0x11c   :  { %v662_v62 = vpop.f32.mrf.mxu0 }
 0x11d   :  { %v735_v63 = vpop.f32.mrf.mxu1  ;;  %v663_v33 = vadd.f32 %v662_v62, %v120_v59  ;;  %v734_v46 = vadd.f32 %v733_v61, %v661_v25  ;;  %v720_v62 = vadd.f32 %v1383_v45, %v647_v38 }
 0x11e   :  { %v664_v3 = vpop.f32.mrf.mxu0 }
 0x11f   :  { %v737_v4 = vpop.f32.mrf.mxu1  ;;  %v665_v47 = vadd.f32 %v664_v3, %v116_v58  ;;  %v736_v52 = vadd.f32 %v735_v63, %v663_v33 }
 0x120   :  { %v666_v7 = vpop.f32.mrf.mxu0 }
 0x121   :  { %v1388_v8 = vpop.f32.mrf.mxu1  ;;  %v667_v53 = vadd.f32 %v666_v7, %v120_v59  ;;  %v738_v58 = vadd.f32 %v737_v4, %v665_v47 }
 0x122   :  { %v776_v14 = vpop.f32.mrf.mxu0 }
 0x123   :  { %v796_v15 = vpop.f32.mrf.mxu1  ;;  %v777_v18 = vadd.f32 %v776_v14, %v704_v9  ;;  %v740_v63 = vadd.f32 %v1388_v8, %v667_v53 }
 0x124   :  { %v797_v19 = vadd.f32 %v796_v15, %v724_v10  ;;  %v778_v22 = vpop.f32.mrf.mxu0 }
 0x125   :  { %v798_v23 = vpop.f32.mrf.mxu1  ;;  %815 = vst [vmem:[%s1448_s3] sm:$0xff] %v777_v18  ;;  %v779_v26 = vadd.f32 %v778_v22, %v706_v12 }
 0x126   :  { %823 = vst [vmem:[%s1448_s3 + $0x40] sm:$0xff] %v797_v19  ;;  %v799_v27 = vadd.f32 %v798_v23, %v726_v16  ;;  %v780_v30 = vpop.f32.mrf.mxu0 }
 0x127   :  { %v800_v31 = vpop.f32.mrf.mxu1  ;;  %816 = vst [vmem:[%s1448_s3 + $0x8] sm:$0xff] %v779_v26  ;;  %v781_v34 = vadd.f32 %v780_v30, %v708_v20 }
 0x128   :  { %824 = vst [vmem:[%s1448_s3 + $0x48] sm:$0xff] %v799_v27  ;;  %v801_v35 = vadd.f32 %v800_v31, %v728_v24  ;;  %v782_v36 = vpop.f32.mrf.mxu0 }
 0x129   :  { %v802_v39 = vpop.f32.mrf.mxu1  ;;  %817 = vst [vmem:[%s1448_s3 + $0x10] sm:$0xff] %v781_v34  ;;  %v783_v48 = vadd.f32 %v782_v36, %v710_v28 }
 0x12a   :  { %825 = vst [vmem:[%s1448_s3 + $0x50] sm:$0xff] %v801_v35  ;;  %v803_v49 = vadd.f32 %v802_v39, %v730_v32  ;;  %v786_v51 = vpop.f32.mrf.mxu0 }
 0x12b   :  { %v806_v42 = vpop.f32.mrf.mxu1  ;;  %818 = vst [vmem:[%s1448_s3 + $0x18] sm:$0xff] %v783_v48  ;;  %v787_v54 = vadd.f32 %v786_v51, %v714_v37 }
 0x12c   :  { %826 = vst [vmem:[%s1448_s3 + $0x58] sm:$0xff] %v803_v49  ;;  %v807_v55 = vadd.f32 %v806_v42, %v734_v46  ;;  %v788_v56 = vpop.f32.mrf.mxu0 }
 0x12d   :  { %v808_v57 = vpop.f32.mrf.mxu1  ;;  %819 = vst [vmem:[%s1448_s3 + $0x20] sm:$0xff] %v787_v54  ;;  %v789_v44 = vadd.f32 %v788_v56, %v716_v50 }
 0x12e   :  { %827 = vst [vmem:[%s1448_s3 + $0x60] sm:$0xff] %v807_v55  ;;  %v809_v59 = vadd.f32 %v808_v57, %v736_v52  ;;  %v790_v60 = vpop.f32.mrf.mxu0 }
 0x12f   :  { %v810_v61 = vpop.f32.mrf.mxu1  ;;  %820 = vst [vmem:[%s1448_s3 + $0x28] sm:$0xff] %v789_v44  ;;  %v791_v43 = vadd.f32 %v790_v60, %v718_v40 }
 0x130   :  { %828 = vst [vmem:[%s1448_s3 + $0x68] sm:$0xff] %v809_v59  ;;  %v811_v0 = vadd.f32 %v810_v61, %v738_v58  ;;  %v792_v1 = vpop.f32.mrf.mxu0 }
 0x131   :  { %v812_v2 = vpop.f32.mrf.mxu1  ;;  %821 = vst [vmem:[%s1448_s3 + $0x30] sm:$0xff] %v791_v43  ;;  %v793_v45 = vadd.f32 %v792_v1, %v720_v62 }
 0x132   :  { %829 = vst [vmem:[%s1448_s3 + $0x70] sm:$0xff] %v811_v0  ;;  %v813_v3 = vadd.f32 %v812_v2, %v740_v63 }
 0x133   :  { %822 = vst [vmem:[%s1448_s3 + $0x38] sm:$0xff] %v793_v45 }
 0x134   :  { %830 = vst [vmem:[%s1448_s3 + $0x78] sm:$0xff] %v813_v3 }

// kernel: _net_forward_impl.265
= control target key start
LH: loop header
LB: loop body
LE: loop exit
PB: predicated region body
PF: predicated region fallthrough
CT: control target
= control target key end

     0   :  { %s773_s1 = inlined_call_operand.vmem [shape: bf16[128,128], index: 1, kind: input, shape index: {}]   ;;  %s774_s0 = inlined_call_operand.vmem [shape: bf16[256,128], index: 0, kind: input, shape index: {}]   ;;  %s775_s2 = inlined_call_operand.vmem [shape: f32[1,128], index: 2, kind: input, shape index: {}]   ;;  %s776_s3 = inlined_call_operand.vmem [shape: f32[256,128], index: 3, kind: output, shape index: {}]  }
   0x1   :  { %v524_v0 = vld [vmem:[%s773_s1 + $0x38] sm:$0xff]   ;;  %v525_v1 = vld [vmem:[%s773_s1 + $0x30] sm:$0xff]   ;;  %v526_v2 = vld [vmem:[%s773_s1 + $0x28] sm:$0xff]  }
   0x2   :  { %460 = vmatprep.subr.bf16.mxu0 %v524_v0  ;;  %508 = vmatprep.subr.bf16.mxu1 %v524_v0  ;;  %v527_v3 = vld [vmem:[%s773_s1 + $0x20] sm:$0xff]   ;;  %v528_v6 = vld [vmem:[%s773_s1 + $0x18] sm:$0xff]   ;;  %v529_v7 = vld [vmem:[%s773_s1 + $0x10] sm:$0xff]  }
   0x3   :  { %461 = vmatpush3.bf16.msra.mxu0 %v524_v0  ;;  %516 = vmatpush3.bf16.msra.mxu1 %v524_v0  ;;  %v532_v4 = vld [vmem:[%s774_s0] sm:$0xff]   ;;  %v530_v8 = vld [vmem:[%s773_s1 + $0x8] sm:$0xff]   ;;  %v536_v12 = vld [vmem:[%s774_s0 + $0x10] sm:$0xff]  }
   0x4   :  { %462 = vmatprep.subr.bf16.mxu0 %v525_v1  ;;  %509 = vmatprep.subr.bf16.mxu1 %v525_v1  ;;  %v533_v5 = vld [vmem:[%s774_s0 + $0x40] sm:$0xff]   ;;  %v534_v10 = vld [vmem:[%s774_s0 + $0x8] sm:$0xff]   ;;  %v537_v13 = vld [vmem:[%s774_s0 + $0x50] sm:$0xff]  }
   0x5   :  { %476 = vmatprep.mubr.bf16.mxu0 %v532_v4  ;;  %492 = vmatprep.mubr.bf16.mxu1 %v533_v5  ;;  %v531_v9 = vld [vmem:[%s773_s1] sm:$0xff]   ;;  %v535_v11 = vld [vmem:[%s774_s0 + $0x48] sm:$0xff]   ;;  %v538_v14 = vld [vmem:[%s774_s0 + $0x18] sm:$0xff]  }
   0x6   :  { %v539_v15 = vld [vmem:[%s774_s0 + $0x58] sm:$0xff]   ;;  %v540_v16 = vld [vmem:[%s774_s0 + $0x20] sm:$0xff]   ;;  %v542_v18 = vld [vmem:[%s774_s0 + $0x28] sm:$0xff]  }
   0x7   :  { %463 = vmatpush3.bf16.msra.mxu0 %v525_v1  ;;  %517 = vmatpush3.bf16.msra.mxu1 %v525_v1  ;;  %v541_v17 = vld [vmem:[%s774_s0 + $0x60] sm:$0xff]   ;;  %v543_v19 = vld [vmem:[%s774_s0 + $0x68] sm:$0xff]   ;;  %v544_v20 = vld [vmem:[%s774_s0 + $0x30] sm:$0xff]  }
   0x8   :  { %464 = vmatprep.subr.bf16.mxu0 %v526_v2  ;;  %510 = vmatprep.subr.bf16.mxu1 %v526_v2  ;;  %v545_v21 = vld [vmem:[%s774_s0 + $0x70] sm:$0xff]   ;;  %v546_v22 = vld [vmem:[%s774_s0 + $0x38] sm:$0xff]   ;;  %v643_v24 = vld [vmem:[%s775_s2] ss:$0 sm:$0xff] }
   0x9   :  { %v547_v23 = vld [vmem:[%s774_s0 + $0x78] sm:$0xff]  }
   0xb   :  { %465 = vmatpush3.bf16.msra.mxu0 %v526_v2  ;;  %518 = vmatpush3.bf16.msra.mxu1 %v526_v2 }
   0xc   :  { %466 = vmatprep.subr.bf16.mxu0 %v527_v3  ;;  %511 = vmatprep.subr.bf16.mxu1 %v527_v3 }
   0xf   :  { %467 = vmatpush3.bf16.msra.mxu0 %v527_v3  ;;  %519 = vmatpush3.bf16.msra.mxu1 %v527_v3 }
  0x10   :  { %468 = vmatprep.subr.bf16.mxu0 %v528_v6  ;;  %512 = vmatprep.subr.bf16.mxu1 %v528_v6 }
  0x13   :  { %469 = vmatpush3.bf16.msra.mxu0 %v528_v6  ;;  %520 = vmatpush3.bf16.msra.mxu1 %v528_v6 }
  0x14   :  { %470 = vmatprep.subr.bf16.mxu0 %v529_v7  ;;  %513 = vmatprep.subr.bf16.mxu1 %v529_v7 }
  0x17   :  { %471 = vmatpush3.bf16.msra.mxu0 %v529_v7  ;;  %521 = vmatpush3.bf16.msra.mxu1 %v529_v7 }
  0x18   :  { %472 = vmatprep.subr.bf16.mxu0 %v530_v8  ;;  %514 = vmatprep.subr.bf16.mxu1 %v530_v8 }
  0x1b   :  { %473 = vmatpush3.bf16.msra.mxu0 %v530_v8  ;;  %522 = vmatpush3.bf16.msra.mxu1 %v530_v8 }
  0x1c   :  { %474 = vmatprep.subr.bf16.mxu0 %v531_v9  ;;  %515 = vmatprep.subr.bf16.mxu1 %v531_v9 }
  0x1f   :  { %475 = vmatpush3.bf16.msra.mxu0 %v531_v9  ;;  %523 = vmatpush3.bf16.msra.mxu1 %v531_v9 }
  0x22   :  { %477 = vmatmul.mubr.bf16.vlgmr.msra.gmra.mxu0 %v534_v10  ;;  %493 = vmatmul.mubr.bf16.vlgmr.msra.gmra.mxu1 %v535_v11 }
  0x23   :  { %480 = vmatprep.mubr.bf16.mxu0 %v536_v12  ;;  %496 = vmatprep.mubr.bf16.mxu1 %v537_v13 }
  0x2a   :  { %481 = vmatmul.mubr.bf16.gmra.mxu0 %v538_v14  ;;  %497 = vmatmul.mubr.bf16.gmra.mxu1 %v539_v15 }
  0x2b   :  { %484 = vmatprep.mubr.bf16.mxu0 %v540_v16  ;;  %500 = vmatprep.mubr.bf16.mxu1 %v541_v17 }
  0x32   :  { %485 = vmatmul.mubr.bf16.gmra.mxu0 %v542_v18  ;;  %501 = vmatmul.mubr.bf16.gmra.mxu1 %v543_v19 }
  0x33   :  { %488 = vmatprep.mubr.bf16.mxu0 %v544_v20  ;;  %504 = vmatprep.mubr.bf16.mxu1 %v545_v21 }
  0x3a   :  { %489 = vmatmul.mubr.bf16.gmra.mxu0 %v546_v22  ;;  %505 = vmatmul.mubr.bf16.gmra.mxu1 %v547_v23 }
  0xe2   :  { %v478_v25 = vpop.f32.mrf.mxu0  ;;  %v494_v26 = vpop.f32.mrf.mxu1 }
  0xe3   :  { %v257_v27 = vadd.f32 %v478_v25, %v643_v24  ;;  %v321_v28 = vadd.f32 %v494_v26, %v643_v24 }
  0xe4   :  { %v248_v29 = vpop.f32.mrf.mxu0  ;;  %v312_v30 = vpop.f32.mrf.mxu1 }
  0xe5   :  { %377 = vst [vmem:[%s776_s3 + $0x10] sm:$0xff] %v257_v27  ;;  %393 = vst [vmem:[%s776_s3 + $0x90] sm:$0xff] %v321_v28  ;;  %v249_v31 = vadd.f32 %v643_v24, %v248_v29  ;;  %v313_v32 = vadd.f32 %v643_v24, %v312_v30 }
  0xe6   :  { %v479_v33 = vpop.f32.mrf.mxu0  ;;  %v495_v34 = vpop.f32.mrf.mxu1 }
  0xe7   :  { %375 = vst [vmem:[%s776_s3] sm:$0xff] %v249_v31  ;;  %391 = vst [vmem:[%s776_s3 + $0x80] sm:$0xff] %v313_v32  ;;  %v260_v35 = vadd.f32 %v479_v33, %v643_v24  ;;  %v324_v36 = vadd.f32 %v495_v34, %v643_v24 }
  0xe8   :  { %v251_v37 = vpop.f32.mrf.mxu0  ;;  %v315_v38 = vpop.f32.mrf.mxu1 }
  0xe9   :  { %378 = vst [vmem:[%s776_s3 + $0x18] sm:$0xff] %v260_v35  ;;  %394 = vst [vmem:[%s776_s3 + $0x98] sm:$0xff] %v324_v36  ;;  %v252_v39 = vadd.f32 %v643_v24, %v251_v37  ;;  %v316_v40 = vadd.f32 %v643_v24, %v315_v38 }
  0xea   :  { %v482_v41 = vpop.f32.mrf.mxu0  ;;  %v498_v42 = vpop.f32.mrf.mxu1 }
  0xeb   :  { %376 = vst [vmem:[%s776_s3 + $0x8] sm:$0xff] %v252_v39  ;;  %392 = vst [vmem:[%s776_s3 + $0x88] sm:$0xff] %v316_v40  ;;  %v273_v43 = vadd.f32 %v482_v41, %v643_v24  ;;  %v337_v44 = vadd.f32 %v498_v42, %v643_v24 }
  0xec   :  { %v264_v45 = vpop.f32.mrf.mxu0  ;;  %v328_v46 = vpop.f32.mrf.mxu1 }
  0xed   :  { %381 = vst [vmem:[%s776_s3 + $0x30] sm:$0xff] %v273_v43  ;;  %397 = vst [vmem:[%s776_s3 + $0xb0] sm:$0xff] %v337_v44  ;;  %v265_v47 = vadd.f32 %v643_v24, %v264_v45  ;;  %v329_v48 = vadd.f32 %v643_v24, %v328_v46 }
  0xee   :  { %v483_v49 = vpop.f32.mrf.mxu0  ;;  %v499_v50 = vpop.f32.mrf.mxu1 }
  0xef   :  { %379 = vst [vmem:[%s776_s3 + $0x20] sm:$0xff] %v265_v47  ;;  %395 = vst [vmem:[%s776_s3 + $0xa0] sm:$0xff] %v329_v48  ;;  %v276_v51 = vadd.f32 %v483_v49, %v643_v24  ;;  %v340_v52 = vadd.f32 %v499_v50, %v643_v24 }
  0xf0   :  { %v267_v53 = vpop.f32.mrf.mxu0  ;;  %v331_v54 = vpop.f32.mrf.mxu1 }
  0xf1   :  { %382 = vst [vmem:[%s776_s3 + $0x38] sm:$0xff] %v276_v51  ;;  %398 = vst [vmem:[%s776_s3 + $0xb8] sm:$0xff] %v340_v52  ;;  %v268_v55 = vadd.f32 %v643_v24, %v267_v53  ;;  %v332_v56 = vadd.f32 %v643_v24, %v331_v54 }
  0xf2   :  { %v486_v57 = vpop.f32.mrf.mxu0  ;;  %v502_v58 = vpop.f32.mrf.mxu1 }
  0xf3   :  { %380 = vst [vmem:[%s776_s3 + $0x28] sm:$0xff] %v268_v55  ;;  %396 = vst [vmem:[%s776_s3 + $0xa8] sm:$0xff] %v332_v56  ;;  %v289_v59 = vadd.f32 %v486_v57, %v643_v24  ;;  %v353_v60 = vadd.f32 %v502_v58, %v643_v24 }
  0xf4   :  { %v280_v61 = vpop.f32.mrf.mxu0  ;;  %v344_v62 = vpop.f32.mrf.mxu1 }
  0xf5   :  { %385 = vst [vmem:[%s776_s3 + $0x50] sm:$0xff] %v289_v59  ;;  %401 = vst [vmem:[%s776_s3 + $0xd0] sm:$0xff] %v353_v60  ;;  %v281_v63 = vadd.f32 %v643_v24, %v280_v61  ;;  %v345_v0 = vadd.f32 %v643_v24, %v344_v62 }
  0xf6   :  { %v487_v1 = vpop.f32.mrf.mxu0  ;;  %v503_v2 = vpop.f32.mrf.mxu1 }
  0xf7   :  { %383 = vst [vmem:[%s776_s3 + $0x40] sm:$0xff] %v281_v63  ;;  %399 = vst [vmem:[%s776_s3 + $0xc0] sm:$0xff] %v345_v0  ;;  %v292_v3 = vadd.f32 %v487_v1, %v643_v24  ;;  %v356_v4 = vadd.f32 %v503_v2, %v643_v24 }
  0xf8   :  { %v283_v5 = vpop.f32.mrf.mxu0  ;;  %v347_v6 = vpop.f32.mrf.mxu1 }
  0xf9   :  { %386 = vst [vmem:[%s776_s3 + $0x58] sm:$0xff] %v292_v3  ;;  %402 = vst [vmem:[%s776_s3 + $0xd8] sm:$0xff] %v356_v4  ;;  %v284_v7 = vadd.f32 %v643_v24, %v283_v5  ;;  %v348_v8 = vadd.f32 %v643_v24, %v347_v6 }
  0xfa   :  { %v490_v9 = vpop.f32.mrf.mxu0  ;;  %v506_v10 = vpop.f32.mrf.mxu1 }
  0xfb   :  { %384 = vst [vmem:[%s776_s3 + $0x48] sm:$0xff] %v284_v7  ;;  %400 = vst [vmem:[%s776_s3 + $0xc8] sm:$0xff] %v348_v8  ;;  %v305_v11 = vadd.f32 %v490_v9, %v643_v24  ;;  %v369_v12 = vadd.f32 %v506_v10, %v643_v24 }
  0xfc   :  { %v296_v13 = vpop.f32.mrf.mxu0  ;;  %v360_v14 = vpop.f32.mrf.mxu1 }
  0xfd   :  { %389 = vst [vmem:[%s776_s3 + $0x70] sm:$0xff] %v305_v11  ;;  %405 = vst [vmem:[%s776_s3 + $0xf0] sm:$0xff] %v369_v12  ;;  %v297_v15 = vadd.f32 %v643_v24, %v296_v13  ;;  %v361_v16 = vadd.f32 %v643_v24, %v360_v14 }
  0xfe   :  { %v491_v17 = vpop.f32.mrf.mxu0  ;;  %v507_v18 = vpop.f32.mrf.mxu1 }
  0xff   :  { %387 = vst [vmem:[%s776_s3 + $0x60] sm:$0xff] %v297_v15  ;;  %403 = vst [vmem:[%s776_s3 + $0xe0] sm:$0xff] %v361_v16  ;;  %v308_v19 = vadd.f32 %v491_v17, %v643_v24  ;;  %v372_v20 = vadd.f32 %v507_v18, %v643_v24 }
 0x100   :  { %v299_v21 = vpop.f32.mrf.mxu0  ;;  %v363_v22 = vpop.f32.mrf.mxu1 }
 0x101   :  { %390 = vst [vmem:[%s776_s3 + $0x78] sm:$0xff] %v308_v19  ;;  %406 = vst [vmem:[%s776_s3 + $0xf8] sm:$0xff] %v372_v20  ;;  %v300_v23 = vadd.f32 %v643_v24, %v299_v21  ;;  %v364_v25 = vadd.f32 %v643_v24, %v363_v22 }
 0x103   :  { %388 = vst [vmem:[%s776_s3 + $0x68] sm:$0xff] %v300_v23  ;;  %404 = vst [vmem:[%s776_s3 + $0xe8] sm:$0xff] %v364_v25 }

// kernel: _net_forward_impl.276
= control target key start
LH: loop header
LB: loop body
LE: loop exit
PB: predicated region body
PF: predicated region fallthrough
CT: control target
= control target key end

     0   :  { %s2123_s1 = inlined_call_operand.vmem [shape: bf16[1152,128], index: 1, kind: input, shape index: {}]   ;;  %s2124_s0 = inlined_call_operand.vmem [shape: bf16[64,1152], index: 0, kind: input, shape index: {}]   ;;  %s2125_s2 = inlined_call_operand.vmem [shape: f32[1,128], index: 2, kind: input, shape index: {}]   ;;  %s2126_s3 = inlined_call_operand.vmem [shape: f32[64,128], index: 3, kind: output, shape index: {}]  }
   0x1   :  { %v1536_v0 = vld [vmem:[%s2123_s1 + $0x78] sm:$0xff]   ;;  %v1540_v4 = vld [vmem:[%s2123_s1 + $0x70] sm:$0xff]   ;;  %v1544_v8 = vld [vmem:[%s2123_s1 + $0x68] sm:$0xff]  }
   0x2   :  { %v1537_v1 = vld [vmem:[%s2123_s1 + $0xf8] sm:$0xff]   ;;  %1324 = vmatprep.subr.bf16.mxu0 %v1536_v0  ;;  %v1541_v5 = vld [vmem:[%s2123_s1 + $0xf0] sm:$0xff]   ;;  %v1545_v9 = vld [vmem:[%s2123_s1 + $0xe8] sm:$0xff]  }
   0x3   :  { %v1538_v2 = vld [vmem:[%s2123_s1 + $0x38] sm:$0xff]   ;;  %1364 = vmatprep.subr.bf16.mxu1 %v1537_v1  ;;  %v1542_v6 = vld [vmem:[%s2123_s1 + $0x30] sm:$0xff]   ;;  %v1546_v10 = vld [vmem:[%s2123_s1 + $0x28] sm:$0xff]  }
   0x4   :  { %v1539_v3 = vld [vmem:[%s2123_s1 + $0xb8] sm:$0xff]   ;;  %1325 = vmatpush3.bf16.msra.mxu0 %v1538_v2  ;;  %v1543_v7 = vld [vmem:[%s2123_s1 + $0xb0] sm:$0xff]   ;;  %v1547_v11 = vld [vmem:[%s2123_s1 + $0xa8] sm:$0xff]  }
   0x5   :  { %1365 = vmatpush3.bf16.msra.mxu1 %v1539_v3  ;;  %1326 = vmatprep.subr.bf16.mxu0 %v1540_v4  ;;  %v1548_v12 = vld [vmem:[%s2123_s1 + $0x60] sm:$0xff]   ;;  %v1552_v16 = vld [vmem:[%s2123_s1 + $0x58] sm:$0xff]   ;;  %v1556_v20 = vld [vmem:[%s2123_s1 + $0x50] sm:$0xff]  }
   0x6   :  { %1366 = vmatprep.subr.bf16.mxu1 %v1541_v5  ;;  %v1549_v13 = vld [vmem:[%s2123_s1 + $0xe0] sm:$0xff]   ;;  %v1553_v17 = vld [vmem:[%s2123_s1 + $0xd8] sm:$0xff]   ;;  %v1557_v21 = vld [vmem:[%s2123_s1 + $0xd0] sm:$0xff]  }
   0x7   :  { %v1550_v14 = vld [vmem:[%s2123_s1 + $0x20] sm:$0xff]   ;;  %v1554_v18 = vld [vmem:[%s2123_s1 + $0x18] sm:$0xff]   ;;  %v1558_v22 = vld [vmem:[%s2123_s1 + $0x10] sm:$0xff]  }
   0x8   :  { %1327 = vmatpush3.bf16.msra.mxu0 %v1542_v6  ;;  %v1551_v15 = vld [vmem:[%s2123_s1 + $0xa0] sm:$0xff]   ;;  %v1555_v19 = vld [vmem:[%s2123_s1 + $0x98] sm:$0xff]   ;;  %v1559_v23 = vld [vmem:[%s2123_s1 + $0x90] sm:$0xff]  }
   0x9   :  { %1367 = vmatpush3.bf16.msra.mxu1 %v1543_v7  ;;  %1328 = vmatprep.subr.bf16.mxu0 %v1544_v8  ;;  %v1560_v24 = vld [vmem:[%s2123_s1 + $0x48] sm:$0xff]   ;;  %v1564_v28 = vld [vmem:[%s2123_s1 + $0x40] sm:$0xff]   ;;  %v1574_v36 = vld [vmem:[%s2123_s1 + $0x178] sm:$0xff]  }
   0xa   :  { %1368 = vmatprep.subr.bf16.mxu1 %v1545_v9  ;;  %v1561_v25 = vld [vmem:[%s2123_s1 + $0xc8] sm:$0xff]   ;;  %v1565_v29 = vld [vmem:[%s2123_s1 + $0xc0] sm:$0xff]   ;;  %v1575_v37 = vld [vmem:[%s2123_s1 + $0x1f8] sm:$0xff]  }
   0xb   :  { %v1562_v26 = vld [vmem:[%s2123_s1 + $0x8] sm:$0xff]   ;;  %v1566_v30 = vld [vmem:[%s2123_s1] sm:$0xff]   ;;  %v1576_v38 = vld [vmem:[%s2123_s1 + $0x138] sm:$0xff]  }
   0xc   :  { %1329 = vmatpush3.bf16.msra.mxu0 %v1546_v10  ;;  %v1563_v27 = vld [vmem:[%s2123_s1 + $0x88] sm:$0xff]   ;;  %v1567_v31 = vld [vmem:[%s2123_s1 + $0x80] sm:$0xff]   ;;  %v1577_v39 = vld [vmem:[%s2123_s1 + $0x1b8] sm:$0xff]  }
   0xd   :  { %1369 = vmatpush3.bf16.msra.mxu1 %v1547_v11  ;;  %1330 = vmatprep.subr.bf16.mxu0 %v1548_v12  ;;  %v1568_v32 = vld [vmem:[%s2124_s0] ss:$36 sps:$4 sm:$0xff]   ;;  %v1571_v34 = vld [vmem:[%s2124_s0 + $0x8] ss:$36 sps:$4 sm:$0xff]   ;;  %v1578_v40 = vld [vmem:[%s2123_s1 + $0x170] sm:$0xff]  }
   0xe   :  { %1370 = vmatprep.subr.bf16.mxu1 %v1549_v13  ;;  %v1570_v33 = vld [vmem:[%s2124_s0 + $0x4] ss:$36 sps:$4 sm:$0xff]   ;;  %v1573_v35 = vld [vmem:[%s2124_s0 + $0xc] ss:$36 sps:$4 sm:$0xff]   ;;  %v1584_v45 = vld [vmem:[%s2124_s0 + $0x54] ss:$36 sps:$4 sm:$0xff]  }
   0xf   :  { %854 = vmatprep.mubr.bf16.mxu0 %v1570_v33  ;;  %919 = vmatprep.mubr.bf16.mxu1 %v1573_v35  ;;  %v1579_v41 = vld [vmem:[%s2123_s1 + $0x1f0] sm:$0xff]   ;;  %v1586_v46 = vld [vmem:[%s2124_s0 + $0x48] ss:$36 sps:$4 sm:$0xff]   ;;  %v1592_v52 = vld [vmem:[%s2123_s1 + $0x160] sm:$0xff]  }
  0x10   :  { %1331 = vmatpush3.bf16.msra.mxu0 %v1550_v14  ;;  %v1580_v42 = vld [vmem:[%s2123_s1 + $0x130] sm:$0xff]   ;;  %v1588_v48 = vld [vmem:[%s2123_s1 + $0x168] sm:$0xff]   ;;  %v1593_v53 = vld [vmem:[%s2123_s1 + $0x1e0] sm:$0xff]  }
  0x11   :  { %1371 = vmatpush3.bf16.msra.mxu1 %v1551_v15  ;;  %1332 = vmatprep.subr.bf16.mxu0 %v1552_v16  ;;  %v1581_v43 = vld [vmem:[%s2123_s1 + $0x1b0] sm:$0xff]   ;;  %v1589_v49 = vld [vmem:[%s2123_s1 + $0x1e8] sm:$0xff]   ;;  %v1594_v54 = vld [vmem:[%s2123_s1 + $0x120] sm:$0xff]  }
  0x12   :  { %1372 = vmatprep.subr.bf16.mxu1 %v1553_v17  ;;  %v1582_v44 = vld [vmem:[%s2124_s0 + $0x4c] ss:$36 sps:$4 sm:$0xff]   ;;  %v1595_v55 = vld [vmem:[%s2123_s1 + $0x1a0] sm:$0xff]   ;;  %v1596_v56 = vld [vmem:[%s2124_s0 + $0x94] ss:$36 sps:$4 sm:$0xff]  }
  0x13   :  { %v1587_v47 = vld [vmem:[%s2124_s0 + $0x50] ss:$36 sps:$4 sm:$0xff]   ;;  %v1590_v50 = vld [vmem:[%s2123_s1 + $0x128] sm:$0xff]   ;;  %v1598_v57 = vld [vmem:[%s2124_s0 + $0x9c] ss:$36 sps:$4 sm:$0xff]  }
  0x14   :  { %1333 = vmatpush3.bf16.msra.mxu0 %v1554_v18  ;;  %v1591_v51 = vld [vmem:[%s2123_s1 + $0x1a8] sm:$0xff]   ;;  %v1600_v58 = vld [vmem:[%s2124_s0 + $0x90] ss:$36 sps:$4 sm:$0xff]   ;;  %v1601_v59 = vld [vmem:[%s2124_s0 + $0x98] ss:$36 sps:$4 sm:$0xff]  }
  0x15   :  { %1373 = vmatpush3.bf16.msra.mxu1 %v1555_v19  ;;  %1334 = vmatprep.subr.bf16.mxu0 %v1556_v20  ;;  %v1602_v60 = vld [vmem:[%s2123_s1 + $0x158] sm:$0xff]   ;;  %v1606_v0 = vld [vmem:[%s2123_s1 + $0x150] sm:$0xff]   ;;  %v1612_v5 = vld [vmem:[%s2124_s0 + $0xe4] ss:$36 sps:$4 sm:$0xff]  }
  0x16   :  { %1374 = vmatprep.subr.bf16.mxu1 %v1557_v21  ;;  %v1603_v61 = vld [vmem:[%s2123_s1 + $0x1d8] sm:$0xff]   ;;  %v1607_v1 = vld [vmem:[%s2123_s1 + $0x1d0] sm:$0xff]   ;;  %v1615_v7 = vld [vmem:[%s2124_s0 + $0xe0] ss:$36 sps:$4 sm:$0xff]  }
  0x17   :  { %v1604_v62 = vld [vmem:[%s2123_s1 + $0x118] sm:$0xff]   ;;  %v1608_v2 = vld [vmem:[%s2123_s1 + $0x110] sm:$0xff]   ;;  %v1616_v8 = vld [vmem:[%s2123_s1 + $0x148] sm:$0xff]  }
  0x18   :  { %1335 = vmatpush3.bf16.msra.mxu0 %v1558_v22  ;;  %v1605_v63 = vld [vmem:[%s2123_s1 + $0x198] sm:$0xff]   ;;  %v1609_v3 = vld [vmem:[%s2123_s1 + $0x190] sm:$0xff]   ;;  %v1617_v9 = vld [vmem:[%s2123_s1 + $0x1c8] sm:$0xff]  }
  0x19   :  { %1375 = vmatpush3.bf16.msra.mxu1 %v1559_v23  ;;  %1336 = vmatprep.subr.bf16.mxu0 %v1560_v24  ;;  %v1610_v4 = vld [vmem:[%s2124_s0 + $0xdc] ss:$36 sps:$4 sm:$0xff]   ;;  %v1618_v10 = vld [vmem:[%s2123_s1 + $0x108] sm:$0xff]   ;;  %v1624_v16 = vld [vmem:[%s2124_s0 + $0x10] ss:$36 sps:$4 sm:$0xff]  }
  0x1a   :  { %1376 = vmatprep.subr.bf16.mxu1 %v1561_v25  ;;  %v1614_v6 = vld [vmem:[%s2124_s0 + $0xd8] ss:$36 sps:$4 sm:$0xff]   ;;  %v1619_v11 = vld [vmem:[%s2123_s1 + $0x188] sm:$0xff]   ;;  %v1620_v12 = vld [vmem:[%s2123_s1 + $0x140] sm:$0xff]  }
  0x1b   :  { %v1621_v13 = vld [vmem:[%s2123_s1 + $0x1c0] sm:$0xff]   ;;  %v1626_v17 = vld [vmem:[%s2124_s0 + $0x14] ss:$36 sps:$4 sm:$0xff]   ;;  %v1648_v33 = vld [vmem:[%s2124_s0 + $0xec] ss:$36 sps:$4 sm:$0xff]  }
  0x1c   :  { %1337 = vmatpush3.bf16.msra.mxu0 %v1562_v26  ;;  %v1622_v14 = vld [vmem:[%s2123_s1 + $0x100] sm:$0xff]   ;;  %v1627_v18 = vld [vmem:[%s2124_s0 + $0x18] ss:$36 sps:$4 sm:$0xff]   ;;  %v1631_v21 = vld [vmem:[%s2123_s1 + $0x230] sm:$0xff]  }
  0x1d   :  { %1377 = vmatpush3.bf16.msra.mxu1 %v1563_v27  ;;  %1338 = vmatprep.subr.bf16.mxu0 %v1564_v28  ;;  %v1623_v15 = vld [vmem:[%s2123_s1 + $0x180] sm:$0xff]   ;;  %v1630_v20 = vld [vmem:[%s2123_s1 + $0x238] sm:$0xff]   ;;  %v1638_v26 = vld [vmem:[%s2123_s1 + $0x228] sm:$0xff]  }
  0x1e   :  { %1378 = vmatprep.subr.bf16.mxu1 %v1565_v29  ;;  %v1629_v19 = vld [vmem:[%s2124_s0 + $0x1c] ss:$36 sps:$4 sm:$0xff]   ;;  %v1634_v23 = vld [vmem:[%s2124_s0 + $0x64] ss:$36 sps:$4 sm:$0xff]   ;;  %v1642_v28 = vld [vmem:[%s2124_s0 + $0xac] ss:$36 sps:$4 sm:$0xff]  }
  0x1f   :  { %v1632_v22 = vld [vmem:[%s2124_s0 + $0x5c] ss:$36 sps:$4 sm:$0xff]   ;;  %v1640_v27 = vld [vmem:[%s2124_s0 + $0xa4] ss:$36 sps:$4 sm:$0xff]   ;;  %v1647_v35 = vld [vmem:[%s2123_s1 + $0x210] sm:$0xff]  }
  0x20   :  { %1339 = vmatpush3.bf16.msra.mxu0 %v1566_v30  ;;  %v1636_v24 = vld [vmem:[%s2124_s0 + $0x58] ss:$36 sps:$4 sm:$0xff]   ;;  %v1637_v25 = vld [vmem:[%s2124_s0 + $0x60] ss:$36 sps:$4 sm:$0xff]  }
  0x21   :  { %1379 = vmatpush3.bf16.msra.mxu1 %v1567_v31  ;;  %1404 = vmatprep.subr.bf16.mxu0 %v1574_v36  ;;  %v1639_v29 = vld [vmem:[%s2123_s1 + $0x220] sm:$0xff]   ;;  %v1645_v31 = vld [vmem:[%s2124_s0 + $0xa8] ss:$36 sps:$4 sm:$0xff]  }
  0x22   :  { %1444 = vmatprep.subr.bf16.mxu1 %v1575_v37  ;;  %v1644_v30 = vld [vmem:[%s2124_s0 + $0xa0] ss:$36 sps:$4 sm:$0xff]   ;;  %v1652_v36 = vld [vmem:[%s2124_s0 + $0xe8] ss:$36 sps:$4 sm:$0xff]  }
  0x23   :  { %855 = vmatmul.mubr.bf16.vlgmr.msra.gmra.mxu0 %v1568_v32  ;;  %v1646_v32 = vld [vmem:[%s2123_s1 + $0x218] sm:$0xff]   ;;  %v1654_v37 = vld [vmem:[%s2123_s1 + $0x208] sm:$0xff]  }
  0x24   :  { %920 = vmatmul.mubr.bf16.vlgmr.msra.gmra.mxu1 %v1571_v34  ;;  %1405 = vmatpush3.bf16.msra.mxu0 %v1576_v38  ;;  %v1650_v34 = vld [vmem:[%s2124_s0 + $0xf4] ss:$36 sps:$4 sm:$0xff]  }
  0x25   :  { %1445 = vmatpush3.bf16.msra.mxu1 %v1577_v39  ;;  %1406 = vmatprep.subr.bf16.mxu0 %v1578_v40  ;;  %v1653_v38 = vld [vmem:[%s2124_s0 + $0xf0] ss:$36 sps:$4 sm:$0xff]   ;;  %v1656_v39 = vld [vmem:[%s2124_s0 + $0x20] ss:$36 sps:$4 sm:$0xff]  }
  0x26   :  { %1446 = vmatprep.subr.bf16.mxu1 %v1579_v41  ;;  %862 = vmatprep.mubr.bf16.mxu0 %v1582_v44  ;;  %v1657_v40 = vld [vmem:[%s2124_s0 + $0xb0] ss:$36 sps:$4 sm:$0xff]   ;;  %v1655_v41 = vld [vmem:[%s2123_s1 + $0x200] sm:$0xff]  }
  0x27   :  { %927 = vmatprep.mubr.bf16.mxu1 %v1584_v45 }
  0x28   :  { %1407 = vmatpush3.bf16.msra.mxu0 %v1580_v42  ;;  %v1658_v42 = vld [vmem:[%s2124_s0 + $0x68] ss:$36 sps:$4 sm:$0xff]  }
  0x29   :  { %1447 = vmatpush3.bf16.msra.mxu1 %v1581_v43  ;;  %1408 = vmatprep.subr.bf16.mxu0 %v1588_v48  ;;  %v1659_v43 = vld [vmem:[%s2124_s0 + $0xf8] ss:$36 sps:$4 sm:$0xff]  }
  0x2a   :  { %1448 = vmatprep.subr.bf16.mxu1 %v1589_v49 }
  0x2b   :  { %863 = vmatmul.mubr.bf16.gmra.mxu0 %v1586_v46 }
  0x2c   :  { %928 = vmatmul.mubr.bf16.gmra.mxu1 %v1587_v47  ;;  %1409 = vmatpush3.bf16.msra.mxu0 %v1590_v50 }
  0x2d   :  { %1449 = vmatpush3.bf16.msra.mxu1 %v1591_v51  ;;  %1410 = vmatprep.subr.bf16.mxu0 %v1592_v52 }
  0x2e   :  { %1450 = vmatprep.subr.bf16.mxu1 %v1593_v53  ;;  %870 = vmatprep.mubr.bf16.mxu0 %v1596_v56 }
  0x2f   :  { %935 = vmatprep.mubr.bf16.mxu1 %v1598_v57 }
  0x30   :  { %1411 = vmatpush3.bf16.msra.mxu0 %v1594_v54 }
  0x31   :  { %1451 = vmatpush3.bf16.msra.mxu1 %v1595_v55  ;;  %1412 = vmatprep.subr.bf16.mxu0 %v1602_v60 }
  0x32   :  { %1452 = vmatprep.subr.bf16.mxu1 %v1603_v61 }
  0x33   :  { %871 = vmatmul.mubr.bf16.gmra.mxu0 %v1600_v58 }
  0x34   :  { %936 = vmatmul.mubr.bf16.gmra.mxu1 %v1601_v59  ;;  %1413 = vmatpush3.bf16.msra.mxu0 %v1604_v62 }
  0x35   :  { %1453 = vmatpush3.bf16.msra.mxu1 %v1605_v63  ;;  %1414 = vmatprep.subr.bf16.mxu0 %v1606_v0 }
  0x36   :  { %1454 = vmatprep.subr.bf16.mxu1 %v1607_v1  ;;  %878 = vmatprep.mubr.bf16.mxu0 %v1610_v4 }
  0x37   :  { %943 = vmatprep.mubr.bf16.mxu1 %v1612_v5 }
  0x38   :  { %1415 = vmatpush3.bf16.msra.mxu0 %v1608_v2 }
  0x39   :  { %1455 = vmatpush3.bf16.msra.mxu1 %v1609_v3  ;;  %1416 = vmatprep.subr.bf16.mxu0 %v1616_v8 }
  0x3a   :  { %1456 = vmatprep.subr.bf16.mxu1 %v1617_v9 }
  0x3b   :  { %879 = vmatmul.mubr.bf16.gmra.mxu0 %v1614_v6 }
  0x3c   :  { %944 = vmatmul.mubr.bf16.gmra.mxu1 %v1615_v7  ;;  %1417 = vmatpush3.bf16.msra.mxu0 %v1618_v10 }
  0x3d   :  { %1457 = vmatpush3.bf16.msra.mxu1 %v1619_v11  ;;  %1418 = vmatprep.subr.bf16.mxu0 %v1620_v12 }
  0x3e   :  { %1458 = vmatprep.subr.bf16.mxu1 %v1621_v13  ;;  %984 = vmatprep.mubr.bf16.mxu0 %v1626_v17 }
  0x3f   :  { %1049 = vmatprep.mubr.bf16.mxu1 %v1629_v19 }
  0x40   :  { %1419 = vmatpush3.bf16.msra.mxu0 %v1622_v14 }
  0x41   :  { %1459 = vmatpush3.bf16.msra.mxu1 %v1623_v15  ;;  %1496 = vmatprep.subr.bf16.mxu0 %v1630_v20 }
  0x42   :  { %1520 = vmatprep.subr.bf16.mxu1 %v1630_v20 }
  0x43   :  { %985 = vmatmul.mubr.bf16.vlgmr.msra.gmra.mxu0 %v1624_v16 }
  0x44   :  { %1050 = vmatmul.mubr.bf16.vlgmr.msra.gmra.mxu1 %v1627_v18  ;;  %1497 = vmatpush3.bf16.msra.mxu0 %v1630_v20 }
  0x45   :  { %1528 = vmatpush3.bf16.msra.mxu1 %v1630_v20  ;;  %1498 = vmatprep.subr.bf16.mxu0 %v1631_v21 }
  0x46   :  { %1521 = vmatprep.subr.bf16.mxu1 %v1631_v21  ;;  %992 = vmatprep.mubr.bf16.mxu0 %v1632_v22 }
  0x47   :  { %1057 = vmatprep.mubr.bf16.mxu1 %v1634_v23 }
  0x48   :  { %1499 = vmatpush3.bf16.msra.mxu0 %v1631_v21 }
  0x49   :  { %1529 = vmatpush3.bf16.msra.mxu1 %v1631_v21  ;;  %1500 = vmatprep.subr.bf16.mxu0 %v1638_v26 }
  0x4a   :  { %1522 = vmatprep.subr.bf16.mxu1 %v1638_v26 }
  0x4b   :  { %993 = vmatmul.mubr.bf16.gmra.mxu0 %v1636_v24 }
  0x4c   :  { %1058 = vmatmul.mubr.bf16.gmra.mxu1 %v1637_v25  ;;  %1000 = vmatprep.mubr.bf16.mxu0 %v1640_v27 }
  0x4d   :  { %1501 = vmatpush3.bf16.msra.mxu0 %v1638_v26  ;;  %1065 = vmatprep.mubr.bf16.mxu1 %v1642_v28 }
  0x4e   :  { %1530 = vmatpush3.bf16.msra.mxu1 %v1638_v26  ;;  %1502 = vmatprep.subr.bf16.mxu0 %v1639_v29 }
  0x4f   :  { %1523 = vmatprep.subr.bf16.mxu1 %v1639_v29 }
  0x51   :  { %1503 = vmatpush3.bf16.msra.mxu0 %v1639_v29 }
  0x52   :  { %1531 = vmatpush3.bf16.msra.mxu1 %v1639_v29  ;;  %1504 = vmatprep.subr.bf16.mxu0 %v1646_v32 }
  0x53   :  { %1001 = vmatmul.mubr.bf16.gmra.mxu0 %v1644_v30  ;;  %1524 = vmatprep.subr.bf16.mxu1 %v1646_v32  ;;  %v1207_v30 = vld [vmem:[%s2125_s2] ss:$0 sm:$0xff] }
  0x54   :  { %1066 = vmatmul.mubr.bf16.gmra.mxu1 %v1645_v31  ;;  %1008 = vmatprep.mubr.bf16.mxu0 %v1648_v33 }
  0x55   :  { %1505 = vmatpush3.bf16.msra.mxu0 %v1646_v32  ;;  %1073 = vmatprep.mubr.bf16.mxu1 %v1650_v34 }
  0x56   :  { %1532 = vmatpush3.bf16.msra.mxu1 %v1646_v32  ;;  %1506 = vmatprep.subr.bf16.mxu0 %v1647_v35 }
  0x57   :  { %1525 = vmatprep.subr.bf16.mxu1 %v1647_v35 }
  0x59   :  { %1507 = vmatpush3.bf16.msra.mxu0 %v1647_v35 }
  0x5a   :  { %1533 = vmatpush3.bf16.msra.mxu1 %v1647_v35  ;;  %1508 = vmatprep.subr.bf16.mxu0 %v1654_v37 }
  0x5b   :  { %1009 = vmatmul.mubr.bf16.gmra.mxu0 %v1652_v36  ;;  %1526 = vmatprep.subr.bf16.mxu1 %v1654_v37 }
  0x5c   :  { %1074 = vmatmul.mubr.bf16.gmra.mxu1 %v1653_v38  ;;  %1512 = vmatprep.mubr.bf16.mxu0 %v1656_v39 }
  0x5d   :  { %1509 = vmatpush3.bf16.msra.mxu0 %v1654_v37  ;;  %1516 = vmatprep.mubr.bf16.mxu1 %v1657_v40 }
  0x5e   :  { %1534 = vmatpush3.bf16.msra.mxu1 %v1654_v37  ;;  %1510 = vmatprep.subr.bf16.mxu0 %v1655_v41 }
  0x5f   :  { %1527 = vmatprep.subr.bf16.mxu1 %v1655_v41 }
  0x61   :  { %1511 = vmatpush3.bf16.msra.mxu0 %v1655_v41 }
  0x62   :  { %1535 = vmatpush3.bf16.msra.mxu1 %v1655_v41 }
  0x64   :  { %1513 = vmatmul.mubr.bf16.vlgmr.msra.gmra.mxu0 %v1658_v42 }
  0x65   :  { %1517 = vmatmul.mubr.bf16.vlgmr.msra.gmra.mxu1 %v1659_v43 }
  0xe3   :  { %v1340_v44 = vpop.f32.mrf.mxu0 }
  0xe4   :  { %v1380_v45 = vpop.f32.mrf.mxu1 }
  0xe5   :  { %v1341_v46 = vpop.f32.mrf.mxu0 }
  0xe6   :  { %v1381_v47 = vpop.f32.mrf.mxu1  ;;  %v1342_v27 = vadd.f32 %v1341_v46, %v1340_v44 }
  0xe7   :  { %v1343_v48 = vpop.f32.mrf.mxu0  ;;  %v1382_v40 = vadd.f32 %v1381_v47, %v1380_v45 }
  0xe8   :  { %v2036_v49 = vpop.f32.mrf.mxu1  ;;  %v857_v35 = vadd.f32 %v1342_v27, %v1207_v30 }
  0xe9   :  { %v1344_v50 = vpop.f32.mrf.mxu0 }
  0xea   :  { %v2038_v51 = vpop.f32.mrf.mxu1  ;;  %v1345_v36 = vadd.f32 %v1344_v50, %v1343_v48 }
  0xeb   :  { %v1346_v52 = vpop.f32.mrf.mxu0  ;;  %v1385_v48 = vadd.f32 %v2038_v51, %v2036_v49 }
  0xec   :  { %v1386_v53 = vpop.f32.mrf.mxu1 }
  0xed   :  { %v1347_v54 = vpop.f32.mrf.mxu0 }
  0xee   :  { %v1387_v55 = vpop.f32.mrf.mxu1  ;;  %v1348_v31 = vadd.f32 %v1347_v54, %v1346_v52 }
  0xef   :  { %v1349_v56 = vpop.f32.mrf.mxu0  ;;  %v1388_v52 = vadd.f32 %v1387_v55, %v1386_v53 }
  0xf0   :  { %v2040_v57 = vpop.f32.mrf.mxu1  ;;  %v865_v41 = vadd.f32 %v1348_v31, %v1207_v30 }
  0xf1   :  { %v1350_v58 = vpop.f32.mrf.mxu0 }
  0xf2   :  { %v2042_v59 = vpop.f32.mrf.mxu1  ;;  %v1351_v39 = vadd.f32 %v1350_v58, %v1349_v56  ;;  %v930_v45 = vadd.f32 %v1388_v52, %v865_v41 }
  0xf3   :  { %v1352_v60 = vpop.f32.mrf.mxu0 }
  0xf4   :  { %v2044_v61 = vpop.f32.mrf.mxu1  ;;  %v868_v50 = vadd.f32 %v1351_v39, %v1207_v30 }
  0xf5   :  { %v1353_v62 = vpop.f32.mrf.mxu0 }
  0xf6   :  { %v2046_v63 = vpop.f32.mrf.mxu1  ;;  %v1354_v42 = vadd.f32 %v1353_v62, %v1352_v60 }
  0xf7   :  { %v1355_v0 = vpop.f32.mrf.mxu0  ;;  %v1394_v31 = vadd.f32 %v2046_v63, %v2044_v61 }
  0xf8   :  { %v2048_v1 = vpop.f32.mrf.mxu1  ;;  %v873_v47 = vadd.f32 %v1354_v42, %v1207_v30 }
  0xf9   :  { %v1356_v2 = vpop.f32.mrf.mxu0 }
  0xfa   :  { %v2050_v3 = vpop.f32.mrf.mxu1  ;;  %v1357_v58 = vadd.f32 %v1356_v2, %v1355_v0 }
  0xfb   :  { %v1358_v4 = vpop.f32.mrf.mxu0 }
  0xfc   :  { %v1398_v5 = vpop.f32.mrf.mxu1 }
  0xfd   :  { %v1359_v6 = vpop.f32.mrf.mxu0 }
  0xfe   :  { %v1399_v7 = vpop.f32.mrf.mxu1  ;;  %v1360_v34 = vadd.f32 %v1359_v6, %v1358_v4 }
  0xff   :  { %v1361_v8 = vpop.f32.mrf.mxu0  ;;  %v1400_v4 = vadd.f32 %v1399_v7, %v1398_v5 }
 0x100   :  { %v1401_v9 = vpop.f32.mrf.mxu1 }
 0x101   :  { %v1362_v10 = vpop.f32.mrf.mxu0 }
 0x102   :  { %v1402_v11 = vpop.f32.mrf.mxu1  ;;  %v1363_v43 = vadd.f32 %v1362_v10, %v1361_v8  ;;  %v1391_v8 = vadd.f32 %v2042_v59, %v2040_v57 }
 0x103   :  { %v1420_v12 = vpop.f32.mrf.mxu0  ;;  %v1403_v49 = vadd.f32 %v1402_v11, %v1401_v9  ;;  %v1397_v9 = vadd.f32 %v2050_v3, %v2048_v1 }
 0x104   :  { %v2052_v13 = vpop.f32.mrf.mxu1  ;;  %v884_v60 = vadd.f32 %v1363_v43, %v1207_v30 }
 0x105   :  { %v1421_v14 = vpop.f32.mrf.mxu0 }
 0x106   :  { %v2054_v15 = vpop.f32.mrf.mxu1  ;;  %v1422_v53 = vadd.f32 %v1421_v14, %v1420_v12 }
 0x107   :  { %v2056_v16 = vpop.f32.mrf.mxu0 }
 0x108   :  { %v2058_v17 = vpop.f32.mrf.mxu1 }
 0x109   :  { %2127 = vst [vmem:[#allocation2_spill] sm:$0xff] %v2058_v17  ;;  %v2060_v18 = vpop.f32.mrf.mxu0  ;;  %v922_v17 = vadd.f32 %v1382_v40, %v857_v35  ;;  %v876_v35 = vadd.f32 %v1357_v58, %v1207_v30 }
 0x10a   :  { %v2062_v19 = vpop.f32.mrf.mxu1  ;;  %v1425_v14 = vadd.f32 %v2060_v18, %v2056_v16 }
 0x10b   :  { %2128 = vst [vmem:[#allocation3_spill] sm:$0xff] %v2062_v19  ;;  %v1426_v20 = vpop.f32.mrf.mxu0  ;;  %v881_v19 = vadd.f32 %v1360_v34, %v1207_v30  ;;  %v938_v34 = vadd.f32 %v1394_v31, %v873_v47  ;;  %v987_v12 = vadd.f32 %v1422_v53, %v922_v17  ;;  %v941_v17 = vadd.f32 %v1397_v9, %v876_v35 }
 0x10c   :  { %v2064_v21 = vpop.f32.mrf.mxu1 }
 0x10d   :  { %v1427_v22 = vpop.f32.mrf.mxu0  ;;  %v946_v10 = vadd.f32 %v1400_v4, %v881_v19 }
 0x10e   :  { %v1467_v23 = vpop.f32.mrf.mxu1  ;;  %v1428_v56 = vadd.f32 %v1427_v22, %v1426_v20  ;;  %v933_v20 = vadd.f32 %v1391_v8, %v868_v50 }
 0x10f   :  { %v1429_v24 = vpop.f32.mrf.mxu0  ;;  %v1468_v61 = vadd.f32 %v1467_v23, %v2064_v21 }
 0x110   :  { %v2066_v25 = vpop.f32.mrf.mxu1  ;;  %v995_v22 = vadd.f32 %v1428_v56, %v930_v45 }
 0x111   :  { %2129 = vst [vmem:[#allocation4_spill] sm:$0xff] %v2066_v25  ;;  %v1430_v26 = vpop.f32.mrf.mxu0 }
 0x112   :  { %v2068_v28 = vpop.f32.mrf.mxu1  ;;  %v1431_v0 = vadd.f32 %v1430_v26, %v1429_v24  ;;  %v1462_v26 = vadd.f32 %v2054_v15, %v2052_v13  ;;  %v2133_v15 = vld [vmem:[#allocation2_spill] sm:$0xff] }
 0x113   :  { %2130 = vst [vmem:[#allocation5_spill] sm:$0xff] %v2068_v28  ;;  %v1432_v29 = vpop.f32.mrf.mxu0  ;;  %v860_v28 = vadd.f32 %v1345_v36, %v1207_v30  ;;  %v949_v36 = vadd.f32 %v1403_v49, %v884_v60  ;;  %v1060_v30 = vadd.f32 %v1468_v61, %v995_v22 }
 0x114   :  { %v2073_v32 = vpop.f32.mrf.mxu1 }
 0x115   :  { %v1433_v33 = vpop.f32.mrf.mxu0  ;;  %v925_v27 = vadd.f32 %v1385_v48, %v860_v28  ;;  %v998_v28 = vadd.f32 %v1431_v0, %v933_v20  ;;  %v2134_v48 = vld [vmem:[#allocation3_spill] sm:$0xff] }
 0x116   :  { %v1473_v37 = vpop.f32.mrf.mxu1  ;;  %v1434_v51 = vadd.f32 %v1433_v33, %v1432_v29  ;;  %v1465_v50 = vadd.f32 %v2134_v48, %v2133_v15 }
 0x117   :  { %v1435_v38 = vpop.f32.mrf.mxu0  ;;  %v1474_v33 = vadd.f32 %v1473_v37, %v2073_v32  ;;  %v990_v21 = vadd.f32 %v1425_v14, %v925_v27 }
 0x118   :  { %v2075_v44 = vpop.f32.mrf.mxu1  ;;  %v1003_v11 = vadd.f32 %v1434_v51, %v938_v34  ;;  %v2131_v23 = vld [vmem:[#allocation4_spill] sm:$0xff] }
 0x119   :  { %v1436_v46 = vpop.f32.mrf.mxu0 }
 0x11a   :  { %v2077_v54 = vpop.f32.mrf.mxu1  ;;  %v1437_v19 = vadd.f32 %v1436_v46, %v1435_v38  ;;  %v2132_v40 = vld [vmem:[#allocation5_spill] sm:$0xff]  ;;  %v1052_v38 = vadd.f32 %v1462_v26, %v987_v12  ;;  %v1068_v52 = vadd.f32 %v1474_v33, %v1003_v11 }
 0x11b   :  { %v1438_v25 = vpop.f32.mrf.mxu0  ;;  %v1471_v41 = vadd.f32 %v2132_v40, %v2131_v23  ;;  %v1477_v45 = vadd.f32 %v2077_v54, %v2075_v44 }
 0x11c   :  { %v1478_v62 = vpop.f32.mrf.mxu1  ;;  %v1006_v42 = vadd.f32 %v1437_v19, %v941_v17 }
 0x11d   :  { %v1439_v6 = vpop.f32.mrf.mxu0  ;;  %v1063_v37 = vadd.f32 %v1471_v41, %v998_v28 }
 0x11e   :  { %v1440_v55 = vadd.f32 %v1439_v6, %v1438_v25  ;;  %v1479_v5 = vpop.f32.mrf.mxu1  ;;  %v1071_v31 = vadd.f32 %v1477_v45, %v1006_v42 }
 0x11f   :  { %v1441_v7 = vpop.f32.mrf.mxu0  ;;  %v1480_v39 = vadd.f32 %v1479_v5, %v1478_v62 }
 0x120   :  { %v1011_v2 = vadd.f32 %v1440_v55, %v946_v10  ;;  %v1481_v57 = vpop.f32.mrf.mxu1  ;;  %v1055_v10 = vadd.f32 %v1465_v50, %v990_v21 }
 0x121   :  { %v1442_v59 = vpop.f32.mrf.mxu0 }
 0x122   :  { %v1443_v63 = vadd.f32 %v1442_v59, %v1441_v7  ;;  %v1482_v24 = vpop.f32.mrf.mxu1  ;;  %v1076_v25 = vadd.f32 %v1480_v39, %v1011_v2 }
 0x123   :  { %v1483_v16 = vadd.f32 %v1482_v24, %v1481_v57 }
 0x124   :  { %v1014_v29 = vadd.f32 %v1443_v63, %v949_v36  ;;  %v1514_v18 = vpop.f32.mrf.mxu0 }
 0x125   :  { %v1125_v1 = vadd.f32 %v1514_v18, %v1060_v30  ;;  %v1518_v3 = vpop.f32.mrf.mxu1 }
 0x126   :  { %v1141_v43 = vadd.f32 %v1518_v3, %v1076_v25  ;;  %v1116_v46 = vpop.f32.mrf.mxu0  ;;  %v1079_v13 = vadd.f32 %v1483_v16, %v1014_v29 }
 0x127   :  { %v1318_v4 = vmul.f32 -1.442695, %v1125_v1  ;;  %v1117_v56 = vadd.f32 %v1116_v46, %v1052_v38  ;;  %v1132_v32 = vpop.f32.mrf.mxu1 }
 0x128   :  { %v1322_v47 = vmul.f32 -1.442695, %v1141_v43  ;;  %v1133_v58 = vadd.f32 %v1132_v32, %v1068_v52  ;;  %v1515_v60 = vpop.f32.mrf.mxu0 }
 0x129   :  { %1660 = vpow2.f32 %v1318_v4  ;;  %v1316_v62 = vmul.f32 -1.442695, %v1117_v56  ;;  %v1128_v6 = vadd.f32 %v1515_v60, %v1063_v37  ;;  %v1519_v8 = vpop.f32.mrf.mxu1 }
 0x12a   :  { %1662 = vpow2.f32 %v1322_v47  ;;  %v1320_v53 = vmul.f32 -1.442695, %v1133_v58  ;;  %v1144_v55 = vadd.f32 %v1519_v8, %v1079_v13  ;;  %v1119_v27 = vpop.f32.mrf.mxu0 }
 0x12b   :  { %1664 = vpow2.f32 %v1316_v62  ;;  %v1319_v49 = vmul.f32 -1.442695, %v1128_v6  ;;  %v1120_v51 = vadd.f32 %v1119_v27, %v1055_v10  ;;  %v1135_v5 = vpop.f32.mrf.mxu1 }
 0x12c   :  { %1666 = vpow2.f32 %v1320_v53  ;;  %v1323_v7 = vmul.f32 -1.442695, %v1144_v55  ;;  %v1136_v44 = vadd.f32 %v1135_v5, %v1071_v31 }
 0x12d   :  { %1668 = vpow2.f32 %v1319_v49  ;;  %v1317_v54 = vmul.f32 -1.442695, %v1120_v51 }
 0x12e   :  { %1670 = vpow2.f32 %v1323_v7  ;;  %v1321_v20 = vmul.f32 -1.442695, %v1136_v44 }
 0x12f   :  { %1672 = vpow2.f32 %v1317_v54 }
 0x130   :  { %1674 = vpow2.f32 %v1321_v20 }
 0x136   :  { %v1661_v22 = vpop.eup %1660 }
 0x137   :  { %v1663_v0 = vpop.eup %1662  ;;  %v1173_v2 = vadd.f32 1.0, %v1661_v22 }
 0x138   :  { %v1665_v34 = vpop.eup %1664  ;;  %v1177_v35 = vadd.f32 1.0, %v1663_v0 }
 0x139   :  { %v1667_v36 = vpop.eup %1666  ;;  %1676 = vrcp.f32 %v1173_v2  ;;  %v1171_v39 = vadd.f32 1.0, %v1665_v34 }
 0x13a   :  { %v1669_v57 = vpop.eup %1668  ;;  %1678 = vrcp.f32 %v1177_v35  ;;  %v1175_v59 = vadd.f32 1.0, %v1667_v36 }
 0x13b   :  { %v1671_v12 = vpop.eup %1670  ;;  %1680 = vrcp.f32 %v1171_v39  ;;  %v1174_v14 = vadd.f32 1.0, %v1669_v57 }
 0x13c   :  { %v1673_v61 = vpop.eup %1672  ;;  %1682 = vrcp.f32 %v1175_v59  ;;  %v1178_v63 = vadd.f32 1.0, %v1671_v12 }
 0x13d   :  { %v1675_v9 = vpop.eup %1674  ;;  %1684 = vrcp.f32 %v1174_v14  ;;  %v1172_v11 = vadd.f32 1.0, %v1673_v61 }
 0x13e   :  { %1686 = vrcp.f32 %v1178_v63  ;;  %v1176_v19 = vadd.f32 1.0, %v1675_v9 }
 0x13f   :  { %1688 = vrcp.f32 %v1172_v11 }
 0x140   :  { %1690 = vrcp.f32 %v1176_v19 }
 0x146   :  { %v1677_v24 = vpop.eup %1676 }
 0x147   :  { %v1679_v25 = vpop.eup %1678  ;;  %1197 = vst [vmem:[%s2126_s3 + $0x10] sm:$0xff] %v1677_v24 }
 0x148   :  { %v1681_v26 = vpop.eup %1680  ;;  %1201 = vst [vmem:[%s2126_s3 + $0x30] sm:$0xff] %v1679_v25 }
 0x149   :  { %v1683_v28 = vpop.eup %1682  ;;  %1195 = vst [vmem:[%s2126_s3] sm:$0xff] %v1681_v26 }
 0x14a   :  { %v1685_v29 = vpop.eup %1684  ;;  %1199 = vst [vmem:[%s2126_s3 + $0x20] sm:$0xff] %v1683_v28 }
 0x14b   :  { %v1687_v30 = vpop.eup %1686  ;;  %1198 = vst [vmem:[%s2126_s3 + $0x18] sm:$0xff] %v1685_v29 }
 0x14c   :  { %v1689_v17 = vpop.eup %1688  ;;  %1202 = vst [vmem:[%s2126_s3 + $0x38] sm:$0xff] %v1687_v30 }
 0x14d   :  { %v1691_v33 = vpop.eup %1690  ;;  %1196 = vst [vmem:[%s2126_s3 + $0x8] sm:$0xff] %v1689_v17 }
 0x14e   :  { %1200 = vst [vmem:[%s2126_s3 + $0x28] sm:$0xff] %v1691_v33 }

// kernel: _net_forward_impl.277
= control target key start
LH: loop header
LB: loop body
LE: loop exit
PB: predicated region body
PF: predicated region fallthrough
CT: control target
= control target key end

     0   :  { %s2059_s1 = inlined_call_operand.vmem [shape: bf16[1152,128], index: 1, kind: input, shape index: {}]   ;;  %s2060_s0 = inlined_call_operand.vmem [shape: bf16[64,1152], index: 0, kind: input, shape index: {}]   ;;  %s2061_s2 = inlined_call_operand.vmem [shape: f32[1,128], index: 2, kind: input, shape index: {}]   ;;  %s2062_s3 = inlined_call_operand.vmem [shape: f32[64,128], index: 3, kind: output, shape index: {}]  }
   0x1   :  { %v1488_v0 = vld [vmem:[%s2059_s1 + $0x78] sm:$0xff]   ;;  %v1492_v4 = vld [vmem:[%s2059_s1 + $0x70] sm:$0xff]   ;;  %v1496_v8 = vld [vmem:[%s2059_s1 + $0x68] sm:$0xff]  }
   0x2   :  { %v1489_v1 = vld [vmem:[%s2059_s1 + $0xf8] sm:$0xff]   ;;  %1276 = vmatprep.subr.bf16.mxu0 %v1488_v0  ;;  %v1493_v5 = vld [vmem:[%s2059_s1 + $0xf0] sm:$0xff]   ;;  %v1497_v9 = vld [vmem:[%s2059_s1 + $0xe8] sm:$0xff]  }
   0x3   :  { %v1490_v2 = vld [vmem:[%s2059_s1 + $0x38] sm:$0xff]   ;;  %1316 = vmatprep.subr.bf16.mxu1 %v1489_v1  ;;  %v1494_v6 = vld [vmem:[%s2059_s1 + $0x30] sm:$0xff]   ;;  %v1498_v10 = vld [vmem:[%s2059_s1 + $0x28] sm:$0xff]  }
   0x4   :  { %v1491_v3 = vld [vmem:[%s2059_s1 + $0xb8] sm:$0xff]   ;;  %1277 = vmatpush3.bf16.msra.mxu0 %v1490_v2  ;;  %v1495_v7 = vld [vmem:[%s2059_s1 + $0xb0] sm:$0xff]   ;;  %v1499_v11 = vld [vmem:[%s2059_s1 + $0xa8] sm:$0xff]  }
   0x5   :  { %1317 = vmatpush3.bf16.msra.mxu1 %v1491_v3  ;;  %1278 = vmatprep.subr.bf16.mxu0 %v1492_v4  ;;  %v1500_v12 = vld [vmem:[%s2059_s1 + $0x60] sm:$0xff]   ;;  %v1504_v16 = vld [vmem:[%s2059_s1 + $0x58] sm:$0xff]   ;;  %v1508_v20 = vld [vmem:[%s2059_s1 + $0x50] sm:$0xff]  }
   0x6   :  { %1318 = vmatprep.subr.bf16.mxu1 %v1493_v5  ;;  %v1501_v13 = vld [vmem:[%s2059_s1 + $0xe0] sm:$0xff]   ;;  %v1505_v17 = vld [vmem:[%s2059_s1 + $0xd8] sm:$0xff]   ;;  %v1509_v21 = vld [vmem:[%s2059_s1 + $0xd0] sm:$0xff]  }
   0x7   :  { %v1502_v14 = vld [vmem:[%s2059_s1 + $0x20] sm:$0xff]   ;;  %v1506_v18 = vld [vmem:[%s2059_s1 + $0x18] sm:$0xff]   ;;  %v1510_v22 = vld [vmem:[%s2059_s1 + $0x10] sm:$0xff]  }
   0x8   :  { %1279 = vmatpush3.bf16.msra.mxu0 %v1494_v6  ;;  %v1503_v15 = vld [vmem:[%s2059_s1 + $0xa0] sm:$0xff]   ;;  %v1507_v19 = vld [vmem:[%s2059_s1 + $0x98] sm:$0xff]   ;;  %v1511_v23 = vld [vmem:[%s2059_s1 + $0x90] sm:$0xff]  }
   0x9   :  { %1319 = vmatpush3.bf16.msra.mxu1 %v1495_v7  ;;  %1280 = vmatprep.subr.bf16.mxu0 %v1496_v8  ;;  %v1512_v24 = vld [vmem:[%s2059_s1 + $0x48] sm:$0xff]   ;;  %v1516_v28 = vld [vmem:[%s2059_s1 + $0x40] sm:$0xff]   ;;  %v1526_v36 = vld [vmem:[%s2059_s1 + $0x178] sm:$0xff]  }
   0xa   :  { %1320 = vmatprep.subr.bf16.mxu1 %v1497_v9  ;;  %v1513_v25 = vld [vmem:[%s2059_s1 + $0xc8] sm:$0xff]   ;;  %v1517_v29 = vld [vmem:[%s2059_s1 + $0xc0] sm:$0xff]   ;;  %v1527_v37 = vld [vmem:[%s2059_s1 + $0x1f8] sm:$0xff]  }
   0xb   :  { %v1514_v26 = vld [vmem:[%s2059_s1 + $0x8] sm:$0xff]   ;;  %v1518_v30 = vld [vmem:[%s2059_s1] sm:$0xff]   ;;  %v1528_v38 = vld [vmem:[%s2059_s1 + $0x138] sm:$0xff]  }
   0xc   :  { %1281 = vmatpush3.bf16.msra.mxu0 %v1498_v10  ;;  %v1515_v27 = vld [vmem:[%s2059_s1 + $0x88] sm:$0xff]   ;;  %v1519_v31 = vld [vmem:[%s2059_s1 + $0x80] sm:$0xff]   ;;  %v1529_v39 = vld [vmem:[%s2059_s1 + $0x1b8] sm:$0xff]  }
   0xd   :  { %1321 = vmatpush3.bf16.msra.mxu1 %v1499_v11  ;;  %1282 = vmatprep.subr.bf16.mxu0 %v1500_v12  ;;  %v1520_v32 = vld [vmem:[%s2060_s0] ss:$36 sps:$4 sm:$0xff]   ;;  %v1523_v34 = vld [vmem:[%s2060_s0 + $0x8] ss:$36 sps:$4 sm:$0xff]   ;;  %v1530_v40 = vld [vmem:[%s2059_s1 + $0x170] sm:$0xff]  }
   0xe   :  { %1322 = vmatprep.subr.bf16.mxu1 %v1501_v13  ;;  %v1522_v33 = vld [vmem:[%s2060_s0 + $0x4] ss:$36 sps:$4 sm:$0xff]   ;;  %v1525_v35 = vld [vmem:[%s2060_s0 + $0xc] ss:$36 sps:$4 sm:$0xff]   ;;  %v1536_v45 = vld [vmem:[%s2060_s0 + $0x54] ss:$36 sps:$4 sm:$0xff]  }
   0xf   :  { %854 = vmatprep.mubr.bf16.mxu0 %v1522_v33  ;;  %919 = vmatprep.mubr.bf16.mxu1 %v1525_v35  ;;  %v1531_v41 = vld [vmem:[%s2059_s1 + $0x1f0] sm:$0xff]   ;;  %v1538_v46 = vld [vmem:[%s2060_s0 + $0x48] ss:$36 sps:$4 sm:$0xff]   ;;  %v1544_v52 = vld [vmem:[%s2059_s1 + $0x160] sm:$0xff]  }
  0x10   :  { %1283 = vmatpush3.bf16.msra.mxu0 %v1502_v14  ;;  %v1532_v42 = vld [vmem:[%s2059_s1 + $0x130] sm:$0xff]   ;;  %v1540_v48 = vld [vmem:[%s2059_s1 + $0x168] sm:$0xff]   ;;  %v1545_v53 = vld [vmem:[%s2059_s1 + $0x1e0] sm:$0xff]  }
  0x11   :  { %1323 = vmatpush3.bf16.msra.mxu1 %v1503_v15  ;;  %1284 = vmatprep.subr.bf16.mxu0 %v1504_v16  ;;  %v1533_v43 = vld [vmem:[%s2059_s1 + $0x1b0] sm:$0xff]   ;;  %v1541_v49 = vld [vmem:[%s2059_s1 + $0x1e8] sm:$0xff]   ;;  %v1546_v54 = vld [vmem:[%s2059_s1 + $0x120] sm:$0xff]  }
  0x12   :  { %1324 = vmatprep.subr.bf16.mxu1 %v1505_v17  ;;  %v1534_v44 = vld [vmem:[%s2060_s0 + $0x4c] ss:$36 sps:$4 sm:$0xff]   ;;  %v1547_v55 = vld [vmem:[%s2059_s1 + $0x1a0] sm:$0xff]   ;;  %v1548_v56 = vld [vmem:[%s2060_s0 + $0x94] ss:$36 sps:$4 sm:$0xff]  }
  0x13   :  { %v1539_v47 = vld [vmem:[%s2060_s0 + $0x50] ss:$36 sps:$4 sm:$0xff]   ;;  %v1542_v50 = vld [vmem:[%s2059_s1 + $0x128] sm:$0xff]   ;;  %v1550_v57 = vld [vmem:[%s2060_s0 + $0x9c] ss:$36 sps:$4 sm:$0xff]  }
  0x14   :  { %1285 = vmatpush3.bf16.msra.mxu0 %v1506_v18  ;;  %v1543_v51 = vld [vmem:[%s2059_s1 + $0x1a8] sm:$0xff]   ;;  %v1552_v58 = vld [vmem:[%s2060_s0 + $0x90] ss:$36 sps:$4 sm:$0xff]   ;;  %v1553_v59 = vld [vmem:[%s2060_s0 + $0x98] ss:$36 sps:$4 sm:$0xff]  }
  0x15   :  { %1325 = vmatpush3.bf16.msra.mxu1 %v1507_v19  ;;  %1286 = vmatprep.subr.bf16.mxu0 %v1508_v20  ;;  %v1554_v60 = vld [vmem:[%s2059_s1 + $0x158] sm:$0xff]   ;;  %v1558_v0 = vld [vmem:[%s2059_s1 + $0x150] sm:$0xff]   ;;  %v1564_v5 = vld [vmem:[%s2060_s0 + $0xe4] ss:$36 sps:$4 sm:$0xff]  }
  0x16   :  { %1326 = vmatprep.subr.bf16.mxu1 %v1509_v21  ;;  %v1555_v61 = vld [vmem:[%s2059_s1 + $0x1d8] sm:$0xff]   ;;  %v1559_v1 = vld [vmem:[%s2059_s1 + $0x1d0] sm:$0xff]   ;;  %v1567_v7 = vld [vmem:[%s2060_s0 + $0xe0] ss:$36 sps:$4 sm:$0xff]  }
  0x17   :  { %v1556_v62 = vld [vmem:[%s2059_s1 + $0x118] sm:$0xff]   ;;  %v1560_v2 = vld [vmem:[%s2059_s1 + $0x110] sm:$0xff]   ;;  %v1568_v8 = vld [vmem:[%s2059_s1 + $0x148] sm:$0xff]  }
  0x18   :  { %1287 = vmatpush3.bf16.msra.mxu0 %v1510_v22  ;;  %v1557_v63 = vld [vmem:[%s2059_s1 + $0x198] sm:$0xff]   ;;  %v1561_v3 = vld [vmem:[%s2059_s1 + $0x190] sm:$0xff]   ;;  %v1569_v9 = vld [vmem:[%s2059_s1 + $0x1c8] sm:$0xff]  }
  0x19   :  { %1327 = vmatpush3.bf16.msra.mxu1 %v1511_v23  ;;  %1288 = vmatprep.subr.bf16.mxu0 %v1512_v24  ;;  %v1562_v4 = vld [vmem:[%s2060_s0 + $0xdc] ss:$36 sps:$4 sm:$0xff]   ;;  %v1570_v10 = vld [vmem:[%s2059_s1 + $0x108] sm:$0xff]   ;;  %v1576_v16 = vld [vmem:[%s2060_s0 + $0x10] ss:$36 sps:$4 sm:$0xff]  }
  0x1a   :  { %1328 = vmatprep.subr.bf16.mxu1 %v1513_v25  ;;  %v1566_v6 = vld [vmem:[%s2060_s0 + $0xd8] ss:$36 sps:$4 sm:$0xff]   ;;  %v1571_v11 = vld [vmem:[%s2059_s1 + $0x188] sm:$0xff]   ;;  %v1572_v12 = vld [vmem:[%s2059_s1 + $0x140] sm:$0xff]  }
  0x1b   :  { %v1573_v13 = vld [vmem:[%s2059_s1 + $0x1c0] sm:$0xff]   ;;  %v1578_v17 = vld [vmem:[%s2060_s0 + $0x14] ss:$36 sps:$4 sm:$0xff]   ;;  %v1600_v33 = vld [vmem:[%s2060_s0 + $0xec] ss:$36 sps:$4 sm:$0xff]  }
  0x1c   :  { %1289 = vmatpush3.bf16.msra.mxu0 %v1514_v26  ;;  %v1574_v14 = vld [vmem:[%s2059_s1 + $0x100] sm:$0xff]   ;;  %v1579_v18 = vld [vmem:[%s2060_s0 + $0x18] ss:$36 sps:$4 sm:$0xff]   ;;  %v1583_v21 = vld [vmem:[%s2059_s1 + $0x230] sm:$0xff]  }
  0x1d   :  { %1329 = vmatpush3.bf16.msra.mxu1 %v1515_v27  ;;  %1290 = vmatprep.subr.bf16.mxu0 %v1516_v28  ;;  %v1575_v15 = vld [vmem:[%s2059_s1 + $0x180] sm:$0xff]   ;;  %v1582_v20 = vld [vmem:[%s2059_s1 + $0x238] sm:$0xff]   ;;  %v1590_v26 = vld [vmem:[%s2059_s1 + $0x228] sm:$0xff]  }
  0x1e   :  { %1330 = vmatprep.subr.bf16.mxu1 %v1517_v29  ;;  %v1581_v19 = vld [vmem:[%s2060_s0 + $0x1c] ss:$36 sps:$4 sm:$0xff]   ;;  %v1586_v23 = vld [vmem:[%s2060_s0 + $0x64] ss:$36 sps:$4 sm:$0xff]   ;;  %v1594_v28 = vld [vmem:[%s2060_s0 + $0xac] ss:$36 sps:$4 sm:$0xff]  }
  0x1f   :  { %v1584_v22 = vld [vmem:[%s2060_s0 + $0x5c] ss:$36 sps:$4 sm:$0xff]   ;;  %v1592_v27 = vld [vmem:[%s2060_s0 + $0xa4] ss:$36 sps:$4 sm:$0xff]   ;;  %v1599_v35 = vld [vmem:[%s2059_s1 + $0x210] sm:$0xff]  }
  0x20   :  { %1291 = vmatpush3.bf16.msra.mxu0 %v1518_v30  ;;  %v1588_v24 = vld [vmem:[%s2060_s0 + $0x58] ss:$36 sps:$4 sm:$0xff]   ;;  %v1589_v25 = vld [vmem:[%s2060_s0 + $0x60] ss:$36 sps:$4 sm:$0xff]  }
  0x21   :  { %1331 = vmatpush3.bf16.msra.mxu1 %v1519_v31  ;;  %1356 = vmatprep.subr.bf16.mxu0 %v1526_v36  ;;  %v1591_v29 = vld [vmem:[%s2059_s1 + $0x220] sm:$0xff]   ;;  %v1597_v31 = vld [vmem:[%s2060_s0 + $0xa8] ss:$36 sps:$4 sm:$0xff]  }
  0x22   :  { %1396 = vmatprep.subr.bf16.mxu1 %v1527_v37  ;;  %v1596_v30 = vld [vmem:[%s2060_s0 + $0xa0] ss:$36 sps:$4 sm:$0xff]   ;;  %v1604_v36 = vld [vmem:[%s2060_s0 + $0xe8] ss:$36 sps:$4 sm:$0xff]  }
  0x23   :  { %855 = vmatmul.mubr.bf16.vlgmr.msra.gmra.mxu0 %v1520_v32  ;;  %v1598_v32 = vld [vmem:[%s2059_s1 + $0x218] sm:$0xff]   ;;  %v1606_v37 = vld [vmem:[%s2059_s1 + $0x208] sm:$0xff]  }
  0x24   :  { %920 = vmatmul.mubr.bf16.vlgmr.msra.gmra.mxu1 %v1523_v34  ;;  %1357 = vmatpush3.bf16.msra.mxu0 %v1528_v38  ;;  %v1602_v34 = vld [vmem:[%s2060_s0 + $0xf4] ss:$36 sps:$4 sm:$0xff]  }
  0x25   :  { %1397 = vmatpush3.bf16.msra.mxu1 %v1529_v39  ;;  %1358 = vmatprep.subr.bf16.mxu0 %v1530_v40  ;;  %v1605_v38 = vld [vmem:[%s2060_s0 + $0xf0] ss:$36 sps:$4 sm:$0xff]   ;;  %v1608_v39 = vld [vmem:[%s2060_s0 + $0x20] ss:$36 sps:$4 sm:$0xff]  }
  0x26   :  { %1398 = vmatprep.subr.bf16.mxu1 %v1531_v41  ;;  %862 = vmatprep.mubr.bf16.mxu0 %v1534_v44  ;;  %v1609_v40 = vld [vmem:[%s2060_s0 + $0xb0] ss:$36 sps:$4 sm:$0xff]   ;;  %v1607_v41 = vld [vmem:[%s2059_s1 + $0x200] sm:$0xff]  }
  0x27   :  { %927 = vmatprep.mubr.bf16.mxu1 %v1536_v45 }
  0x28   :  { %1359 = vmatpush3.bf16.msra.mxu0 %v1532_v42  ;;  %v1610_v42 = vld [vmem:[%s2060_s0 + $0x68] ss:$36 sps:$4 sm:$0xff]  }
  0x29   :  { %1399 = vmatpush3.bf16.msra.mxu1 %v1533_v43  ;;  %1360 = vmatprep.subr.bf16.mxu0 %v1540_v48  ;;  %v1611_v43 = vld [vmem:[%s2060_s0 + $0xf8] ss:$36 sps:$4 sm:$0xff]  }
  0x2a   :  { %1400 = vmatprep.subr.bf16.mxu1 %v1541_v49 }
  0x2b   :  { %863 = vmatmul.mubr.bf16.gmra.mxu0 %v1538_v46 }
  0x2c   :  { %928 = vmatmul.mubr.bf16.gmra.mxu1 %v1539_v47  ;;  %1361 = vmatpush3.bf16.msra.mxu0 %v1542_v50 }
  0x2d   :  { %1401 = vmatpush3.bf16.msra.mxu1 %v1543_v51  ;;  %1362 = vmatprep.subr.bf16.mxu0 %v1544_v52 }
  0x2e   :  { %1402 = vmatprep.subr.bf16.mxu1 %v1545_v53  ;;  %870 = vmatprep.mubr.bf16.mxu0 %v1548_v56 }
  0x2f   :  { %935 = vmatprep.mubr.bf16.mxu1 %v1550_v57 }
  0x30   :  { %1363 = vmatpush3.bf16.msra.mxu0 %v1546_v54 }
  0x31   :  { %1403 = vmatpush3.bf16.msra.mxu1 %v1547_v55  ;;  %1364 = vmatprep.subr.bf16.mxu0 %v1554_v60 }
  0x32   :  { %1404 = vmatprep.subr.bf16.mxu1 %v1555_v61 }
  0x33   :  { %871 = vmatmul.mubr.bf16.gmra.mxu0 %v1552_v58 }
  0x34   :  { %936 = vmatmul.mubr.bf16.gmra.mxu1 %v1553_v59  ;;  %1365 = vmatpush3.bf16.msra.mxu0 %v1556_v62 }
  0x35   :  { %1405 = vmatpush3.bf16.msra.mxu1 %v1557_v63  ;;  %1366 = vmatprep.subr.bf16.mxu0 %v1558_v0 }
  0x36   :  { %1406 = vmatprep.subr.bf16.mxu1 %v1559_v1  ;;  %878 = vmatprep.mubr.bf16.mxu0 %v1562_v4 }
  0x37   :  { %943 = vmatprep.mubr.bf16.mxu1 %v1564_v5 }
  0x38   :  { %1367 = vmatpush3.bf16.msra.mxu0 %v1560_v2 }
  0x39   :  { %1407 = vmatpush3.bf16.msra.mxu1 %v1561_v3  ;;  %1368 = vmatprep.subr.bf16.mxu0 %v1568_v8 }
  0x3a   :  { %1408 = vmatprep.subr.bf16.mxu1 %v1569_v9 }
  0x3b   :  { %879 = vmatmul.mubr.bf16.gmra.mxu0 %v1566_v6 }
  0x3c   :  { %944 = vmatmul.mubr.bf16.gmra.mxu1 %v1567_v7  ;;  %1369 = vmatpush3.bf16.msra.mxu0 %v1570_v10 }
  0x3d   :  { %1409 = vmatpush3.bf16.msra.mxu1 %v1571_v11  ;;  %1370 = vmatprep.subr.bf16.mxu0 %v1572_v12 }
  0x3e   :  { %1410 = vmatprep.subr.bf16.mxu1 %v1573_v13  ;;  %984 = vmatprep.mubr.bf16.mxu0 %v1578_v17 }
  0x3f   :  { %1049 = vmatprep.mubr.bf16.mxu1 %v1581_v19 }
  0x40   :  { %1371 = vmatpush3.bf16.msra.mxu0 %v1574_v14 }
  0x41   :  { %1411 = vmatpush3.bf16.msra.mxu1 %v1575_v15  ;;  %1448 = vmatprep.subr.bf16.mxu0 %v1582_v20 }
  0x42   :  { %1472 = vmatprep.subr.bf16.mxu1 %v1582_v20 }
  0x43   :  { %985 = vmatmul.mubr.bf16.vlgmr.msra.gmra.mxu0 %v1576_v16 }
  0x44   :  { %1050 = vmatmul.mubr.bf16.vlgmr.msra.gmra.mxu1 %v1579_v18  ;;  %1449 = vmatpush3.bf16.msra.mxu0 %v1582_v20 }
  0x45   :  { %1480 = vmatpush3.bf16.msra.mxu1 %v1582_v20  ;;  %1450 = vmatprep.subr.bf16.mxu0 %v1583_v21 }
  0x46   :  { %1473 = vmatprep.subr.bf16.mxu1 %v1583_v21  ;;  %992 = vmatprep.mubr.bf16.mxu0 %v1584_v22 }
  0x47   :  { %1057 = vmatprep.mubr.bf16.mxu1 %v1586_v23 }
  0x48   :  { %1451 = vmatpush3.bf16.msra.mxu0 %v1583_v21 }
  0x49   :  { %1481 = vmatpush3.bf16.msra.mxu1 %v1583_v21  ;;  %1452 = vmatprep.subr.bf16.mxu0 %v1590_v26 }
  0x4a   :  { %1474 = vmatprep.subr.bf16.mxu1 %v1590_v26 }
  0x4b   :  { %993 = vmatmul.mubr.bf16.gmra.mxu0 %v1588_v24 }
  0x4c   :  { %1058 = vmatmul.mubr.bf16.gmra.mxu1 %v1589_v25  ;;  %1000 = vmatprep.mubr.bf16.mxu0 %v1592_v27 }
  0x4d   :  { %1453 = vmatpush3.bf16.msra.mxu0 %v1590_v26  ;;  %1065 = vmatprep.mubr.bf16.mxu1 %v1594_v28 }
  0x4e   :  { %1482 = vmatpush3.bf16.msra.mxu1 %v1590_v26  ;;  %1454 = vmatprep.subr.bf16.mxu0 %v1591_v29 }
  0x4f   :  { %1475 = vmatprep.subr.bf16.mxu1 %v1591_v29 }
  0x51   :  { %1455 = vmatpush3.bf16.msra.mxu0 %v1591_v29 }
  0x52   :  { %1483 = vmatpush3.bf16.msra.mxu1 %v1591_v29  ;;  %1456 = vmatprep.subr.bf16.mxu0 %v1598_v32 }
  0x53   :  { %1001 = vmatmul.mubr.bf16.gmra.mxu0 %v1596_v30  ;;  %1476 = vmatprep.subr.bf16.mxu1 %v1598_v32  ;;  %v1167_v30 = vld [vmem:[%s2061_s2] ss:$0 sm:$0xff] }
  0x54   :  { %1066 = vmatmul.mubr.bf16.gmra.mxu1 %v1597_v31  ;;  %1008 = vmatprep.mubr.bf16.mxu0 %v1600_v33 }
  0x55   :  { %1457 = vmatpush3.bf16.msra.mxu0 %v1598_v32  ;;  %1073 = vmatprep.mubr.bf16.mxu1 %v1602_v34 }
  0x56   :  { %1484 = vmatpush3.bf16.msra.mxu1 %v1598_v32  ;;  %1458 = vmatprep.subr.bf16.mxu0 %v1599_v35 }
  0x57   :  { %1477 = vmatprep.subr.bf16.mxu1 %v1599_v35 }
  0x59   :  { %1459 = vmatpush3.bf16.msra.mxu0 %v1599_v35 }
  0x5a   :  { %1485 = vmatpush3.bf16.msra.mxu1 %v1599_v35  ;;  %1460 = vmatprep.subr.bf16.mxu0 %v1606_v37 }
  0x5b   :  { %1009 = vmatmul.mubr.bf16.gmra.mxu0 %v1604_v36  ;;  %1478 = vmatprep.subr.bf16.mxu1 %v1606_v37 }
  0x5c   :  { %1074 = vmatmul.mubr.bf16.gmra.mxu1 %v1605_v38  ;;  %1464 = vmatprep.mubr.bf16.mxu0 %v1608_v39 }
  0x5d   :  { %1461 = vmatpush3.bf16.msra.mxu0 %v1606_v37  ;;  %1468 = vmatprep.mubr.bf16.mxu1 %v1609_v40 }
  0x5e   :  { %1486 = vmatpush3.bf16.msra.mxu1 %v1606_v37  ;;  %1462 = vmatprep.subr.bf16.mxu0 %v1607_v41 }
  0x5f   :  { %1479 = vmatprep.subr.bf16.mxu1 %v1607_v41 }
  0x61   :  { %1463 = vmatpush3.bf16.msra.mxu0 %v1607_v41 }
  0x62   :  { %1487 = vmatpush3.bf16.msra.mxu1 %v1607_v41 }
  0x64   :  { %1465 = vmatmul.mubr.bf16.vlgmr.msra.gmra.mxu0 %v1610_v42 }
  0x65   :  { %1469 = vmatmul.mubr.bf16.vlgmr.msra.gmra.mxu1 %v1611_v43 }
  0xe3   :  { %v1292_v44 = vpop.f32.mrf.mxu0 }
  0xe4   :  { %v1332_v45 = vpop.f32.mrf.mxu1 }
  0xe5   :  { %v1293_v46 = vpop.f32.mrf.mxu0 }
  0xe6   :  { %v1333_v47 = vpop.f32.mrf.mxu1  ;;  %v1294_v27 = vadd.f32 %v1293_v46, %v1292_v44 }
  0xe7   :  { %v1295_v48 = vpop.f32.mrf.mxu0  ;;  %v1334_v40 = vadd.f32 %v1333_v47, %v1332_v45 }
  0xe8   :  { %v1972_v49 = vpop.f32.mrf.mxu1  ;;  %v857_v35 = vadd.f32 %v1294_v27, %v1167_v30 }
  0xe9   :  { %v1296_v50 = vpop.f32.mrf.mxu0 }
  0xea   :  { %v1974_v51 = vpop.f32.mrf.mxu1  ;;  %v1297_v36 = vadd.f32 %v1296_v50, %v1295_v48 }
  0xeb   :  { %v1298_v52 = vpop.f32.mrf.mxu0  ;;  %v1337_v48 = vadd.f32 %v1974_v51, %v1972_v49 }
  0xec   :  { %v1338_v53 = vpop.f32.mrf.mxu1 }
  0xed   :  { %v1299_v54 = vpop.f32.mrf.mxu0 }
  0xee   :  { %v1339_v55 = vpop.f32.mrf.mxu1  ;;  %v1300_v31 = vadd.f32 %v1299_v54, %v1298_v52 }
  0xef   :  { %v1301_v56 = vpop.f32.mrf.mxu0  ;;  %v1340_v52 = vadd.f32 %v1339_v55, %v1338_v53 }
  0xf0   :  { %v1976_v57 = vpop.f32.mrf.mxu1  ;;  %v865_v41 = vadd.f32 %v1300_v31, %v1167_v30 }
  0xf1   :  { %v1302_v58 = vpop.f32.mrf.mxu0 }
  0xf2   :  { %v1978_v59 = vpop.f32.mrf.mxu1  ;;  %v1303_v39 = vadd.f32 %v1302_v58, %v1301_v56  ;;  %v930_v45 = vadd.f32 %v1340_v52, %v865_v41 }
  0xf3   :  { %v1304_v60 = vpop.f32.mrf.mxu0 }
  0xf4   :  { %v1980_v61 = vpop.f32.mrf.mxu1  ;;  %v868_v50 = vadd.f32 %v1303_v39, %v1167_v30 }
  0xf5   :  { %v1305_v62 = vpop.f32.mrf.mxu0 }
  0xf6   :  { %v1982_v63 = vpop.f32.mrf.mxu1  ;;  %v1306_v42 = vadd.f32 %v1305_v62, %v1304_v60 }
  0xf7   :  { %v1307_v0 = vpop.f32.mrf.mxu0  ;;  %v1346_v31 = vadd.f32 %v1982_v63, %v1980_v61 }
  0xf8   :  { %v1984_v1 = vpop.f32.mrf.mxu1  ;;  %v873_v47 = vadd.f32 %v1306_v42, %v1167_v30 }
  0xf9   :  { %v1308_v2 = vpop.f32.mrf.mxu0 }
  0xfa   :  { %v1986_v3 = vpop.f32.mrf.mxu1  ;;  %v1309_v58 = vadd.f32 %v1308_v2, %v1307_v0 }
  0xfb   :  { %v1310_v4 = vpop.f32.mrf.mxu0 }
  0xfc   :  { %v1350_v5 = vpop.f32.mrf.mxu1 }
  0xfd   :  { %v1311_v6 = vpop.f32.mrf.mxu0 }
  0xfe   :  { %v1351_v7 = vpop.f32.mrf.mxu1  ;;  %v1312_v34 = vadd.f32 %v1311_v6, %v1310_v4 }
  0xff   :  { %v1313_v8 = vpop.f32.mrf.mxu0  ;;  %v1352_v4 = vadd.f32 %v1351_v7, %v1350_v5 }
 0x100   :  { %v1353_v9 = vpop.f32.mrf.mxu1 }
 0x101   :  { %v1314_v10 = vpop.f32.mrf.mxu0 }
 0x102   :  { %v1354_v11 = vpop.f32.mrf.mxu1  ;;  %v1315_v43 = vadd.f32 %v1314_v10, %v1313_v8  ;;  %v1343_v8 = vadd.f32 %v1978_v59, %v1976_v57 }
 0x103   :  { %v1372_v12 = vpop.f32.mrf.mxu0  ;;  %v1355_v49 = vadd.f32 %v1354_v11, %v1353_v9  ;;  %v1349_v9 = vadd.f32 %v1986_v3, %v1984_v1 }
 0x104   :  { %v1988_v13 = vpop.f32.mrf.mxu1  ;;  %v884_v60 = vadd.f32 %v1315_v43, %v1167_v30 }
 0x105   :  { %v1373_v14 = vpop.f32.mrf.mxu0 }
 0x106   :  { %v1990_v15 = vpop.f32.mrf.mxu1  ;;  %v1374_v53 = vadd.f32 %v1373_v14, %v1372_v12 }
 0x107   :  { %v1992_v16 = vpop.f32.mrf.mxu0 }
 0x108   :  { %v1994_v17 = vpop.f32.mrf.mxu1 }
 0x109   :  { %2063 = vst [vmem:[#allocation2_spill] sm:$0xff] %v1994_v17  ;;  %v1996_v18 = vpop.f32.mrf.mxu0  ;;  %v922_v17 = vadd.f32 %v1334_v40, %v857_v35  ;;  %v876_v35 = vadd.f32 %v1309_v58, %v1167_v30 }
 0x10a   :  { %v1998_v19 = vpop.f32.mrf.mxu1  ;;  %v1377_v14 = vadd.f32 %v1996_v18, %v1992_v16 }
 0x10b   :  { %2064 = vst [vmem:[#allocation3_spill] sm:$0xff] %v1998_v19  ;;  %v1378_v20 = vpop.f32.mrf.mxu0  ;;  %v881_v19 = vadd.f32 %v1312_v34, %v1167_v30  ;;  %v938_v34 = vadd.f32 %v1346_v31, %v873_v47  ;;  %v987_v12 = vadd.f32 %v1374_v53, %v922_v17  ;;  %v941_v17 = vadd.f32 %v1349_v9, %v876_v35 }
 0x10c   :  { %v2000_v21 = vpop.f32.mrf.mxu1 }
 0x10d   :  { %v1379_v22 = vpop.f32.mrf.mxu0  ;;  %v946_v10 = vadd.f32 %v1352_v4, %v881_v19 }
 0x10e   :  { %v1419_v23 = vpop.f32.mrf.mxu1  ;;  %v1380_v56 = vadd.f32 %v1379_v22, %v1378_v20  ;;  %v933_v20 = vadd.f32 %v1343_v8, %v868_v50 }
 0x10f   :  { %v1381_v24 = vpop.f32.mrf.mxu0  ;;  %v1420_v61 = vadd.f32 %v1419_v23, %v2000_v21 }
 0x110   :  { %v2002_v25 = vpop.f32.mrf.mxu1  ;;  %v995_v22 = vadd.f32 %v1380_v56, %v930_v45 }
 0x111   :  { %2065 = vst [vmem:[#allocation4_spill] sm:$0xff] %v2002_v25  ;;  %v1382_v26 = vpop.f32.mrf.mxu0 }
 0x112   :  { %v2004_v28 = vpop.f32.mrf.mxu1  ;;  %v1383_v0 = vadd.f32 %v1382_v26, %v1381_v24  ;;  %v1414_v26 = vadd.f32 %v1990_v15, %v1988_v13  ;;  %v2069_v15 = vld [vmem:[#allocation2_spill] sm:$0xff] }
 0x113   :  { %2066 = vst [vmem:[#allocation5_spill] sm:$0xff] %v2004_v28  ;;  %v1384_v29 = vpop.f32.mrf.mxu0  ;;  %v860_v28 = vadd.f32 %v1297_v36, %v1167_v30  ;;  %v949_v36 = vadd.f32 %v1355_v49, %v884_v60  ;;  %v1060_v30 = vadd.f32 %v1420_v61, %v995_v22 }
 0x114   :  { %v2009_v32 = vpop.f32.mrf.mxu1 }
 0x115   :  { %v1385_v33 = vpop.f32.mrf.mxu0  ;;  %v925_v27 = vadd.f32 %v1337_v48, %v860_v28  ;;  %v998_v28 = vadd.f32 %v1383_v0, %v933_v20  ;;  %v2070_v48 = vld [vmem:[#allocation3_spill] sm:$0xff] }
 0x116   :  { %v1425_v37 = vpop.f32.mrf.mxu1  ;;  %v1386_v51 = vadd.f32 %v1385_v33, %v1384_v29  ;;  %v1417_v50 = vadd.f32 %v2070_v48, %v2069_v15 }
 0x117   :  { %v1387_v38 = vpop.f32.mrf.mxu0  ;;  %v1426_v33 = vadd.f32 %v1425_v37, %v2009_v32  ;;  %v990_v21 = vadd.f32 %v1377_v14, %v925_v27 }
 0x118   :  { %v2011_v44 = vpop.f32.mrf.mxu1  ;;  %v1003_v11 = vadd.f32 %v1386_v51, %v938_v34  ;;  %v2067_v23 = vld [vmem:[#allocation4_spill] sm:$0xff] }
 0x119   :  { %v1388_v46 = vpop.f32.mrf.mxu0 }
 0x11a   :  { %v2013_v54 = vpop.f32.mrf.mxu1  ;;  %v1389_v19 = vadd.f32 %v1388_v46, %v1387_v38  ;;  %v2068_v40 = vld [vmem:[#allocation5_spill] sm:$0xff]  ;;  %v1052_v38 = vadd.f32 %v1414_v26, %v987_v12  ;;  %v1068_v52 = vadd.f32 %v1426_v33, %v1003_v11 }
 0x11b   :  { %v1390_v25 = vpop.f32.mrf.mxu0  ;;  %v1423_v41 = vadd.f32 %v2068_v40, %v2067_v23  ;;  %v1429_v56 = vadd.f32 %v2013_v54, %v2011_v44 }
 0x11c   :  { %v1430_v62 = vpop.f32.mrf.mxu1  ;;  %v1006_v42 = vadd.f32 %v1389_v19, %v941_v17 }
 0x11d   :  { %v1391_v6 = vpop.f32.mrf.mxu0  ;;  %v1063_v37 = vadd.f32 %v1423_v41, %v998_v28 }
 0x11e   :  { %v1392_v55 = vadd.f32 %v1391_v6, %v1390_v25  ;;  %v1431_v5 = vpop.f32.mrf.mxu1 }
 0x11f   :  { %v1393_v7 = vpop.f32.mrf.mxu0  ;;  %v1432_v39 = vadd.f32 %v1431_v5, %v1430_v62  ;;  %v1055_v62 = vadd.f32 %v1417_v50, %v990_v21 }
 0x120   :  { %v1011_v2 = vadd.f32 %v1392_v55, %v946_v10  ;;  %v1433_v57 = vpop.f32.mrf.mxu1  ;;  %v1071_v10 = vadd.f32 %v1429_v56, %v1006_v42 }
 0x121   :  { %v1394_v59 = vpop.f32.mrf.mxu0 }
 0x122   :  { %v1395_v63 = vadd.f32 %v1394_v59, %v1393_v7  ;;  %v1434_v24 = vpop.f32.mrf.mxu1  ;;  %v1076_v25 = vadd.f32 %v1432_v39, %v1011_v2 }
 0x123   :  { %v1435_v16 = vadd.f32 %v1434_v24, %v1433_v57 }
 0x124   :  { %v1014_v29 = vadd.f32 %v1395_v63, %v949_v36  ;;  %v1466_v18 = vpop.f32.mrf.mxu0 }
 0x125   :  { %v1125_v1 = vadd.f32 %v1466_v18, %v1060_v30  ;;  %v1470_v3 = vpop.f32.mrf.mxu1 }
 0x126   :  { %v1141_v43 = vadd.f32 %v1470_v3, %v1076_v25  ;;  %v1116_v46 = vpop.f32.mrf.mxu0  ;;  %v1079_v13 = vadd.f32 %v1435_v16, %v1014_v29 }
 0x127   :  { %1612 = vtanh.f32 %v1125_v1  ;;  %v1117_v4 = vadd.f32 %v1116_v46, %v1052_v38  ;;  %v1132_v32 = vpop.f32.mrf.mxu1 }
 0x128   :  { %1614 = vtanh.f32 %v1141_v43  ;;  %v1133_v45 = vadd.f32 %v1132_v32, %v1068_v52  ;;  %v1467_v47 = vpop.f32.mrf.mxu0 }
 0x129   :  { %1616 = vtanh.f32 %v1117_v4  ;;  %v1128_v58 = vadd.f32 %v1467_v47, %v1063_v37  ;;  %v1471_v60 = vpop.f32.mrf.mxu1 }
 0x12a   :  { %1618 = vtanh.f32 %v1133_v45  ;;  %v1144_v6 = vadd.f32 %v1471_v60, %v1079_v13  ;;  %v1119_v8 = vpop.f32.mrf.mxu0 }
 0x12b   :  { %1620 = vtanh.f32 %v1128_v58  ;;  %v1120_v53 = vadd.f32 %v1119_v8, %v1055_v62  ;;  %v1135_v55 = vpop.f32.mrf.mxu1 }
 0x12c   :  { %1622 = vtanh.f32 %v1144_v6  ;;  %v1136_v27 = vadd.f32 %v1135_v55, %v1071_v10 }
 0x12d   :  { %1624 = vtanh.f32 %v1120_v53 }
 0x12e   :  { %1626 = vtanh.f32 %v1136_v27 }
 0x134   :  { %v1613_v31 = vpop.eup %1612 }
 0x135   :  { %v1615_v44 = vpop.eup %1614  ;;  %1157 = vst [vmem:[%s2062_s3 + $0x10] sm:$0xff] %v1613_v31 }
 0x136   :  { %v1617_v54 = vpop.eup %1616  ;;  %1161 = vst [vmem:[%s2062_s3 + $0x30] sm:$0xff] %v1615_v44 }
 0x137   :  { %v1619_v49 = vpop.eup %1618  ;;  %1155 = vst [vmem:[%s2062_s3] sm:$0xff] %v1617_v54 }
 0x138   :  { %v1621_v51 = vpop.eup %1620  ;;  %1159 = vst [vmem:[%s2062_s3 + $0x20] sm:$0xff] %v1619_v49 }
 0x139   :  { %v1623_v5 = vpop.eup %1622  ;;  %1158 = vst [vmem:[%s2062_s3 + $0x18] sm:$0xff] %v1621_v51 }
 0x13a   :  { %v1625_v7 = vpop.eup %1624  ;;  %1162 = vst [vmem:[%s2062_s3 + $0x38] sm:$0xff] %v1623_v5 }
 0x13b   :  { %v1627_v20 = vpop.eup %1626  ;;  %1156 = vst [vmem:[%s2062_s3 + $0x8] sm:$0xff] %v1625_v7 }
 0x13c   :  { %1160 = vst [vmem:[%s2062_s3 + $0x28] sm:$0xff] %v1627_v20 }

</bundles_post_ra>
